<compile_context>
chip_gen: v6e
topology: v6e:2x2x1
jax: 0.10.0
libtpu: 0.0.40
codegen_flags: <defaults>
</compile_context>

<pallas_src>
import functools

import jax
import jax.numpy as jnp
from jax import lax
from jax.experimental import pallas as pl
from jax.experimental.pallas import tpu as pltpu


def cross_attention_kernel(x1_ref, ctx_ref, wq_ref, wk_ref, wv_ref, wo_ref,
                           bo_ref, out_ref, sim_ref, k_s, v_s,
                           *, heads, dim_head):
    # x1_ref : (TILE_N, Dq) f32          ctx_ref : (M, Dc) f32
    # wq_ref : (Dq, inner) bf16 (softmax scale pre-folded)
    # wk_ref / wv_ref : (Dc, inner) bf16  wo_ref : (inner, inner) bf16
    # bo_ref : (1, inner) f32
    # out_ref: (TILE_N, inner) f32        sim_ref: (heads, TILE_N, M) bf16
    # k_s/v_s: (M, inner) bf16 VMEM scratch, persists across query tiles of one batch.
    nt = pl.program_id(1)

    # ---- K / V projections: one flat matmul per batch element, cached in VMEM ----
    @pl.when(nt == 0)
    def _():
        ctx = ctx_ref[...].astype(jnp.bfloat16)                      # (M, Dc)
        k_s[...] = jnp.dot(ctx, wk_ref[...],
                           preferred_element_type=jnp.float32).astype(jnp.bfloat16)
        v_s[...] = jnp.dot(ctx, wv_ref[...],
                           preferred_element_type=jnp.float32).astype(jnp.bfloat16)

    # ---- Q projection for this query tile (scale already folded into Wq) ----
    x1 = x1_ref[...].astype(jnp.bfloat16)                            # (TN, Dq)
    q = jnp.dot(x1, wq_ref[...],
                preferred_element_type=jnp.float32).astype(jnp.bfloat16)  # (TN, inner)

    # ---- per-head attention (contraction genuinely per-head).  dim_head=128 (module
    #      default) makes every slice / concatenate below a 128-lane-aligned vreg op. ----
    out_parts = []
    for h in range(heads):
        lo = h * dim_head
        hi = lo + dim_head
        q_h = q[:, lo:hi]                                            # (TN, dh) bf16
        k_h = k_s[:, lo:hi]                                          # (M,  dh) bf16
        v_h = v_s[:, lo:hi]                                          # (M,  dh) bf16

        sim_h = lax.dot_general(q_h, k_h, (((1,), (1,)), ((), ())),
                                preferred_element_type=jnp.float32)  # (TN, M) f32
        sim_ref[h] = sim_h.astype(sim_ref.dtype)                     # module returns sim

        # Numerically stable softmax; 1/denominator (EUP approx reciprocal) is applied to
        # the (TN, dh) PV result rather than the (TN, M) attention matrix.
        m = jnp.max(sim_h, axis=-1, keepdims=True)
        e = jnp.exp(sim_h - m)                                       # f32 (v5e-safe)
        inv = pl.reciprocal(jnp.sum(e, axis=-1, keepdims=True), approx=True)
        pv = lax.dot_general(e.astype(jnp.bfloat16), v_h, (((1,), (0,)), ((), ())),
                             preferred_element_type=jnp.float32)     # (TN, dh) f32
        out_parts.append((pv * inv).astype(jnp.bfloat16))

    # ---- to_out: head reduction fused into one lane-flat, inner-deep matmul ----
    out_flat = jnp.concatenate(out_parts, axis=-1)                   # (TN, inner) bf16
    out_ref[...] = jnp.dot(out_flat, wo_ref[...],
                           preferred_element_type=jnp.float32) + bo_ref[...]


def cross_attention(x1, context, wq, wk, wv, wo, bo, *, heads, dim_head,
                    tile_n=128, sim_dtype=jnp.bfloat16):
    B, N, Dq = x1.shape
    _, M, Dc = context.shape
    inner = heads * dim_head
    scale = float(dim_head) ** (-0.5)

    tile_n = min(tile_n, N)
    assert N % tile_n == 0, "N must be divisible by the query tile size"
    n_tiles = N // tile_n

    # Host-side layout plumbing (free): lane-flattened bf16 projection matrices
    # (nn.Linear computes x @ W.T); the softmax scale is folded into Wq.
    wq_flat = (wq.T * scale).astype(jnp.bfloat16)    # (Dq, inner)
    wk_flat = wk.T.astype(jnp.bfloat16)              # (Dc, inner)
    wv_flat = wv.T.astype(jnp.bfloat16)              # (Dc, inner)
    wo_t = wo.T.astype(jnp.bfloat16)                 # (inner, inner)
    bo2d = bo.reshape(1, inner).astype(jnp.float32)

    kernel = functools.partial(cross_attention_kernel, heads=heads, dim_head=dim_head)

    # Explicit VMEM budget: never below the 32 MiB default (safe for small shapes),
    # never above 64 MiB (v7x physical VMEM per core).
    sim_bytes = jnp.dtype(sim_dtype).itemsize
    est = (2 * tile_n * Dq * 4                                   # x1 tile (double-buffered)
           + 2 * M * Dc * 4                                      # context
           + 2 * ((Dq + 2 * Dc + inner) * inner * 2 + inner * 4)  # weights + bias
           + 2 * tile_n * inner * 4                              # out tile
           + 2 * heads * tile_n * M * sim_bytes                  # sim tile
           + 2 * M * inner * 2)                                  # K/V scratch
    vmem_limit = int(min(max(32 * 1024 * 1024, 2 * est), 64 * 1024 * 1024))

    def build(single_buffer_consts):
        def spec(shape, index_map, const_like):
            # Constant-index blocks (weights, bias) never change across the grid, so
            # double-buffering them only doubles their VMEM footprint.
            if single_buffer_consts and const_like:
                return pl.BlockSpec(shape, index_map, pipeline_mode=pl.Buffered(1))
            return pl.BlockSpec(shape, index_map)

        in_specs = [
            spec((None, tile_n, Dq), lambda b, t: (b, t, 0), False),      # x1 tile
            # context changes with b; kept double-buffered to overlap its DMA across
            # batches.  For v7x at very large M: single-buffer it / pass bf16 context.
            spec((None, M, Dc), lambda b, t: (b, 0, 0), False),           # context
            spec((Dq, inner), lambda b, t: (0, 0), True),                 # Wq (scaled)
            spec((Dc, inner), lambda b, t: (0, 0), True),                 # Wk
            spec((Dc, inner), lambda b, t: (0, 0), True),                 # Wv
            spec((inner, inner), lambda b, t: (0, 0), True),              # Wo
            spec((1, inner), lambda b, t: (0, 0), True),                  # bias
        ]
        out_specs = (
            pl.BlockSpec((None, tile_n, inner), lambda b, t: (b, t, 0)),  # out tile
            pl.BlockSpec((heads, tile_n, M), lambda b, t: (b, t, 0)),     # sim tile
        )
        return pl.pallas_call(
            kernel,
            out_shape=(
                jax.ShapeDtypeStruct((B, N, inner), jnp.float32),
                jax.ShapeDtypeStruct((B * heads, N, M), sim_dtype),
            ),
            grid_spec=pltpu.PrefetchScalarGridSpec(
                num_scalar_prefetch=0,
                grid=(B, n_tiles),
                in_specs=in_specs,
                out_specs=out_specs,
                scratch_shapes=[
                    pltpu.VMEM((M, inner), jnp.bfloat16),                 # K cache
                    pltpu.VMEM((M, inner), jnp.bfloat16),                 # V cache
                ],
            ),
            # K/V scratch is reused across the query-tile axis -> it must stay
            # "arbitrary"; the batch axis is megacore-parallel.
            compiler_params=pltpu.CompilerParams(
                dimension_semantics=("parallel", "arbitrary"),
                vmem_limit_bytes=vmem_limit),
        )

    args = (x1, context, wq_flat, wk_flat, wv_flat, wo_t, bo2d)
    try:
        out, sim = build(True)(*args)
        jax.block_until_ready((out, sim))
    except Exception:
        # Feature-detect fallback: if this JAX/Mosaic build rejects single-buffered
        # blocks in the implicit pipeline, use default double-buffering.
        out, sim = build(False)(*args)
    return out, sim


def reference(x1, context, wq, wk, wv, wo, bo, *, heads, dim_head):
    # Pure-JAX f32 reference mirroring the PyTorch forward (negative=False, p=0).
    B, N, _ = x1.shape
    _, M, _ = context.shape
    inner = heads * dim_head
    scale = float(dim_head) ** (-0.5)
    q = x1 @ wq.T
    k = context @ wk.T
    v = context @ wv.T

    def split(t, L):
        return t.reshape(B, L, heads, dim_head).transpose(0, 2, 1, 3).reshape(
            B * heads, L, dim_head)

    qh, kh, vh = split(q, N), split(k, M), split(v, M)
    sim = jnp.einsum('bid,bjd->bij', qh, kh) * scale
    attn = jax.nn.softmax(sim, axis=-1)
    out = jnp.einsum('bij,bjd->bid', attn, vh)
    out = out.reshape(B, heads, N, dim_head).transpose(0, 2, 1, 3).reshape(B, N, inner)
    return out @ wo.T + bo, sim


if __name__ == "__main__":
    # Module defaults are heads=4, dim_head=128 (kept, so per-head slices are 128-lane
    # aligned); the other dims are shrunk for a quick run.
    B, N, M = 2, 128, 128
    query_dim = 128
    context_dim = 128
    heads = 4
    dim_head = 128
    inner = heads * dim_head

    key = jax.random.PRNGKey(0)
    k1, k2, k3, k4, k5, k6, k7 = jax.random.split(key, 7)
    x1 = jax.random.normal(k1, (B, N, query_dim), dtype=jnp.float32)
    context = jax.random.normal(k2, (B, M, context_dim), dtype=jnp.float32)
    wq = jax.random.normal(k3, (inner, query_dim), dtype=jnp.float32) * 0.1
    wk = jax.random.normal(k4, (inner, context_dim), dtype=jnp.float32) * 0.1
    wv = jax.random.normal(k5, (inner, context_dim), dtype=jnp.float32) * 0.1
    wo = jax.random.normal(k6, (inner, inner), dtype=jnp.float32) * 0.1
    bo = jax.random.normal(k7, (inner,), dtype=jnp.float32) * 0.1

    out, sim = cross_attention(x1, context, wq, wk, wv, wo, bo,
                               heads=heads, dim_head=dim_head)
    jax.block_until_ready((out, sim))

    out_ref, sim_ref = reference(x1, context, wq, wk, wv, wo, bo,
                                 heads=heads, dim_head=dim_head)
    assert out.shape == (B, N, inner) and sim.shape == (B * heads, N, M)

    # bf16 MXU inputs / bf16 sim storage with f32 accumulation -> bf16-level tolerance.
    def max_rel(a, b):
        return float(jnp.max(jnp.abs(a - b)) / (jnp.max(jnp.abs(b)) + 1e-8))

    sim_err = max_rel(sim.astype(jnp.float32), sim_ref)
    out_err = max_rel(out, out_ref)
    assert sim_err < 5e-2, f"sim mismatch: {sim_err}"
    assert out_err < 5e-2, f"out mismatch: {out_err}"

    print("KERNEL_OK")
</pallas_src>

<mosaic_0001>
module attributes {stable_mosaic.version = 11 : i64} {
  func.func @cross_attention_kernel(%arg0: i32, %arg1: i32, %arg2: memref<1x128x128xf32, #tpu.memory_space<vmem>>, %arg3: memref<1x128x128xf32, #tpu.memory_space<vmem>>, %arg4: memref<128x512xbf16, #tpu.memory_space<vmem>>, %arg5: memref<128x512xbf16, #tpu.memory_space<vmem>>, %arg6: memref<128x512xbf16, #tpu.memory_space<vmem>>, %arg7: memref<512x512xbf16, #tpu.memory_space<vmem>>, %arg8: memref<1x512xf32, #tpu.memory_space<vmem>>, %arg9: memref<1x128x512xf32, #tpu.memory_space<vmem>>, %arg10: memref<4x128x128xbf16, #tpu.memory_space<vmem>>, %arg11: memref<128x512xbf16, #tpu.memory_space<vmem>>, %arg12: memref<128x512xbf16, #tpu.memory_space<vmem>>) attributes {dimension_semantics = [#tpu.dimension_semantics<parallel>, #tpu.dimension_semantics<arbitrary>], iteration_bounds = array<i64: 2, 1>, scalar_prefetch = 0 : i64, scratch_operands = 2 : i64, tpu.core_type = #tpu.core_type<tc>, window_params = [{transform_indices = @transform_0, window_bounds = array<i64: 1, 128, 128>}, {transform_indices = @transform_1, window_bounds = array<i64: 1, 128, 128>}, {pipeline_mode = #tpu.pipeline_mode<synchronous>, transform_indices = @transform_2, window_bounds = array<i64: 128, 512>}, {pipeline_mode = #tpu.pipeline_mode<synchronous>, transform_indices = @transform_3, window_bounds = array<i64: 128, 512>}, {pipeline_mode = #tpu.pipeline_mode<synchronous>, transform_indices = @transform_4, window_bounds = array<i64: 128, 512>}, {pipeline_mode = #tpu.pipeline_mode<synchronous>, transform_indices = @transform_5, window_bounds = array<i64: 512, 512>}, {pipeline_mode = #tpu.pipeline_mode<synchronous>, transform_indices = @transform_6, window_bounds = array<i64: 1, 512>}, {transform_indices = @transform_7, window_bounds = array<i64: 1, 128, 512>}, {transform_indices = @transform_8, window_bounds = array<i64: 4, 128, 128>}]} {
    %c0_i32 = arith.constant 0 : i32
    %0 = arith.cmpi eq, %arg1, %c0_i32 : i32
    %1 = arith.extui %0 : i1 to i32
    %c0_i32_0 = arith.constant 0 : i32
    %2 = arith.cmpi ne, %1, %c0_i32_0 : i32
    scf.if %2 {
      %c0_51 = arith.constant 0 : index
      %c0_52 = arith.constant 0 : index
      %c0_53 = arith.constant 0 : index
      %102 = vector.load %arg3[%c0_51, %c0_52, %c0_53] : memref<1x128x128xf32, #tpu.memory_space<vmem>>, vector<1x128x128xf32>
      %103 = vector.shape_cast %102 : vector<1x128x128xf32> to vector<128x128xf32>
      %104 = arith.truncf %103 : vector<128x128xf32> to vector<128x128xbf16>
      %c0_54 = arith.constant 0 : index
      %c0_55 = arith.constant 0 : index
      %105 = vector.load %arg5[%c0_54, %c0_55] : memref<128x512xbf16, #tpu.memory_space<vmem>>, vector<128x512xbf16>
      %cst_56 = arith.constant dense<0.000000e+00> : vector<128x512xf32>
      %106 = tpu.matmul %104, %105, %cst_56 {dimension_numbers = #tpu.dot_dimension_numbers<[1], [0], [0], [1], [0, 0, 1, 1], [], []>} : vector<128x128xbf16>, vector<128x512xbf16>, vector<128x512xf32> -> vector<128x512xf32>
      %107 = arith.truncf %106 : vector<128x512xf32> to vector<128x512xbf16>
      %c0_57 = arith.constant 0 : index
      %c0_58 = arith.constant 0 : index
      %108 = vector.load %arg11[%c0_57, %c0_58] : memref<128x512xbf16, #tpu.memory_space<vmem>>, vector<128x512xbf16>
      tpu.vector_store %arg11[%c0_57, %c0_58], %107 {strides = array<i32>} : memref<128x512xbf16, #tpu.memory_space<vmem>>, vector<128x512xbf16>,
      %c0_59 = arith.constant 0 : index
      %c0_60 = arith.constant 0 : index
      %109 = vector.load %arg6[%c0_59, %c0_60] : memref<128x512xbf16, #tpu.memory_space<vmem>>, vector<128x512xbf16>
      %cst_61 = arith.constant dense<0.000000e+00> : vector<128x512xf32>
      %110 = tpu.matmul %104, %109, %cst_61 {dimension_numbers = #tpu.dot_dimension_numbers<[1], [0], [0], [1], [0, 0, 1, 1], [], []>} : vector<128x128xbf16>, vector<128x512xbf16>, vector<128x512xf32> -> vector<128x512xf32>
      %111 = arith.truncf %110 : vector<128x512xf32> to vector<128x512xbf16>
      %c0_62 = arith.constant 0 : index
      %c0_63 = arith.constant 0 : index
      %112 = vector.load %arg12[%c0_62, %c0_63] : memref<128x512xbf16, #tpu.memory_space<vmem>>, vector<128x512xbf16>
      tpu.vector_store %arg12[%c0_62, %c0_63], %111 {strides = array<i32>} : memref<128x512xbf16, #tpu.memory_space<vmem>>, vector<128x512xbf16>,
    } else {
    }
    %c0 = arith.constant 0 : index
    %c0_1 = arith.constant 0 : index
    %c0_2 = arith.constant 0 : index
    %3 = vector.load %arg2[%c0, %c0_1, %c0_2] : memref<1x128x128xf32, #tpu.memory_space<vmem>>, vector<1x128x128xf32>
    %4 = vector.shape_cast %3 : vector<1x128x128xf32> to vector<128x128xf32>
    %5 = arith.truncf %4 : vector<128x128xf32> to vector<128x128xbf16>
    %c0_3 = arith.constant 0 : index
    %c0_4 = arith.constant 0 : index
    %6 = vector.load %arg4[%c0_3, %c0_4] : memref<128x512xbf16, #tpu.memory_space<vmem>>, vector<128x512xbf16>
    %cst = arith.constant dense<0.000000e+00> : vector<128x512xf32>
    %7 = tpu.matmul %5, %6, %cst {dimension_numbers = #tpu.dot_dimension_numbers<[1], [0], [0], [1], [0, 0, 1, 1], [], []>} : vector<128x128xbf16>, vector<128x512xbf16>, vector<128x512xf32> -> vector<128x512xf32>
    %8 = arith.truncf %7 : vector<128x512xf32> to vector<128x512xbf16>
    %9 = vector.extract_strided_slice %8 {offsets = [0, 0], sizes = [128, 128], strides = [1, 1]} : vector<128x512xbf16> to vector<128x128xbf16>
    %c0_5 = arith.constant 0 : index
    %c0_6 = arith.constant 0 : index
    %10 = vector.load %arg11[%c0_5, %c0_6] : memref<128x512xbf16, #tpu.memory_space<vmem>>, vector<128x128xbf16>
    %c0_7 = arith.constant 0 : index
    %c0_8 = arith.constant 0 : index
    %11 = vector.load %arg12[%c0_7, %c0_8] : memref<128x512xbf16, #tpu.memory_space<vmem>>, vector<128x128xbf16>
    %cst_9 = arith.constant dense<0.000000e+00> : vector<128x128xf32>
    %12 = tpu.matmul %9, %10, %cst_9 {dimension_numbers = #tpu.dot_dimension_numbers<[1], [1], [0], [0], [0, 0, 1, 0], [], []>} : vector<128x128xbf16>, vector<128x128xbf16>, vector<128x128xf32> -> vector<128x128xf32>
    %13 = arith.truncf %12 : vector<128x128xf32> to vector<128x128xbf16>
    %c0_10 = arith.constant 0 : index
    %c0_11 = arith.constant 0 : index
    %c0_12 = arith.constant 0 : index
    %14 = vector.load %arg10[%c0_10, %c0_11, %c0_12] : memref<4x128x128xbf16, #tpu.memory_space<vmem>>, vector<1x128x128xbf16>
    %15 = vector.shape_cast %14 : vector<1x128x128xbf16> to vector<128x128xbf16>
    %16 = vector.shape_cast %13 : vector<128x128xbf16> to vector<1x128x128xbf16>
    tpu.vector_store %arg10[%c0_10, %c0_11, %c0_12], %16 {strides = array<i32>} : memref<4x128x128xbf16, #tpu.memory_space<vmem>>, vector<1x128x128xbf16>,
    %cst_13 = arith.constant dense<0xFF800000> : vector<128xf32>
    %17 = vector.multi_reduction <maximumf>, %12, %cst_13 [1] : vector<128x128xf32> to vector<128xf32>
    %18 = vector.shape_cast %17 : vector<128xf32> to vector<128x1xf32>
    %19 = vector.broadcast %18 : vector<128x1xf32> to vector<128x128xf32>
    %20 = arith.subf %12, %19 : vector<128x128xf32>
    %21 = math.exp %20 : vector<128x128xf32>
    %cst_14 = arith.constant dense<0.000000e+00> : vector<128xf32>
    %22 = vector.multi_reduction <add>, %21, %cst_14 [1] : vector<128x128xf32> to vector<128xf32>
    %23 = vector.shape_cast %22 : vector<128xf32> to vector<128x1xf32>
    %24 = tpu.reciprocal %23 {approx = true} : vector<128x1xf32> -> vector<128x1xf32>
    %25 = arith.truncf %21 : vector<128x128xf32> to vector<128x128xbf16>
    %cst_15 = arith.constant dense<0.000000e+00> : vector<128x128xf32>
    %26 = tpu.matmul %25, %11, %cst_15 {dimension_numbers = #tpu.dot_dimension_numbers<[1], [0], [0], [1], [0, 0, 1, 1], [], []>} : vector<128x128xbf16>, vector<128x128xbf16>, vector<128x128xf32> -> vector<128x128xf32>
    %27 = vector.broadcast %24 : vector<128x1xf32> to vector<128x128xf32>
    %28 = arith.mulf %26, %27 : vector<128x128xf32>
    %29 = arith.truncf %28 : vector<128x128xf32> to vector<128x128xbf16>
    %30 = vector.extract_strided_slice %8 {offsets = [0, 128], sizes = [128, 128], strides = [1, 1]} : vector<128x512xbf16> to vector<128x128xbf16>
    %c0_16 = arith.constant 0 : index
    %c128 = arith.constant 128 : index
    %31 = vector.load %arg11[%c0_16, %c128] : memref<128x512xbf16, #tpu.memory_space<vmem>>, vector<128x128xbf16>
    %c0_17 = arith.constant 0 : index
    %c128_18 = arith.constant 128 : index
    %32 = vector.load %arg12[%c0_17, %c128_18] : memref<128x512xbf16, #tpu.memory_space<vmem>>, vector<128x128xbf16>
    %cst_19 = arith.constant dense<0.000000e+00> : vector<128x128xf32>
    %33 = tpu.matmul %30, %31, %cst_19 {dimension_numbers = #tpu.dot_dimension_numbers<[1], [1], [0], [0], [0, 0, 1, 0], [], []>} : vector<128x128xbf16>, vector<128x128xbf16>, vector<128x128xf32> -> vector<128x128xf32>
    %34 = arith.truncf %33 : vector<128x128xf32> to vector<128x128xbf16>
    %c1 = arith.constant 1 : index
    %c0_20 = arith.constant 0 : index
    %c0_21 = arith.constant 0 : index
    %35 = vector.load %arg10[%c1, %c0_20, %c0_21] : memref<4x128x128xbf16, #tpu.memory_space<vmem>>, vector<1x128x128xbf16>
    %36 = vector.shape_cast %35 : vector<1x128x128xbf16> to vector<128x128xbf16>
    %37 = vector.shape_cast %34 : vector<128x128xbf16> to vector<1x128x128xbf16>
    tpu.vector_store %arg10[%c1, %c0_20, %c0_21], %37 {strides = array<i32>} : memref<4x128x128xbf16, #tpu.memory_space<vmem>>, vector<1x128x128xbf16>,
    %cst_22 = arith.constant dense<0xFF800000> : vector<128xf32>
    %38 = vector.multi_reduction <maximumf>, %33, %cst_22 [1] : vector<128x128xf32> to vector<128xf32>
    %39 = vector.shape_cast %38 : vector<128xf32> to vector<128x1xf32>
    %40 = vector.broadcast %39 : vector<128x1xf32> to vector<128x128xf32>
    %41 = arith.subf %33, %40 : vector<128x128xf32>
    %42 = math.exp %41 : vector<128x128xf32>
    %cst_23 = arith.constant dense<0.000000e+00> : vector<128xf32>
    %43 = vector.multi_reduction <add>, %42, %cst_23 [1] : vector<128x128xf32> to vector<128xf32>
    %44 = vector.shape_cast %43 : vector<128xf32> to vector<128x1xf32>
    %45 = tpu.reciprocal %44 {approx = true} : vector<128x1xf32> -> vector<128x1xf32>
    %46 = arith.truncf %42 : vector<128x128xf32> to vector<128x128xbf16>
    %cst_24 = arith.constant dense<0.000000e+00> : vector<128x128xf32>
    %47 = tpu.matmul %46, %32, %cst_24 {dimension_numbers = #tpu.dot_dimension_numbers<[1], [0], [0], [1], [0, 0, 1, 1], [], []>} : vector<128x128xbf16>, vector<128x128xbf16>, vector<128x128xf32> -> vector<128x128xf32>
    %48 = vector.broadcast %45 : vector<128x1xf32> to vector<128x128xf32>
    %49 = arith.mulf %47, %48 : vector<128x128xf32>
    %50 = arith.truncf %49 : vector<128x128xf32> to vector<128x128xbf16>
    %51 = vector.extract_strided_slice %8 {offsets = [0, 256], sizes = [128, 128], strides = [1, 1]} : vector<128x512xbf16> to vector<128x128xbf16>
    %c0_25 = arith.constant 0 : index
    %c256 = arith.constant 256 : index
    %52 = vector.load %arg11[%c0_25, %c256] : memref<128x512xbf16, #tpu.memory_space<vmem>>, vector<128x128xbf16>
    %c0_26 = arith.constant 0 : index
    %c256_27 = arith.constant 256 : index
    %53 = vector.load %arg12[%c0_26, %c256_27] : memref<128x512xbf16, #tpu.memory_space<vmem>>, vector<128x128xbf16>
    %cst_28 = arith.constant dense<0.000000e+00> : vector<128x128xf32>
    %54 = tpu.matmul %51, %52, %cst_28 {dimension_numbers = #tpu.dot_dimension_numbers<[1], [1], [0], [0], [0, 0, 1, 0], [], []>} : vector<128x128xbf16>, vector<128x128xbf16>, vector<128x128xf32> -> vector<128x128xf32>
    %55 = arith.truncf %54 : vector<128x128xf32> to vector<128x128xbf16>
    %c2 = arith.constant 2 : index
    %c0_29 = arith.constant 0 : index
    %c0_30 = arith.constant 0 : index
    %56 = vector.load %arg10[%c2, %c0_29, %c0_30] : memref<4x128x128xbf16, #tpu.memory_space<vmem>>, vector<1x128x128xbf16>
    %57 = vector.shape_cast %56 : vector<1x128x128xbf16> to vector<128x128xbf16>
    %58 = vector.shape_cast %55 : vector<128x128xbf16> to vector<1x128x128xbf16>
    tpu.vector_store %arg10[%c2, %c0_29, %c0_30], %58 {strides = array<i32>} : memref<4x128x128xbf16, #tpu.memory_space<vmem>>, vector<1x128x128xbf16>,
    %cst_31 = arith.constant dense<0xFF800000> : vector<128xf32>
    %59 = vector.multi_reduction <maximumf>, %54, %cst_31 [1] : vector<128x128xf32> to vector<128xf32>
    %60 = vector.shape_cast %59 : vector<128xf32> to vector<128x1xf32>
    %61 = vector.broadcast %60 : vector<128x1xf32> to vector<128x128xf32>
    %62 = arith.subf %54, %61 : vector<128x128xf32>
    %63 = math.exp %62 : vector<128x128xf32>
    %cst_32 = arith.constant dense<0.000000e+00> : vector<128xf32>
    %64 = vector.multi_reduction <add>, %63, %cst_32 [1] : vector<128x128xf32> to vector<128xf32>
    %65 = vector.shape_cast %64 : vector<128xf32> to vector<128x1xf32>
    %66 = tpu.reciprocal %65 {approx = true} : vector<128x1xf32> -> vector<128x1xf32>
    %67 = arith.truncf %63 : vector<128x128xf32> to vector<128x128xbf16>
    %cst_33 = arith.constant dense<0.000000e+00> : vector<128x128xf32>
    %68 = tpu.matmul %67, %53, %cst_33 {dimension_numbers = #tpu.dot_dimension_numbers<[1], [0], [0], [1], [0, 0, 1, 1], [], []>} : vector<128x128xbf16>, vector<128x128xbf16>, vector<128x128xf32> -> vector<128x128xf32>
    %69 = vector.broadcast %66 : vector<128x1xf32> to vector<128x128xf32>
    %70 = arith.mulf %68, %69 : vector<128x128xf32>
    %71 = arith.truncf %70 : vector<128x128xf32> to vector<128x128xbf16>
    %72 = vector.extract_strided_slice %8 {offsets = [0, 384], sizes = [128, 128], strides = [1, 1]} : vector<128x512xbf16> to vector<128x128xbf16>
    %c0_34 = arith.constant 0 : index
    %c384 = arith.constant 384 : index
    %73 = vector.load %arg11[%c0_34, %c384] : memref<128x512xbf16, #tpu.memory_space<vmem>>, vector<128x128xbf16>
    %c0_35 = arith.constant 0 : index
    %c384_36 = arith.constant 384 : index
    %74 = vector.load %arg12[%c0_35, %c384_36] : memref<128x512xbf16, #tpu.memory_space<vmem>>, vector<128x128xbf16>
    %cst_37 = arith.constant dense<0.000000e+00> : vector<128x128xf32>
    %75 = tpu.matmul %72, %73, %cst_37 {dimension_numbers = #tpu.dot_dimension_numbers<[1], [1], [0], [0], [0, 0, 1, 0], [], []>} : vector<128x128xbf16>, vector<128x128xbf16>, vector<128x128xf32> -> vector<128x128xf32>
    %76 = arith.truncf %75 : vector<128x128xf32> to vector<128x128xbf16>
    %c3 = arith.constant 3 : index
    %c0_38 = arith.constant 0 : index
    %c0_39 = arith.constant 0 : index
    %77 = vector.load %arg10[%c3, %c0_38, %c0_39] : memref<4x128x128xbf16, #tpu.memory_space<vmem>>, vector<1x128x128xbf16>
    %78 = vector.shape_cast %77 : vector<1x128x128xbf16> to vector<128x128xbf16>
    %79 = vector.shape_cast %76 : vector<128x128xbf16> to vector<1x128x128xbf16>
    tpu.vector_store %arg10[%c3, %c0_38, %c0_39], %79 {strides = array<i32>} : memref<4x128x128xbf16, #tpu.memory_space<vmem>>, vector<1x128x128xbf16>,
    %cst_40 = arith.constant dense<0xFF800000> : vector<128xf32>
    %80 = vector.multi_reduction <maximumf>, %75, %cst_40 [1] : vector<128x128xf32> to vector<128xf32>
    %81 = vector.shape_cast %80 : vector<128xf32> to vector<128x1xf32>
    %82 = vector.broadcast %81 : vector<128x1xf32> to vector<128x128xf32>
    %83 = arith.subf %75, %82 : vector<128x128xf32>
    %84 = math.exp %83 : vector<128x128xf32>
    %cst_41 = arith.constant dense<0.000000e+00> : vector<128xf32>
    %85 = vector.multi_reduction <add>, %84, %cst_41 [1] : vector<128x128xf32> to vector<128xf32>
    %86 = vector.shape_cast %85 : vector<128xf32> to vector<128x1xf32>
    %87 = tpu.reciprocal %86 {approx = true} : vector<128x1xf32> -> vector<128x1xf32>
    %88 = arith.truncf %84 : vector<128x128xf32> to vector<128x128xbf16>
    %cst_42 = arith.constant dense<0.000000e+00> : vector<128x128xf32>
    %89 = tpu.matmul %88, %74, %cst_42 {dimension_numbers = #tpu.dot_dimension_numbers<[1], [0], [0], [1], [0, 0, 1, 1], [], []>} : vector<128x128xbf16>, vector<128x128xbf16>, vector<128x128xf32> -> vector<128x128xf32>
    %90 = vector.broadcast %87 : vector<128x1xf32> to vector<128x128xf32>
    %91 = arith.mulf %89, %90 : vector<128x128xf32>
    %92 = arith.truncf %91 : vector<128x128xf32> to vector<128x128xbf16>
    %93 = tpu.concatenate %29, %50, %71, %92 in 1 : vector<128x128xbf16>, vector<128x128xbf16>, vector<128x128xbf16>, vector<128x128xbf16> -> vector<128x512xbf16>
    %c0_43 = arith.constant 0 : index
    %c0_44 = arith.constant 0 : index
    %94 = vector.load %arg7[%c0_43, %c0_44] : memref<512x512xbf16, #tpu.memory_space<vmem>>, vector<512x512xbf16>
    %cst_45 = arith.constant dense<0.000000e+00> : vector<128x512xf32>
    %95 = tpu.matmul %93, %94, %cst_45 {dimension_numbers = #tpu.dot_dimension_numbers<[1], [0], [0], [1], [0, 0, 1, 1], [], []>} : vector<128x512xbf16>, vector<512x512xbf16>, vector<128x512xf32> -> vector<128x512xf32>
    %c0_46 = arith.constant 0 : index
    %c0_47 = arith.constant 0 : index
    %96 = vector.load %arg8[%c0_46, %c0_47] : memref<1x512xf32, #tpu.memory_space<vmem>>, vector<1x512xf32>
    %97 = vector.broadcast %96 : vector<1x512xf32> to vector<128x512xf32>
    %98 = arith.addf %95, %97 : vector<128x512xf32>
    %c0_48 = arith.constant 0 : index
    %c0_49 = arith.constant 0 : index
    %c0_50 = arith.constant 0 : index
    %99 = vector.load %arg9[%c0_48, %c0_49, %c0_50] : memref<1x128x512xf32, #tpu.memory_space<vmem>>, vector<1x128x512xf32>
    %100 = vector.shape_cast %99 : vector<1x128x512xf32> to vector<128x512xf32>
    %101 = vector.shape_cast %98 : vector<128x512xf32> to vector<1x128x512xf32>
    tpu.vector_store %arg9[%c0_48, %c0_49, %c0_50], %101 {strides = array<i32>} : memref<1x128x512xf32, #tpu.memory_space<vmem>>, vector<1x128x512xf32>,
    return
  }
  func.func @transform_0(%arg0: i32, %arg1: i32) -> (i32, i32, i32) {
    %c0_i32 = arith.constant 0 : i32
    %c0_i32_0 = arith.constant 0 : i32
    return %arg0, %arg1, %c0_i32 : i32, i32, i32
  }
  func.func @transform_1(%arg0: i32, %arg1: i32) -> (i32, i32, i32) {
    %c0_i32 = arith.constant 0 : i32
    %c0_i32_0 = arith.constant 0 : i32
    %c0_i32_1 = arith.constant 0 : i32
    return %arg0, %c0_i32, %c0_i32_0 : i32, i32, i32
  }
  func.func @transform_2(%arg0: i32, %arg1: i32) -> (i32, i32) {
    %c0_i32 = arith.constant 0 : i32
    %c0_i32_0 = arith.constant 0 : i32
    %c0_i32_1 = arith.constant 0 : i32
    return %c0_i32, %c0_i32_0 : i32, i32
  }
  func.func @transform_3(%arg0: i32, %arg1: i32) -> (i32, i32) {
    %c0_i32 = arith.constant 0 : i32
    %c0_i32_0 = arith.constant 0 : i32
    %c0_i32_1 = arith.constant 0 : i32
    return %c0_i32, %c0_i32_0 : i32, i32
  }
  func.func @transform_4(%arg0: i32, %arg1: i32) -> (i32, i32) {
    %c0_i32 = arith.constant 0 : i32
    %c0_i32_0 = arith.constant 0 : i32
    %c0_i32_1 = arith.constant 0 : i32
    return %c0_i32, %c0_i32_0 : i32, i32
  }
  func.func @transform_5(%arg0: i32, %arg1: i32) -> (i32, i32) {
    %c0_i32 = arith.constant 0 : i32
    %c0_i32_0 = arith.constant 0 : i32
    %c0_i32_1 = arith.constant 0 : i32
    return %c0_i32, %c0_i32_0 : i32, i32
  }
  func.func @transform_6(%arg0: i32, %arg1: i32) -> (i32, i32) {
    %c0_i32 = arith.constant 0 : i32
    %c0_i32_0 = arith.constant 0 : i32
    %c0_i32_1 = arith.constant 0 : i32
    return %c0_i32, %c0_i32_0 : i32, i32
  }
  func.func @transform_7(%arg0: i32, %arg1: i32) -> (i32, i32, i32) {
    %c0_i32 = arith.constant 0 : i32
    %c0_i32_0 = arith.constant 0 : i32
    return %arg0, %arg1, %c0_i32 : i32, i32, i32
  }
  func.func @transform_8(%arg0: i32, %arg1: i32) -> (i32, i32, i32) {
    %c0_i32 = arith.constant 0 : i32
    %c0_i32_0 = arith.constant 0 : i32
    return %arg0, %arg1, %c0_i32 : i32, i32, i32
  }
}

module attributes {stable_mosaic.version = 11 : i64} {
  func.func @cross_attention_kernel(%arg0: i32, %arg1: i32, %arg2: memref<1x128x128xf32, #tpu.memory_space<vmem>>, %arg3: memref<1x128x128xf32, #tpu.memory_space<vmem>>, %arg4: memref<128x512xbf16, #tpu.memory_space<vmem>>, %arg5: memref<128x512xbf16, #tpu.memory_space<vmem>>, %arg6: memref<128x512xbf16, #tpu.memory_space<vmem>>, %arg7: memref<512x512xbf16, #tpu.memory_space<vmem>>, %arg8: memref<1x512xf32, #tpu.memory_space<vmem>>, %arg9: memref<1x128x512xf32, #tpu.memory_space<vmem>>, %arg10: memref<4x128x128xbf16, #tpu.memory_space<vmem>>, %arg11: memref<128x512xbf16, #tpu.memory_space<vmem>>, %arg12: memref<128x512xbf16, #tpu.memory_space<vmem>>) attributes {dimension_semantics = [#tpu.dimension_semantics<parallel>, #tpu.dimension_semantics<arbitrary>], iteration_bounds = array<i64: 2, 1>, scalar_prefetch = 0 : i64, scratch_operands = 2 : i64, tpu.core_type = #tpu.core_type<tc>, window_params = [{transform_indices = @transform_0, window_bounds = array<i64: 1, 128, 128>}, {transform_indices = @transform_1, window_bounds = array<i64: 1, 128, 128>}, {pipeline_mode = #tpu.pipeline_mode<synchronous>, transform_indices = @transform_2, window_bounds = array<i64: 128, 512>}, {pipeline_mode = #tpu.pipeline_mode<synchronous>, transform_indices = @transform_3, window_bounds = array<i64: 128, 512>}, {pipeline_mode = #tpu.pipeline_mode<synchronous>, transform_indices = @transform_4, window_bounds = array<i64: 128, 512>}, {pipeline_mode = #tpu.pipeline_mode<synchronous>, transform_indices = @transform_5, window_bounds = array<i64: 512, 512>}, {pipeline_mode = #tpu.pipeline_mode<synchronous>, transform_indices = @transform_6, window_bounds = array<i64: 1, 512>}, {transform_indices = @transform_7, window_bounds = array<i64: 1, 128, 512>}, {transform_indices = @transform_8, window_bounds = array<i64: 4, 128, 128>}]} {
    %c0_i32 = arith.constant 0 : i32
    %0 = arith.cmpi eq, %arg1, %c0_i32 : i32
    %1 = arith.extui %0 : i1 to i32
    %c0_i32_0 = arith.constant 0 : i32
    %2 = arith.cmpi ne, %1, %c0_i32_0 : i32
    scf.if %2 {
      %c0_51 = arith.constant 0 : index
      %c0_52 = arith.constant 0 : index
      %c0_53 = arith.constant 0 : index
      %102 = vector.load %arg3[%c0_51, %c0_52, %c0_53] : memref<1x128x128xf32, #tpu.memory_space<vmem>>, vector<1x128x128xf32>
      %103 = vector.shape_cast %102 : vector<1x128x128xf32> to vector<128x128xf32>
      %104 = arith.truncf %103 : vector<128x128xf32> to vector<128x128xbf16>
      %c0_54 = arith.constant 0 : index
      %c0_55 = arith.constant 0 : index
      %105 = vector.load %arg5[%c0_54, %c0_55] : memref<128x512xbf16, #tpu.memory_space<vmem>>, vector<128x512xbf16>
      %cst_56 = arith.constant dense<0.000000e+00> : vector<128x512xf32>
      %106 = tpu.matmul %104, %105, %cst_56 {dimension_numbers = #tpu.dot_dimension_numbers<[1], [0], [0], [1], [0, 0, 1, 1], [], []>} : vector<128x128xbf16>, vector<128x512xbf16>, vector<128x512xf32> -> vector<128x512xf32>
      %107 = arith.truncf %106 : vector<128x512xf32> to vector<128x512xbf16>
      %c0_57 = arith.constant 0 : index
      %c0_58 = arith.constant 0 : index
      %108 = vector.load %arg11[%c0_57, %c0_58] : memref<128x512xbf16, #tpu.memory_space<vmem>>, vector<128x512xbf16>
      tpu.vector_store %arg11[%c0_57, %c0_58], %107 {strides = array<i32>} : memref<128x512xbf16, #tpu.memory_space<vmem>>, vector<128x512xbf16>,
      %c0_59 = arith.constant 0 : index
      %c0_60 = arith.constant 0 : index
      %109 = vector.load %arg6[%c0_59, %c0_60] : memref<128x512xbf16, #tpu.memory_space<vmem>>, vector<128x512xbf16>
      %cst_61 = arith.constant dense<0.000000e+00> : vector<128x512xf32>
      %110 = tpu.matmul %104, %109, %cst_61 {dimension_numbers = #tpu.dot_dimension_numbers<[1], [0], [0], [1], [0, 0, 1, 1], [], []>} : vector<128x128xbf16>, vector<128x512xbf16>, vector<128x512xf32> -> vector<128x512xf32>
      %111 = arith.truncf %110 : vector<128x512xf32> to vector<128x512xbf16>
      %c0_62 = arith.constant 0 : index
      %c0_63 = arith.constant 0 : index
      %112 = vector.load %arg12[%c0_62, %c0_63] : memref<128x512xbf16, #tpu.memory_space<vmem>>, vector<128x512xbf16>
      tpu.vector_store %arg12[%c0_62, %c0_63], %111 {strides = array<i32>} : memref<128x512xbf16, #tpu.memory_space<vmem>>, vector<128x512xbf16>,
    } else {
    }
    %c0 = arith.constant 0 : index
    %c0_1 = arith.constant 0 : index
    %c0_2 = arith.constant 0 : index
    %3 = vector.load %arg2[%c0, %c0_1, %c0_2] : memref<1x128x128xf32, #tpu.memory_space<vmem>>, vector<1x128x128xf32>
    %4 = vector.shape_cast %3 : vector<1x128x128xf32> to vector<128x128xf32>
    %5 = arith.truncf %4 : vector<128x128xf32> to vector<128x128xbf16>
    %c0_3 = arith.constant 0 : index
    %c0_4 = arith.constant 0 : index
    %6 = vector.load %arg4[%c0_3, %c0_4] : memref<128x512xbf16, #tpu.memory_space<vmem>>, vector<128x512xbf16>
    %cst = arith.constant dense<0.000000e+00> : vector<128x512xf32>
    %7 = tpu.matmul %5, %6, %cst {dimension_numbers = #tpu.dot_dimension_numbers<[1], [0], [0], [1], [0, 0, 1, 1], [], []>} : vector<128x128xbf16>, vector<128x512xbf16>, vector<128x512xf32> -> vector<128x512xf32>
    %8 = arith.truncf %7 : vector<128x512xf32> to vector<128x512xbf16>
    %9 = vector.extract_strided_slice %8 {offsets = [0, 0], sizes = [128, 128], strides = [1, 1]} : vector<128x512xbf16> to vector<128x128xbf16>
    %c0_5 = arith.constant 0 : index
    %c0_6 = arith.constant 0 : index
    %10 = vector.load %arg11[%c0_5, %c0_6] : memref<128x512xbf16, #tpu.memory_space<vmem>>, vector<128x128xbf16>
    %c0_7 = arith.constant 0 : index
    %c0_8 = arith.constant 0 : index
    %11 = vector.load %arg12[%c0_7, %c0_8] : memref<128x512xbf16, #tpu.memory_space<vmem>>, vector<128x128xbf16>
    %cst_9 = arith.constant dense<0.000000e+00> : vector<128x128xf32>
    %12 = tpu.matmul %9, %10, %cst_9 {dimension_numbers = #tpu.dot_dimension_numbers<[1], [1], [0], [0], [0, 0, 1, 0], [], []>} : vector<128x128xbf16>, vector<128x128xbf16>, vector<128x128xf32> -> vector<128x128xf32>
    %13 = arith.truncf %12 : vector<128x128xf32> to vector<128x128xbf16>
    %c0_10 = arith.constant 0 : index
    %c0_11 = arith.constant 0 : index
    %c0_12 = arith.constant 0 : index
    %14 = vector.load %arg10[%c0_10, %c0_11, %c0_12] : memref<4x128x128xbf16, #tpu.memory_space<vmem>>, vector<1x128x128xbf16>
    %15 = vector.shape_cast %14 : vector<1x128x128xbf16> to vector<128x128xbf16>
    %16 = vector.shape_cast %13 : vector<128x128xbf16> to vector<1x128x128xbf16>
    tpu.vector_store %arg10[%c0_10, %c0_11, %c0_12], %16 {strides = array<i32>} : memref<4x128x128xbf16, #tpu.memory_space<vmem>>, vector<1x128x128xbf16>,
    %cst_13 = arith.constant dense<0xFF800000> : vector<128xf32>
    %17 = vector.multi_reduction <maximumf>, %12, %cst_13 [1] : vector<128x128xf32> to vector<128xf32>
    %18 = vector.shape_cast %17 : vector<128xf32> to vector<128x1xf32>
    %19 = vector.broadcast %18 : vector<128x1xf32> to vector<128x128xf32>
    %20 = arith.subf %12, %19 : vector<128x128xf32>
    %21 = math.exp %20 : vector<128x128xf32>
    %cst_14 = arith.constant dense<0.000000e+00> : vector<128xf32>
    %22 = vector.multi_reduction <add>, %21, %cst_14 [1] : vector<128x128xf32> to vector<128xf32>
    %23 = vector.shape_cast %22 : vector<128xf32> to vector<128x1xf32>
    %24 = tpu.reciprocal %23 {approx = true} : vector<128x1xf32> -> vector<128x1xf32>
    %25 = arith.truncf %21 : vector<128x128xf32> to vector<128x128xbf16>
    %cst_15 = arith.constant dense<0.000000e+00> : vector<128x128xf32>
    %26 = tpu.matmul %25, %11, %cst_15 {dimension_numbers = #tpu.dot_dimension_numbers<[1], [0], [0], [1], [0, 0, 1, 1], [], []>} : vector<128x128xbf16>, vector<128x128xbf16>, vector<128x128xf32> -> vector<128x128xf32>
    %27 = vector.broadcast %24 : vector<128x1xf32> to vector<128x128xf32>
    %28 = arith.mulf %26, %27 : vector<128x128xf32>
    %29 = arith.truncf %28 : vector<128x128xf32> to vector<128x128xbf16>
    %30 = vector.extract_strided_slice %8 {offsets = [0, 128], sizes = [128, 128], strides = [1, 1]} : vector<128x512xbf16> to vector<128x128xbf16>
    %c0_16 = arith.constant 0 : index
    %c128 = arith.constant 128 : index
    %31 = vector.load %arg11[%c0_16, %c128] : memref<128x512xbf16, #tpu.memory_space<vmem>>, vector<128x128xbf16>
    %c0_17 = arith.constant 0 : index
    %c128_18 = arith.constant 128 : index
    %32 = vector.load %arg12[%c0_17, %c128_18] : memref<128x512xbf16, #tpu.memory_space<vmem>>, vector<128x128xbf16>
    %cst_19 = arith.constant dense<0.000000e+00> : vector<128x128xf32>
    %33 = tpu.matmul %30, %31, %cst_19 {dimension_numbers = #tpu.dot_dimension_numbers<[1], [1], [0], [0], [0, 0, 1, 0], [], []>} : vector<128x128xbf16>, vector<128x128xbf16>, vector<128x128xf32> -> vector<128x128xf32>
    %34 = arith.truncf %33 : vector<128x128xf32> to vector<128x128xbf16>
    %c1 = arith.constant 1 : index
    %c0_20 = arith.constant 0 : index
    %c0_21 = arith.constant 0 : index
    %35 = vector.load %arg10[%c1, %c0_20, %c0_21] : memref<4x128x128xbf16, #tpu.memory_space<vmem>>, vector<1x128x128xbf16>
    %36 = vector.shape_cast %35 : vector<1x128x128xbf16> to vector<128x128xbf16>
    %37 = vector.shape_cast %34 : vector<128x128xbf16> to vector<1x128x128xbf16>
    tpu.vector_store %arg10[%c1, %c0_20, %c0_21], %37 {strides = array<i32>} : memref<4x128x128xbf16, #tpu.memory_space<vmem>>, vector<1x128x128xbf16>,
    %cst_22 = arith.constant dense<0xFF800000> : vector<128xf32>
    %38 = vector.multi_reduction <maximumf>, %33, %cst_22 [1] : vector<128x128xf32> to vector<128xf32>
    %39 = vector.shape_cast %38 : vector<128xf32> to vector<128x1xf32>
    %40 = vector.broadcast %39 : vector<128x1xf32> to vector<128x128xf32>
    %41 = arith.subf %33, %40 : vector<128x128xf32>
    %42 = math.exp %41 : vector<128x128xf32>
    %cst_23 = arith.constant dense<0.000000e+00> : vector<128xf32>
    %43 = vector.multi_reduction <add>, %42, %cst_23 [1] : vector<128x128xf32> to vector<128xf32>
    %44 = vector.shape_cast %43 : vector<128xf32> to vector<128x1xf32>
    %45 = tpu.reciprocal %44 {approx = true} : vector<128x1xf32> -> vector<128x1xf32>
    %46 = arith.truncf %42 : vector<128x128xf32> to vector<128x128xbf16>
    %cst_24 = arith.constant dense<0.000000e+00> : vector<128x128xf32>
    %47 = tpu.matmul %46, %32, %cst_24 {dimension_numbers = #tpu.dot_dimension_numbers<[1], [0], [0], [1], [0, 0, 1, 1], [], []>} : vector<128x128xbf16>, vector<128x128xbf16>, vector<128x128xf32> -> vector<128x128xf32>
    %48 = vector.broadcast %45 : vector<128x1xf32> to vector<128x128xf32>
    %49 = arith.mulf %47, %48 : vector<128x128xf32>
    %50 = arith.truncf %49 : vector<128x128xf32> to vector<128x128xbf16>
    %51 = vector.extract_strided_slice %8 {offsets = [0, 256], sizes = [128, 128], strides = [1, 1]} : vector<128x512xbf16> to vector<128x128xbf16>
    %c0_25 = arith.constant 0 : index
    %c256 = arith.constant 256 : index
    %52 = vector.load %arg11[%c0_25, %c256] : memref<128x512xbf16, #tpu.memory_space<vmem>>, vector<128x128xbf16>
    %c0_26 = arith.constant 0 : index
    %c256_27 = arith.constant 256 : index
    %53 = vector.load %arg12[%c0_26, %c256_27] : memref<128x512xbf16, #tpu.memory_space<vmem>>, vector<128x128xbf16>
    %cst_28 = arith.constant dense<0.000000e+00> : vector<128x128xf32>
    %54 = tpu.matmul %51, %52, %cst_28 {dimension_numbers = #tpu.dot_dimension_numbers<[1], [1], [0], [0], [0, 0, 1, 0], [], []>} : vector<128x128xbf16>, vector<128x128xbf16>, vector<128x128xf32> -> vector<128x128xf32>
    %55 = arith.truncf %54 : vector<128x128xf32> to vector<128x128xbf16>
    %c2 = arith.constant 2 : index
    %c0_29 = arith.constant 0 : index
    %c0_30 = arith.constant 0 : index
    %56 = vector.load %arg10[%c2, %c0_29, %c0_30] : memref<4x128x128xbf16, #tpu.memory_space<vmem>>, vector<1x128x128xbf16>
    %57 = vector.shape_cast %56 : vector<1x128x128xbf16> to vector<128x128xbf16>
    %58 = vector.shape_cast %55 : vector<128x128xbf16> to vector<1x128x128xbf16>
    tpu.vector_store %arg10[%c2, %c0_29, %c0_30], %58 {strides = array<i32>} : memref<4x128x128xbf16, #tpu.memory_space<vmem>>, vector<1x128x128xbf16>,
    %cst_31 = arith.constant dense<0xFF800000> : vector<128xf32>
    %59 = vector.multi_reduction <maximumf>, %54, %cst_31 [1] : vector<128x128xf32> to vector<128xf32>
    %60 = vector.shape_cast %59 : vector<128xf32> to vector<128x1xf32>
    %61 = vector.broadcast %60 : vector<128x1xf32> to vector<128x128xf32>
    %62 = arith.subf %54, %61 : vector<128x128xf32>
    %63 = math.exp %62 : vector<128x128xf32>
    %cst_32 = arith.constant dense<0.000000e+00> : vector<128xf32>
    %64 = vector.multi_reduction <add>, %63, %cst_32 [1] : vector<128x128xf32> to vector<128xf32>
    %65 = vector.shape_cast %64 : vector<128xf32> to vector<128x1xf32>
    %66 = tpu.reciprocal %65 {approx = true} : vector<128x1xf32> -> vector<128x1xf32>
    %67 = arith.truncf %63 : vector<128x128xf32> to vector<128x128xbf16>
    %cst_33 = arith.constant dense<0.000000e+00> : vector<128x128xf32>
    %68 = tpu.matmul %67, %53, %cst_33 {dimension_numbers = #tpu.dot_dimension_numbers<[1], [0], [0], [1], [0, 0, 1, 1], [], []>} : vector<128x128xbf16>, vector<128x128xbf16>, vector<128x128xf32> -> vector<128x128xf32>
    %69 = vector.broadcast %66 : vector<128x1xf32> to vector<128x128xf32>
    %70 = arith.mulf %68, %69 : vector<128x128xf32>
    %71 = arith.truncf %70 : vector<128x128xf32> to vector<128x128xbf16>
    %72 = vector.extract_strided_slice %8 {offsets = [0, 384], sizes = [128, 128], strides = [1, 1]} : vector<128x512xbf16> to vector<128x128xbf16>
    %c0_34 = arith.constant 0 : index
    %c384 = arith.constant 384 : index
    %73 = vector.load %arg11[%c0_34, %c384] : memref<128x512xbf16, #tpu.memory_space<vmem>>, vector<128x128xbf16>
    %c0_35 = arith.constant 0 : index
    %c384_36 = arith.constant 384 : index
    %74 = vector.load %arg12[%c0_35, %c384_36] : memref<128x512xbf16, #tpu.memory_space<vmem>>, vector<128x128xbf16>
    %cst_37 = arith.constant dense<0.000000e+00> : vector<128x128xf32>
    %75 = tpu.matmul %72, %73, %cst_37 {dimension_numbers = #tpu.dot_dimension_numbers<[1], [1], [0], [0], [0, 0, 1, 0], [], []>} : vector<128x128xbf16>, vector<128x128xbf16>, vector<128x128xf32> -> vector<128x128xf32>
    %76 = arith.truncf %75 : vector<128x128xf32> to vector<128x128xbf16>
    %c3 = arith.constant 3 : index
    %c0_38 = arith.constant 0 : index
    %c0_39 = arith.constant 0 : index
    %77 = vector.load %arg10[%c3, %c0_38, %c0_39] : memref<4x128x128xbf16, #tpu.memory_space<vmem>>, vector<1x128x128xbf16>
    %78 = vector.shape_cast %77 : vector<1x128x128xbf16> to vector<128x128xbf16>
    %79 = vector.shape_cast %76 : vector<128x128xbf16> to vector<1x128x128xbf16>
    tpu.vector_store %arg10[%c3, %c0_38, %c0_39], %79 {strides = array<i32>} : memref<4x128x128xbf16, #tpu.memory_space<vmem>>, vector<1x128x128xbf16>,
    %cst_40 = arith.constant dense<0xFF800000> : vector<128xf32>
    %80 = vector.multi_reduction <maximumf>, %75, %cst_40 [1] : vector<128x128xf32> to vector<128xf32>
    %81 = vector.shape_cast %80 : vector<128xf32> to vector<128x1xf32>
    %82 = vector.broadcast %81 : vector<128x1xf32> to vector<128x128xf32>
    %83 = arith.subf %75, %82 : vector<128x128xf32>
    %84 = math.exp %83 : vector<128x128xf32>
    %cst_41 = arith.constant dense<0.000000e+00> : vector<128xf32>
    %85 = vector.multi_reduction <add>, %84, %cst_41 [1] : vector<128x128xf32> to vector<128xf32>
    %86 = vector.shape_cast %85 : vector<128xf32> to vector<128x1xf32>
    %87 = tpu.reciprocal %86 {approx = true} : vector<128x1xf32> -> vector<128x1xf32>
    %88 = arith.truncf %84 : vector<128x128xf32> to vector<128x128xbf16>
    %cst_42 = arith.constant dense<0.000000e+00> : vector<128x128xf32>
    %89 = tpu.matmul %88, %74, %cst_42 {dimension_numbers = #tpu.dot_dimension_numbers<[1], [0], [0], [1], [0, 0, 1, 1], [], []>} : vector<128x128xbf16>, vector<128x128xbf16>, vector<128x128xf32> -> vector<128x128xf32>
    %90 = vector.broadcast %87 : vector<128x1xf32> to vector<128x128xf32>
    %91 = arith.mulf %89, %90 : vector<128x128xf32>
    %92 = arith.truncf %91 : vector<128x128xf32> to vector<128x128xbf16>
    %93 = tpu.concatenate %29, %50, %71, %92 in 1 : vector<128x128xbf16>, vector<128x128xbf16>, vector<128x128xbf16>, vector<128x128xbf16> -> vector<128x512xbf16>
    %c0_43 = arith.constant 0 : index
    %c0_44 = arith.constant 0 : index
    %94 = vector.load %arg7[%c0_43, %c0_44] : memref<512x512xbf16, #tpu.memory_space<vmem>>, vector<512x512xbf16>
    %cst_45 = arith.constant dense<0.000000e+00> : vector<128x512xf32>
    %95 = tpu.matmul %93, %94, %cst_45 {dimension_numbers = #tpu.dot_dimension_numbers<[1], [0], [0], [1], [0, 0, 1, 1], [], []>} : vector<128x512xbf16>, vector<512x512xbf16>, vector<128x512xf32> -> vector<128x512xf32>
    %c0_46 = arith.constant 0 : index
    %c0_47 = arith.constant 0 : index
    %96 = vector.load %arg8[%c0_46, %c0_47] : memref<1x512xf32, #tpu.memory_space<vmem>>, vector<1x512xf32>
    %97 = vector.broadcast %96 : vector<1x512xf32> to vector<128x512xf32>
    %98 = arith.addf %95, %97 : vector<128x512xf32>
    %c0_48 = arith.constant 0 : index
    %c0_49 = arith.constant 0 : index
    %c0_50 = arith.constant 0 : index
    %99 = vector.load %arg9[%c0_48, %c0_49, %c0_50] : memref<1x128x512xf32, #tpu.memory_space<vmem>>, vector<1x128x512xf32>
    %100 = vector.shape_cast %99 : vector<1x128x512xf32> to vector<128x512xf32>
    %101 = vector.shape_cast %98 : vector<128x512xf32> to vector<1x128x512xf32>
    tpu.vector_store %arg9[%c0_48, %c0_49, %c0_50], %101 {strides = array<i32>} : memref<1x128x512xf32, #tpu.memory_space<vmem>>, vector<1x128x512xf32>,
    return
  }
  func.func @transform_0(%arg0: i32, %arg1: i32) -> (i32, i32, i32) {
    %c0_i32 = arith.constant 0 : i32
    %c0_i32_0 = arith.constant 0 : i32
    return %arg0, %arg1, %c0_i32 : i32, i32, i32
  }
  func.func @transform_1(%arg0: i32, %arg1: i32) -> (i32, i32, i32) {
    %c0_i32 = arith.constant 0 : i32
    %c0_i32_0 = arith.constant 0 : i32
    %c0_i32_1 = arith.constant 0 : i32
    return %arg0, %c0_i32, %c0_i32_0 : i32, i32, i32
  }
  func.func @transform_2(%arg0: i32, %arg1: i32) -> (i32, i32) {
    %c0_i32 = arith.constant 0 : i32
    %c0_i32_0 = arith.constant 0 : i32
    %c0_i32_1 = arith.constant 0 : i32
    return %c0_i32, %c0_i32_0 : i32, i32
  }
  func.func @transform_3(%arg0: i32, %arg1: i32) -> (i32, i32) {
    %c0_i32 = arith.constant 0 : i32
    %c0_i32_0 = arith.constant 0 : i32
    %c0_i32_1 = arith.constant 0 : i32
    return %c0_i32, %c0_i32_0 : i32, i32
  }
  func.func @transform_4(%arg0: i32, %arg1: i32) -> (i32, i32) {
    %c0_i32 = arith.constant 0 : i32
    %c0_i32_0 = arith.constant 0 : i32
    %c0_i32_1 = arith.constant 0 : i32
    return %c0_i32, %c0_i32_0 : i32, i32
  }
  func.func @transform_5(%arg0: i32, %arg1: i32) -> (i32, i32) {
    %c0_i32 = arith.constant 0 : i32
    %c0_i32_0 = arith.constant 0 : i32
    %c0_i32_1 = arith.constant 0 : i32
    return %c0_i32, %c0_i32_0 : i32, i32
  }
  func.func @transform_6(%arg0: i32, %arg1: i32) -> (i32, i32) {
    %c0_i32 = arith.constant 0 : i32
    %c0_i32_0 = arith.constant 0 : i32
    %c0_i32_1 = arith.constant 0 : i32
    return %c0_i32, %c0_i32_0 : i32, i32
  }
  func.func @transform_7(%arg0: i32, %arg1: i32) -> (i32, i32, i32) {
    %c0_i32 = arith.constant 0 : i32
    %c0_i32_0 = arith.constant 0 : i32
    return %arg0, %arg1, %c0_i32 : i32, i32, i32
  }
  func.func @transform_8(%arg0: i32, %arg1: i32) -> (i32, i32, i32) {
    %c0_i32 = arith.constant 0 : i32
    %c0_i32_0 = arith.constant 0 : i32
    return %arg0, %arg1, %c0_i32 : i32, i32, i32
  }
}

</mosaic_0001>

<bundles_post_ra>
// kernel: tpu_custom_call.1
= control target key start
LH: loop header
LB: loop body
LE: loop exit
PB: predicated region body
PF: predicated region fallthrough
CT: control target
= control target key end

     0   :  { %s10217_s0 = inlined_call_operand.hbm [shape: f32[2,128,128], index: 0, kind: input, shape index: {}]   ;;  %s10218_s1 = inlined_call_operand.hbm [shape: f32[2,128,128], index: 1, kind: input, shape index: {}]   ;;  %s10219_s2 = inlined_call_operand.hbm [shape: bf16[128,512], index: 2, kind: input, shape index: {}]   ;;  %s10220_s3 = inlined_call_operand.hbm [shape: bf16[128,512], index: 3, kind: input, shape index: {}]   ;;  %s10221_s4 = inlined_call_operand.hbm [shape: bf16[128,512], index: 4, kind: input, shape index: {}]   ;;  %s10222_s5 = inlined_call_operand.hbm [shape: bf16[512,512], index: 5, kind: input, shape index: {}]   ;;  %s10223_s6 = inlined_call_operand.vmem [shape: f32[1,512], index: 6, kind: input, shape index: {}]   ;;  %s10224_s7 = inlined_call_operand.hbm [shape: f32[2,128,512], index: 7, kind: output, shape index: {0}]   ;;  %s10225_s8 = inlined_call_operand.hbm [shape: bf16[8,128,128], index: 8, kind: output, shape index: {1}]  }
   0x1   :  { %10250 = sst [smem:[#allocation80_spill]] %s10217_s0 }
   0x2   :  { %10251 = sst [smem:[#allocation81_spill]] %s10219_s2 }
   0x3   :  { %10252 = sst [smem:[#allocation82_spill]] %s10220_s3 }
   0x4   :  { %10253 = sst [smem:[#allocation83_spill]] %s10221_s4 }
   0x5   :  { %10254 = sst [smem:[#allocation84_spill]] %s10222_s5 }
   0x6   :  { %14 = vsyncpa [#allocation5], 0 }
   0x7   :  { %16 = vsyncpa [#allocation5 + $0x1], 0 }
   0x8   :  { %17 = vsyncpa [#allocation8], 0 }
   0x9   :  { %19 = vsyncpa [#allocation8 + $0x1], 0 }
   0xa   :  { %20 = vsyncpa [#allocation11], 0 }
   0xb   :  { %21 = vsyncpa [#allocation14], 0 }
   0xc   :  { %22 = vsyncpa [#allocation6], 0 }
   0xd   :  { %24 = vsyncpa [#allocation6 + $0x1], 0 }
   0xe   :  { %25 = vsyncpa [#allocation17], 0 }
   0xf   :  { %27 = vsyncpa [#allocation17 + $0x1], 0  ;;  %s8389_s27 = smov 0   ;;  %s8391_s28 = smov 0  }
  0x10   :  { %s8393_s29 = smov 0   ;;  %s8395_s30 = smov 0  }
  0x11   :  { %s8397_s9 = smov 0   ;;  %s8399_s10 = smov 0  }
  0x12 LB: > { %10255 = sst [smem:[#allocation25_spill]] %s8313_s29  ;;  %s8420_s11 = sadd.s32 4294967295, %s8325_s10   ;;  %s8325_s10 = sphi %s8399_s10, %s33_s10   ;;  %s8321_s9 = sphi %s8397_s9, %s10387_s9   ;;  %s8317_s30 = sphi %s8395_s30, %s10386_s30   ;;  %s8313_s29 = sphi %s8393_s29, %s10382_s29   ;;  %s8309_s28 = sphi %s8391_s28, %s10385_s28   ;;  %s8305_s27 = sphi %s8389_s27, %s10384_s27  }
  0x13   : > { %s6026_s12 = sadd.s32 4294967294, %s8325_s10   ;;  %p67_p0 = scmp.ne.s32.totalorder %s8309_s28, %s8305_s27 }
  0x14   : > { %p10226_p1 = scmp.eq.s32.totalorder %s8420_s11, 0  ;;  %p224_p2 = scmp.eq.s32.totalorder %s8420_s11, 1 }
  0x15   : > { %p230_p3 = scmp.eq.s32.totalorder %s6026_s12, 1  ;;  %p6027_p5 = scmp.ge.s32.totalorder %s8325_s10, 1 }
  0x16   : > { %p8429_p4 = por %p10226_p1, %p67_p0  ;;  %p265_p7 = scmp.lt.s32.totalorder %s8325_s10, 3 }
  0x17   : > { %p8434_p6 = por %p230_p3, %p67_p0  ;;  %s8327_s16 = smov [#allocation9]  }
  0x18   : > { %p8439_p8 = pnand %p6027_p5, %p265_p7  ;;  %s277_s17 = sshll.u32 %s8327_s16, 4  ;;  %s278_s17 = int_to_ptr.vmem [resolvable:$true] %s277_s17 }
  0x19   : > { %s10257_s14 = scalar_select %p8434_p6, 1, 0 }
  0x1a   : > { %p7285_p9 = pneg %p8439_p8  ;;  %s8328_s19 = smov [#allocation10]  }
  0x1b   : > { %10258 = sst [smem:[#allocation26_spill]] %s10257_s14  ;;  %s290_s20 = sshll.u32 %s8328_s19, 4  ;;  %s291_s20 = int_to_ptr.vmem [resolvable:$true] %s290_s20 }
  0x1c   : > { %p8448_p11 = pnand %p7285_p9, %p10226_p1  ;;  %s8329_s21 = smov [#allocation12]  }
  0x1d   : > { %s303_s22 = sshll.u32 %s8329_s21, 4  ;;  %s8050_s23 = scalar_lea.vmem %s278_s17, 4096  ;;  %s304_s22 = int_to_ptr.vmem [resolvable:$true] %s303_s22 }
  0x1e   : > { %p8041_p12 = pneg %p8448_p11  ;;  %p8051_p13 = scmp.ne.s32.totalorder %s278_s17, %s8050_s23 }
  0x1f   : > { %p8058_p5 = scmp.lt.s32.totalorder %s278_s17, %s278_s17  ;;  %p8059_p7 = scmp.lt.s32.totalorder %s8050_s23, %s8050_s23 }
  0x20   : > { %p8053_p0 = pnand %p8051_p13, %p8041_p12 }
  0x21   : > { %p8060_p9 = por %p8059_p7, %p8058_p5 }
  0x22   : > { %p8054_p3 = pneg %p8053_p0 }
  0x24   : > { %p8061_p10 = pnand %p8060_p9, %p8054_p3 }
  0x26   : > { %8064 = shalt.err (!%p8061_p10)
}
  0x27   : > { %s8330_s24 = smov 256   ;;  %s8331_s25 = smov 16  }
  0x28   : > { %s10261_s2 = sld [smem:[#allocation81_spill]]  ;;  %s8076_s16 = scalar_lea.vmem %s291_s20, 4096 }
  0x29   : > { %p8077_p13 = scmp.ne.s32.totalorder %s291_s20, %s8076_s16  ;;  %p8084_p3 = scmp.lt.s32.totalorder %s291_s20, %s291_s20 }
  0x2a   : > { %p8085_p10 = scmp.lt.s32.totalorder %s8076_s16, %s8076_s16 }
  0x2b   : > { %p8079_p0 = pnand %p8077_p13, %p8041_p12 }
  0x2c   : > { %p8086_p7 = por %p8085_p10, %p8084_p3 }
  0x2d   : > { %p8080_p5 = pneg %p8079_p0 }
  0x2e   : > { %7288 = dma.hbm_to_vmem [thread:$0]  (!%p8448_p11), %s10261_s2, 4096, %s278_s17, [#allocation8], %s8330_s24, %s8330_s24, %s8331_s25  }
  0x2f   : > { %p8087_p9 = pnand %p8086_p7, %p8080_p5 }
  0x31   : > { %8090 = shalt.err (!%p8087_p9)
}
  0x32   : > { %s10262_s3 = sld [smem:[#allocation82_spill]]  ;;  %s8102_s17 = scalar_lea.vmem %s304_s22, 4096 }
  0x33   : > { %p8103_p1 = scmp.ne.s32.totalorder %s304_s22, %s8102_s17  ;;  %p8110_p3 = scmp.lt.s32.totalorder %s304_s22, %s304_s22 }
  0x34   : > { %p8111_p5 = scmp.lt.s32.totalorder %s8102_s17, %s8102_s17 }
  0x35   : > { %p8105_p13 = pnand %p8103_p1, %p8041_p12 }
  0x36   : > { %p8112_p10 = por %p8111_p5, %p8110_p3 }
  0x37   : > { %p8106_p0 = pneg %p8105_p13 }
  0x38   : > { %7291 = dma.hbm_to_vmem [thread:$0]  (!%p8448_p11), %s10262_s3, 4096, %s291_s20, [#allocation11], %s8330_s24, %s8330_s24, %s8331_s25  }
  0x39   : > { %p8113_p7 = pnand %p8112_p10, %p8106_p0 }
  0x3b   : > { %8116 = shalt.err (!%p8113_p7)
}
  0x3c   : > { %s10263_s4 = sld [smem:[#allocation83_spill]]  ;;  %s8332_s20 = smov [#allocation13]  }
  0x3d   : > { %s316_s12 = sshll.u32 %s8332_s20, 4  ;;  %s317_s12 = int_to_ptr.vmem [resolvable:$true] %s316_s12 }
  0x3e   : > { %s8128_s16 = scalar_lea.vmem %s317_s12, 16384  ;;  %p8136_p0 = scmp.lt.s32.totalorder %s317_s12, %s317_s12 }
  0x3f   : > { %p8129_p1 = scmp.ne.s32.totalorder %s317_s12, %s8128_s16  ;;  %p8137_p3 = scmp.lt.s32.totalorder %s8128_s16, %s8128_s16 }
  0x41   : > { %p8131_p9 = pnand %p8129_p1, %p8041_p12  ;;  %p8138_p5 = por %p8137_p3, %p8136_p0 }
  0x42   : > { %7294 = dma.hbm_to_vmem [thread:$0]  (!%p8448_p11), %s10263_s4, 4096, %s304_s22, [#allocation11], %s8330_s24, %s8330_s24, %s8331_s25  }
  0x43   : > { %p8132_p13 = pneg %p8131_p9 }
  0x45   : > { %p8139_p10 = pnand %p8138_p5, %p8132_p13 }
  0x47   : > { %8142 = shalt.err (!%p8139_p10)
}
  0x48   : > { %s10264_s5 = sld [smem:[#allocation84_spill]]  ;;  %s45_s18 = sadd.s32 1, %s8321_s9 }
  0x49   : > { %s54_s21 = sadd.s32 1, %s8313_s29  ;;  %p47_p12 = scmp.ge.s32.totalorder %s45_s18, 2 }
  0x4a   : > { %p61_p7 = scmp.ne.s32.totalorder %s8313_s29, %s8309_s28  ;;  %p62_p1 = scmp.eq.s32.totalorder %s8325_s10, 0 }
  0x4b   : > { %p7316_p9 = scmp.lt.s32.totalorder %s8325_s10, 2  ;;  %s10389_s18 = smov (%p47_p12, %s45_s18), 0 }
  0x4c   : > { %10265 = sst [smem:[#allocation27_spill]] %s10389_s18  ;;  %p63_p13 = por %p62_p1, %p61_p7 }
  0x4d   : > { %p8508_p0 = por %p224_p2, %p61_p7  ;;  %s49_s23 = ssub.s32 %s8321_s9, %s10389_s18 }
  0x4e   : > { %7297 = dma.hbm_to_vmem [thread:$0]  (!%p8448_p11), %s10264_s5, 16384, %s317_s12, [#allocation14], %s8330_s24, %s8330_s24, %s8331_s25  }
  0x4f   : > { %s333_s26 = sand.u32 1, %s8313_s29   ;;  %p52_p11 = scmp.eq.s32.totalorder %s49_s23, 0 }
  0x50   : > { %s8515_s24 = sshll.u32 %s333_s26, 7  ;;  %s10227_s25 = sshll.u32 %s8321_s9, 11 }
  0x51   : > { %s8519_s20 = scalar_select %p52_p11, %s8313_s29, %s54_s21  }
  0x52   : > { %s10268_s0 = sld [smem:[#allocation80_spill]]  ;;  %s337_s19 = scalar_lea.vmem [#allocation4], %s8515_s24 }
  0x53   : > { %10267 = sst [smem:[#allocation28_spill]] %s8519_s20  ;;  %s346_s2 = sshll.u32 %s337_s19, 4  ;;  %s347_s2 = int_to_ptr.vmem [resolvable:$true] %s346_s2 }
  0x54   : > { %p8529_p2 = pnand %p7316_p9, %p63_p13  ;;  %s334_s23 = scalar_lea.sflag [#allocation5], %s333_s26 }
  0x55   : > { %s8156_s21 = scalar_lea.vmem %s347_s2, 2048  ;;  %s8333_s12 = smov [#allocation4]  }
  0x56   : > { %p8145_p3 = pneg %p8529_p2  ;;  %p8157_p5 = scmp.ne.s32.totalorder %s347_s2, %s8156_s21 }
  0x57   : > { %s8161_s16 = sshll.u32 %s8333_s12, 4  ;;  %s8162_s16 = int_to_ptr.vmem [resolvable:$false] %s8161_s16 }
  0x58   : > { %s345_s22 = scalar_lea.hbm %s10268_s0, %s10227_s25  ;;  %p8159_p10 = pnand %p8157_p5, %p8145_p3 }
  0x59   : > { %s8163_s19 = scalar_lea.vmem %s8162_s16, 4096  ;;  %p8164_p7 = scmp.lt.s32.totalorder %s347_s2, %s8162_s16 }
  0x5a   : > { %p8160_p12 = pneg %p8159_p10  ;;  %p8165_p1 = scmp.lt.s32.totalorder %s8163_s19, %s8156_s21 }
  0x5c   : > { %p8166_p9 = por %p8165_p1, %p8164_p7 }
  0x5e   : > { %p8167_p13 = pnand %p8166_p9, %p8160_p12 }
  0x60   : > { %8170 = shalt.err (!%p8167_p13)
}
  0x61   : > { %s8334_s25 = smov 128   ;;  %s8335_s26 = smov 8  }
  0x62   : > { %7301 = dma.hbm_to_vmem [thread:$0]  (!%p8529_p2), %s345_s22, 2048, %s347_s2, %s334_s23, %s8334_s25, %s8334_s25, %s8335_s26  }
  0x63   : > { %s10270_s0 = sshll.u32 %s8321_s9, 11  ;;  %s360_s18 = scalar_lea.vmem [#allocation7], %s8515_s24 }
  0x64   : > { %s366_s12 = scalar_lea.hbm %s10218_s1, %s10270_s0  ;;  %s367_s16 = sshll.u32 %s360_s18, 4  ;;  %s368_s16 = int_to_ptr.vmem [resolvable:$true] %s367_s16 }
  0x65   : > { %s356_s21 = sand.u32 1, %s8325_s10   ;;  %s8184_s20 = scalar_lea.vmem %s368_s16, 2048 }
  0x66   : > { %s357_s19 = scalar_lea.sflag [#allocation8], %s356_s21  ;;  %p8185_p11 = scmp.ne.s32.totalorder %s368_s16, %s8184_s20 }
  0x67   : > { %s8336_s29 = smov [#allocation7]  }
  0x68   : > { %p8187_p5 = pnand %p8185_p11, %p8145_p3  ;;  %s8189_s14 = sshll.u32 %s8336_s29, 4  ;;  %s8190_s14 = int_to_ptr.vmem [resolvable:$false] %s8189_s14 }
  0x69   : > { %s8191_s2 = scalar_lea.vmem %s8190_s14, 4096  ;;  %p8192_p12 = scmp.lt.s32.totalorder %s368_s16, %s8190_s14 }
  0x6a   : > { %p8188_p10 = pneg %p8187_p5  ;;  %p8193_p7 = scmp.lt.s32.totalorder %s8191_s2, %s8184_s20 }
  0x6c   : > { %p8194_p1 = por %p8193_p7, %p8192_p12 }
  0x6e   : > { %p8195_p9 = pnand %p8194_p1, %p8188_p10 }
  0x70   : > { %8198 = shalt.err (!%p8195_p9)
}
  0x71   : > { %7304 = dma.hbm_to_vmem [thread:$0]  (!%p8529_p2), %s366_s12, 2048, %s368_s16, %s357_s19, %s8334_s25, %s8334_s25, %s8335_s26  }
  0x72   : > { %379 = sbr.rel (%p8439_p8) target bundleno = 2305 (0x901), region = 48 }
  0x77   : > { %s8555_s0 = sand.u32 1, %s8309_s28  }
  0x78   : > { %s6040_s4 = sshll.u32 %s8555_s0, 7  ;;  %s382_s5 = scalar_lea.sflag [#allocation5], %s8555_s0 }
  0x79   : > { %s8559_s29 = scalar_lea.vmem [#allocation4], %s6040_s4 }
  0x7a   : > { %8276 = dma.done.wait (%p8429_p4), %s382_s5, 2048  }
  0x7b   : > { %8278 = vsyncadd (%p8429_p4), %s382_s5, 4294965248  ;;  %s390_s3 = sand.u32 1, %s8420_s11   ;;  %s8566_s15 = scalar_lea.vmem [#allocation7], %s6040_s4 }
  0x7c   : > { %s391_s14 = scalar_lea.sflag [#allocation8], %s390_s3 }
  0x7d   : > { %8280 = dma.done.wait (%p8429_p4), %s391_s14, 2048  }
  0x7e   : > { %8282 = vsyncadd (%p8429_p4), %s391_s14, 4294965248  ;;  %p10271_p8 = scmp.eq.s32.totalorder %s8420_s11, 0 }
  0x80   : > { %8284 = dma.done.wait (%p10271_p8), [#allocation8], 4096   ;;  %p10272_p2 = pmov %p10271_p8 }
  0x82   : > { %8286 = vsyncadd (%p10272_p2), [#allocation8], 4294963200  ;;  %p10273_p3 = pmov %p10272_p2 }
  0x83   : > { %p10274_p13 = pmov %p10272_p2 }
  0x84   : > { %8288 = dma.done.wait (%p10273_p3), [#allocation11], 8192  }
  0x85   : > { %8290 = vsyncadd (%p10274_p13), [#allocation11], 4294959104  ;;  %p10275_p11 = pmov %p10272_p2 }
  0x86   : > { %p10276_p5 = pmov %p10272_p2 }
  0x87   : > { %8292 = dma.done.wait (%p10275_p11), [#allocation14], 16384  }
  0x88   : > { %8294 = vsyncadd (%p10276_p5), [#allocation14], 4294950912  ;;  %v8337_v0 = vmov 0   ;;  %v7383_v1 = vld [vmem:[#allocation10 + $0xe4] ss:$16 sps:$4 sm:$0xff]   ;;  %v463_v18 = vld [vmem:[%s8566_s15 + $0x8] sm:$0xff] }
  0x89   : > { %710 = vmatprep.mubr.bf16.mxu0 %v8337_v0  ;;  %823 = vmatprep.mubr.bf16.mxu1 %v8337_v0  ;;  %v7385_v2 = vld [vmem:[#allocation10 + $0xe0] ss:$16 sps:$4 sm:$0xff]   ;;  %v7386_v3 = vld [vmem:[#allocation10 + $0xc4] ss:$16 sps:$4 sm:$0xff]   ;;  %v465_v24 = vld [vmem:[%s8566_s15 + $0x18] sm:$0xff]  ;;  %s6047_s11 = sshll.u32 %s8555_s0, 8 }
  0x8a   : > { %678 = vmatprep.subr.bf16.mxu0 %v7383_v1  ;;  %v7388_v4 = vld [vmem:[#allocation10 + $0xc0] ss:$16 sps:$4 sm:$0xff]   ;;  %v7389_v5 = vld [vmem:[#allocation10 + $0xa4] ss:$16 sps:$4 sm:$0xff]   ;;  %v467_v31 = vld [vmem:[%s8566_s15 + $0x28] sm:$0xff]  ;;  %s8782_s13 = scalar_lea.vmem [#allocation16], %s6047_s11 }
  0x8b   : > { %679 = vmatpush1.bf16.msra.mxu0 %v7385_v2  ;;  %v7391_v6 = vld [vmem:[#allocation10 + $0xa0] ss:$16 sps:$4 sm:$0xff]   ;;  %v7392_v7 = vld [vmem:[#allocation10 + $0x84] ss:$16 sps:$4 sm:$0xff]   ;;  %v469_v38 = vld [vmem:[%s8566_s15 + $0x38] sm:$0xff]  ;;  %s6653_s18 = sshll.u32 %s8317_s30, 12 }
  0x8c   : > { %680 = vmatprep.subr.bf16.mxu0 %v7386_v3  ;;  %v7394_v8 = vld [vmem:[#allocation10 + $0x80] ss:$16 sps:$4 sm:$0xff]   ;;  %v7395_v9 = vld [vmem:[#allocation10 + $0x64] ss:$16 sps:$4 sm:$0xff]   ;;  %v471_v45 = vld [vmem:[%s8566_s15 + $0x48] sm:$0xff]  ;;  %s5842_s24 = sshll.u32 %s8782_s13, 4  ;;  %s9883_s22 = scalar_lea.hbm %s10225_s8, %s6653_s18  ;;  %s9885_s24 = int_to_ptr.vmem [resolvable:$true] %s5842_s24 }
  0x8d   : > { %v7397_v10 = vld [vmem:[#allocation10 + $0x60] ss:$16 sps:$4 sm:$0xff]   ;;  %v7398_v11 = vld [vmem:[#allocation10 + $0x44] ss:$16 sps:$4 sm:$0xff]   ;;  %v473_v50 = vld [vmem:[%s8566_s15 + $0x58] sm:$0xff]  ;;  %s5807_s12 = scalar_lea.sflag [#allocation17], %s8555_s0 }
  0x8e   : > { %v7400_v12 = vld [vmem:[#allocation10 + $0x40] ss:$16 sps:$4 sm:$0xff]   ;;  %v7401_v13 = vld [vmem:[#allocation10 + $0x24] ss:$16 sps:$4 sm:$0xff]   ;;  %v7455_v52 = vld [vmem:[#allocation10 + $0xec] ss:$16 sps:$4 sm:$0xff]  }
  0x8f   : > { %681 = vmatpush1.bf16.msra.mxu0 %v7388_v4  ;;  %v7403_v14 = vld [vmem:[#allocation10 + $0x20] ss:$16 sps:$4 sm:$0xff]   ;;  %v7404_v15 = vld [vmem:[#allocation10 + $0x4] ss:$16 sps:$4 sm:$0xff]   ;;  %v7457_v53 = vld [vmem:[#allocation10 + $0xe8] ss:$16 sps:$4 sm:$0xff]   ;;  %791 = vmatprep.subr.bf16.mxu1 %v7455_v52 }
  0x90   : > { %682 = vmatprep.subr.bf16.mxu0 %v7389_v5  ;;  %v7406_v16 = vld [vmem:[#allocation10] ss:$16 sps:$4 sm:$0xff]   ;;  %v7409_v19 = vld [vmem:[#allocation12 + $0xe4] ss:$16 sps:$4 sm:$0xff]   ;;  %v475_v55 = vld [vmem:[%s8566_s15 + $0x68] sm:$0xff]  ;;  %792 = vmatpush1.bf16.msra.mxu1 %v7457_v53  ;;  %s8199_s16 = scalar_lea.vmem %s9885_s24, 4096 }
  0x91   : > { %v462_v17 = vld [vmem:[%s8566_s15] sm:$0xff]  ;;  %v464_v23 = vld [vmem:[%s8566_s15 + $0x10] sm:$0xff]  ;;  %v7458_v56 = vld [vmem:[#allocation10 + $0xcc] ss:$16 sps:$4 sm:$0xff]   ;;  %p8200_p4 = scmp.ne.s32.totalorder %s9885_s24, %s8199_s16  ;;  %s8338_s21 = smov [#allocation16]  }
  0x92   : > { %v8588_v20 = vpack.c.bf16 %v463_v18, %v462_v17  ;;  %v7407_v21 = vld [vmem:[#allocation12 + $0xe0] ss:$16 sps:$4 sm:$0xff]   ;;  %v7412_v22 = vld [vmem:[#allocation12 + $0xc4] ss:$16 sps:$4 sm:$0xff]   ;;  %v8594_v27 = vpack.c.bf16 %v465_v24, %v464_v23  ;;  %793 = vmatprep.subr.bf16.mxu1 %v7458_v56  ;;  %v7460_v58 = vld [vmem:[#allocation10 + $0xc8] ss:$16 sps:$4 sm:$0xff]  }
  0x93   : > { %683 = vmatpush1.bf16.msra.mxu0 %v7391_v6  ;;  %v7410_v25 = vld [vmem:[#allocation12 + $0xc0] ss:$16 sps:$4 sm:$0xff]   ;;  %v7415_v26 = vld [vmem:[#allocation12 + $0xa4] ss:$16 sps:$4 sm:$0xff]   ;;  %v7461_v59 = vld [vmem:[#allocation10 + $0xac] ss:$16 sps:$4 sm:$0xff]   ;;  %p8201_p10 = pnand %p8200_p4, %p8508_p0 }
  0x94   : > { %684 = vmatprep.subr.bf16.mxu0 %v7392_v7  ;;  %v7413_v28 = vld [vmem:[#allocation12 + $0xa0] ss:$16 sps:$4 sm:$0xff]   ;;  %v7418_v29 = vld [vmem:[#allocation12 + $0x84] ss:$16 sps:$4 sm:$0xff]   ;;  %794 = vmatpush1.bf16.msra.mxu1 %v7460_v58  ;;  %v7463_v60 = vld [vmem:[#allocation10 + $0xa8] ss:$16 sps:$4 sm:$0xff]  }
  0x95   : > { %v466_v30 = vld [vmem:[%s8566_s15 + $0x20] sm:$0xff]  ;;  %v468_v37 = vld [vmem:[%s8566_s15 + $0x30] sm:$0xff]  ;;  %v477_v62 = vld [vmem:[%s8566_s15 + $0x78] sm:$0xff]  ;;  %795 = vmatprep.subr.bf16.mxu1 %v7461_v59  ;;  %p8202_p12 = pneg %p8201_p10  ;;  %s8203_s19 = sshll.u32 %s8338_s21, 4  ;;  %s8204_s19 = int_to_ptr.vmem [resolvable:$false] %s8203_s19 }
  0x96   : > { %v7416_v32 = vld [vmem:[#allocation12 + $0x80] ss:$16 sps:$4 sm:$0xff]   ;;  %v7421_v33 = vld [vmem:[#allocation12 + $0x64] ss:$16 sps:$4 sm:$0xff]   ;;  %v8600_v35 = vpack.c.bf16 %v467_v31, %v466_v30  ;;  %v8606_v42 = vpack.c.bf16 %v469_v38, %v468_v37  ;;  %v7464_v63 = vld [vmem:[#allocation10 + $0x8c] ss:$16 sps:$4 sm:$0xff]   ;;  %p8206_p7 = scmp.lt.s32.totalorder %s9885_s24, %s8204_s19 }
  0x97   : > { %685 = vmatpush1.bf16.msra.mxu0 %v7394_v8  ;;  %v7419_v34 = vld [vmem:[#allocation12 + $0x60] ss:$16 sps:$4 sm:$0xff]   ;;  %v7424_v36 = vld [vmem:[#allocation12 + $0x44] ss:$16 sps:$4 sm:$0xff]   ;;  %v7466_v2 = vld [vmem:[#allocation10 + $0x88] ss:$16 sps:$4 sm:$0xff]  }
  0x98   : > { %686 = vmatprep.subr.bf16.mxu0 %v7395_v9  ;;  %v7422_v39 = vld [vmem:[#allocation12 + $0x40] ss:$16 sps:$4 sm:$0xff]   ;;  %v7427_v40 = vld [vmem:[#allocation12 + $0x24] ss:$16 sps:$4 sm:$0xff]   ;;  %796 = vmatpush1.bf16.msra.mxu1 %v7463_v60  ;;  %v7467_v3 = vld [vmem:[#allocation10 + $0x6c] ss:$16 sps:$4 sm:$0xff]  }
  0x99   : > { %v7425_v41 = vld [vmem:[#allocation12 + $0x20] ss:$16 sps:$4 sm:$0xff]   ;;  %v7430_v43 = vld [vmem:[#allocation12 + $0x4] ss:$16 sps:$4 sm:$0xff]   ;;  %797 = vmatprep.subr.bf16.mxu1 %v7464_v63  ;;  %v7469_v4 = vld [vmem:[#allocation10 + $0x68] ss:$16 sps:$4 sm:$0xff]  }
  0x9a   : > { %v470_v44 = vld [vmem:[%s8566_s15 + $0x40] sm:$0xff]  ;;  %v472_v49 = vld [vmem:[%s8566_s15 + $0x50] sm:$0xff]  ;;  %v7470_v7 = vld [vmem:[#allocation10 + $0x4c] ss:$16 sps:$4 sm:$0xff]   ;;  %s8205_s2 = scalar_lea.vmem %s8204_s19, 8192 }
  0x9b   : > { %687 = vmatpush1.bf16.msra.mxu0 %v7397_v10  ;;  %v7428_v46 = vld [vmem:[#allocation12] ss:$16 sps:$4 sm:$0xff]   ;;  %v7433_v47 = vld [vmem:[#allocation9 + $0xe4] ss:$16 sps:$4 sm:$0xff]   ;;  %v8612_v48 = vpack.c.bf16 %v471_v45, %v470_v44  ;;  %v8618_v51 = vpack.c.bf16 %v473_v50, %v472_v49  ;;  %v7472_v8 = vld [vmem:[#allocation10 + $0x48] ss:$16 sps:$4 sm:$0xff]   ;;  %p8207_p1 = scmp.lt.s32.totalorder %s8205_s2, %s8199_s16 }
  0x9c   : > { %688 = vmatprep.subr.bf16.mxu0 %v7398_v11  ;;  %v474_v54 = vld [vmem:[%s8566_s15 + $0x60] sm:$0xff]  ;;  %v476_v61 = vld [vmem:[%s8566_s15 + $0x70] sm:$0xff]  ;;  %798 = vmatpush1.bf16.msra.mxu1 %v7466_v2  ;;  %v7473_v11 = vld [vmem:[#allocation10 + $0x2c] ss:$16 sps:$4 sm:$0xff]  }
  0x9d   : > { %v8624_v57 = vpack.c.bf16 %v475_v55, %v474_v54  ;;  %v8630_v1 = vpack.c.bf16 %v477_v62, %v476_v61  ;;  %799 = vmatprep.subr.bf16.mxu1 %v7467_v3  ;;  %v7431_v5 = vld [vmem:[#allocation9 + $0xe0] ss:$16 sps:$4 sm:$0xff]   ;;  %v7436_v6 = vld [vmem:[#allocation9 + $0xc4] ss:$16 sps:$4 sm:$0xff]   ;;  %v7484_v30 = vld [vmem:[#allocation12 + $0xcc] ss:$16 sps:$4 sm:$0xff]   ;;  %p8208_p9 = por %p8207_p1, %p8206_p7 }
  0x9e   : > { %v7434_v9 = vld [vmem:[#allocation9 + $0xc0] ss:$16 sps:$4 sm:$0xff]   ;;  %v7439_v10 = vld [vmem:[#allocation9 + $0xa4] ss:$16 sps:$4 sm:$0xff]   ;;  %v7482_v31 = vld [vmem:[#allocation12 + $0xc8] ss:$16 sps:$4 sm:$0xff]  }
  0x9f   : > { %689 = vmatpush1.bf16.msra.mxu0 %v7400_v12  ;;  %v7475_v12 = vld [vmem:[#allocation10 + $0x28] ss:$16 sps:$4 sm:$0xff]   ;;  %v7440_v17 = vld [vmem:[#allocation9 + $0x80] ss:$16 sps:$4 sm:$0xff]   ;;  %v7445_v18 = vld [vmem:[#allocation9 + $0x64] ss:$16 sps:$4 sm:$0xff]   ;;  %p8209_p8 = pnand %p8208_p9, %p8202_p12 }
  0xa0   : > { %690 = vmatprep.subr.bf16.mxu0 %v7401_v13  ;;  %800 = vmatpush1.bf16.msra.mxu1 %v7469_v4  ;;  %v7437_v13 = vld [vmem:[#allocation9 + $0xa0] ss:$16 sps:$4 sm:$0xff]   ;;  %v7451_v23 = vld [vmem:[#allocation9 + $0x24] ss:$16 sps:$4 sm:$0xff]   ;;  %v1771_v38 = vld [vmem:[%s8559_s29 + $0x8] sm:$0xff] }
  0xa1   : > { %801 = vmatprep.subr.bf16.mxu1 %v7470_v7  ;;  %v7449_v24 = vld [vmem:[#allocation9 + $0x20] ss:$16 sps:$4 sm:$0xff]   ;;  %v7494_v44 = vld [vmem:[#allocation12 + $0x48] ss:$16 sps:$4 sm:$0xff]   ;;  %v7502_v52 = vld [vmem:[#allocation12 + $0xc] ss:$16 sps:$4 sm:$0xff]  }
  0xa2   : > { %v1770_v37 = vld [vmem:[%s8559_s29] sm:$0xff]  ;;  %v1772_v45 = vld [vmem:[%s8559_s29 + $0x10] sm:$0xff]  ;;  %v7497_v49 = vld [vmem:[#allocation12 + $0x28] ss:$16 sps:$4 sm:$0xff]  }
  0xa3   : > { %691 = vmatpush1.bf16.msra.mxu0 %v7403_v14  ;;  %v7442_v14 = vld [vmem:[#allocation9 + $0x84] ss:$16 sps:$4 sm:$0xff]   ;;  %v7500_v53 = vld [vmem:[#allocation12 + $0x8] ss:$16 sps:$4 sm:$0xff]   ;;  %v7510_v3 = vld [vmem:[#allocation9 + $0xec] ss:$16 sps:$4 sm:$0xff]  }
  0xa4   : > { %692 = vmatprep.subr.bf16.mxu0 %v7404_v15  ;;  %802 = vmatpush1.bf16.msra.mxu1 %v7472_v8  ;;  %v7476_v15 = vld [vmem:[#allocation10 + $0xc] ss:$16 sps:$4 sm:$0xff]   ;;  %v1774_v54 = vld [vmem:[%s8559_s29 + $0x20] sm:$0xff]  ;;  %v1776_v58 = vld [vmem:[%s8559_s29 + $0x30] sm:$0xff] }
  0xa5   : > { %803 = vmatprep.subr.bf16.mxu1 %v7473_v11  ;;  %v1775_v55 = vld [vmem:[%s8559_s29 + $0x28] sm:$0xff]  ;;  %v1777_v59 = vld [vmem:[%s8559_s29 + $0x38] sm:$0xff] }
  0xa6   : > { %v8681_v56 = vpack.c.bf16 %v1775_v55, %v1774_v54  ;;  %v8689_v60 = vpack.c.bf16 %v1777_v59, %v1776_v58  ;;  %v1779_v61 = vld [vmem:[%s8559_s29 + $0x48] sm:$0xff]  ;;  %v1781_v63 = vld [vmem:[%s8559_s29 + $0x58] sm:$0xff] }
  0xa7   : > { %693 = vmatpush1.bf16.msra.mxu0 %v7406_v16  ;;  %v7478_v16 = vld [vmem:[#allocation10 + $0x8] ss:$16 sps:$4 sm:$0xff]   ;;  %v7517_v8 = vld [vmem:[#allocation9 + $0xac] ss:$16 sps:$4 sm:$0xff]  }
  0xa8   : > { %1320 = vmatprep.subr.bf16.mxu0 %v7409_v19  ;;  %804 = vmatpush1.bf16.msra.mxu1 %v7475_v12  ;;  %v7443_v19 = vld [vmem:[#allocation9 + $0x60] ss:$16 sps:$4 sm:$0xff]   ;;  %v1783_v4 = vld [vmem:[%s8559_s29 + $0x68] sm:$0xff] }
  0xa9   : > { %805 = vmatprep.subr.bf16.mxu1 %v7476_v15  ;;  %v7512_v7 = vld [vmem:[#allocation9 + $0xc8] ss:$16 sps:$4 sm:$0xff]   ;;  %v7521_v12 = vld [vmem:[#allocation9 + $0x8c] ss:$16 sps:$4 sm:$0xff]  }
  0xaa   : > { %711 = vmatmul.mubr.bf16.vlgmr.msra.gmra.mxu0 %v8588_v20  ;;  %v7515_v11 = vld [vmem:[#allocation9 + $0xa8] ss:$16 sps:$4 sm:$0xff]  }
  0xab   : > { %1321 = vmatpush1.bf16.msra.mxu0 %v7407_v21  ;;  %720 = vmatprep.mubr.bf16.mxu0 %v8337_v0  ;;  %v7448_v21 = vld [vmem:[#allocation9 + $0x44] ss:$16 sps:$4 sm:$0xff]   ;;  %v7522_v15 = vld [vmem:[#allocation9 + $0x68] ss:$16 sps:$4 sm:$0xff]  }
  0xac   : > { %1322 = vmatprep.subr.bf16.mxu0 %v7412_v22  ;;  %806 = vmatpush1.bf16.msra.mxu1 %v7478_v16  ;;  %v7446_v22 = vld [vmem:[#allocation9 + $0x40] ss:$16 sps:$4 sm:$0xff]   ;;  %v7528_v16 = vld [vmem:[#allocation9 + $0x4c] ss:$16 sps:$4 sm:$0xff]  }
  0xaf   : > { %1323 = vmatpush1.bf16.msra.mxu0 %v7410_v25  ;;  %824 = vmatmul.mubr.bf16.vlgmr.msra.gmra.mxu1 %v8588_v20  ;;  %v7454_v25 = vld [vmem:[#allocation9 + $0x4] ss:$16 sps:$4 sm:$0xff]  }
  0xb0   : > { %1324 = vmatprep.subr.bf16.mxu0 %v7415_v26  ;;  %833 = vmatprep.mubr.bf16.mxu1 %v8337_v0  ;;  %v7452_v26 = vld [vmem:[#allocation9] ss:$16 sps:$4 sm:$0xff]  }
  0xb2   : > { %721 = vmatmul.mubr.bf16.gmra.mxu0 %v8594_v27 }
  0xb3   : > { %730 = vmatprep.mubr.bf16.mxu0 %v8337_v0  ;;  %1325 = vmatpush1.bf16.msra.mxu0 %v7413_v28  ;;  %v7481_v28 = vld [vmem:[#allocation12 + $0xec] ss:$16 sps:$4 sm:$0xff]  }
  0xb4   : > { %1326 = vmatprep.subr.bf16.mxu0 %v7418_v29  ;;  %v7479_v29 = vld [vmem:[#allocation12 + $0xe8] ss:$16 sps:$4 sm:$0xff]   ;;  %1433 = vmatprep.subr.bf16.mxu1 %v7481_v28 }
  0xb5   : > { %1434 = vmatpush1.bf16.msra.mxu1 %v7479_v29 }
  0xb6   : > { %1435 = vmatprep.subr.bf16.mxu1 %v7484_v30 }
  0xb7   : > { %1327 = vmatpush1.bf16.msra.mxu0 %v7416_v32  ;;  %834 = vmatmul.mubr.bf16.gmra.mxu1 %v8594_v27  ;;  %v7487_v32 = vld [vmem:[#allocation12 + $0xac] ss:$16 sps:$4 sm:$0xff]  }
  0xb8   : > { %1328 = vmatprep.subr.bf16.mxu0 %v7421_v33  ;;  %843 = vmatprep.mubr.bf16.mxu1 %v8337_v0  ;;  %v7485_v33 = vld [vmem:[#allocation12 + $0xa8] ss:$16 sps:$4 sm:$0xff]  }
  0xb9   : > { %1436 = vmatpush1.bf16.msra.mxu1 %v7482_v31 }
  0xba   : > { %731 = vmatmul.mubr.bf16.gmra.mxu0 %v8600_v35  ;;  %1437 = vmatprep.subr.bf16.mxu1 %v7487_v32 }
  0xbb   : > { %740 = vmatprep.mubr.bf16.mxu0 %v8337_v0  ;;  %1329 = vmatpush1.bf16.msra.mxu0 %v7419_v34  ;;  %v7490_v34 = vld [vmem:[#allocation12 + $0x8c] ss:$16 sps:$4 sm:$0xff]  }
  0xbc   : > { %1330 = vmatprep.subr.bf16.mxu0 %v7424_v36  ;;  %v7488_v36 = vld [vmem:[#allocation12 + $0x88] ss:$16 sps:$4 sm:$0xff]  }
  0xbd   : > { %1438 = vmatpush1.bf16.msra.mxu1 %v7485_v33 }
  0xbe   : > { %1439 = vmatprep.subr.bf16.mxu1 %v7490_v34 }
  0xbf   : > { %1331 = vmatpush1.bf16.msra.mxu0 %v7422_v39  ;;  %844 = vmatmul.mubr.bf16.gmra.mxu1 %v8600_v35  ;;  %v7493_v39 = vld [vmem:[#allocation12 + $0x6c] ss:$16 sps:$4 sm:$0xff]  }
  0xc0   : > { %1332 = vmatprep.subr.bf16.mxu0 %v7427_v40  ;;  %853 = vmatprep.mubr.bf16.mxu1 %v8337_v0  ;;  %v7491_v40 = vld [vmem:[#allocation12 + $0x68] ss:$16 sps:$4 sm:$0xff]  }
  0xc1   : > { %1440 = vmatpush1.bf16.msra.mxu1 %v7488_v36 }
  0xc2   : > { %741 = vmatmul.mubr.bf16.gmra.mxu0 %v8606_v42  ;;  %1441 = vmatprep.subr.bf16.mxu1 %v7493_v39 }
  0xc3   : > { %750 = vmatprep.mubr.bf16.mxu0 %v8337_v0  ;;  %1333 = vmatpush1.bf16.msra.mxu0 %v7425_v41  ;;  %v8665_v41 = vpack.c.bf16 %v1771_v38, %v1770_v37 }
  0xc4   : > { %1334 = vmatprep.subr.bf16.mxu0 %v7430_v43  ;;  %v7496_v43 = vld [vmem:[#allocation12 + $0x4c] ss:$16 sps:$4 sm:$0xff]  }
  0xc5   : > { %1442 = vmatpush1.bf16.msra.mxu1 %v7491_v40 }
  0xc6   : > { %1443 = vmatprep.subr.bf16.mxu1 %v7496_v43 }
  0xc7   : > { %1335 = vmatpush1.bf16.msra.mxu0 %v7428_v46  ;;  %854 = vmatmul.mubr.bf16.gmra.mxu1 %v8606_v42  ;;  %v1773_v46 = vld [vmem:[%s8559_s29 + $0x18] sm:$0xff] }
  0xc8   : > { %1986 = vmatprep.subr.bf16.mxu0 %v7433_v47  ;;  %863 = vmatprep.mubr.bf16.mxu1 %v8337_v0  ;;  %v7499_v47 = vld [vmem:[#allocation12 + $0x2c] ss:$16 sps:$4 sm:$0xff]   ;;  %v8673_v50 = vpack.c.bf16 %v1773_v46, %v1772_v45 }
  0xc9   : > { %1444 = vmatpush1.bf16.msra.mxu1 %v7494_v44 }
  0xca   : > { %751 = vmatmul.mubr.bf16.gmra.mxu0 %v8612_v48  ;;  %1445 = vmatprep.subr.bf16.mxu1 %v7499_v47 }
  0xcb   : > { %760 = vmatprep.mubr.bf16.mxu0 %v8337_v0 }
  0xcd   : > { %1446 = vmatpush1.bf16.msra.mxu1 %v7497_v49 }
  0xce   : > { %1447 = vmatprep.subr.bf16.mxu1 %v7502_v52 }
  0xcf   : > { %864 = vmatmul.mubr.bf16.gmra.mxu1 %v8612_v48 }
  0xd0   : > { %873 = vmatprep.mubr.bf16.mxu1 %v8337_v0 }
  0xd1   : > { %1448 = vmatpush1.bf16.msra.mxu1 %v7500_v53 }
  0xd2   : > { %761 = vmatmul.mubr.bf16.gmra.mxu0 %v8618_v51  ;;  %2099 = vmatprep.subr.bf16.mxu1 %v7510_v3 }
  0xd3   : > { %770 = vmatprep.mubr.bf16.mxu0 %v8337_v0 }
  0xd7   : > { %874 = vmatmul.mubr.bf16.gmra.mxu1 %v8618_v51 }
  0xd8   : > { %883 = vmatprep.mubr.bf16.mxu1 %v8337_v0 }
  0xda   : > { %771 = vmatmul.mubr.bf16.gmra.mxu0 %v8624_v57 }
  0xdb   : > { %780 = vmatprep.mubr.bf16.mxu0 %v8337_v0 }
  0xdf   : > { %884 = vmatmul.mubr.bf16.gmra.mxu1 %v8624_v57 }
  0xe0   : > { %893 = vmatprep.mubr.bf16.mxu1 %v8337_v0 }
  0xe2   : > { %781 = vmatmul.mubr.bf16.gmra.mxu0 %v8630_v1 }
  0xe3   : > { %1352 = vmatprep.mubr.bf16.mxu0 %v8337_v0 }
  0xe7   : > { %894 = vmatmul.mubr.bf16.gmra.mxu1 %v8630_v1 }
  0xe8   : > { %1465 = vmatprep.mubr.bf16.mxu1 %v8337_v0 }
  0xea   : > { %1353 = vmatmul.mubr.bf16.vlgmr.msra.gmra.mxu0 %v8588_v20 }
  0xeb   : > { %1987 = vmatpush1.bf16.msra.mxu0 %v7431_v5  ;;  %1362 = vmatprep.mubr.bf16.mxu0 %v8337_v0  ;;  %v7508_v5 = vld [vmem:[#allocation9 + $0xe8] ss:$16 sps:$4 sm:$0xff]  }
  0xec   : > { %1988 = vmatprep.subr.bf16.mxu0 %v7436_v6 }
  0xef   : > { %1989 = vmatpush1.bf16.msra.mxu0 %v7434_v9  ;;  %1466 = vmatmul.mubr.bf16.vlgmr.msra.gmra.mxu1 %v8588_v20  ;;  %v1778_v20 = vld [vmem:[%s8559_s29 + $0x40] sm:$0xff]  ;;  %v1784_v9 = vld [vmem:[%s8559_s29 + $0x70] sm:$0xff] }
  0xf0   : > { %1990 = vmatprep.subr.bf16.mxu0 %v7439_v10  ;;  %1475 = vmatprep.mubr.bf16.mxu1 %v8337_v0  ;;  %v8697_v62 = vpack.c.bf16 %v1779_v61, %v1778_v20  ;;  %v1785_v10 = vld [vmem:[%s8559_s29 + $0x78] sm:$0xff] }
  0xf1   : > { %2100 = vmatpush1.bf16.msra.mxu1 %v7508_v5 }
  0xf2   : > { %1363 = vmatmul.mubr.bf16.gmra.mxu0 %v8594_v27 }
  0xf3   : > { %1372 = vmatprep.mubr.bf16.mxu0 %v8337_v0  ;;  %1991 = vmatpush1.bf16.msra.mxu0 %v7437_v13  ;;  %v7519_v13 = vld [vmem:[#allocation9 + $0x88] ss:$16 sps:$4 sm:$0xff]  }
  0xf4   : > { %1992 = vmatprep.subr.bf16.mxu0 %v7442_v14  ;;  %v7524_v14 = vld [vmem:[#allocation9 + $0x6c] ss:$16 sps:$4 sm:$0xff]  }
  0xf7   : > { %1993 = vmatpush1.bf16.msra.mxu0 %v7440_v17  ;;  %1476 = vmatmul.mubr.bf16.gmra.mxu1 %v8594_v27  ;;  %v1780_v27 = vld [vmem:[%s8559_s29 + $0x50] sm:$0xff] }
  0xf8   : > { %1994 = vmatprep.subr.bf16.mxu0 %v7445_v18  ;;  %1485 = vmatprep.mubr.bf16.mxu1 %v8337_v0  ;;  %v8705_v2 = vpack.c.bf16 %v1781_v63, %v1780_v27  ;;  %v7531_v18 = vld [vmem:[#allocation9 + $0x2c] ss:$16 sps:$4 sm:$0xff]  }
  0xfa   : > { %1373 = vmatmul.mubr.bf16.gmra.mxu0 %v8600_v35 }
  0xfb   : > { %1382 = vmatprep.mubr.bf16.mxu0 %v8337_v0  ;;  %1995 = vmatpush1.bf16.msra.mxu0 %v7443_v19  ;;  %v7529_v19 = vld [vmem:[#allocation9 + $0x28] ss:$16 sps:$4 sm:$0xff]  }
  0xfc   : > { %1996 = vmatprep.subr.bf16.mxu0 %v7448_v21 }
  0xff   : > { %1997 = vmatpush1.bf16.msra.mxu0 %v7446_v22  ;;  %1486 = vmatmul.mubr.bf16.gmra.mxu1 %v8600_v35  ;;  %v1782_v35 = vld [vmem:[%s8559_s29 + $0x60] sm:$0xff] }
 0x100   : > { %1998 = vmatprep.subr.bf16.mxu0 %v7451_v23  ;;  %1495 = vmatprep.mubr.bf16.mxu1 %v8337_v0  ;;  %v8713_v6 = vpack.c.bf16 %v1783_v4, %v1782_v35 }
 0x102   : > { %1383 = vmatmul.mubr.bf16.gmra.mxu0 %v8606_v42 }
 0x103   : > { %1392 = vmatprep.mubr.bf16.mxu0 %v8337_v0  ;;  %1999 = vmatpush1.bf16.msra.mxu0 %v7449_v24 }
 0x104   : > { %2000 = vmatprep.subr.bf16.mxu0 %v7454_v25  ;;  %v7533_v25 = vld [vmem:[#allocation9 + $0x8] ss:$16 sps:$4 sm:$0xff]  }
 0x107   : > { %2001 = vmatpush1.bf16.msra.mxu0 %v7452_v26  ;;  %1496 = vmatmul.mubr.bf16.gmra.mxu1 %v8606_v42  ;;  %v7514_v42 = vld [vmem:[#allocation9 + $0xcc] ss:$16 sps:$4 sm:$0xff]  }
 0x108   : > { %1505 = vmatprep.mubr.bf16.mxu1 %v8337_v0  ;;  %2101 = vmatprep.subr.bf16.mxu1 %v7514_v42 }
 0x109   : > { %2102 = vmatpush1.bf16.msra.mxu1 %v7512_v7 }
 0x10a   : > { %1393 = vmatmul.mubr.bf16.gmra.mxu0 %v8612_v48  ;;  %2103 = vmatprep.subr.bf16.mxu1 %v7517_v8 }
 0x10b   : > { %1402 = vmatprep.mubr.bf16.mxu0 %v8337_v0 }
 0x10d   : > { %2104 = vmatpush1.bf16.msra.mxu1 %v7515_v11 }
 0x10e   : > { %2105 = vmatprep.subr.bf16.mxu1 %v7521_v12 }
 0x10f   : > { %1506 = vmatmul.mubr.bf16.gmra.mxu1 %v8612_v48  ;;  %v8721_v48 = vpack.c.bf16 %v1785_v10, %v1784_v9 }
 0x110   : > { %1515 = vmatprep.mubr.bf16.mxu1 %v8337_v0 }
 0x111   : > { %2106 = vmatpush1.bf16.msra.mxu1 %v7519_v13 }
 0x112   : > { %1403 = vmatmul.mubr.bf16.gmra.mxu0 %v8618_v51  ;;  %2107 = vmatprep.subr.bf16.mxu1 %v7524_v14 }
 0x113   : > { %1412 = vmatprep.mubr.bf16.mxu0 %v8337_v0 }
 0x115   : > { %2108 = vmatpush1.bf16.msra.mxu1 %v7522_v15 }
 0x116   : > { %2109 = vmatprep.subr.bf16.mxu1 %v7528_v16 }
 0x117   : > { %1516 = vmatmul.mubr.bf16.gmra.mxu1 %v8618_v51  ;;  %v7526_v51 = vld [vmem:[#allocation9 + $0x48] ss:$16 sps:$4 sm:$0xff]  }
 0x118   : > { %1525 = vmatprep.mubr.bf16.mxu1 %v8337_v0 }
 0x119   : > { %2110 = vmatpush1.bf16.msra.mxu1 %v7526_v51 }
 0x11a   : > { %1413 = vmatmul.mubr.bf16.gmra.mxu0 %v8624_v57  ;;  %2111 = vmatprep.subr.bf16.mxu1 %v7531_v18 }
 0x11b   : > { %1422 = vmatprep.mubr.bf16.mxu0 %v8337_v0 }
 0x11d   : > { %2112 = vmatpush1.bf16.msra.mxu1 %v7529_v19 }
 0x11f   : > { %1526 = vmatmul.mubr.bf16.gmra.mxu1 %v8624_v57  ;;  %v7535_v57 = vld [vmem:[#allocation9 + $0xc] ss:$16 sps:$4 sm:$0xff]  }
 0x120   : > { %1535 = vmatprep.mubr.bf16.mxu1 %v8337_v0  ;;  %2113 = vmatprep.subr.bf16.mxu1 %v7535_v57 }
 0x121   : > { %2114 = vmatpush1.bf16.msra.mxu1 %v7533_v25 }
 0x122   : > { %1423 = vmatmul.mubr.bf16.gmra.mxu0 %v8630_v1 }
 0x123   : > { %2018 = vmatprep.mubr.bf16.mxu0 %v8337_v0 }
 0x127   : > { %1536 = vmatmul.mubr.bf16.gmra.mxu1 %v8630_v1 }
 0x128   : > { %2131 = vmatprep.mubr.bf16.mxu1 %v8337_v0 }
 0x12a   : > { %2019 = vmatmul.mubr.bf16.vlgmr.msra.gmra.mxu0 %v8665_v41 }
 0x12b   : > { %2028 = vmatprep.mubr.bf16.mxu0 %v8337_v0 }
 0x12f   : > { %2132 = vmatmul.mubr.bf16.vlgmr.msra.gmra.mxu1 %v8665_v41 }
 0x130   : > { %2141 = vmatprep.mubr.bf16.mxu1 %v8337_v0 }
 0x132   : > { %2029 = vmatmul.mubr.bf16.gmra.mxu0 %v8673_v50 }
 0x133   : > { %2038 = vmatprep.mubr.bf16.mxu0 %v8337_v0 }
 0x137   : > { %2142 = vmatmul.mubr.bf16.gmra.mxu1 %v8673_v50 }
 0x138   : > { %2151 = vmatprep.mubr.bf16.mxu1 %v8337_v0 }
 0x13a   : > { %2039 = vmatmul.mubr.bf16.gmra.mxu0 %v8681_v56 }
 0x13b   : > { %2048 = vmatprep.mubr.bf16.mxu0 %v8337_v0 }
 0x13f   : > { %2152 = vmatmul.mubr.bf16.gmra.mxu1 %v8681_v56 }
 0x140   : > { %2161 = vmatprep.mubr.bf16.mxu1 %v8337_v0 }
 0x142   : > { %2049 = vmatmul.mubr.bf16.gmra.mxu0 %v8689_v60 }
 0x143   : > { %2058 = vmatprep.mubr.bf16.mxu0 %v8337_v0 }
 0x147   : > { %2162 = vmatmul.mubr.bf16.gmra.mxu1 %v8689_v60 }
 0x148   : > { %2171 = vmatprep.mubr.bf16.mxu1 %v8337_v0 }
 0x14a   : > { %2059 = vmatmul.mubr.bf16.gmra.mxu0 %v8697_v62 }
 0x14b   : > { %2068 = vmatprep.mubr.bf16.mxu0 %v8337_v0 }
 0x14f   : > { %2172 = vmatmul.mubr.bf16.gmra.mxu1 %v8697_v62 }
 0x150   : > { %2181 = vmatprep.mubr.bf16.mxu1 %v8337_v0 }
 0x152   : > { %2069 = vmatmul.mubr.bf16.gmra.mxu0 %v8705_v2 }
 0x153   : > { %2078 = vmatprep.mubr.bf16.mxu0 %v8337_v0 }
 0x157   : > { %2182 = vmatmul.mubr.bf16.gmra.mxu1 %v8705_v2 }
 0x158   : > { %2191 = vmatprep.mubr.bf16.mxu1 %v8337_v0 }
 0x15a   : > { %2079 = vmatmul.mubr.bf16.gmra.mxu0 %v8713_v6 }
 0x15b   : > { %2088 = vmatprep.mubr.bf16.mxu0 %v8337_v0 }
 0x15f   : > { %2192 = vmatmul.mubr.bf16.gmra.mxu1 %v8713_v6 }
 0x160   : > { %2201 = vmatprep.mubr.bf16.mxu1 %v8337_v0 }
 0x162   : > { %2089 = vmatmul.mubr.bf16.gmra.mxu0 %v8721_v48 }
 0x167   : > { %2202 = vmatmul.mubr.bf16.gmra.mxu1 %v8721_v48 }
 0x16a   : > { %v712_v17 = vpop.f32.mrf.mxu0 }
 0x16c   : > { %v714_v21 = vpop.f32.mrf.mxu0 }
 0x16d   : > { %v6523_v22 = vpack.c.bf16 %v714_v21, %v712_v17 }
 0x16e   : > { %v716_v23 = vpop.f32.mrf.mxu0 }
 0x16f   : > { %1096 = vst [vmem:[#allocation2] sm:$0xff] %v6523_v22 }
 0x170   : > { %v718_v24 = vpop.f32.mrf.mxu0 }
 0x171   : > { %v6525_v26 = vpack.c.bf16 %v718_v24, %v716_v23 }
 0x172   : > { %v722_v28 = vpop.f32.mrf.mxu0 }
 0x173   : > { %1098 = vst [vmem:[#allocation2 + $0x10] sm:$0xff] %v6525_v26 }
 0x174   : > { %v724_v29 = vpop.f32.mrf.mxu0 }
 0x175   : > { %v6527_v30 = vpack.c.bf16 %v724_v29, %v722_v28 }
 0x176   : > { %v726_v31 = vpop.f32.mrf.mxu0 }
 0x177   : > { %1100 = vst [vmem:[#allocation2 + $0x20] sm:$0xff] %v6527_v30 }
 0x178   : > { %v728_v1 = vpop.f32.mrf.mxu0 }
 0x179   : > { %v6529_v32 = vpack.c.bf16 %v728_v1, %v726_v31 }
 0x17a   : > { %v732_v33 = vpop.f32.mrf.mxu0 }
 0x17b   : > { %1102 = vst [vmem:[#allocation2 + $0x30] sm:$0xff] %v6529_v32 }
 0x17c   : > { %v734_v34 = vpop.f32.mrf.mxu0 }
 0x17d   : > { %v6531_v36 = vpack.c.bf16 %v734_v34, %v732_v33 }
 0x17e   : > { %v736_v37 = vpop.f32.mrf.mxu0 }
 0x17f   : > { %1104 = vst [vmem:[#allocation2 + $0x40] sm:$0xff] %v6531_v36 }
 0x180   : > { %v738_v38 = vpop.f32.mrf.mxu0 }
 0x181   : > { %v6533_v39 = vpack.c.bf16 %v738_v38, %v736_v37 }
 0x182   : > { %v742_v40 = vpop.f32.mrf.mxu0 }
 0x183   : > { %1106 = vst [vmem:[#allocation2 + $0x50] sm:$0xff] %v6533_v39 }
 0x184   : > { %v744_v41 = vpop.f32.mrf.mxu0 }
 0x185   : > { %v6535_v43 = vpack.c.bf16 %v744_v41, %v742_v40 }
 0x186   : > { %v746_v44 = vpop.f32.mrf.mxu0 }
 0x187   : > { %1108 = vst [vmem:[#allocation2 + $0x60] sm:$0xff] %v6535_v43 }
 0x188   : > { %v748_v45 = vpop.f32.mrf.mxu0 }
 0x189   : > { %v6537_v46 = vpack.c.bf16 %v748_v45, %v746_v44 }
 0x18a   : > { %v752_v47 = vpop.f32.mrf.mxu0  ;;  %v7511_v44 = vld [vmem:[#allocation2 + $0x40] ss:$16 sps:$4 sm:$0xff]  }
 0x18b   : > { %1110 = vst [vmem:[#allocation2 + $0x70] sm:$0xff] %v6537_v46 }
 0x18c   : > { %v754_v49 = vpop.f32.mrf.mxu0 }
 0x18d   : > { %v6539_v50 = vpack.c.bf16 %v754_v49, %v752_v47 }
 0x18e   : > { %v756_v52 = vpop.f32.mrf.mxu0 }
 0x18f   : > { %1112 = vst [vmem:[#allocation2 + $0x80] sm:$0xff] %v6539_v50 }
 0x190   : > { %v758_v53 = vpop.f32.mrf.mxu0 }
 0x191   : > { %v6541_v54 = vpack.c.bf16 %v758_v53, %v756_v52  ;;  %v7518_v53 = vld [vmem:[#allocation2 + $0x20] ss:$16 sps:$4 sm:$0xff]  }
 0x192   : > { %v762_v55 = vpop.f32.mrf.mxu0  ;;  %v7507_v36 = vld [vmem:[#allocation2 + $0x60] ss:$16 sps:$4 sm:$0xff]  }
 0x193   : > { %1114 = vst [vmem:[#allocation2 + $0x90] sm:$0xff] %v6541_v54 }
 0x194   : > { %v764_v56 = vpop.f32.mrf.mxu0 }
 0x195   : > { %v6543_v58 = vpack.c.bf16 %v764_v56, %v762_v55 }
 0x196   : > { %v766_v59 = vpop.f32.mrf.mxu0 }
 0x197   : > { %1116 = vst [vmem:[#allocation2 + $0xa0] sm:$0xff] %v6543_v58 }
 0x198   : > { %v768_v20 = vpop.f32.mrf.mxu0 }
 0x199   : > { %v6545_v61 = vpack.c.bf16 %v768_v20, %v766_v59 }
 0x19a   : > { %v772_v27 = vpop.f32.mrf.mxu0  ;;  %v7506_v29 = vld [vmem:[#allocation2 + $0x80] ss:$16 sps:$4 sm:$0xff]  }
 0x19b   : > { %1118 = vst [vmem:[#allocation2 + $0xb0] sm:$0xff] %v6545_v61  ;;  %v7525_v61 = vld [vmem:[#allocation2] ss:$16 sps:$4 sm:$0xff]  }
 0x19c   : > { %v774_v60 = vpop.f32.mrf.mxu0 }
 0x19d   : > { %v6547_v63 = vpack.c.bf16 %v774_v60, %v772_v27 }
 0x19e   : > { %v776_v3 = vpop.f32.mrf.mxu0 }
 0x19f   : > { %1120 = vst [vmem:[#allocation2 + $0xc0] sm:$0xff] %v6547_v63 }
 0x1a0   : > { %v778_v35 = vpop.f32.mrf.mxu0 }
 0x1a1   : > { %v6549_v4 = vpack.c.bf16 %v778_v35, %v776_v3 }
 0x1a2   : > { %v782_v5 = vpop.f32.mrf.mxu0  ;;  %v7505_v22 = vld [vmem:[#allocation2 + $0xa0] ss:$16 sps:$4 sm:$0xff]  }
 0x1a3   : > { %1122 = vst [vmem:[#allocation2 + $0xd0] sm:$0xff] %v6549_v4 }
 0x1a4   : > { %v784_v62 = vpop.f32.mrf.mxu0 }
 0x1a5   : > { %v6551_v42 = vpack.c.bf16 %v784_v62, %v782_v5 }
 0x1a6   : > { %v786_v7 = vpop.f32.mrf.mxu0 }
 0x1a7   : > { %1124 = vst [vmem:[#allocation2 + $0xe0] sm:$0xff] %v6551_v42 }
 0x1a8   : > { %v788_v8 = vpop.f32.mrf.mxu0 }
 0x1a9   : > { %v6553_v9 = vpack.c.bf16 %v788_v8, %v786_v7 }
 0x1aa   : > { %v1354_v10 = vpop.f32.mrf.mxu0  ;;  %v7504_v51 = vld [vmem:[#allocation2 + $0xc0] ss:$16 sps:$4 sm:$0xff]  }
 0x1ab   : > { %1126 = vst [vmem:[#allocation2 + $0xf0] sm:$0xff] %v6553_v9 }
 0x1ac   : > { %v1356_v2 = vpop.f32.mrf.mxu0 }
 0x1ad   : > { %v6555_v11 = vpack.c.bf16 %v1356_v2, %v1354_v10 }
 0x1ae   : > { %v1358_v12 = vpop.f32.mrf.mxu0 }
 0x1af   : > { %1738 = vst [vmem:[#allocation3] sm:$0xff] %v6555_v11 }
 0x1b0   : > { %v1360_v13 = vpop.f32.mrf.mxu0 }
 0x1b1   : > { %v6557_v14 = vpack.c.bf16 %v1360_v13, %v1358_v12 }
 0x1b2   : > { %v1364_v15 = vpop.f32.mrf.mxu0  ;;  %v7503_v16 = vld [vmem:[#allocation2 + $0xe0] ss:$16 sps:$4 sm:$0xff]   ;;  %v7532_v5 = vld [vmem:[#allocation2 + $0xe4] ss:$16 sps:$4 sm:$0xff]  }
 0x1b3   : > { %1740 = vst [vmem:[#allocation3 + $0x10] sm:$0xff] %v6557_v14  ;;  %6973 = vmatprep.subr.bf16.mxu0 %v7503_v16 }
 0x1b4   : > { %v1366_v6 = vpop.f32.mrf.mxu0  ;;  %6974 = vmatpush3.bf16.xpose.msra.mxu0 %v7503_v16 }
 0x1b5   : > { %v6559_v0 = vpack.c.bf16 %v1366_v6, %v1364_v15  ;;  %6975 = vmatprep.subr.bf16.mxu0 %v7504_v51  ;;  %v7538_v15 = vld [vmem:[#allocation2 + $0xc4] ss:$16 sps:$4 sm:$0xff]  }
 0x1b6   : > { %v1368_v17 = vpop.f32.mrf.mxu0 }
 0x1b7   : > { %1742 = vst [vmem:[#allocation3 + $0x20] sm:$0xff] %v6559_v0 }
 0x1b8   : > { %v1370_v18 = vpop.f32.mrf.mxu0 }
 0x1b9   : > { %v6561_v19 = vpack.c.bf16 %v1370_v18, %v1368_v17 }
 0x1ba   : > { %v1374_v21 = vpop.f32.mrf.mxu0 }
 0x1bb   : > { %1744 = vst [vmem:[#allocation3 + $0x30] sm:$0xff] %v6561_v19 }
 0x1bc   : > { %v1376_v48 = vpop.f32.mrf.mxu0  ;;  %6976 = vmatpush3.bf16.xpose.msra.mxu0 %v7504_v51 }
 0x1bd   : > { %v6563_v23 = vpack.c.bf16 %v1376_v48, %v1374_v21  ;;  %6977 = vmatprep.subr.bf16.mxu0 %v7505_v22  ;;  %v7541_v21 = vld [vmem:[#allocation2 + $0xa4] ss:$16 sps:$4 sm:$0xff]  }
 0x1be   : > { %v1378_v57 = vpop.f32.mrf.mxu0 }
 0x1bf   : > { %1746 = vst [vmem:[#allocation3 + $0x40] sm:$0xff] %v6563_v23 }
 0x1c0   : > { %v1380_v24 = vpop.f32.mrf.mxu0 }
 0x1c1   : > { %v6565_v25 = vpack.c.bf16 %v1380_v24, %v1378_v57 }
 0x1c2   : > { %v1384_v26 = vpop.f32.mrf.mxu0 }
 0x1c3   : > { %1748 = vst [vmem:[#allocation3 + $0x50] sm:$0xff] %v6565_v25 }
 0x1c4   : > { %v1386_v28 = vpop.f32.mrf.mxu0  ;;  %6978 = vmatpush3.bf16.xpose.msra.mxu0 %v7505_v22 }
 0x1c5   : > { %v6567_v30 = vpack.c.bf16 %v1386_v28, %v1384_v26  ;;  %6979 = vmatprep.subr.bf16.mxu0 %v7506_v29  ;;  %v7545_v26 = vld [vmem:[#allocation3 + $0x20] ss:$16 sps:$4 sm:$0xff]   ;;  %v7544_v28 = vld [vmem:[#allocation2 + $0x84] ss:$16 sps:$4 sm:$0xff]  }
 0x1c6   : > { %v1388_v31 = vpop.f32.mrf.mxu0 }
 0x1c7   : > { %1750 = vst [vmem:[#allocation3 + $0x60] sm:$0xff] %v6567_v30 }
 0x1c8   : > { %v1390_v1 = vpop.f32.mrf.mxu0 }
 0x1c9   : > { %v6569_v32 = vpack.c.bf16 %v1390_v1, %v1388_v31  ;;  %v7546_v31 = vld [vmem:[#allocation3] ss:$16 sps:$4 sm:$0xff]  }
 0x1ca   : > { %v1394_v33 = vpop.f32.mrf.mxu0  ;;  %v7543_v23 = vld [vmem:[#allocation3 + $0x40] ss:$16 sps:$4 sm:$0xff]  }
 0x1cb   : > { %1752 = vst [vmem:[#allocation3 + $0x70] sm:$0xff] %v6569_v32 }
 0x1cc   : > { %v1396_v34 = vpop.f32.mrf.mxu0  ;;  %6980 = vmatpush3.bf16.xpose.msra.mxu0 %v7506_v29 }
 0x1cd   : > { %v6571_v37 = vpack.c.bf16 %v1396_v34, %v1394_v33  ;;  %6981 = vmatprep.subr.bf16.mxu0 %v7507_v36 }
 0x1ce   : > { %v1398_v38 = vpop.f32.mrf.mxu0 }
 0x1cf   : > { %1754 = vst [vmem:[#allocation3 + $0x80] sm:$0xff] %v6571_v37 }
 0x1d0   : > { %v1400_v39 = vpop.f32.mrf.mxu0 }
 0x1d1   : > { %v6573_v40 = vpack.c.bf16 %v1400_v39, %v1398_v38 }
 0x1d2   : > { %v1404_v41 = vpop.f32.mrf.mxu0  ;;  %v7542_v19 = vld [vmem:[#allocation3 + $0x60] ss:$16 sps:$4 sm:$0xff]  }
 0x1d3   : > { %1756 = vst [vmem:[#allocation3 + $0x90] sm:$0xff] %v6573_v40 }
 0x1d4   : > { %v1406_v43 = vpop.f32.mrf.mxu0  ;;  %6982 = vmatpush3.bf16.xpose.msra.mxu0 %v7507_v36  ;;  %v7547_v36 = vld [vmem:[#allocation2 + $0x64] ss:$16 sps:$4 sm:$0xff]  }
 0x1d5   : > { %v6575_v45 = vpack.c.bf16 %v1406_v43, %v1404_v41  ;;  %6983 = vmatprep.subr.bf16.mxu0 %v7511_v44  ;;  %v7549_v43 = vld [vmem:[#allocation2 + $0x44] ss:$16 sps:$4 sm:$0xff]  }
 0x1d6   : > { %v1408_v46 = vpop.f32.mrf.mxu0 }
 0x1d7   : > { %1758 = vst [vmem:[#allocation3 + $0xa0] sm:$0xff] %v6575_v45 }
 0x1d8   : > { %v1410_v47 = vpop.f32.mrf.mxu0 }
 0x1d9   : > { %v6577_v49 = vpack.c.bf16 %v1410_v47, %v1408_v46 }
 0x1da   : > { %v1414_v50 = vpop.f32.mrf.mxu0  ;;  %v7540_v51 = vld [vmem:[#allocation3 + $0x80] ss:$16 sps:$4 sm:$0xff]  }
 0x1db   : > { %1760 = vst [vmem:[#allocation3 + $0xb0] sm:$0xff] %v6577_v49 }
 0x1dc   : > { %v1416_v52 = vpop.f32.mrf.mxu0  ;;  %6984 = vmatpush3.bf16.xpose.msra.mxu0 %v7511_v44 }
 0x1dd   : > { %v6579_v54 = vpack.c.bf16 %v1416_v52, %v1414_v50  ;;  %6985 = vmatprep.subr.bf16.mxu0 %v7518_v53  ;;  %v7550_v50 = vld [vmem:[#allocation2 + $0x24] ss:$16 sps:$4 sm:$0xff]  }
 0x1de   : > { %v1418_v55 = vpop.f32.mrf.mxu0 }
 0x1df   : > { %1762 = vst [vmem:[#allocation3 + $0xc0] sm:$0xff] %v6579_v54 }
 0x1e0   : > { %v1420_v56 = vpop.f32.mrf.mxu0 }
 0x1e1   : > { %v6581_v58 = vpack.c.bf16 %v1420_v56, %v1418_v55 }
 0x1e2   : > { %v1424_v59 = vpop.f32.mrf.mxu0  ;;  %v7539_v14 = vld [vmem:[#allocation3 + $0xa0] ss:$16 sps:$4 sm:$0xff]  }
 0x1e3   : > { %1764 = vst [vmem:[#allocation3 + $0xd0] sm:$0xff] %v6581_v58  ;;  %v7551_v58 = vld [vmem:[#allocation2 + $0x4] ss:$16 sps:$4 sm:$0xff]  }
 0x1e4   : > { %v1426_v20 = vpop.f32.mrf.mxu0  ;;  %6986 = vmatpush3.bf16.xpose.msra.mxu0 %v7518_v53 }
 0x1e5   : > { %v6583_v27 = vpack.c.bf16 %v1426_v20, %v1424_v59  ;;  %6987 = vmatprep.subr.bf16.mxu0 %v7525_v61 }
 0x1e6   : > { %v1428_v60 = vpop.f32.mrf.mxu0 }
 0x1e7   : > { %1766 = vst [vmem:[#allocation3 + $0xe0] sm:$0xff] %v6583_v27 }
 0x1e8   : > { %v1430_v63 = vpop.f32.mrf.mxu0 }
 0x1e9   : > { %v6585_v3 = vpack.c.bf16 %v1430_v63, %v1428_v60 }
 0x1ea   : > { %v2020_v35 = vpop.f32.mrf.mxu0  ;;  %v7537_v2 = vld [vmem:[#allocation3 + $0xc0] ss:$16 sps:$4 sm:$0xff]  }
 0x1eb   : > { %1768 = vst [vmem:[#allocation3 + $0xf0] sm:$0xff] %v6585_v3 }
 0x1ec   : > { %v8744_v4 = vpop.f32.mrf.mxu0  ;;  %6988 = vmatpush3.bf16.xpose.msra.mxu0 %v7525_v61 }
 0x1ed   : > { %7037 = vmatprep.subr.bf16.mxu0 %v7532_v5 }
 0x1ee   : > { %v2024_v62 = vpop.f32.mrf.mxu0 }
 0x1ef   : > { %v2212_v42 = vpack.c.bf16 %v2024_v62, %v2020_v35 }
 0x1f0   : > { %v8746_v7 = vpop.f32.mrf.mxu0 }
 0x1f1   : > { %6989 = vmatprep.mubr.bf16.mxu0 %v2212_v42  ;;  %v2213_v56 = vpack.c.bf16 %v8746_v7, %v8744_v4  ;;  %v825_v4 = vpop.f32.mrf.mxu1 }
 0x1f2   : > { %v2030_v8 = vpop.f32.mrf.mxu0  ;;  %v7536_v9 = vld [vmem:[#allocation3 + $0xe0] ss:$16 sps:$4 sm:$0xff]   ;;  %v8758_v34 = vld [vmem:[#allocation3 + $0xe4] ss:$16 sps:$4 sm:$0xff]  }
 0x1f3   : > { %7005 = vmatprep.subr.bf16.mxu1 %v7536_v9 }
 0x1f4   : > { %v8748_v10 = vpop.f32.mrf.mxu0  ;;  %7006 = vmatpush3.bf16.msra.mxu1 %v7536_v9 }
 0x1f5   : > { %7007 = vmatprep.subr.bf16.mxu1 %v7537_v2 }
 0x1f6   : > { %v2034_v11 = vpop.f32.mrf.mxu0 }
 0x1f7   : > { %v2216_v12 = vpack.c.bf16 %v2034_v11, %v2030_v8 }
 0x1f8   : > { %v8750_v13 = vpop.f32.mrf.mxu0  ;;  %7008 = vmatpush3.bf16.msra.mxu1 %v7537_v2 }
 0x1f9   : > { %6990 = vmatmul.mubr.bf16.vlgmr.msra.gmra.mxu0 %v2216_v12  ;;  %7009 = vmatprep.subr.bf16.mxu1 %v7539_v14  ;;  %v2217_v59 = vpack.c.bf16 %v8750_v13, %v8748_v10 }
 0x1fa   : > { %7038 = vmatpush3.bf16.xpose.msra.mxu0 %v7532_v5  ;;  %v2040_v16 = vpop.f32.mrf.mxu0  ;;  %v827_v5 = vpop.f32.mrf.mxu1 }
 0x1fb   : > { %7039 = vmatprep.subr.bf16.mxu0 %v7538_v15  ;;  %v6524_v62 = vpack.c.bf16 %v827_v5, %v825_v4 }
 0x1fc   : > { %v8752_v6 = vpop.f32.mrf.mxu0  ;;  %7010 = vmatpush3.bf16.msra.mxu1 %v7539_v14  ;;  %v829_v42 = vpop.f32.mrf.mxu1 }
 0x1fd   : > { %7011 = vmatprep.subr.bf16.mxu1 %v7540_v51  ;;  %1097 = vst [vmem:[#allocation2 + $0x8] sm:$0xff] %v6524_v62 }
 0x1fe   : > { %v2044_v0 = vpop.f32.mrf.mxu0  ;;  %v831_v7 = vpop.f32.mrf.mxu1 }
 0x1ff   : > { %v2220_v17 = vpack.c.bf16 %v2044_v0, %v2040_v16  ;;  %v6526_v8 = vpack.c.bf16 %v831_v7, %v829_v42 }
 0x200   : > { %v8754_v18 = vpop.f32.mrf.mxu0  ;;  %7012 = vmatpush3.bf16.msra.mxu1 %v7540_v51  ;;  %v835_v9 = vpop.f32.mrf.mxu1 }
 0x201   : > { %6993 = vmatprep.mubr.bf16.mxu0 %v2220_v17  ;;  %7013 = vmatprep.subr.bf16.mxu1 %v7542_v19  ;;  %v2221_v20 = vpack.c.bf16 %v8754_v18, %v8752_v6  ;;  %1099 = vst [vmem:[#allocation2 + $0x18] sm:$0xff] %v6526_v8 }
 0x202   : > { %7040 = vmatpush3.bf16.xpose.msra.mxu0 %v7538_v15  ;;  %v2050_v48 = vpop.f32.mrf.mxu0  ;;  %v837_v10 = vpop.f32.mrf.mxu1 }
 0x203   : > { %7041 = vmatprep.subr.bf16.mxu0 %v7541_v21  ;;  %v6528_v2 = vpack.c.bf16 %v837_v10, %v835_v9 }
 0x204   : > { %v8756_v22 = vpop.f32.mrf.mxu0  ;;  %7014 = vmatpush3.bf16.msra.mxu1 %v7542_v19  ;;  %v839_v11 = vpop.f32.mrf.mxu1 }
 0x205   : > { %7015 = vmatprep.subr.bf16.mxu1 %v7543_v23  ;;  %1101 = vst [vmem:[#allocation2 + $0x28] sm:$0xff] %v6528_v2 }
 0x206   : > { %v2054_v57 = vpop.f32.mrf.mxu0  ;;  %v841_v12 = vpop.f32.mrf.mxu1 }
 0x207   : > { %v2224_v24 = vpack.c.bf16 %v2054_v57, %v2050_v48  ;;  %v6530_v13 = vpack.c.bf16 %v841_v12, %v839_v11 }
 0x208   : > { %v2056_v25 = vpop.f32.mrf.mxu0  ;;  %7016 = vmatpush3.bf16.msra.mxu1 %v7543_v23  ;;  %v845_v14 = vpop.f32.mrf.mxu1 }
 0x209   : > { %6994 = vmatmul.mubr.bf16.gmra.mxu0 %v2224_v24  ;;  %7017 = vmatprep.subr.bf16.mxu1 %v7545_v26  ;;  %v2225_v61 = vpack.c.bf16 %v2056_v25, %v8756_v22  ;;  %1103 = vst [vmem:[#allocation2 + $0x38] sm:$0xff] %v6530_v13 }
 0x20a   : > { %7042 = vmatpush3.bf16.xpose.msra.mxu0 %v7541_v21  ;;  %v2060_v29 = vpop.f32.mrf.mxu0  ;;  %v847_v15 = vpop.f32.mrf.mxu1 }
 0x20b   : > { %7043 = vmatprep.subr.bf16.mxu0 %v7544_v28  ;;  %v6532_v16 = vpack.c.bf16 %v847_v15, %v845_v14 }
 0x20c   : > { %v2062_v30 = vpop.f32.mrf.mxu0  ;;  %7018 = vmatpush3.bf16.msra.mxu1 %v7545_v26  ;;  %v849_v6 = vpop.f32.mrf.mxu1 }
 0x20d   : > { %7019 = vmatprep.subr.bf16.mxu1 %v7546_v31  ;;  %1105 = vst [vmem:[#allocation2 + $0x48] sm:$0xff] %v6532_v16 }
 0x20e   : > { %v2064_v1 = vpop.f32.mrf.mxu0  ;;  %v851_v51 = vpop.f32.mrf.mxu1 }
 0x20f   : > { %v2228_v32 = vpack.c.bf16 %v2064_v1, %v2060_v29  ;;  %v6534_v0 = vpack.c.bf16 %v851_v51, %v849_v6 }
 0x210   : > { %v2066_v33 = vpop.f32.mrf.mxu0  ;;  %7020 = vmatpush3.bf16.msra.mxu1 %v7546_v31  ;;  %v855_v17 = vpop.f32.mrf.mxu1 }
 0x211   : > { %6997 = vmatprep.mubr.bf16.mxu0 %v2228_v32  ;;  %7069 = vmatprep.subr.bf16.mxu1 %v8758_v34  ;;  %v2229_v27 = vpack.c.bf16 %v2066_v33, %v2062_v30  ;;  %1107 = vst [vmem:[#allocation2 + $0x58] sm:$0xff] %v6534_v0 }
 0x212   : > { %7044 = vmatpush3.bf16.xpose.msra.mxu0 %v7544_v28  ;;  %v2070_v37 = vpop.f32.mrf.mxu0  ;;  %v857_v18 = vpop.f32.mrf.mxu1 }
 0x213   : > { %7045 = vmatprep.subr.bf16.mxu0 %v7547_v36  ;;  %v6536_v19 = vpack.c.bf16 %v857_v18, %v855_v17 }
 0x214   : > { %v2072_v38 = vpop.f32.mrf.mxu0  ;;  %v859_v21 = vpop.f32.mrf.mxu1 }
 0x215   : > { %1109 = vst [vmem:[#allocation2 + $0x68] sm:$0xff] %v6536_v19 }
 0x216   : > { %v2074_v39 = vpop.f32.mrf.mxu0  ;;  %v861_v48 = vpop.f32.mrf.mxu1 }
 0x217   : > { %v2232_v40 = vpack.c.bf16 %v2074_v39, %v2070_v37  ;;  %v6538_v22 = vpack.c.bf16 %v861_v48, %v859_v21 }
 0x218   : > { %v2076_v41 = vpop.f32.mrf.mxu0  ;;  %v865_v23 = vpop.f32.mrf.mxu1 }
 0x219   : > { %6998 = vmatmul.mubr.bf16.gmra.mxu0 %v2232_v40  ;;  %v2233_v60 = vpack.c.bf16 %v2076_v41, %v2072_v38  ;;  %1111 = vst [vmem:[#allocation2 + $0x78] sm:$0xff] %v6538_v22 }
 0x21a   : > { %7046 = vmatpush3.bf16.xpose.msra.mxu0 %v7547_v36  ;;  %v2080_v44 = vpop.f32.mrf.mxu0  ;;  %v867_v57 = vpop.f32.mrf.mxu1 }
 0x21b   : > { %7047 = vmatprep.subr.bf16.mxu0 %v7549_v43  ;;  %v6540_v24 = vpack.c.bf16 %v867_v57, %v865_v23 }
 0x21c   : > { %v2082_v45 = vpop.f32.mrf.mxu0  ;;  %v869_v25 = vpop.f32.mrf.mxu1 }
 0x21d   : > { %1113 = vst [vmem:[#allocation2 + $0x88] sm:$0xff] %v6540_v24 }
 0x21e   : > { %v2084_v46 = vpop.f32.mrf.mxu0  ;;  %v871_v26 = vpop.f32.mrf.mxu1 }
 0x21f   : > { %v2236_v47 = vpack.c.bf16 %v2084_v46, %v2080_v44  ;;  %v6542_v28 = vpack.c.bf16 %v871_v26, %v869_v25 }
 0x220   : > { %v2086_v49 = vpop.f32.mrf.mxu0  ;;  %v875_v29 = vpop.f32.mrf.mxu1 }
 0x221   : > { %7001 = vmatprep.mubr.bf16.mxu0 %v2236_v47  ;;  %v2237_v63 = vpack.c.bf16 %v2086_v49, %v2082_v45  ;;  %1115 = vst [vmem:[#allocation2 + $0x98] sm:$0xff] %v6542_v28 }
 0x222   : > { %7048 = vmatpush3.bf16.xpose.msra.mxu0 %v7549_v43  ;;  %v2090_v52 = vpop.f32.mrf.mxu0  ;;  %v877_v30 = vpop.f32.mrf.mxu1 }
 0x223   : > { %7049 = vmatprep.subr.bf16.mxu0 %v7550_v50  ;;  %v6544_v31 = vpack.c.bf16 %v877_v30, %v875_v29 }
 0x224   : > { %v2092_v53 = vpop.f32.mrf.mxu0  ;;  %v879_v1 = vpop.f32.mrf.mxu1 }
 0x225   : > { %1117 = vst [vmem:[#allocation2 + $0xa8] sm:$0xff] %v6544_v31 }
 0x226   : > { %v2094_v54 = vpop.f32.mrf.mxu0  ;;  %v881_v32 = vpop.f32.mrf.mxu1 }
 0x227   : > { %v2240_v55 = vpack.c.bf16 %v2094_v54, %v2090_v52  ;;  %v6546_v33 = vpack.c.bf16 %v881_v32, %v879_v1 }
 0x228   : > { %v2096_v3 = vpop.f32.mrf.mxu0  ;;  %v885_v36 = vpop.f32.mrf.mxu1 }
 0x229   : > { %7002 = vmatmul.mubr.bf16.gmra.mxu0 %v2240_v55  ;;  %v2241_v35 = vpack.c.bf16 %v2096_v3, %v2092_v53  ;;  %1119 = vst [vmem:[#allocation2 + $0xb8] sm:$0xff] %v6546_v33 }
 0x22a   : > { %7050 = vmatpush3.bf16.xpose.msra.mxu0 %v7550_v50  ;;  %7053 = vmatprep.mubr.bf16.mxu0 %v2213_v56  ;;  %v887_v37 = vpop.f32.mrf.mxu1 }
 0x22b   : > { %7051 = vmatprep.subr.bf16.mxu0 %v7551_v58  ;;  %v6548_v38 = vpack.c.bf16 %v887_v37, %v885_v36 }
 0x22c   : > { %v889_v39 = vpop.f32.mrf.mxu1 }
 0x22d   : > { %1121 = vst [vmem:[#allocation2 + $0xc8] sm:$0xff] %v6548_v38 }
 0x22e   : > { %v891_v40 = vpop.f32.mrf.mxu1 }
 0x22f   : > { %v6550_v41 = vpack.c.bf16 %v891_v40, %v889_v39 }
 0x230   : > { %v895_v43 = vpop.f32.mrf.mxu1 }
 0x231   : > { %1123 = vst [vmem:[#allocation2 + $0xd8] sm:$0xff] %v6550_v41 }
 0x232   : > { %7052 = vmatpush3.bf16.xpose.msra.mxu0 %v7551_v58  ;;  %v897_v44 = vpop.f32.mrf.mxu1 }
 0x233   : > { %v6552_v45 = vpack.c.bf16 %v897_v44, %v895_v43 }
 0x234   : > { %v899_v46 = vpop.f32.mrf.mxu1 }
 0x235   : > { %1125 = vst [vmem:[#allocation2 + $0xe8] sm:$0xff] %v6552_v45 }
 0x236   : > { %v901_v47 = vpop.f32.mrf.mxu1 }
 0x237   : > { %v6554_v49 = vpack.c.bf16 %v901_v47, %v899_v46 }
 0x238   : > { %v1467_v50 = vpop.f32.mrf.mxu1 }
 0x239   : > { %7054 = vmatmul.mubr.bf16.vlgmr.msra.gmra.mxu0 %v2217_v59  ;;  %1127 = vst [vmem:[#allocation2 + $0xf8] sm:$0xff] %v6554_v49 }
 0x23a   : > { %7057 = vmatprep.mubr.bf16.mxu0 %v2221_v20  ;;  %v1469_v52 = vpop.f32.mrf.mxu1 }
 0x23b   : > { %v6556_v53 = vpack.c.bf16 %v1469_v52, %v1467_v50 }
 0x23c   : > { %v1471_v54 = vpop.f32.mrf.mxu1 }
 0x23d   : > { %1739 = vst [vmem:[#allocation3 + $0x8] sm:$0xff] %v6556_v53 }
 0x23e   : > { %v1473_v55 = vpop.f32.mrf.mxu1 }
 0x23f   : > { %v6558_v56 = vpack.c.bf16 %v1473_v55, %v1471_v54 }
 0x240   : > { %v1477_v58 = vpop.f32.mrf.mxu1 }
 0x241   : > { %7058 = vmatmul.mubr.bf16.gmra.mxu0 %v2225_v61  ;;  %1741 = vst [vmem:[#allocation3 + $0x18] sm:$0xff] %v6558_v56 }
 0x242   : > { %7061 = vmatprep.mubr.bf16.mxu0 %v2229_v27  ;;  %v1479_v59 = vpop.f32.mrf.mxu1 }
 0x243   : > { %v6560_v61 = vpack.c.bf16 %v1479_v59, %v1477_v58 }
 0x244   : > { %v1481_v27 = vpop.f32.mrf.mxu1 }
 0x245   : > { %1743 = vst [vmem:[#allocation3 + $0x28] sm:$0xff] %v6560_v61 }
 0x249   : > { %7062 = vmatmul.mubr.bf16.gmra.mxu0 %v2233_v60 }
 0x24a   : > { %7065 = vmatprep.mubr.bf16.mxu0 %v2237_v63  ;;  %v1483_v63 = vpop.f32.mrf.mxu1 }
 0x24c   : > { %v1487_v5 = vpop.f32.mrf.mxu1 }
 0x24e   : > { %v1489_v7 = vpop.f32.mrf.mxu1 }
 0x24f   : > { %v6564_v8 = vpack.c.bf16 %v1489_v7, %v1487_v5 }
 0x250   : > { %v1491_v9 = vpop.f32.mrf.mxu1 }
 0x251   : > { %7066 = vmatmul.mubr.bf16.gmra.mxu0 %v2241_v35  ;;  %v6562_v35 = vpack.c.bf16 %v1483_v63, %v1481_v27  ;;  %1747 = vst [vmem:[#allocation3 + $0x48] sm:$0xff] %v6564_v8 }
 0x252   : > { %v1493_v10 = vpop.f32.mrf.mxu1 }
 0x253   : > { %1745 = vst [vmem:[#allocation3 + $0x38] sm:$0xff] %v6562_v35  ;;  %v6566_v11 = vpack.c.bf16 %v1493_v10, %v1491_v9 }
 0x254   : > { %v1497_v2 = vpop.f32.mrf.mxu1 }
 0x255   : > { %1749 = vst [vmem:[#allocation3 + $0x58] sm:$0xff] %v6566_v11 }
 0x256   : > { %v1499_v12 = vpop.f32.mrf.mxu1 }
 0x257   : > { %v6568_v16 = vpack.c.bf16 %v1499_v12, %v1497_v2 }
 0x258   : > { %v1501_v14 = vpop.f32.mrf.mxu1 }
 0x259   : > { %1751 = vst [vmem:[#allocation3 + $0x68] sm:$0xff] %v6568_v16 }
 0x25a   : > { %v1503_v6 = vpop.f32.mrf.mxu1 }
 0x25b   : > { %v6570_v17 = vpack.c.bf16 %v1503_v6, %v1501_v14 }
 0x25c   : > { %v1507_v18 = vpop.f32.mrf.mxu1 }
 0x25d   : > { %1753 = vst [vmem:[#allocation3 + $0x78] sm:$0xff] %v6570_v17 }
 0x25e   : > { %v1509_v48 = vpop.f32.mrf.mxu1 }
 0x25f   : > { %v6572_v22 = vpack.c.bf16 %v1509_v48, %v1507_v18 }
 0x260   : > { %v1511_v23 = vpop.f32.mrf.mxu1 }
 0x261   : > { %1755 = vst [vmem:[#allocation3 + $0x88] sm:$0xff] %v6572_v22 }
 0x262   : > { %v1513_v57 = vpop.f32.mrf.mxu1 }
 0x263   : > { %v6574_v24 = vpack.c.bf16 %v1513_v57, %v1511_v23  ;;  %v7565_v57 = vld [vmem:[#allocation3 + $0x28] ss:$16 sps:$4 sm:$0xff]  }
 0x264   : > { %v1517_v25 = vpop.f32.mrf.mxu1  ;;  %v7563_v6 = vld [vmem:[#allocation3 + $0x68] ss:$16 sps:$4 sm:$0xff]  }
 0x265   : > { %1757 = vst [vmem:[#allocation3 + $0x98] sm:$0xff] %v6574_v24 }
 0x266   : > { %v1519_v26 = vpop.f32.mrf.mxu1 }
 0x267   : > { %v6576_v29 = vpack.c.bf16 %v1519_v26, %v1517_v25 }
 0x268   : > { %v1521_v30 = vpop.f32.mrf.mxu1 }
 0x269   : > { %1759 = vst [vmem:[#allocation3 + $0xa8] sm:$0xff] %v6576_v29  ;;  %v7566_v29 = vld [vmem:[#allocation3 + $0x8] ss:$16 sps:$4 sm:$0xff]  }
 0x26a   : > { %v1523_v1 = vpop.f32.mrf.mxu1 }
 0x26b   : > { %v6578_v38 = vpack.c.bf16 %v1523_v1, %v1521_v30  ;;  %v8904_v1 = vld [vmem:[#allocation2 + $0xec] ss:$16 sps:$4 sm:$0xff]  }
 0x26c   : > { %v1527_v36 = vpop.f32.mrf.mxu1  ;;  %v7562_v2 = vld [vmem:[#allocation3 + $0x88] ss:$16 sps:$4 sm:$0xff]  }
 0x26d   : > { %1761 = vst [vmem:[#allocation3 + $0xb8] sm:$0xff] %v6578_v38 }
 0x26e   : > { %v1529_v40 = vpop.f32.mrf.mxu1 }
 0x26f   : > { %v6580_v41 = vpack.c.bf16 %v1529_v40, %v1527_v36 }
 0x270   : > { %v1531_v43 = vpop.f32.mrf.mxu1 }
 0x271   : > { %1763 = vst [vmem:[#allocation3 + $0xc8] sm:$0xff] %v6580_v41 }
 0x272   : > { %v1533_v44 = vpop.f32.mrf.mxu1 }
 0x273   : > { %v6582_v45 = vpack.c.bf16 %v1533_v44, %v1531_v43 }
 0x274   : > { %v1537_v46 = vpop.f32.mrf.mxu1  ;;  %v7561_v7 = vld [vmem:[#allocation3 + $0xa8] ss:$16 sps:$4 sm:$0xff]  }
 0x275   : > { %1765 = vst [vmem:[#allocation3 + $0xd8] sm:$0xff] %v6582_v45 }
 0x276   : > { %v1539_v47 = vpop.f32.mrf.mxu1 }
 0x277   : > { %v6584_v50 = vpack.c.bf16 %v1539_v47, %v1537_v46 }
 0x278   : > { %v1541_v52 = vpop.f32.mrf.mxu1 }
 0x279   : > { %1767 = vst [vmem:[#allocation3 + $0xe8] sm:$0xff] %v6584_v50 }
 0x27a   : > { %v1543_v54 = vpop.f32.mrf.mxu1 }
 0x27b   : > { %v6586_v56 = vpack.c.bf16 %v1543_v54, %v1541_v52 }
 0x27c   : > { %v7560_v35 = vld [vmem:[#allocation3 + $0xc8] ss:$16 sps:$4 sm:$0xff]  }
 0x27d   : > { %1769 = vst [vmem:[#allocation3 + $0xf8] sm:$0xff] %v6586_v56 }
 0x284   : > { %v7559_v27 = vld [vmem:[#allocation3 + $0xe8] ss:$16 sps:$4 sm:$0xff]  }
 0x285   : > { %7133 = vmatprep.subr.bf16.mxu0 %v7559_v27 }
 0x286   : > { %7134 = vmatpush3.bf16.msra.mxu0 %v7559_v27 }
 0x287   : > { %7135 = vmatprep.subr.bf16.mxu0 %v7560_v35 }
 0x28a   : > { %7136 = vmatpush3.bf16.msra.mxu0 %v7560_v35 }
 0x28b   : > { %7137 = vmatprep.subr.bf16.mxu0 %v7561_v7 }
 0x28e   : > { %7138 = vmatpush3.bf16.msra.mxu0 %v7561_v7 }
 0x28f   : > { %7139 = vmatprep.subr.bf16.mxu0 %v7562_v2 }
 0x292   : > { %7140 = vmatpush3.bf16.msra.mxu0 %v7562_v2 }
 0x293   : > { %7141 = vmatprep.subr.bf16.mxu0 %v7563_v6 }
 0x296   : > { %7142 = vmatpush3.bf16.msra.mxu0 %v7563_v6 }
 0x2b9   : > { %v8768_v20 = vpop.f32.mrf.mxu0 }
 0x2ba   : > { %2505 = vmax.xlane.f32.xlu1 %v8768_v20 }
 0x2bb   : > { %v8772_v60 = vpop.f32.mrf.mxu0 }
 0x2bc   : > { %2501 = vmax.xlane.f32.xlu0 %v8772_v60 }
 0x2bd   : > { %v8775_v3 = vpop.f32.mrf.mxu0 }
 0x2be   : > { %v6662_v4 = vpack.c.bf16 %v8775_v3, %v8768_v20  ;;  %2507 = vmax.xlane.f32.xlu1 %v8775_v3 }
 0x2bf   : > { %v8780_v62 = vpop.f32.mrf.mxu0 }
 0x2c0   : > { %6814 = vst [vmem:[%s8782_s13 + $0x8] sm:$0xff] %v6662_v4   ;;  %v6657_v42 = vpack.c.bf16 %v8780_v62, %v8772_v60  ;;  %2503 = vmax.xlane.f32.xlu0 %v8780_v62 }
 0x2c2   : > { %6658 = vst [vmem:[%s8782_s13] sm:$0xff] %v6657_v42  }
 0x2c9   : > { %v8789_v13 = vpop.f32.mrf.mxu0 }
 0x2cb   : > { %v8791_v15 = vpop.f32.mrf.mxu0 }
 0x2cc   : > { %2509 = vmax.xlane.f32.xlu0 %v8791_v15 }
 0x2cd   : > { %v8794_v51 = vpop.f32.mrf.mxu0 }
 0x2ce   : > { %v6672_v0 = vpack.c.bf16 %v8794_v51, %v8789_v13 }
 0x2cf   : > { %v8798_v19 = vpop.f32.mrf.mxu0 }
 0x2d0   : > { %6816 = vst [vmem:[%s8782_s13 + $0x18] sm:$0xff] %v6672_v0   ;;  %v6667_v21 = vpack.c.bf16 %v8798_v19, %v8791_v15  ;;  %2513 = vmax.xlane.f32.xlu0 %v8789_v13  ;;  %2511 = vmax.xlane.f32.xlu1 %v8798_v19 }
 0x2d2   : > { %6815 = vst [vmem:[%s8782_s13 + $0x10] sm:$0xff] %v6667_v21   ;;  %v7564_v21 = vld [vmem:[#allocation3 + $0x48] ss:$16 sps:$4 sm:$0xff]  }
 0x2d3   : > { %7143 = vmatprep.subr.bf16.mxu0 %v7564_v21 }
 0x2d4   : > { %2515 = vmax.xlane.f32.xlu1 %v8794_v51  ;;  %7144 = vmatpush3.bf16.msra.mxu0 %v7564_v21 }
 0x2d5   : > { %7145 = vmatprep.subr.bf16.mxu0 %v7565_v57 }
 0x2d8   : > { %7146 = vmatpush3.bf16.msra.mxu0 %v7565_v57 }
 0x2d9   : > { %v8807_v28 = vpop.f32.mrf.mxu0  ;;  %7147 = vmatprep.subr.bf16.mxu0 %v7566_v29 }
 0x2db   : > { %v8809_v31 = vpop.f32.mrf.mxu0 }
 0x2dc   : > { %2517 = vmax.xlane.f32.xlu0 %v8809_v31  ;;  %7148 = vmatpush3.bf16.msra.mxu0 %v7566_v29  ;;  %v7554_v29 = vld [vmem:[#allocation3 + $0x84] ss:$16 sps:$4 sm:$0xff]  }
 0x2dd   : > { %v8812_v32 = vpop.f32.mrf.mxu0  ;;  %7165 = vmatprep.subr.bf16.mxu0 %v8904_v1 }
 0x2de   : > { %v6682_v33 = vpack.c.bf16 %v8812_v32, %v8807_v28 }
 0x2df   : > { %v8816_v37 = vpop.f32.mrf.mxu0 }
 0x2e0   : > { %6818 = vst [vmem:[%s8782_s13 + $0x28] sm:$0xff] %v6682_v33   ;;  %v6677_v39 = vpack.c.bf16 %v8816_v37, %v8809_v31  ;;  %2521 = vmax.xlane.f32.xlu0 %v8807_v28  ;;  %2519 = vmax.xlane.f32.xlu1 %v8816_v37 }
 0x2e2   : > { %6817 = vst [vmem:[%s8782_s13 + $0x20] sm:$0xff] %v6677_v39  }
 0x2e4   : > { %2523 = vmax.xlane.f32.xlu1 %v8812_v32 }
 0x2e9   : > { %v8825_v49 = vpop.f32.mrf.mxu0 }
 0x2eb   : > { %v8827_v53 = vpop.f32.mrf.mxu0 }
 0x2ec   : > { %2525 = vmax.xlane.f32.xlu0 %v8827_v53 }
 0x2ed   : > { %v8830_v55 = vpop.f32.mrf.mxu0 }
 0x2ee   : > { %v6692_v58 = vpack.c.bf16 %v8830_v55, %v8825_v49 }
 0x2ef   : > { %v8834_v59 = vpop.f32.mrf.mxu0 }
 0x2f0   : > { %6820 = vst [vmem:[%s8782_s13 + $0x38] sm:$0xff] %v6692_v58   ;;  %v6687_v61 = vpack.c.bf16 %v8834_v59, %v8827_v53  ;;  %2529 = vmax.xlane.f32.xlu0 %v8825_v49  ;;  %2527 = vmax.xlane.f32.xlu1 %v8834_v59 }
 0x2f2   : > { %6819 = vst [vmem:[%s8782_s13 + $0x30] sm:$0xff] %v6687_v61  }
 0x2f4   : > { %2531 = vmax.xlane.f32.xlu1 %v8830_v55 }
 0x2f9   : > { %v8843_v63 = vpop.f32.mrf.mxu0 }
 0x2fb   : > { %v8845_v4 = vpop.f32.mrf.mxu0 }
 0x2fc   : > { %3064 = vmax.xlane.f32.xlu0 %v8845_v4 }
 0x2fd   : > { %v8848_v5 = vpop.f32.mrf.mxu0 }
 0x2fe   : > { %v6702_v42 = vpack.c.bf16 %v8848_v5, %v8843_v63 }
 0x2ff   : > { %v8852_v8 = vpop.f32.mrf.mxu0 }
 0x300   : > { %6822 = vst [vmem:[%s8782_s13 + $0x48] sm:$0xff] %v6702_v42   ;;  %v6697_v9 = vpack.c.bf16 %v8852_v8, %v8845_v4  ;;  %3068 = vmax.xlane.f32.xlu0 %v8843_v63  ;;  %3066 = vmax.xlane.f32.xlu1 %v8852_v8 }
 0x301   : > { %v8859_v10 = vpop.f32.mrf.mxu0 }
 0x302   : > { %6821 = vst [vmem:[%s8782_s13 + $0x40] sm:$0xff] %v6697_v9  }
 0x303   : > { %v8862_v11 = vpop.f32.mrf.mxu0 }
 0x304   : > { %3070 = vmax.xlane.f32.xlu1 %v8848_v5  ;;  %3072 = vmax.xlane.f32.xlu0 %v8862_v11 }
 0x305   : > { %v8866_v12 = vpop.f32.mrf.mxu0 }
 0x306   : > { %v6712_v14 = vpack.c.bf16 %v8866_v12, %v8859_v10 }
 0x307   : > { %v8870_v16 = vpop.f32.mrf.mxu0 }
 0x308   : > { %6824 = vst [vmem:[%s8782_s13 + $0x58] sm:$0xff] %v6712_v14   ;;  %v6707_v0 = vpack.c.bf16 %v8870_v16, %v8862_v11  ;;  %3076 = vmax.xlane.f32.xlu0 %v8859_v10  ;;  %3074 = vmax.xlane.f32.xlu1 %v8870_v16 }
 0x309   : > { %v8877_v17 = vpop.f32.mrf.mxu0 }
 0x30a   : > { %6823 = vst [vmem:[%s8782_s13 + $0x50] sm:$0xff] %v6707_v0  }
 0x30b   : > { %v8880_v18 = vpop.f32.mrf.mxu0 }
 0x30c   : > { %3078 = vmax.xlane.f32.xlu1 %v8866_v12  ;;  %3080 = vmax.xlane.f32.xlu0 %v8880_v18 }
 0x30d   : > { %v8884_v48 = vpop.f32.mrf.mxu0 }
 0x30e   : > { %v6722_v22 = vpack.c.bf16 %v8884_v48, %v8877_v17 }
 0x30f   : > { %v8888_v23 = vpop.f32.mrf.mxu0 }
 0x310   : > { %6826 = vst [vmem:[%s8782_s13 + $0x68] sm:$0xff] %v6722_v22   ;;  %v6717_v24 = vpack.c.bf16 %v8888_v23, %v8880_v18  ;;  %3084 = vmax.xlane.f32.xlu0 %v8877_v17  ;;  %3082 = vmax.xlane.f32.xlu1 %v8888_v23  ;;  %v7553_v22 = vld [vmem:[#allocation3 + $0xa4] ss:$16 sps:$4 sm:$0xff]  }
 0x311   : > { %v8895_v25 = vpop.f32.mrf.mxu0 }
 0x312   : > { %6825 = vst [vmem:[%s8782_s13 + $0x60] sm:$0xff] %v6717_v24  }
 0x313   : > { %v8898_v26 = vpop.f32.mrf.mxu0 }
 0x314   : > { %3086 = vmax.xlane.f32.xlu1 %v8884_v48  ;;  %3088 = vmax.xlane.f32.xlu0 %v8898_v26 }
 0x315   : > { %v8902_v30 = vpop.f32.mrf.mxu0 }
 0x316   : > { %v6732_v33 = vpack.c.bf16 %v8902_v30, %v8895_v25 }
 0x317   : > { %v8908_v36 = vpop.f32.mrf.mxu0 }
 0x318   : > { %6828 = vst [vmem:[%s8782_s13 + $0x78] sm:$0xff] %v6732_v33   ;;  %v6727_v38 = vpack.c.bf16 %v8908_v36, %v8898_v26  ;;  %3092 = vmax.xlane.f32.xlu0 %v8895_v25  ;;  %3090 = vmax.xlane.f32.xlu1 %v8908_v36 }
 0x31a   : > { %6827 = vst [vmem:[%s8782_s13 + $0x70] sm:$0xff] %v6727_v38  }
 0x31c   : > { %3094 = vmax.xlane.f32.xlu1 %v8902_v30 }
 0x343   : > { %v2506_v39 = vpop.xlane.xlu1 %2505 }
 0x344   : > { %v2535_v43 = vsub.f32 %v8768_v20, %v2506_v39 }
 0x345   : > { %v2502_v40 = vpop.xlane.xlu0 %2501 }
 0x346   : > { %v2533_v41 = vsub.f32 %v8772_v60, %v2502_v40  ;;  %v2553_v54 = vmul.f32 1.442695, %v2535_v43 }
 0x347   : > { %v2508_v44 = vpop.xlane.xlu1 %2507 }
 0x348   : > { %v2549_v45 = vmul.f32 1.442695, %v2533_v41  ;;  %v2536_v46 = vsub.f32 %v8775_v3, %v2508_v44  ;;  %v7555_v41 = vld [vmem:[#allocation3 + $0x64] ss:$16 sps:$4 sm:$0xff]  }
 0x349   : > { %v2504_v47 = vpop.xlane.xlu0 %2503 }
 0x34a   : > { %v2555_v50 = vmul.f32 1.442695, %v2536_v46  ;;  %v2534_v52 = vsub.f32 %v8780_v62, %v2504_v47  ;;  %7783 = vpow2.f32 %v2549_v45 }
 0x34c   : > { %v2551_v56 = vmul.f32 1.442695, %v2534_v52  ;;  %7785 = vpow2.f32 %v2555_v50 }
 0x34e   : > { %7787 = vpow2.f32 %v2551_v56  ;;  %v7557_v56 = vld [vmem:[#allocation3 + $0x24] ss:$16 sps:$4 sm:$0xff]  }
 0x34f   : > { %7789 = vpow2.f32 %v2553_v54 }
 0x355   : > { %v2510_v58 = vpop.xlane.xlu0 %2509 }
 0x356   : > { %v2537_v61 = vsub.f32 %v8791_v15, %v2510_v58 }
 0x357   : > { %v8923_v60 = vpop.eup %7783 }
 0x358   : > { %v2557_v3 = vmul.f32 1.442695, %v2537_v61  ;;  %v7558_v61 = vld [vmem:[#allocation3 + $0x4] ss:$16 sps:$4 sm:$0xff]  }
 0x359   : > { %v2514_v20 = vpop.xlane.xlu0 %2513  ;;  %v2512_v27 = vpop.xlane.xlu1 %2511 }
 0x35a   : > { %v8925_v35 = vpop.eup %7785  ;;  %v2539_v42 = vsub.f32 %v8789_v13, %v2514_v20  ;;  %v2538_v62 = vsub.f32 %v8798_v19, %v2512_v27  ;;  %7791 = vpow2.f32 %v2557_v3  ;;  %v7552_v13 = vld [vmem:[#allocation3 + $0xc4] ss:$16 sps:$4 sm:$0xff]   ;;  %v8956_v3 = vld [vmem:[#allocation2 + $0xe8] ss:$16 sps:$4 sm:$0xff]  }
 0x35b   : > { %v8929_v7 = vpop.eup %7787 }
 0x35c   : > { %v8931_v9 = vpop.eup %7789  ;;  %v2559_v2 = vmul.f32 1.442695, %v2538_v62  ;;  %v2629_v14 = vpack.c.bf16 %v8929_v7, %v8923_v60  ;;  %v2561_v15 = vmul.f32 1.442695, %v2539_v42 }
 0x35d   : > { %v2516_v6 = vpop.xlane.xlu1 %2515  ;;  %v2630_v0 = vpack.c.bf16 %v8925_v35, %v8931_v9 }
 0x35e   : > { %v2540_v21 = vsub.f32 %v8794_v51, %v2516_v6  ;;  %7021 = vmatprep.mubr.bf16.mxu1 %v2629_v14  ;;  %7793 = vpow2.f32 %v2559_v2 }
 0x35f   : > { %7022 = vmatmul.mubr.bf16.vlgmr.msra.gmra.mxu1 %v2630_v0  ;;  %7795 = vpow2.f32 %v2561_v15  ;;  %v8962_v15 = vpop.f32.mrf.mxu1 }
 0x360   : > { %v2563_v19 = vmul.f32 1.442695, %v2540_v21  ;;  %7070 = vmatpush3.bf16.msra.mxu1 %v8758_v34 }
 0x361   : > { %7071 = vmatprep.subr.bf16.mxu1 %v7552_v13 }
 0x362   : > { %7797 = vpow2.f32 %v2563_v19 }
 0x364   : > { %7072 = vmatpush3.bf16.msra.mxu1 %v7552_v13 }
 0x365   : > { %7073 = vmatprep.subr.bf16.mxu1 %v7553_v22  ;;  %v2518_v57 = vpop.xlane.xlu0 %2517 }
 0x366   : > { %v2541_v24 = vsub.f32 %v8809_v31, %v2518_v57 }
 0x367   : > { %v8942_v34 = vpop.eup %7791 }
 0x368   : > { %7074 = vmatpush3.bf16.msra.mxu1 %v7553_v22  ;;  %v2565_v38 = vmul.f32 1.442695, %v2541_v24  ;;  %v8974_v22 = vpop.f32.mrf.mxu1 }
 0x369   : > { %7075 = vmatprep.subr.bf16.mxu1 %v7554_v29  ;;  %v2522_v51 = vpop.xlane.xlu0 %2521  ;;  %v2520_v33 = vpop.xlane.xlu1 %2519 }
 0x36a   : > { %v2543_v39 = vsub.f32 %v8807_v28, %v2522_v51  ;;  %v2542_v40 = vsub.f32 %v8816_v37, %v2520_v33  ;;  %7799 = vpow2.f32 %v2565_v38  ;;  %v7556_v37 = vld [vmem:[#allocation3 + $0x44] ss:$16 sps:$4 sm:$0xff]  }
 0x36b   : > { %v8944_v43 = vpop.eup %7793 }
 0x36c   : > { %v2567_v44 = vmul.f32 1.442695, %v2542_v40  ;;  %7076 = vmatpush3.bf16.msra.mxu1 %v7554_v29  ;;  %v2569_v45 = vmul.f32 1.442695, %v2543_v39  ;;  %v2631_v46 = vpack.c.bf16 %v8944_v43, %v8942_v34  ;;  %v8948_v47 = vpop.eup %7795  ;;  %v8978_v29 = vpop.f32.mrf.mxu1 }
 0x36d   : > { %7077 = vmatprep.subr.bf16.mxu1 %v7555_v41  ;;  %v2524_v31 = vpop.xlane.xlu1 %2523  ;;  %10277 = vst [vmem:[#allocation29_spill] sm:$0xff] %v8948_v47 }
 0x36e   : > { %v2544_v28 = vsub.f32 %v8812_v32, %v2524_v31  ;;  %7801 = vpow2.f32 %v2567_v44  ;;  %7025 = vmatprep.mubr.bf16.mxu1 %v2631_v46  ;;  %v8981_v38 = vpop.f32.mrf.mxu1 }
 0x36f   : > { %v8951_v50 = vpop.eup %7797  ;;  %7803 = vpow2.f32 %v2569_v45 }
 0x370   : > { %10278 = vst [vmem:[#allocation30_spill] sm:$0xff] %v8951_v50  ;;  %v2571_v52 = vmul.f32 1.442695, %v2544_v28  ;;  %7078 = vmatpush3.bf16.msra.mxu1 %v7555_v41  ;;  %v2632_v54 = vpack.c.bf16 %v8951_v50, %v8948_v47  ;;  %v8987_v31 = vpop.f32.mrf.mxu1 }
 0x371   : > { %7079 = vmatprep.subr.bf16.mxu1 %v7556_v37 }
 0x372   : > { %7805 = vpow2.f32 %v2571_v52  ;;  %7026 = vmatmul.mubr.bf16.gmra.mxu1 %v2632_v54 }
 0x374   : > { %7080 = vmatpush3.bf16.msra.mxu1 %v7556_v37 }
 0x375   : > { %7081 = vmatprep.subr.bf16.mxu1 %v7557_v56  ;;  %v2526_v58 = vpop.xlane.xlu0 %2525 }
 0x376   : > { %v2545_v32 = vsub.f32 %v8827_v53, %v2526_v58 }
 0x377   : > { %v8960_v14 = vpop.eup %7799 }
 0x378   : > { %7082 = vmatpush3.bf16.msra.mxu1 %v7557_v56  ;;  %v2573_v42 = vmul.f32 1.442695, %v2545_v32  ;;  %10279 = vst [vmem:[#allocation31_spill] sm:$0xff] %v8960_v14  ;;  %v8999_v32 = vpop.f32.mrf.mxu1 }
 0x379   : > { %7083 = vmatprep.subr.bf16.mxu1 %v7558_v61  ;;  %v2530_v20 = vpop.xlane.xlu0 %2529  ;;  %v2528_v27 = vpop.xlane.xlu1 %2527 }
 0x37a   : > { %v2547_v62 = vsub.f32 %v8825_v49, %v2530_v20  ;;  %v2546_v2 = vsub.f32 %v8834_v59, %v2528_v27  ;;  %7807 = vpow2.f32 %v2573_v42 }
 0x37b   : > { %v8964_v6 = vpop.eup %7801 }
 0x37c   : > { %10280 = vst [vmem:[#allocation32_spill] sm:$0xff] %v8964_v6  ;;  %v2575_v0 = vmul.f32 1.442695, %v2546_v2  ;;  %7084 = vmatpush3.bf16.msra.mxu1 %v7558_v61  ;;  %v2577_v53 = vmul.f32 1.442695, %v2547_v62  ;;  %v2633_v13 = vpack.c.bf16 %v8964_v6, %v8960_v14  ;;  %v8969_v19 = vpop.eup %7803 }
 0x37d   : > { %v2532_v21 = vpop.xlane.xlu1 %2531  ;;  %7101 = vmatprep.subr.bf16.mxu1 %v8956_v3  ;;  %10281 = vst [vmem:[#allocation33_spill] sm:$0xff] %v8969_v19 }
 0x37e   : > { %v2548_v49 = vsub.f32 %v8830_v55, %v2532_v21  ;;  %7809 = vpow2.f32 %v2575_v0  ;;  %7029 = vmatprep.mubr.bf16.mxu1 %v2633_v13 }
 0x37f   : > { %v8972_v59 = vpop.eup %7805  ;;  %7811 = vpow2.f32 %v2577_v53 }
 0x380   : > { %10282 = vst [vmem:[#allocation34_spill] sm:$0xff] %v8972_v59  ;;  %v2579_v57 = vmul.f32 1.442695, %v2548_v49  ;;  %v2634_v24 = vpack.c.bf16 %v8972_v59, %v8969_v19 }
 0x382   : > { %7813 = vpow2.f32 %v2579_v57  ;;  %7030 = vmatmul.mubr.bf16.gmra.mxu1 %v2634_v24 }
 0x385   : > { %v3065_v51 = vpop.xlane.xlu0 %3064 }
 0x386   : > { %v3096_v33 = vsub.f32 %v8845_v4, %v3065_v51 }
 0x387   : > { %v8985_v45 = vpop.eup %7807 }
 0x388   : > { %v3112_v40 = vmul.f32 1.442695, %v3096_v33  ;;  %10283 = vst [vmem:[#allocation35_spill] sm:$0xff] %v8985_v45 }
 0x389   : > { %v3069_v55 = vpop.xlane.xlu0 %3068  ;;  %v3067_v39 = vpop.xlane.xlu1 %3066 }
 0x38a   : > { %v3098_v41 = vsub.f32 %v8843_v63, %v3069_v55  ;;  %v3097_v44 = vsub.f32 %v8852_v8, %v3067_v39  ;;  %7815 = vpow2.f32 %v3112_v40 }
 0x38b   : > { %v8989_v46 = vpop.eup %7809 }
 0x38c   : > { %10284 = vst [vmem:[#allocation36_spill] sm:$0xff] %v8989_v46  ;;  %v3114_v28 = vmul.f32 1.442695, %v3097_v44  ;;  %v3116_v37 = vmul.f32 1.442695, %v3098_v41  ;;  %v2635_v4 = vpack.c.bf16 %v8989_v46, %v8985_v45  ;;  %v8993_v56 = vpop.eup %7811 }
 0x38d   : > { %v3071_v52 = vpop.xlane.xlu1 %3070  ;;  %v3073_v54 = vpop.xlane.xlu0 %3072  ;;  %10285 = vst [vmem:[#allocation37_spill] sm:$0xff] %v8993_v56 }
 0x38e   : > { %v3099_v63 = vsub.f32 %v8848_v5, %v3071_v52  ;;  %v3100_v8 = vsub.f32 %v8862_v11, %v3073_v54  ;;  %7817 = vpow2.f32 %v3114_v28  ;;  %7033 = vmatprep.mubr.bf16.mxu1 %v2635_v4  ;;  %v9005_v11 = vpop.f32.mrf.mxu1 }
 0x38f   : > { %v8997_v58 = vpop.eup %7813  ;;  %7819 = vpow2.f32 %v3116_v37 }
 0x390   : > { %10286 = vst [vmem:[#allocation38_spill] sm:$0xff] %v8997_v58  ;;  %v3118_v61 = vmul.f32 1.442695, %v3099_v63  ;;  %v2636_v20 = vpack.c.bf16 %v8997_v58, %v8993_v56  ;;  %v3120_v62 = vmul.f32 1.442695, %v3100_v8  ;;  %v9009_v24 = vpop.f32.mrf.mxu1 }
 0x391   : > { %v3077_v27 = vpop.xlane.xlu0 %3076  ;;  %v3075_v42 = vpop.xlane.xlu1 %3074  ;;  %v7578_v58 = vld [vmem:[#allocation3 + $0xac] ss:$16 sps:$4 sm:$0xff]  }
 0x392   : > { %7821 = vpow2.f32 %v3118_v61  ;;  %v3102_v2 = vsub.f32 %v8859_v10, %v3077_v27  ;;  %v3101_v5 = vsub.f32 %v8870_v16, %v3075_v42  ;;  %7034 = vmatmul.mubr.bf16.gmra.mxu1 %v2636_v20  ;;  %v9015_v41 = vpop.f32.mrf.mxu1 }
 0x393   : > { %7823 = vpow2.f32 %v3120_v62 }
 0x394   : > { %v3122_v0 = vmul.f32 1.442695, %v3101_v5  ;;  %v3124_v53 = vmul.f32 1.442695, %v3102_v2  ;;  %v9027_v63 = vpop.f32.mrf.mxu1 }
 0x395   : > { %v3079_v21 = vpop.xlane.xlu1 %3078  ;;  %v3081_v13 = vpop.xlane.xlu0 %3080 }
 0x396   : > { %v3103_v49 = vsub.f32 %v8866_v12, %v3079_v21  ;;  %v3104_v57 = vsub.f32 %v8880_v18, %v3081_v13  ;;  %7825 = vpow2.f32 %v3122_v0  ;;  %v9036_v5 = vpop.f32.mrf.mxu1 }
 0x397   : > { %7827 = vpow2.f32 %v3124_v53  ;;  %v9013_v40 = vpop.eup %7815 }
 0x398   : > { %v3126_v51 = vmul.f32 1.442695, %v3103_v49  ;;  %v3128_v16 = vmul.f32 1.442695, %v3104_v57 }
 0x399   : > { %v3085_v10 = vpop.xlane.xlu0 %3084  ;;  %v3083_v33 = vpop.xlane.xlu1 %3082 }
 0x39a   : > { %7829 = vpow2.f32 %v3126_v51  ;;  %v3106_v55 = vsub.f32 %v8877_v17, %v3085_v10  ;;  %v3105_v39 = vsub.f32 %v8888_v23, %v3083_v33  ;;  %v7570_v33 = vld [vmem:[#allocation2 + $0xa8] ss:$16 sps:$4 sm:$0xff]  }
 0x39b   : > { %v9017_v12 = vpop.eup %7817  ;;  %7831 = vpow2.f32 %v3128_v16 }
 0x39c   : > { %v3130_v18 = vmul.f32 1.442695, %v3105_v39  ;;  %v3132_v44 = vmul.f32 1.442695, %v3106_v55  ;;  %v3192_v52 = vpack.c.bf16 %v9017_v12, %v9013_v40  ;;  %v9021_v54 = vpop.eup %7819 }
 0x39d   : > { %v3087_v28 = vpop.xlane.xlu1 %3086  ;;  %v3089_v37 = vpop.xlane.xlu0 %3088 }
 0x39e   : > { %v3107_v17 = vsub.f32 %v8884_v48, %v3087_v28  ;;  %v3108_v23 = vsub.f32 %v8898_v26, %v3089_v37  ;;  %7833 = vpow2.f32 %v3130_v18  ;;  %7085 = vmatprep.mubr.bf16.mxu1 %v3192_v52  ;;  %v7569_v26 = vld [vmem:[#allocation2 + $0xc8] ss:$16 sps:$4 sm:$0xff]  }
 0x39f   : > { %v9025_v4 = vpop.eup %7821  ;;  %7835 = vpow2.f32 %v3132_v44  ;;  %v7571_v52 = vld [vmem:[#allocation2 + $0x88] ss:$16 sps:$4 sm:$0xff]  }
 0x3a0   : > { %v3193_v8 = vpack.c.bf16 %v9025_v4, %v9021_v54  ;;  %v3134_v61 = vmul.f32 1.442695, %v3107_v17  ;;  %v3136_v42 = vmul.f32 1.442695, %v3108_v23  ;;  %v9033_v2 = vpop.eup %7823 }
 0x3a1   : > { %v3093_v20 = vpop.xlane.xlu0 %3092  ;;  %v3091_v27 = vpop.xlane.xlu1 %3090 }
 0x3a2   : > { %7837 = vpow2.f32 %v3134_v61  ;;  %v3110_v62 = vsub.f32 %v8895_v25, %v3093_v20  ;;  %v3109_v48 = vsub.f32 %v8908_v36, %v3091_v27  ;;  %7086 = vmatmul.mubr.bf16.vlgmr.msra.gmra.mxu1 %v3193_v8 }
 0x3a3   : > { %7102 = vmatpush3.bf16.xpose.msra.mxu1 %v8956_v3  ;;  %v9038_v0 = vpop.eup %7825  ;;  %7839 = vpow2.f32 %v3136_v42  ;;  %v9047_v3 = vpop.f32.mrf.mxu1  ;;  %v2214_v42 = vpack.c.bf16 %v8978_v29, %v8962_v15  ;;  %v7574_v15 = vld [vmem:[#allocation2 + $0x28] ss:$16 sps:$4 sm:$0xff]  }
 0x3a4   : > { %v3138_v53 = vmul.f32 1.442695, %v3109_v48  ;;  %7103 = vmatprep.subr.bf16.mxu1 %v7569_v26  ;;  %v3140_v21 = vmul.f32 1.442695, %v3110_v62  ;;  %v3194_v49 = vpack.c.bf16 %v9038_v0, %v9033_v2  ;;  %v9042_v25 = vpop.eup %7827 }
 0x3a5   : > { %v3095_v13 = vpop.xlane.xlu1 %3094  ;;  %v9053_v55 = vpop.f32.mrf.mxu1 }
 0x3a6   : > { %v3111_v36 = vsub.f32 %v8902_v30, %v3095_v13  ;;  %7841 = vpow2.f32 %v3138_v53  ;;  %7089 = vmatprep.mubr.bf16.mxu1 %v3194_v49  ;;  %v7573_v13 = vld [vmem:[#allocation2 + $0x48] ss:$16 sps:$4 sm:$0xff]  }
 0x3a7   : > { %v9045_v57 = vpop.eup %7829  ;;  %7843 = vpow2.f32 %v3140_v21  ;;  %v9063_v28 = vpop.f32.mrf.mxu1 }
 0x3a8   : > { %10287 = vst [vmem:[#allocation39_spill] sm:$0xff] %v9045_v57  ;;  %v3142_v51 = vmul.f32 1.442695, %v3111_v36  ;;  %v3195_v10 = vpack.c.bf16 %v9045_v57, %v9042_v25  ;;  %v9051_v16 = vpop.eup %7831 }
 0x3a9   : > { %10288 = vst [vmem:[#allocation40_spill] sm:$0xff] %v9051_v16  ;;  %v2167_v23 = vpop.f32.mrf.mxu1 }
 0x3aa   : > { %7845 = vpow2.f32 %v3142_v51  ;;  %7090 = vmatmul.mubr.bf16.gmra.mxu1 %v3195_v10  ;;  %v7575_v10 = vld [vmem:[#allocation2 + $0x8] ss:$16 sps:$4 sm:$0xff]  }
 0x3ab   : > { %7104 = vmatpush3.bf16.xpose.msra.mxu1 %v7569_v26  ;;  %v9055_v30 = vpop.eup %7833  ;;  %v9079_v62 = vpop.f32.mrf.mxu1  ;;  %v7572_v26 = vld [vmem:[#allocation2 + $0x68] ss:$16 sps:$4 sm:$0xff]  }
 0x3ac   : > { %10289 = vst [vmem:[#allocation41_spill] sm:$0xff] %v9055_v30  ;;  %7105 = vmatprep.subr.bf16.mxu1 %v7570_v33  ;;  %v3196_v39 = vpack.c.bf16 %v9055_v30, %v9051_v16  ;;  %v9059_v18 = vpop.eup %7835 }
 0x3ad   : > { %10290 = vst [vmem:[#allocation42_spill] sm:$0xff] %v9059_v18  ;;  %v2173_v53 = vpop.f32.mrf.mxu1 }
 0x3ae   : > { %7093 = vmatprep.mubr.bf16.mxu1 %v3196_v39 }
 0x3af   : > { %v9061_v44 = vpop.eup %7837  ;;  %v9083_v21 = vpop.f32.mrf.mxu1 }
 0x3b0   : > { %10291 = vst [vmem:[#allocation43_spill] sm:$0xff] %v9061_v44  ;;  %v3197_v37 = vpack.c.bf16 %v9061_v44, %v9059_v18  ;;  %v9067_v17 = vpop.eup %7839 }
 0x3b1   : > { %10292 = vst [vmem:[#allocation44_spill] sm:$0xff] %v9067_v17  ;;  %v2177_v49 = vpop.f32.mrf.mxu1 }
 0x3b2   : > { %7094 = vmatmul.mubr.bf16.gmra.mxu1 %v3197_v37  ;;  %v7576_v37 = vld [vmem:[#allocation3 + $0xec] ss:$16 sps:$4 sm:$0xff]  }
 0x3b3   : > { %7106 = vmatpush3.bf16.xpose.msra.mxu1 %v7570_v33  ;;  %v9069_v8 = vpop.eup %7841  ;;  %v9085_v36 = vpop.f32.mrf.mxu1 }
 0x3b4   : > { %10293 = vst [vmem:[#allocation45_spill] sm:$0xff] %v9069_v8  ;;  %7107 = vmatprep.subr.bf16.mxu1 %v7571_v52  ;;  %v3198_v61 = vpack.c.bf16 %v9069_v8, %v9067_v17  ;;  %v9073_v20 = vpop.eup %7843 }
 0x3b5   : > { %10294 = vst [vmem:[#allocation46_spill] sm:$0xff] %v9073_v20  ;;  %v2183_v29 = vpop.f32.mrf.mxu1 }
 0x3b6   : > { %7097 = vmatprep.mubr.bf16.mxu1 %v3198_v61  ;;  %v2222_v61 = vpack.c.bf16 %v9036_v5, %v9015_v41  ;;  %v7579_v41 = vld [vmem:[#allocation3 + $0x8c] ss:$16 sps:$4 sm:$0xff]  }
 0x3b7   : > { %v9075_v27 = vpop.eup %7845  ;;  %v9087_v51 = vpop.f32.mrf.mxu1 }
 0x3b8   : > { %10295 = vst [vmem:[#allocation47_spill] sm:$0xff] %v9075_v27  ;;  %v3199_v48 = vpack.c.bf16 %v9075_v27, %v9073_v20 }
 0x3b9   : > { %v2187_v33 = vpop.f32.mrf.mxu1 }
 0x3ba   : > { %7098 = vmatmul.mubr.bf16.gmra.mxu1 %v3199_v48  ;;  %v2218_v48 = vpack.c.bf16 %v9005_v11, %v8987_v31  ;;  %v2234_v31 = vpack.c.bf16 %v2187_v33, %v2183_v29  ;;  %v7580_v11 = vld [vmem:[#allocation3 + $0x6c] ss:$16 sps:$4 sm:$0xff]  }
 0x3bb   : > { %7108 = vmatpush3.bf16.xpose.msra.mxu1 %v7571_v52  ;;  %7117 = vmatprep.mubr.bf16.mxu1 %v2214_v42  ;;  %v9089_v39 = vpop.f32.mrf.mxu1 }
 0x3bc   : > { %7109 = vmatprep.subr.bf16.mxu1 %v7572_v26 }
 0x3bd   : > { %v2193_v52 = vpop.f32.mrf.mxu1 }
 0x3bf   : > { %v9093_v42 = vpop.f32.mrf.mxu1 }
 0x3c3   : > { %7110 = vmatpush3.bf16.xpose.msra.mxu1 %v7572_v26  ;;  %v7577_v26 = vld [vmem:[#allocation3 + $0xcc] ss:$16 sps:$4 sm:$0xff]  }
 0x3c4   : > { %7111 = vmatprep.subr.bf16.mxu1 %v7573_v13 }
 0x3cb   : > { %7112 = vmatpush3.bf16.xpose.msra.mxu1 %v7573_v13  ;;  %v2197_v13 = vpop.f32.mrf.mxu1 }
 0x3cc   : > { %7113 = vmatprep.subr.bf16.mxu1 %v7574_v15 }
 0x3cd   : > { %v9098_v56 = vpop.f32.mrf.mxu1 }
 0x3cf   : > { %v2203_v5 = vpop.f32.mrf.mxu1 }
 0x3d3   : > { %7114 = vmatpush3.bf16.xpose.msra.mxu1 %v7574_v15  ;;  %v2226_v15 = vpack.c.bf16 %v2167_v23, %v9053_v55  ;;  %v7581_v55 = vld [vmem:[#allocation3 + $0x4c] ss:$16 sps:$4 sm:$0xff]  }
 0x3d4   : > { %7115 = vmatprep.subr.bf16.mxu1 %v7575_v10 }
 0x3db   : > { %7116 = vmatpush3.bf16.xpose.msra.mxu1 %v7575_v10  ;;  %v2230_v10 = vpack.c.bf16 %v2177_v49, %v2173_v53  ;;  %v7582_v49 = vld [vmem:[#allocation3 + $0x2c] ss:$16 sps:$4 sm:$0xff]  }
 0x3dc   : > { %7197 = vmatprep.subr.bf16.mxu1 %v7576_v37 }
 0x3e2   : > { %7118 = vmatmul.mubr.bf16.vlgmr.msra.gmra.mxu1 %v2218_v48 }
 0x3e3   : > { %7198 = vmatpush3.bf16.msra.mxu1 %v7576_v37  ;;  %7121 = vmatprep.mubr.bf16.mxu1 %v2222_v61  ;;  %v2238_v37 = vpack.c.bf16 %v2197_v13, %v2193_v52  ;;  %v9100_v61 = vpop.f32.mrf.mxu1 }
 0x3e4   : > { %7199 = vmatprep.subr.bf16.mxu1 %v7577_v26 }
 0x3e5   : > { %v2207_v23 = vpop.f32.mrf.mxu1 }
 0x3e6   : > { %v2242_v53 = vpack.c.bf16 %v2207_v23, %v2203_v5 }
 0x3e7   : > { %7200 = vmatpush3.bf16.msra.mxu1 %v7577_v26  ;;  %v9102_v29 = vpop.f32.mrf.mxu1 }
 0x3e8   : > { %7201 = vmatprep.subr.bf16.mxu1 %v7578_v58 }
 0x3ea   : > { %7122 = vmatmul.mubr.bf16.gmra.mxu1 %v2226_v15 }
 0x3eb   : > { %7202 = vmatpush3.bf16.msra.mxu1 %v7578_v58  ;;  %7125 = vmatprep.mubr.bf16.mxu1 %v2230_v10  ;;  %v7583_v58 = vld [vmem:[#allocation3 + $0xc] ss:$16 sps:$4 sm:$0xff]  }
 0x3ec   : > { %7203 = vmatprep.subr.bf16.mxu1 %v7579_v41 }
 0x3ef   : > { %7204 = vmatpush3.bf16.msra.mxu1 %v7579_v41 }
 0x3f0   : > { %7205 = vmatprep.subr.bf16.mxu1 %v7580_v11 }
 0x3f2   : > { %7126 = vmatmul.mubr.bf16.gmra.mxu1 %v2234_v31 }
 0x3f3   : > { %7206 = vmatpush3.bf16.msra.mxu1 %v7580_v11  ;;  %7129 = vmatprep.mubr.bf16.mxu1 %v2238_v37 }
 0x3f4   : > { %7207 = vmatprep.subr.bf16.mxu1 %v7581_v55 }
 0x3f7   : > { %7208 = vmatpush3.bf16.msra.mxu1 %v7581_v55 }
 0x3f8   : > { %7209 = vmatprep.subr.bf16.mxu1 %v7582_v49 }
 0x3fa   : > { %7130 = vmatmul.mubr.bf16.gmra.mxu1 %v2242_v53 }
 0x3fb   : > { %7210 = vmatpush3.bf16.msra.mxu1 %v7582_v49 }
 0x3fc   : > { %7211 = vmatprep.subr.bf16.mxu1 %v7583_v58 }
 0x3ff   : > { %7212 = vmatpush3.bf16.msra.mxu1 %v7583_v58 }
 0x41f   : > { %v9104_v33 = vpop.f32.mrf.mxu1 }
 0x420   : > { %10296 = vst [vmem:[#allocation48_spill] sm:$0xff] %v9104_v33 }
 0x421   : > { %v9106_v52 = vpop.f32.mrf.mxu1 }
 0x422   : > { %10297 = vst [vmem:[#allocation49_spill] sm:$0xff] %v9106_v52 }
 0x423   : > { %v9108_v48 = vpop.f32.mrf.mxu1 }
 0x424   : > { %10298 = vst [vmem:[#allocation50_spill] sm:$0xff] %v9108_v48 }
 0x425   : > { %v9110_v26 = vpop.f32.mrf.mxu1 }
 0x426   : > { %10299 = vst [vmem:[#allocation51_spill] sm:$0xff] %v9110_v26 }
 0x432   : > { %v9112_v13 = vpop.f32.mrf.mxu1 }
 0x433   : > { %10300 = vst [vmem:[#allocation52_spill] sm:$0xff] %v9112_v13 }
 0x434   : > { %v9114_v15 = vpop.f32.mrf.mxu1 }
 0x435   : > { %10301 = vst [vmem:[#allocation53_spill] sm:$0xff] %v9114_v15 }
 0x436   : > { %v9116_v10 = vpop.f32.mrf.mxu1 }
 0x437   : > { %10302 = vst [vmem:[#allocation54_spill] sm:$0xff] %v9116_v10 }
 0x438   : > { %v9118_v41 = vpop.f32.mrf.mxu1 }
 0x439   : > { %10303 = vst [vmem:[#allocation55_spill] sm:$0xff] %v9118_v41 }
 0x442   : > { %v9120_v5 = vpop.f32.mrf.mxu1 }
 0x443   : > { %10304 = vst [vmem:[#allocation56_spill] sm:$0xff] %v9120_v5 }
 0x444   : > { %v9122_v31 = vpop.f32.mrf.mxu1 }
 0x445   : > { %10305 = vst [vmem:[#allocation57_spill] sm:$0xff] %v9122_v31 }
 0x446   : > { %v9124_v11 = vpop.f32.mrf.mxu1 }
 0x447   : > { %10306 = vst [vmem:[#allocation58_spill] sm:$0xff] %v9124_v11 }
 0x448   : > { %v9126_v37 = vpop.f32.mrf.mxu1 }
 0x449   : > { %10307 = vst [vmem:[#allocation59_spill] sm:$0xff] %v9126_v37 }
 0x452   : > { %v9128_v55 = vpop.f32.mrf.mxu1 }
 0x453   : > { %10308 = vst [vmem:[#allocation60_spill] sm:$0xff] %v9128_v55 }
 0x454   : > { %v9130_v23 = vpop.f32.mrf.mxu1 }
 0x455   : > { %10309 = vst [vmem:[#allocation61_spill] sm:$0xff] %v9130_v23 }
 0x456   : > { %v9132_v53 = vpop.f32.mrf.mxu1 }
 0x457   : > { %10310 = vst [vmem:[#allocation62_spill] sm:$0xff] %v9132_v53 }
 0x458   : > { %v9134_v49 = vpop.f32.mrf.mxu1 }
 0x459   : > { %10311 = vst [vmem:[#allocation63_spill] sm:$0xff] %v9134_v49 }
 0x462   : > { %v9136_v58 = vpop.f32.mrf.mxu1 }
 0x463   : > { %10312 = vst [vmem:[#allocation64_spill] sm:$0xff] %v9136_v58 }
 0x464   : > { %v9138_v13 = vpop.f32.mrf.mxu1 }
 0x465   : > { %10313 = vst [vmem:[#allocation65_spill] sm:$0xff] %v9138_v13 }
 0x466   : > { %v9140_v10 = vpop.f32.mrf.mxu1 }
 0x467   : > { %10314 = vst [vmem:[#allocation66_spill] sm:$0xff] %v9140_v10 }
 0x468   : > { %v9142_v5 = vpop.f32.mrf.mxu1 }
 0x469   : > { %10315 = vst [vmem:[#allocation67_spill] sm:$0xff] %v9142_v5 }
 0x46a   : > { %v9144_v31 = vpop.f32.mrf.mxu1 }
 0x46b   : > { %10316 = vst [vmem:[#allocation68_spill] sm:$0xff] %v9144_v31 }
 0x46c   : > { %v9146_v11 = vpop.f32.mrf.mxu1 }
 0x46d   : > { %10317 = vst [vmem:[#allocation69_spill] sm:$0xff] %v9146_v11 }
 0x46e   : > { %v9148_v37 = vpop.f32.mrf.mxu1 }
 0x46f   : > { %10318 = vst [vmem:[#allocation70_spill] sm:$0xff] %v9148_v37 }
 0x470   : > { %v9150_v55 = vpop.f32.mrf.mxu1 }
 0x471   : > { %10319 = vst [vmem:[#allocation71_spill] sm:$0xff] %v9150_v55 }
 0x472   : > { %v9152_v53 = vpop.f32.mrf.mxu1 }
 0x473   : > { %10320 = vst [vmem:[#allocation72_spill] sm:$0xff] %v9152_v53 }
 0x474   : > { %v9154_v49 = vpop.f32.mrf.mxu1 }
 0x475   : > { %10321 = vst [vmem:[#allocation73_spill] sm:$0xff] %v9154_v49 }
 0x476   : > { %v9156_v23 = vpop.f32.mrf.mxu1 }
 0x477   : > { %10322 = vst [vmem:[#allocation74_spill] sm:$0xff] %v9156_v23 }
 0x478   : > { %v9158_v15 = vpop.f32.mrf.mxu1 }
 0x479   : > { %10323 = vst [vmem:[#allocation75_spill] sm:$0xff] %v9158_v15 }
 0x47a   : > { %v9160_v41 = vpop.f32.mrf.mxu1 }
 0x47b   : > { %10324 = vst [vmem:[#allocation76_spill] sm:$0xff] %v9160_v41 }
 0x47c   : > { %v9162_v33 = vpop.f32.mrf.mxu1 }
 0x47d   : > { %10325 = vst [vmem:[#allocation77_spill] sm:$0xff] %v9162_v33 }
 0x47e   : > { %v9164_v31 = vpop.f32.mrf.mxu1 }
 0x47f   : > { %10326 = vst [vmem:[#allocation78_spill] sm:$0xff] %v9164_v31 }
 0x480   : > { %v9166_v11 = vpop.f32.mrf.mxu1 }
 0x481   : > { %10327 = vst [vmem:[#allocation79_spill] sm:$0xff] %v9166_v11 }
 0x4a2   : > { %v7119_v37 = vpop.f32.mrf.mxu1 }
 0x4a4   : > { %v3483_v48 = vpop.f32.mrf.mxu1 }
 0x4a5   : > { %3627 = vmax.xlane.f32.xlu0 %v3483_v48 }
 0x4a6   : > { %v7120_v53 = vpop.f32.mrf.mxu1 }
 0x4a7   : > { %v6742_v55 = vpack.c.bf16 %v7120_v53, %v7119_v37 }
 0x4a8   : > { %v3486_v49 = vpop.f32.mrf.mxu1 }
 0x4a9   : > { %6830 = vst [vmem:[%s8782_s13 + $0x88] sm:$0xff] %v6742_v55   ;;  %v6737_v23 = vpack.c.bf16 %v3486_v49, %v3483_v48  ;;  %3631 = vmax.xlane.f32.xlu0 %v7119_v37  ;;  %3629 = vmax.xlane.f32.xlu1 %v3486_v49 }
 0x4aa   : > { %v7123_v15 = vpop.f32.mrf.mxu1 }
 0x4ab   : > { %6829 = vst [vmem:[%s8782_s13 + $0x80] sm:$0xff] %v6737_v23  }
 0x4ac   : > { %v3499_v41 = vpop.f32.mrf.mxu1 }
 0x4ad   : > { %3633 = vmax.xlane.f32.xlu1 %v7120_v53  ;;  %3635 = vmax.xlane.f32.xlu0 %v3499_v41 }
 0x4ae   : > { %v9170_v31 = vpop.f32.mrf.mxu1 }
 0x4af   : > { %v6752_v33 = vpack.c.bf16 %v9170_v31, %v7123_v15 }
 0x4b0   : > { %v3502_v11 = vpop.f32.mrf.mxu1 }
 0x4b1   : > { %6832 = vst [vmem:[%s8782_s13 + $0x98] sm:$0xff] %v6752_v33   ;;  %v6747_v58 = vpack.c.bf16 %v3502_v11, %v3499_v41  ;;  %3639 = vmax.xlane.f32.xlu0 %v7123_v15  ;;  %3637 = vmax.xlane.f32.xlu1 %v3502_v11 }
 0x4b2   : > { %v9174_v55 = vpop.f32.mrf.mxu1 }
 0x4b3   : > { %6831 = vst [vmem:[%s8782_s13 + $0x90] sm:$0xff] %v6747_v58  }
 0x4b4   : > { %v3515_v52 = vpop.f32.mrf.mxu1 }
 0x4b5   : > { %3641 = vmax.xlane.f32.xlu1 %v9170_v31  ;;  %3643 = vmax.xlane.f32.xlu0 %v3515_v52 }
 0x4b6   : > { %v9178_v23 = vpop.f32.mrf.mxu1 }
 0x4b7   : > { %v6762_v10 = vpack.c.bf16 %v9178_v23, %v9174_v55 }
 0x4b8   : > { %v3518_v26 = vpop.f32.mrf.mxu1 }
 0x4b9   : > { %6834 = vst [vmem:[%s8782_s13 + $0xa8] sm:$0xff] %v6762_v10   ;;  %v6757_v33 = vpack.c.bf16 %v3518_v26, %v3515_v52  ;;  %3647 = vmax.xlane.f32.xlu0 %v9174_v55  ;;  %3645 = vmax.xlane.f32.xlu1 %v3518_v26 }
 0x4ba   : > { %v9184_v5 = vpop.f32.mrf.mxu1 }
 0x4bb   : > { %6833 = vst [vmem:[%s8782_s13 + $0xa0] sm:$0xff] %v6757_v33  }
 0x4bc   : > { %v9187_v58 = vpop.f32.mrf.mxu1 }
 0x4bd   : > { %3649 = vmax.xlane.f32.xlu1 %v9178_v23  ;;  %3651 = vmax.xlane.f32.xlu0 %v9187_v58 }
 0x4be   : > { %v9191_v13 = vpop.f32.mrf.mxu1 }
 0x4bf   : > { %v6772_v27 = vpack.c.bf16 %v9191_v13, %v9184_v5 }
 0x4c0   : > { %v9195_v10 = vpop.f32.mrf.mxu1 }
 0x4c1   : > { %6836 = vst [vmem:[%s8782_s13 + $0xb8] sm:$0xff] %v6772_v27   ;;  %v6767_v20 = vpack.c.bf16 %v9195_v10, %v9187_v58  ;;  %3655 = vmax.xlane.f32.xlu0 %v9184_v5  ;;  %3653 = vmax.xlane.f32.xlu1 %v9195_v10 }
 0x4c3   : > { %6835 = vst [vmem:[%s8782_s13 + $0xb0] sm:$0xff] %v6767_v20  }
 0x4c5   : > { %3657 = vmax.xlane.f32.xlu1 %v9191_v13 }
 0x52e   : > { %v3628_v33 = vpop.xlane.xlu0 %3627 }
 0x52f   : > { %v3659_v46 = vsub.f32 %v3483_v48, %v3628_v33 }
 0x531   : > { %v3675_v17 = vmul.f32 1.442695, %v3659_v46 }
 0x532   : > { %v3632_v45 = vpop.xlane.xlu0 %3631  ;;  %v3630_v8 = vpop.xlane.xlu1 %3629 }
 0x533   : > { %v3661_v59 = vsub.f32 %v7119_v37, %v3632_v45  ;;  %v3660_v44 = vsub.f32 %v3486_v49, %v3630_v8  ;;  %7847 = vpow2.f32 %v3675_v17 }
 0x535   : > { %v3677_v19 = vmul.f32 1.442695, %v3660_v44  ;;  %v3679_v18 = vmul.f32 1.442695, %v3661_v59 }
 0x536   : > { %v3634_v27 = vpop.xlane.xlu1 %3633  ;;  %v3636_v6 = vpop.xlane.xlu0 %3635 }
 0x537   : > { %v3662_v30 = vsub.f32 %v7120_v53, %v3634_v27  ;;  %v3663_v14 = vsub.f32 %v3499_v41, %v3636_v6  ;;  %7849 = vpow2.f32 %v3677_v19 }
 0x538   : > { %7851 = vpow2.f32 %v3679_v18 }
 0x539   : > { %v3681_v50 = vmul.f32 1.442695, %v3662_v30  ;;  %v3683_v57 = vmul.f32 1.442695, %v3663_v14 }
 0x53a   : > { %v3640_v20 = vpop.xlane.xlu0 %3639  ;;  %v3638_v16 = vpop.xlane.xlu1 %3637 }
 0x53b   : > { %7853 = vpow2.f32 %v3681_v50  ;;  %v3665_v48 = vsub.f32 %v7123_v15, %v3640_v20  ;;  %v3664_v33 = vsub.f32 %v3502_v11, %v3638_v16 }
 0x53c   : > { %7855 = vpow2.f32 %v3683_v57 }
 0x53d   : > { %v3685_v47 = vmul.f32 1.442695, %v3664_v33  ;;  %v3687_v46 = vmul.f32 1.442695, %v3665_v48 }
 0x53e   : > { %v3642_v45 = vpop.xlane.xlu1 %3641  ;;  %v3644_v8 = vpop.xlane.xlu0 %3643 }
 0x53f   : > { %v3666_v59 = vsub.f32 %v9170_v31, %v3642_v45  ;;  %v3667_v44 = vsub.f32 %v3515_v52, %v3644_v8  ;;  %7857 = vpow2.f32 %v3685_v47 }
 0x540   : > { %7859 = vpow2.f32 %v3687_v46  ;;  %v9206_v18 = vpop.eup %7847 }
 0x541   : > { %v3689_v17 = vmul.f32 1.442695, %v3666_v59  ;;  %v3691_v30 = vmul.f32 1.442695, %v3667_v44 }
 0x542   : > { %v3648_v6 = vpop.xlane.xlu0 %3647  ;;  %v3646_v19 = vpop.xlane.xlu1 %3645 }
 0x543   : > { %7861 = vpow2.f32 %v3689_v17  ;;  %v3669_v50 = vsub.f32 %v9174_v55, %v3648_v6  ;;  %v3668_v14 = vsub.f32 %v3518_v26, %v3646_v19  ;;  %v7585_v19 = vld [vmem:[#allocation2 + $0xac] ss:$16 sps:$4 sm:$0xff]  }
 0x544   : > { %v9208_v16 = vpop.eup %7849  ;;  %7863 = vpow2.f32 %v3691_v30 }
 0x545   : > { %v3693_v15 = vmul.f32 1.442695, %v3668_v14  ;;  %v3695_v41 = vmul.f32 1.442695, %v3669_v50  ;;  %v3755_v47 = vpack.c.bf16 %v9208_v16, %v9206_v18  ;;  %v9212_v52 = vpop.eup %7851 }
 0x546   : > { %v3650_v57 = vpop.xlane.xlu1 %3649  ;;  %v3652_v11 = vpop.xlane.xlu0 %3651 }
 0x547   : > { %v3670_v31 = vsub.f32 %v9178_v23, %v3650_v57  ;;  %v3671_v37 = vsub.f32 %v9187_v58, %v3652_v11  ;;  %7865 = vpow2.f32 %v3693_v15  ;;  %7149 = vmatprep.mubr.bf16.mxu0 %v3755_v47  ;;  %v7584_v23 = vld [vmem:[#allocation2 + $0xcc] ss:$16 sps:$4 sm:$0xff]  }
 0x548   : > { %v9216_v53 = vpop.eup %7853  ;;  %7867 = vpow2.f32 %v3695_v41  ;;  %v7586_v57 = vld [vmem:[#allocation2 + $0x8c] ss:$16 sps:$4 sm:$0xff]  }
 0x549   : > { %v3756_v26 = vpack.c.bf16 %v9216_v53, %v9212_v52  ;;  %v3697_v49 = vmul.f32 1.442695, %v3670_v31  ;;  %v3699_v20 = vmul.f32 1.442695, %v3671_v37  ;;  %v9222_v58 = vpop.eup %7855 }
 0x54a   : > { %v3656_v55 = vpop.xlane.xlu0 %3655  ;;  %v3654_v27 = vpop.xlane.xlu1 %3653 }
 0x54b   : > { %7869 = vpow2.f32 %v3697_v49  ;;  %v3673_v48 = vsub.f32 %v9184_v5, %v3656_v55  ;;  %v3672_v33 = vsub.f32 %v9195_v10, %v3654_v27  ;;  %7150 = vmatmul.mubr.bf16.vlgmr.msra.gmra.mxu0 %v3756_v26  ;;  %v2215_v55 = vpack.c.bf16 %v8981_v38, %v8974_v22  ;;  %v7587_v27 = vld [vmem:[#allocation2 + $0x6c] ss:$16 sps:$4 sm:$0xff]  }
 0x54c   : > { %7166 = vmatpush3.bf16.xpose.msra.mxu0 %v8904_v1  ;;  %v9225_v46 = vpop.eup %7857  ;;  %7871 = vpow2.f32 %v3699_v20  ;;  %v7588_v20 = vld [vmem:[#allocation2 + $0x4c] ss:$16 sps:$4 sm:$0xff]   ;;  %v2223_v22 = vpack.c.bf16 %v9047_v3, %v9027_v63  ;;  %v2227_v38 = vpack.c.bf16 %v9079_v62, %v9063_v28 }
 0x54d   : > { %v3701_v45 = vmul.f32 1.442695, %v3672_v33  ;;  %7167 = vmatprep.subr.bf16.mxu0 %v7584_v23  ;;  %v3703_v8 = vmul.f32 1.442695, %v3673_v48  ;;  %v3757_v44 = vpack.c.bf16 %v9225_v46, %v9222_v58  ;;  %v9229_v17 = vpop.eup %7859  ;;  %v7589_v48 = vld [vmem:[#allocation2 + $0x2c] ss:$16 sps:$4 sm:$0xff]  }
 0x54e   : > { %v3658_v59 = vpop.xlane.xlu1 %3657  ;;  %v7590_v33 = vld [vmem:[#allocation2 + $0xc] ss:$16 sps:$4 sm:$0xff]  }
 0x54f   : > { %v3674_v5 = vsub.f32 %v9191_v13, %v3658_v59  ;;  %7873 = vpow2.f32 %v3701_v45  ;;  %7153 = vmatprep.mubr.bf16.mxu0 %v3757_v44  ;;  %v2231_v45 = vpack.c.bf16 %v9085_v36, %v9083_v21  ;;  %v2239_v59 = vpack.c.bf16 %v9098_v56, %v9093_v42 }
 0x550   : > { %v9232_v10 = vpop.eup %7861  ;;  %7875 = vpow2.f32 %v3703_v8  ;;  %v2235_v8 = vpack.c.bf16 %v9089_v39, %v9087_v51 }
 0x551   : > { %v3705_v6 = vmul.f32 1.442695, %v3674_v5  ;;  %v3758_v1 = vpack.c.bf16 %v9232_v10, %v9229_v17  ;;  %v9236_v30 = vpop.eup %7863 }
 0x553   : > { %7877 = vpow2.f32 %v3705_v6  ;;  %7154 = vmatmul.mubr.bf16.gmra.mxu0 %v3758_v1 }
 0x554   : > { %7168 = vmatpush3.bf16.xpose.msra.mxu0 %v7584_v23  ;;  %v9238_v50 = vpop.eup %7865  ;;  %v2219_v23 = vpack.c.bf16 %v9009_v24, %v8999_v32  ;;  %v2243_v32 = vpack.c.bf16 %v9102_v29, %v9100_v61 }
 0x555   : > { %7169 = vmatprep.subr.bf16.mxu0 %v7585_v19  ;;  %v3759_v13 = vpack.c.bf16 %v9238_v50, %v9236_v30  ;;  %v9242_v14 = vpop.eup %7867 }
 0x557   : > { %7157 = vmatprep.mubr.bf16.mxu0 %v3759_v13 }
 0x558   : > { %v9244_v15 = vpop.eup %7869 }
 0x559   : > { %v3760_v41 = vpack.c.bf16 %v9244_v15, %v9242_v14  ;;  %v9248_v11 = vpop.eup %7871 }
 0x55b   : > { %7158 = vmatmul.mubr.bf16.gmra.mxu0 %v3760_v41 }
 0x55c   : > { %7170 = vmatpush3.bf16.xpose.msra.mxu0 %v7585_v19  ;;  %v9250_v47 = vpop.eup %7873 }
 0x55d   : > { %7171 = vmatprep.subr.bf16.mxu0 %v7586_v57  ;;  %v3761_v31 = vpack.c.bf16 %v9250_v47, %v9248_v11  ;;  %v9254_v37 = vpop.eup %7875 }
 0x55f   : > { %7161 = vmatprep.mubr.bf16.mxu0 %v3761_v31 }
 0x560   : > { %v9256_v26 = vpop.eup %7877 }
 0x561   : > { %v3762_v49 = vpack.c.bf16 %v9256_v26, %v9254_v37 }
 0x563   : > { %7162 = vmatmul.mubr.bf16.gmra.mxu0 %v3762_v49 }
 0x564   : > { %7172 = vmatpush3.bf16.xpose.msra.mxu0 %v7586_v57  ;;  %7181 = vmatprep.mubr.bf16.mxu0 %v2215_v55 }
 0x565   : > { %7173 = vmatprep.subr.bf16.mxu0 %v7587_v27 }
 0x56c   : > { %7174 = vmatpush3.bf16.xpose.msra.mxu0 %v7587_v27 }
 0x56d   : > { %7175 = vmatprep.subr.bf16.mxu0 %v7588_v20 }
 0x574   : > { %7176 = vmatpush3.bf16.xpose.msra.mxu0 %v7588_v20 }
 0x575   : > { %7177 = vmatprep.subr.bf16.mxu0 %v7589_v48 }
 0x57c   : > { %7178 = vmatpush3.bf16.xpose.msra.mxu0 %v7589_v48 }
 0x57d   : > { %7179 = vmatprep.subr.bf16.mxu0 %v7590_v33 }
 0x584   : > { %7180 = vmatpush3.bf16.xpose.msra.mxu0 %v7590_v33 }
 0x58b   : > { %7182 = vmatmul.mubr.bf16.vlgmr.msra.gmra.mxu0 %v2219_v23 }
 0x58c   : > { %7185 = vmatprep.mubr.bf16.mxu0 %v2223_v22 }
 0x593   : > { %7186 = vmatmul.mubr.bf16.gmra.mxu0 %v2227_v38 }
 0x594   : > { %7189 = vmatprep.mubr.bf16.mxu0 %v2231_v45 }
 0x59b   : > { %7190 = vmatmul.mubr.bf16.gmra.mxu0 %v2235_v8 }
 0x59c   : > { %7193 = vmatprep.mubr.bf16.mxu0 %v2239_v59 }
 0x5a3   : > { %7194 = vmatmul.mubr.bf16.gmra.mxu0 %v2243_v32 }
 0x60b   : > { %v9276_v24 = vpop.f32.mrf.mxu0 }
 0x60d   : > { %v9278_v63 = vpop.f32.mrf.mxu0 }
 0x60f   : > { %v9280_v3 = vpop.f32.mrf.mxu0 }
 0x611   : > { %v9282_v28 = vpop.f32.mrf.mxu0 }
 0x613   : > { %v9284_v62 = vpop.f32.mrf.mxu0 }
 0x615   : > { %v9286_v21 = vpop.f32.mrf.mxu0 }
 0x617   : > { %v9288_v36 = vpop.f32.mrf.mxu0 }
 0x619   : > { %v9290_v56 = vpop.f32.mrf.mxu0 }
 0x61b   : > { %v9292_v51 = vpop.f32.mrf.mxu0 }
 0x61d   : > { %v9294_v39 = vpop.f32.mrf.mxu0 }
 0x61f   : > { %v9296_v42 = vpop.f32.mrf.mxu0 }
 0x621   : > { %v9298_v61 = vpop.f32.mrf.mxu0 }
 0x623   : > { %v9300_v29 = vpop.f32.mrf.mxu0 }
 0x625   : > { %v9302_v44 = vpop.f32.mrf.mxu0 }
 0x627   : > { %v9304_v5 = vpop.f32.mrf.mxu0 }
 0x629   : > { %v9306_v6 = vpop.f32.mrf.mxu0 }
 0x64b   : > { %v9308_v1 = vpop.f32.mrf.mxu0 }
 0x64d   : > { %v9310_v19 = vpop.f32.mrf.mxu0 }
 0x64e   : > { %4190 = vmax.xlane.f32.xlu0 %v9310_v19 }
 0x64f   : > { %v9313_v13 = vpop.f32.mrf.mxu0 }
 0x650   : > { %v6782_v41 = vpack.c.bf16 %v9313_v13, %v9308_v1 }
 0x651   : > { %v9317_v57 = vpop.f32.mrf.mxu0 }
 0x652   : > { %6838 = vst [vmem:[%s8782_s13 + $0xc8] sm:$0xff] %v6782_v41   ;;  %v6777_v31 = vpack.c.bf16 %v9317_v57, %v9310_v19  ;;  %4194 = vmax.xlane.f32.xlu0 %v9308_v1  ;;  %4192 = vmax.xlane.f32.xlu1 %v9317_v57 }
 0x653   : > { %v9324_v49 = vpop.f32.mrf.mxu0 }
 0x654   : > { %6837 = vst [vmem:[%s8782_s13 + $0xc0] sm:$0xff] %v6777_v31  }
 0x655   : > { %v9327_v55 = vpop.f32.mrf.mxu0 }
 0x656   : > { %4196 = vmax.xlane.f32.xlu1 %v9313_v13  ;;  %4198 = vmax.xlane.f32.xlu0 %v9327_v55 }
 0x657   : > { %v9331_v27 = vpop.f32.mrf.mxu0 }
 0x658   : > { %v6792_v20 = vpack.c.bf16 %v9331_v27, %v9324_v49 }
 0x659   : > { %v9335_v48 = vpop.f32.mrf.mxu0 }
 0x65a   : > { %6840 = vst [vmem:[%s8782_s13 + $0xd8] sm:$0xff] %v6792_v20   ;;  %v6787_v33 = vpack.c.bf16 %v9335_v48, %v9327_v55  ;;  %4202 = vmax.xlane.f32.xlu0 %v9324_v49  ;;  %4200 = vmax.xlane.f32.xlu1 %v9335_v48 }
 0x65b   : > { %v9342_v23 = vpop.f32.mrf.mxu0 }
 0x65c   : > { %6839 = vst [vmem:[%s8782_s13 + $0xd0] sm:$0xff] %v6787_v33  }
 0x65d   : > { %v9345_v22 = vpop.f32.mrf.mxu0 }
 0x65e   : > { %4204 = vmax.xlane.f32.xlu1 %v9331_v27  ;;  %4206 = vmax.xlane.f32.xlu0 %v9345_v22 }
 0x65f   : > { %v9349_v38 = vpop.f32.mrf.mxu0 }
 0x660   : > { %v6802_v45 = vpack.c.bf16 %v9349_v38, %v9342_v23 }
 0x661   : > { %v9353_v8 = vpop.f32.mrf.mxu0 }
 0x662   : > { %6842 = vst [vmem:[%s8782_s13 + $0xe8] sm:$0xff] %v6802_v45   ;;  %v6797_v59 = vpack.c.bf16 %v9353_v8, %v9345_v22  ;;  %4210 = vmax.xlane.f32.xlu0 %v9342_v23  ;;  %4208 = vmax.xlane.f32.xlu1 %v9353_v8 }
 0x663   : > { %v9360_v32 = vpop.f32.mrf.mxu0 }
 0x664   : > { %6841 = vst [vmem:[%s8782_s13 + $0xe0] sm:$0xff] %v6797_v59   ;;  %v7593_v59 = vld [vmem:[#allocation13 + $0xe4] ss:$16 sps:$4 sm:$0xff]  }
 0x665   : > { %v9363_v41 = vpop.f32.mrf.mxu0  ;;  %5285 = vmatprep.subr.bf16.mxu1 %v7593_v59 }
 0x666   : > { %4212 = vmax.xlane.f32.xlu1 %v9349_v38  ;;  %4214 = vmax.xlane.f32.xlu0 %v9363_v41 }
 0x667   : > { %v9367_v31 = vpop.f32.mrf.mxu0 }
 0x668   : > { %v6812_v20 = vpack.c.bf16 %v9367_v31, %v9360_v32 }
 0x669   : > { %v9371_v33 = vpop.f32.mrf.mxu0 }
 0x66a   : > { %6844 = vst [vmem:[%s8782_s13 + $0xf8] sm:$0xff] %v6812_v20   ;;  %v6807_v45 = vpack.c.bf16 %v9371_v33, %v9363_v41  ;;  %4218 = vmax.xlane.f32.xlu0 %v9360_v32  ;;  %4216 = vmax.xlane.f32.xlu1 %v9371_v33 }
 0x66c   : > { %6843 = vst [vmem:[%s8782_s13 + $0xf0] sm:$0xff] %v6807_v45  }
 0x66e   : > { %3144 = vadd.xlane.f32.xlu0 %v9013_v40  ;;  %4220 = vmax.xlane.f32.xlu1 %v9367_v31  ;;  %v10329_v40 = vld [vmem:[#allocation39_spill] sm:$0xff] }
 0x672   : > { %2581 = vadd.xlane.f32.xlu0 %v8923_v60  ;;  %3146 = vadd.xlane.f32.xlu1 %v9017_v12  ;;  %v10328_v60 = vld [vmem:[#allocation29_spill] sm:$0xff]  ;;  %v10332_v12 = vld [vmem:[#allocation31_spill] sm:$0xff] }
 0x676   : > { %3148 = vadd.xlane.f32.xlu0 %v9021_v54  ;;  %2583 = vadd.xlane.f32.xlu1 %v8929_v7  ;;  %v10330_v7 = vld [vmem:[#allocation40_spill] sm:$0xff]  ;;  %v10333_v54 = vld [vmem:[#allocation41_spill] sm:$0xff] }
 0x67a   : > { %2585 = vadd.xlane.f32.xlu0 %v8931_v9  ;;  %3150 = vadd.xlane.f32.xlu1 %v9025_v4  ;;  %v10331_v9 = vld [vmem:[#allocation30_spill] sm:$0xff]  ;;  %v10337_v4 = vld [vmem:[#allocation43_spill] sm:$0xff] }
 0x67e   : > { %3152 = vadd.xlane.f32.xlu0 %v9033_v2  ;;  %2587 = vadd.xlane.f32.xlu1 %v8925_v35  ;;  %v10334_v35 = vld [vmem:[#allocation32_spill] sm:$0xff]  ;;  %v10338_v2 = vld [vmem:[#allocation34_spill] sm:$0xff] }
 0x682   : > { %2589 = vadd.xlane.f32.xlu0 %v8942_v34  ;;  %3154 = vadd.xlane.f32.xlu1 %v9038_v0  ;;  %v10335_v34 = vld [vmem:[#allocation42_spill] sm:$0xff]  ;;  %v10339_v0 = vld [vmem:[#allocation44_spill] sm:$0xff] }
 0x686   : > { %3156 = vadd.xlane.f32.xlu0 %v9042_v25  ;;  %2591 = vadd.xlane.f32.xlu1 %v8944_v43  ;;  %v10336_v43 = vld [vmem:[#allocation33_spill] sm:$0xff] }
 0x687   : > { %v10340_v25 = vld [vmem:[#allocation45_spill] sm:$0xff] }
 0x68a   : > { %2593 = vadd.xlane.f32.xlu0 %v10328_v60  ;;  %3158 = vadd.xlane.f32.xlu1 %v10329_v40 }
 0x68e   : > { %3160 = vadd.xlane.f32.xlu0 %v10330_v7  ;;  %2595 = vadd.xlane.f32.xlu1 %v10331_v9 }
 0x692   : > { %2597 = vadd.xlane.f32.xlu0 %v10332_v12  ;;  %3162 = vadd.xlane.f32.xlu1 %v10333_v54 }
 0x696   : > { %3707 = vadd.xlane.f32.xlu0 %v9206_v18  ;;  %2599 = vadd.xlane.f32.xlu1 %v10334_v35 }
 0x69a   : > { %3164 = vadd.xlane.f32.xlu0 %v10335_v34  ;;  %3709 = vadd.xlane.f32.xlu1 %v9208_v16 }
 0x69e   : > { %2601 = vadd.xlane.f32.xlu0 %v10336_v43  ;;  %3166 = vadd.xlane.f32.xlu1 %v10337_v4 }
 0x6a2   : > { %3711 = vadd.xlane.f32.xlu0 %v9212_v52  ;;  %2603 = vadd.xlane.f32.xlu1 %v10338_v2 }
 0x6a6   : > { %3168 = vadd.xlane.f32.xlu0 %v10339_v0  ;;  %3713 = vadd.xlane.f32.xlu1 %v9216_v53 }
 0x6aa   : > { %3170 = vadd.xlane.f32.xlu1 %v10340_v25 }
 0x6d7   : > { %v4191_v18 = vpop.xlane.xlu0 %4190 }
 0x6d8   : > { %v4222_v20 = vsub.f32 %v9310_v19, %v4191_v18 }
 0x6da   : > { %v4238_v45 = vmul.f32 1.442695, %v4222_v20 }
 0x6db   : > { %v4195_v59 = vpop.xlane.xlu0 %4194  ;;  %v4193_v16 = vpop.xlane.xlu1 %4192 }
 0x6dc   : > { %v4224_v60 = vsub.f32 %v9308_v1, %v4195_v59  ;;  %v4223_v40 = vsub.f32 %v9317_v57, %v4193_v16  ;;  %7879 = vpow2.f32 %v4238_v45 }
 0x6de   : > { %v4242_v7 = vmul.f32 1.442695, %v4224_v60  ;;  %v4240_v52 = vmul.f32 1.442695, %v4223_v40 }
 0x6df   : > { %v4197_v9 = vpop.xlane.xlu1 %4196  ;;  %v4199_v12 = vpop.xlane.xlu0 %4198 }
 0x6e0   : > { %7881 = vpow2.f32 %v4242_v7  ;;  %v4225_v53 = vsub.f32 %v9313_v13, %v4197_v9  ;;  %v4226_v54 = vsub.f32 %v9327_v55, %v4199_v12 }
 0x6e1   : > { %7883 = vpow2.f32 %v4240_v52 }
 0x6e2   : > { %v4244_v35 = vmul.f32 1.442695, %v4225_v53  ;;  %v4246_v43 = vmul.f32 1.442695, %v4226_v54 }
 0x6e3   : > { %v4203_v19 = vpop.xlane.xlu0 %4202  ;;  %v4201_v34 = vpop.xlane.xlu1 %4200 }
 0x6e4   : > { %7885 = vpow2.f32 %v4244_v35  ;;  %v4228_v1 = vsub.f32 %v9324_v49, %v4203_v19  ;;  %v4227_v57 = vsub.f32 %v9335_v48, %v4201_v34  ;;  %v7591_v35 = vld [vmem:[#allocation13 + $0xe0] ss:$16 sps:$4 sm:$0xff]  }
 0x6e5   : > { %7887 = vpow2.f32 %v4246_v43  ;;  %v7596_v43 = vld [vmem:[#allocation13 + $0xc4] ss:$16 sps:$4 sm:$0xff]  }
 0x6e6   : > { %v4248_v4 = vmul.f32 1.442695, %v4227_v57  ;;  %v4250_v2 = vmul.f32 1.442695, %v4228_v1 }
 0x6e7   : > { %v4205_v0 = vpop.xlane.xlu1 %4204  ;;  %v4207_v25 = vpop.xlane.xlu0 %4206 }
 0x6e8   : > { %v4229_v18 = vsub.f32 %v9331_v27, %v4205_v0  ;;  %v4230_v13 = vsub.f32 %v9345_v22, %v4207_v25  ;;  %7889 = vpow2.f32 %v4248_v4  ;;  %v7594_v4 = vld [vmem:[#allocation13 + $0xc0] ss:$16 sps:$4 sm:$0xff]  }
 0x6e9   : > { %7891 = vpow2.f32 %v4250_v2  ;;  %v7880_v59 = vpop.eup %7879 }
 0x6ea   : > { %v4252_v55 = vmul.f32 1.442695, %v4229_v18  ;;  %v4254_v16 = vmul.f32 1.442695, %v4230_v13  ;;  %v10341_v18 = vld [vmem:[#allocation35_spill] sm:$0xff] }
 0x6eb   : > { %v4211_v20 = vpop.xlane.xlu0 %4210  ;;  %v4209_v45 = vpop.xlane.xlu1 %4208 }
 0x6ec   : > { %7893 = vpow2.f32 %v4252_v55  ;;  %v4232_v49 = vsub.f32 %v9342_v23, %v4211_v20  ;;  %v4231_v48 = vsub.f32 %v9353_v8, %v4209_v45  ;;  %v7599_v45 = vld [vmem:[#allocation13 + $0xa4] ss:$16 sps:$4 sm:$0xff]  }
 0x6ed   : > { %v7882_v60 = vpop.eup %7881  ;;  %7895 = vpow2.f32 %v4254_v16  ;;  %v7597_v16 = vld [vmem:[#allocation13 + $0xa0] ss:$16 sps:$4 sm:$0xff]  }
 0x6ee   : > { %v7884_v40 = vpop.eup %7883  ;;  %v4256_v7 = vmul.f32 1.442695, %v4231_v48  ;;  %4274 = vadd.xlane.f32.xlu0 %v7882_v60  ;;  %v4258_v52 = vmul.f32 1.442695, %v4232_v49  ;;  %v10342_v48 = vld [vmem:[#allocation36_spill] sm:$0xff] }
 0x6ef   : > { %v4213_v27 = vpop.xlane.xlu1 %4212  ;;  %v4215_v9 = vpop.xlane.xlu0 %4214  ;;  %v4318_v22 = vpack.c.bf16 %v7884_v40, %v7880_v59 }
 0x6f0   : > { %v4233_v12 = vsub.f32 %v9349_v38, %v4213_v27  ;;  %v4234_v53 = vsub.f32 %v9363_v41, %v4215_v9  ;;  %7897 = vpow2.f32 %v4256_v7  ;;  %v7600_v27 = vld [vmem:[#allocation13 + $0x80] ss:$16 sps:$4 sm:$0xff]  }
 0x6f1   : > { %v7886_v54 = vpop.eup %7885  ;;  %7213 = vmatprep.mubr.bf16.mxu1 %v4318_v22  ;;  %7899 = vpow2.f32 %v4258_v52 }
 0x6f2   : > { %v4319_v23 = vpack.c.bf16 %v7886_v54, %v7882_v60  ;;  %v4260_v19 = vmul.f32 1.442695, %v4233_v12  ;;  %4270 = vadd.xlane.f32.xlu0 %v7880_v59  ;;  %4276 = vadd.xlane.f32.xlu1 %v7886_v54  ;;  %v4262_v1 = vmul.f32 1.442695, %v4234_v53  ;;  %v7888_v41 = vpop.eup %7887  ;;  %v7605_v54 = vld [vmem:[#allocation13 + $0x64] ss:$16 sps:$4 sm:$0xff]  }
 0x6f3   : > { %v4219_v8 = vpop.xlane.xlu0 %4218  ;;  %v4217_v34 = vpop.xlane.xlu1 %4216 }
 0x6f4   : > { %7901 = vpow2.f32 %v4260_v19  ;;  %v4236_v57 = vsub.f32 %v9360_v32, %v4219_v8  ;;  %v4235_v38 = vsub.f32 %v9371_v33, %v4217_v34  ;;  %7214 = vmatmul.mubr.bf16.vlgmr.msra.gmra.mxu1 %v4319_v23  ;;  %v7653_v23 = vld [vmem:[#allocation13 + $0x2e4] ss:$16 sps:$4 sm:$0xff]   ;;  %v7603_v8 = vld [vmem:[#allocation13 + $0x60] ss:$16 sps:$4 sm:$0xff]  }
 0x6f5   : > { %5286 = vmatpush1.bf16.msra.mxu1 %v7591_v35  ;;  %v9425_v2 = vpop.eup %7889  ;;  %7903 = vpow2.f32 %v4262_v1  ;;  %v7651_v34 = vld [vmem:[#allocation13 + $0x2e0] ss:$16 sps:$4 sm:$0xff]   ;;  %5398 = vmatprep.subr.bf16.mxu0 %v7653_v23 }
 0x6f6   : > { %v4266_v0 = vmul.f32 1.442695, %v4236_v57  ;;  %v4264_v25 = vmul.f32 1.442695, %v4235_v38  ;;  %2605 = vadd.xlane.f32.xlu0 %v10341_v18  ;;  %4272 = vadd.xlane.f32.xlu1 %v7884_v40  ;;  %v4320_v20 = vpack.c.bf16 %v9425_v2, %v7888_v41  ;;  %v7892_v32 = vpop.eup %7891  ;;  %v7608_v38 = vld [vmem:[#allocation13 + $0x44] ss:$16 sps:$4 sm:$0xff]  }
 0x6f7   : > { %5287 = vmatprep.subr.bf16.mxu1 %v7596_v43  ;;  %v3145_v13 = vpop.xlane.xlu0 %3144  ;;  %v4221_v55 = vpop.xlane.xlu1 %4220  ;;  %5399 = vmatpush1.bf16.msra.mxu0 %v7651_v34 }
 0x6f8   : > { %v4237_v33 = vsub.f32 %v9367_v31, %v4221_v55  ;;  %7905 = vpow2.f32 %v4264_v25  ;;  %7217 = vmatprep.mubr.bf16.mxu1 %v4320_v20  ;;  %v7602_v31 = vld [vmem:[#allocation13 + $0x84] ss:$16 sps:$4 sm:$0xff]   ;;  %v7606_v25 = vld [vmem:[#allocation13 + $0x40] ss:$16 sps:$4 sm:$0xff]  }
 0x6f9   : > { %v9430_v59 = vpop.eup %7893  ;;  %5288 = vmatpush1.bf16.msra.mxu1 %v7594_v4  ;;  %7907 = vpow2.f32 %v4266_v0  ;;  %v7659_v4 = vld [vmem:[#allocation13 + $0x2c4] ss:$16 sps:$4 sm:$0xff]  }
 0x6fa   : > { %v4268_v49 = vmul.f32 1.442695, %v4237_v33  ;;  %3715 = vadd.xlane.f32.xlu0 %v9222_v58  ;;  %2607 = vadd.xlane.f32.xlu1 %v10342_v48  ;;  %v4321_v60 = vpack.c.bf16 %v9430_v59, %v7892_v32  ;;  %7909 = vrcp.f32 %v3145_v13  ;;  %v9437_v52 = vpop.eup %7895  ;;  %v10343_v58 = vld [vmem:[#allocation46_spill] sm:$0xff]  ;;  %v7611_v33 = vld [vmem:[#allocation13 + $0x24] ss:$16 sps:$4 sm:$0xff]  }
 0x6fb   : > { %5289 = vmatprep.subr.bf16.mxu1 %v7599_v45  ;;  %v9435_v40 = vpop.xlane.xlu0 %2581  ;;  %v3147_v7 = vpop.xlane.xlu1 %3146  ;;  %5400 = vmatprep.subr.bf16.mxu0 %v7659_v4 }
 0x6fc   : > { %7911 = vpow2.f32 %v4268_v49  ;;  %7218 = vmatmul.mubr.bf16.gmra.mxu1 %v4321_v60  ;;  %v7665_v49 = vld [vmem:[#allocation13 + $0x2a4] ss:$16 sps:$4 sm:$0xff]  }
 0x6fd   : > { %5290 = vmatpush1.bf16.msra.mxu1 %v7597_v16  ;;  %v9439_v9 = vpop.eup %7897  ;;  %7913 = vrcp.f32 %v3147_v7  ;;  %v10345_v60 = vld [vmem:[#allocation37_spill] sm:$0xff] }
 0x6fe   : > { %3172 = vadd.xlane.f32.xlu0 %v10343_v58  ;;  %3717 = vadd.xlane.f32.xlu1 %v9225_v46  ;;  %v4322_v53 = vpack.c.bf16 %v9439_v9, %v9437_v52  ;;  %v9449_v35 = vpop.eup %7899  ;;  %v10344_v46 = vld [vmem:[#allocation47_spill] sm:$0xff] }
 0x6ff   : > { %5291 = vmatprep.subr.bf16.mxu1 %v7602_v31  ;;  %v9443_v22 = vpop.xlane.xlu0 %3148  ;;  %v9445_v12 = vpop.xlane.xlu1 %2583 }
 0x700   : > { %7221 = vmatprep.mubr.bf16.mxu1 %v4322_v53  ;;  %v7614_v53 = vld [vmem:[#allocation13 + $0x4] ss:$16 sps:$4 sm:$0xff]   ;;  %7915 = vrcp.f32 %v9445_v12  ;;  %v7627_v12 = vld [vmem:[#allocation13 + $0x160] ss:$16 sps:$4 sm:$0xff]  }
 0x701   : > { %v9451_v19 = vpop.eup %7901  ;;  %5292 = vmatpush1.bf16.msra.mxu1 %v7600_v27 }
 0x702   : > { %4278 = vadd.xlane.f32.xlu0 %v7888_v41  ;;  %3174 = vadd.xlane.f32.xlu1 %v10344_v46  ;;  %v4323_v43 = vpack.c.bf16 %v9451_v19, %v9449_v35  ;;  %v9460_v0 = vpop.eup %7903  ;;  %v7657_v41 = vld [vmem:[#allocation13 + $0x2c0] ss:$16 sps:$4 sm:$0xff]   ;;  %v7671_v46 = vld [vmem:[#allocation13 + $0x284] ss:$16 sps:$4 sm:$0xff]  }
 0x703   : > { %5293 = vmatprep.subr.bf16.mxu1 %v7605_v54  ;;  %v9456_v1 = vpop.xlane.xlu0 %2585  ;;  %v9458_v57 = vpop.xlane.xlu1 %3150  ;;  %5401 = vmatpush1.bf16.msra.mxu0 %v7657_v41  ;;  %v10346_v54 = vld [vmem:[#allocation65_spill] sm:$0xff] }
 0x704   : > { %7222 = vmatmul.mubr.bf16.gmra.mxu1 %v4323_v43  ;;  %5402 = vmatprep.subr.bf16.mxu0 %v7665_v49  ;;  %v7669_v43 = vld [vmem:[#allocation13 + $0x280] ss:$16 sps:$4 sm:$0xff]   ;;  %7917 = vrcp.f32 %v9458_v57  ;;  %v7632_v57 = vld [vmem:[#allocation13 + $0x144] ss:$16 sps:$4 sm:$0xff]  }
 0x705   : > { %5294 = vmatpush1.bf16.msra.mxu1 %v7603_v8  ;;  %v9462_v18 = vpop.eup %7905  ;;  %v10347_v8 = vld [vmem:[#allocation67_spill] sm:$0xff]  ;;  %7919 = vrcp.f32 %v9435_v40 }
 0x706   : > { %4282 = vadd.xlane.f32.xlu0 %v7892_v32  ;;  %4280 = vadd.xlane.f32.xlu1 %v9425_v2  ;;  %v9465_v13 = vpop.eup %7907  ;;  %v4324_v45 = vpack.c.bf16 %v9462_v18, %v9460_v0  ;;  %v7609_v2 = vld [vmem:[#allocation13 + $0x20] ss:$16 sps:$4 sm:$0xff]   ;;  %7921 = vrcp.f32 %v9443_v22  ;;  %v7707_v40 = vld [vmem:[#allocation13 + $0x3c4] ss:$16 sps:$4 sm:$0xff]  }
 0x707   : > { %5295 = vmatprep.subr.bf16.mxu1 %v7608_v38  ;;  %v9467_v55 = vpop.xlane.xlu0 %3152  ;;  %v9469_v20 = vpop.xlane.xlu1 %2587  ;;  %v7663_v32 = vld [vmem:[#allocation13 + $0x2a0] ss:$16 sps:$4 sm:$0xff]   ;;  %v10348_v38 = vld [vmem:[#allocation38_spill] sm:$0xff] }
 0x708   : > { %v7910_v16 = vpop.eup %7909  ;;  %7225 = vmatprep.mubr.bf16.mxu1 %v4324_v45  ;;  %5403 = vmatpush1.bf16.msra.mxu0 %v7663_v32  ;;  %v7617_v45 = vld [vmem:[#allocation13 + $0x1e4] ss:$16 sps:$4 sm:$0xff]   ;;  %v7675_v49 = vld [vmem:[#allocation13 + $0x260] ss:$16 sps:$4 sm:$0xff]  }
 0x709   : > { %v9473_v48 = vpop.eup %7911  ;;  %5296 = vmatpush1.bf16.msra.mxu1 %v7606_v25  ;;  %v3345_v23 = vmul.f32 %v7910_v16, %v10346_v54  ;;  %5404 = vmatprep.subr.bf16.mxu0 %v7671_v46  ;;  %v7615_v16 = vld [vmem:[#allocation13 + $0x1e0] ss:$16 sps:$4 sm:$0xff]   ;;  %v7620_v32 = vld [vmem:[#allocation13 + $0x1c4] ss:$16 sps:$4 sm:$0xff]  }
 0x70a   : > { %2609 = vadd.xlane.f32.xlu0 %v10345_v60  ;;  %4284 = vadd.xlane.f32.xlu1 %v9430_v59  ;;  %v4325_v7 = vpack.c.bf16 %v9473_v48, %v9465_v13  ;;  %v7914_v31 = vpop.eup %7913  ;;  %v7612_v59 = vld [vmem:[#allocation13] ss:$16 sps:$4 sm:$0xff]   ;;  %v7683_v60 = vld [vmem:[#allocation13 + $0x244] ss:$16 sps:$4 sm:$0xff]  }
 0x70b   : > { %5297 = vmatprep.subr.bf16.mxu1 %v7611_v33  ;;  %v9479_v27 = vpop.xlane.xlu0 %2589  ;;  %v9481_v58 = vpop.xlane.xlu1 %3154  ;;  %v3346_v34 = vmul.f32 %v7914_v31, %v10347_v8  ;;  %v7677_v33 = vld [vmem:[#allocation13 + $0x264] ss:$16 sps:$4 sm:$0xff]   ;;  %v7681_v31 = vld [vmem:[#allocation13 + $0x240] ss:$16 sps:$4 sm:$0xff]  }
 0x70c   : > { %7226 = vmatmul.mubr.bf16.gmra.mxu1 %v4325_v7  ;;  %5405 = vmatpush1.bf16.msra.mxu0 %v7669_v43  ;;  %v7618_v7 = vld [vmem:[#allocation13 + $0x1c0] ss:$16 sps:$4 sm:$0xff]   ;;  %v7689_v54 = vld [vmem:[#allocation13 + $0x224] ss:$16 sps:$4 sm:$0xff]  }
 0x70d   : > { %5298 = vmatpush1.bf16.msra.mxu1 %v7609_v2  ;;  %v9487_v4 = vpack.c.bf16 %v3346_v34, %v3345_v23  ;;  %5406 = vmatprep.subr.bf16.mxu0 %v7677_v33  ;;  %v7621_v23 = vld [vmem:[#allocation13 + $0x1a0] ss:$16 sps:$4 sm:$0xff]   ;;  %v7626_v34 = vld [vmem:[#allocation13 + $0x184] ss:$16 sps:$4 sm:$0xff]  }
 0x70e   : > { %3719 = vadd.xlane.f32.xlu0 %v9229_v17  ;;  %2611 = vadd.xlane.f32.xlu1 %v10348_v38  ;;  %v7687_v8 = vld [vmem:[#allocation13 + $0x220] ss:$16 sps:$4 sm:$0xff]   ;;  %v7695_v46 = vld [vmem:[#allocation13 + $0x204] ss:$16 sps:$4 sm:$0xff]  }
 0x70f   : > { %5299 = vmatprep.subr.bf16.mxu1 %v7614_v53  ;;  %v9489_v25 = vpop.xlane.xlu0 %3156  ;;  %v9491_v41 = vpop.xlane.xlu1 %2591  ;;  %5317 = vmatprep.mubr.bf16.mxu1 %v9487_v4  ;;  %v7623_v53 = vld [vmem:[#allocation13 + $0x1a4] ss:$16 sps:$4 sm:$0xff]   ;;  %v7693_v43 = vld [vmem:[#allocation13 + $0x200] ss:$16 sps:$4 sm:$0xff]  }
 0x710   : > { %5407 = vmatpush1.bf16.msra.mxu0 %v7675_v49  ;;  %v7629_v38 = vld [vmem:[#allocation13 + $0x164] ss:$16 sps:$4 sm:$0xff]   ;;  %v7699_v33 = vld [vmem:[#allocation13 + $0x3e0] ss:$16 sps:$4 sm:$0xff]  }
 0x711   : > { %5300 = vmatpush1.bf16.msra.mxu1 %v7612_v59  ;;  %5408 = vmatprep.subr.bf16.mxu0 %v7683_v60  ;;  %v7624_v59 = vld [vmem:[#allocation13 + $0x180] ss:$16 sps:$4 sm:$0xff]   ;;  %v7635_v49 = vld [vmem:[#allocation13 + $0x124] ss:$16 sps:$4 sm:$0xff]  }
 0x712   : > { %4286 = vadd.xlane.f32.xlu0 %v9437_v52  ;;  %3721 = vadd.xlane.f32.xlu1 %v9232_v10  ;;  %v7705_v22 = vld [vmem:[#allocation13 + $0x3c0] ss:$16 sps:$4 sm:$0xff]   ;;  %v7638_v60 = vld [vmem:[#allocation13 + $0x104] ss:$16 sps:$4 sm:$0xff]  }
 0x713   : > { %5301 = vmatprep.subr.bf16.mxu1 %v7617_v45  ;;  %v9496_v17 = vpop.xlane.xlu0 %2593  ;;  %v9498_v2 = vpop.xlane.xlu1 %3158  ;;  %v7701_v45 = vld [vmem:[#allocation13 + $0x3e4] ss:$16 sps:$4 sm:$0xff]  }
 0x714   : > { %5409 = vmatpush1.bf16.msra.mxu0 %v7681_v31  ;;  %v7719_v31 = vld [vmem:[#allocation13 + $0x384] ss:$16 sps:$4 sm:$0xff]  }
 0x715   : > { %5302 = vmatpush2.bf16.msra.mxu1 %v7615_v16  ;;  %5410 = vmatprep.subr.bf16.mxu0 %v7689_v54  ;;  %v7630_v16 = vld [vmem:[#allocation13 + $0x140] ss:$16 sps:$4 sm:$0xff]  }
 0x716   : > { %3723 = vadd.xlane.f32.xlu0 %v9236_v30  ;;  %4288 = vadd.xlane.f32.xlu1 %v9439_v9 }
 0x717   : > { %5303 = vmatprep.subr.bf16.mxu1 %v7620_v32  ;;  %v9502_v52 = vpop.xlane.xlu0 %3160  ;;  %v9504_v10 = vpop.xlane.xlu1 %2595  ;;  %v7713_v32 = vld [vmem:[#allocation13 + $0x3a4] ss:$16 sps:$4 sm:$0xff]  }
 0x718   : > { %5411 = vmatpush1.bf16.msra.mxu0 %v7687_v8  ;;  %v7641_v8 = vld [vmem:[#allocation13 + $0xec] ss:$16 sps:$4 sm:$0xff]  }
 0x719   : > { %5304 = vmatpush2.bf16.msra.mxu1 %v7618_v7  ;;  %5412 = vmatprep.subr.bf16.mxu0 %v7695_v46 }
 0x71a   : > { %4290 = vadd.xlane.f32.xlu0 %v9449_v35  ;;  %3725 = vadd.xlane.f32.xlu1 %v9238_v50 }
 0x71b   : > { %5305 = vmatprep.subr.bf16.mxu1 %v7623_v53  ;;  %v9508_v30 = vpop.xlane.xlu0 %2597  ;;  %v9510_v9 = vpop.xlane.xlu1 %3162  ;;  %v7636_v53 = vld [vmem:[#allocation13 + $0x100] ss:$16 sps:$4 sm:$0xff]  }
 0x71c   : > { %5413 = vmatpush1.bf16.msra.mxu0 %v7693_v43 }
 0x71d   : > { %5306 = vmatpush2.bf16.msra.mxu1 %v7621_v23  ;;  %5414 = vmatprep.subr.bf16.mxu0 %v7701_v45 }
 0x71e   : > { %3727 = vadd.xlane.f32.xlu0 %v9242_v14  ;;  %4292 = vadd.xlane.f32.xlu1 %v9451_v19 }
 0x71f   : > { %5307 = vmatprep.subr.bf16.mxu1 %v7626_v34  ;;  %v3708_v50 = vpop.xlane.xlu0 %3707  ;;  %v9516_v35 = vpop.xlane.xlu1 %2599  ;;  %v10350_v34 = vld [vmem:[#allocation66_spill] sm:$0xff] }
 0x720   : > { %7923 = vrcp.f32 %v3708_v50  ;;  %5415 = vmatpush2.bf16.msra.mxu0 %v7699_v33  ;;  %v7725_v50 = vld [vmem:[#allocation13 + $0x364] ss:$16 sps:$4 sm:$0xff]   ;;  %v7644_v33 = vld [vmem:[#allocation13 + $0xcc] ss:$16 sps:$4 sm:$0xff]  }
 0x721   : > { %5308 = vmatpush2.bf16.msra.mxu1 %v7624_v59  ;;  %5416 = vmatprep.subr.bf16.mxu0 %v7707_v40  ;;  %v10351_v59 = vld [vmem:[#allocation49_spill] sm:$0xff] }
 0x722   : > { %4294 = vadd.xlane.f32.xlu0 %v9460_v0  ;;  %3729 = vadd.xlane.f32.xlu1 %v9244_v15 }
 0x723   : > { %5309 = vmatprep.subr.bf16.mxu1 %v7629_v38  ;;  %v9522_v14 = vpop.xlane.xlu0 %3164  ;;  %v3710_v19 = vpop.xlane.xlu1 %3709  ;;  %v7639_v38 = vld [vmem:[#allocation13 + $0xe8] ss:$16 sps:$4 sm:$0xff]  }
 0x724   : > { %7925 = vrcp.f32 %v3710_v19  ;;  %5417 = vmatpush2.bf16.msra.mxu0 %v7705_v22  ;;  %v7731_v22 = vld [vmem:[#allocation13 + $0x344] ss:$16 sps:$4 sm:$0xff]  }
 0x725   : > { %5310 = vmatpush2.bf16.msra.mxu1 %v7627_v12  ;;  %7927 = vrcp.f32 %v9469_v20  ;;  %v7633_v20 = vld [vmem:[#allocation13 + $0x120] ss:$16 sps:$4 sm:$0xff]   ;;  %5418 = vmatprep.subr.bf16.mxu0 %v7713_v32 }
 0x726   : > { %3731 = vadd.xlane.f32.xlu0 %v9248_v11  ;;  %4296 = vadd.xlane.f32.xlu1 %v9462_v18  ;;  %7929 = vrcp.f32 %v9481_v58  ;;  %v7711_v11 = vld [vmem:[#allocation13 + $0x3a0] ss:$16 sps:$4 sm:$0xff]   ;;  %v7916_v18 = vpop.eup %7915 }
 0x727   : > { %5311 = vmatprep.subr.bf16.mxu1 %v7632_v57  ;;  %v9528_v15 = vpop.xlane.xlu0 %2601  ;;  %v9530_v0 = vpop.xlane.xlu1 %3166  ;;  %7931 = vrcp.f32 %v9456_v1 }
 0x728   : > { %7933 = vrcp.f32 %v9467_v55  ;;  %v7918_v7 = vpop.eup %7917  ;;  %5419 = vmatpush2.bf16.msra.mxu0 %v7711_v11 }
 0x729   : > { %5312 = vmatpush2.bf16.msra.mxu1 %v7630_v16  ;;  %7935 = vrcp.f32 %v9479_v27  ;;  %v7920_v55 = vpop.eup %7919  ;;  %v3348_v46 = vmul.f32 %v7918_v7, %v10350_v34  ;;  %5420 = vmatprep.subr.bf16.mxu0 %v7719_v31 }
 0x72a   : > { %4298 = vadd.xlane.f32.xlu0 %v9465_v13  ;;  %3733 = vadd.xlane.f32.xlu1 %v9250_v47  ;;  %7937 = vrcp.f32 %v9491_v41  ;;  %v7717_v13 = vld [vmem:[#allocation13 + $0x380] ss:$16 sps:$4 sm:$0xff]   ;;  %v7922_v54 = vpop.eup %7921  ;;  %v2782_v43 = vmul.f32 %v7920_v55, %v10351_v59  ;;  %v7737_v55 = vld [vmem:[#allocation13 + $0x324] ss:$16 sps:$4 sm:$0xff]  }
 0x72b   : > { %5313 = vmatprep.subr.bf16.mxu1 %v7635_v49  ;;  %v9536_v58 = vpop.xlane.xlu1 %2603  ;;  %v3712_v1 = vpop.xlane.xlu0 %3711  ;;  %v10349_v47 = vld [vmem:[#allocation51_spill] sm:$0xff]  ;;  %7939 = vrcp.f32 %v9498_v2  ;;  %v10352_v2 = vld [vmem:[#allocation64_spill] sm:$0xff] }
 0x72c   : > { %v2783_v23 = vmul.f32 %v7916_v18, %v10349_v47  ;;  %7941 = vrcp.f32 %v3712_v1  ;;  %5421 = vmatpush2.bf16.msra.mxu0 %v7717_v13  ;;  %v7647_v18 = vld [vmem:[#allocation13 + $0xac] ss:$16 sps:$4 sm:$0xff]   ;;  %v10356_v13 = vld [vmem:[#allocation69_spill] sm:$0xff] }
 0x72d   : > { %5314 = vmatpush2.bf16.msra.mxu1 %v7633_v20  ;;  %v7924_v41 = vpop.eup %7923  ;;  %7943 = vrcp.f32 %v9489_v25  ;;  %5422 = vmatprep.subr.bf16.mxu0 %v7725_v50  ;;  %v7729_v20 = vld [vmem:[#allocation13 + $0x340] ss:$16 sps:$4 sm:$0xff]   ;;  %v10355_v1 = vld [vmem:[#allocation48_spill] sm:$0xff] }
 0x72e   : > { %3735 = vadd.xlane.f32.xlu0 %v9254_v37  ;;  %4300 = vadd.xlane.f32.xlu1 %v9473_v48  ;;  %v3347_v37 = vmul.f32 %v7922_v54, %v10352_v2  ;;  %v7723_v48 = vld [vmem:[#allocation13 + $0x360] ss:$16 sps:$4 sm:$0xff]   ;;  %v9548_v12 = vpack.c.bf16 %v2783_v23, %v2782_v43  ;;  %v3908_v57 = vmul.f32 %v7924_v41, %v9278_v63  ;;  %v10353_v63 = vld [vmem:[#allocation50_spill] sm:$0xff] }
 0x72f   : > { %5315 = vmatprep.subr.bf16.mxu1 %v7638_v60  ;;  %v3714_v27 = vpop.xlane.xlu1 %3713  ;;  %v10354_v60 = vld [vmem:[#allocation71_spill] sm:$0xff]  ;;  %v7645_v54 = vld [vmem:[#allocation13 + $0xa8] ss:$16 sps:$4 sm:$0xff]  }
 0x730   : > { %7945 = vrcp.f32 %v3714_v27  ;;  %v9553_v40 = vpack.c.bf16 %v3348_v46, %v3347_v37  ;;  %5423 = vmatpush2.bf16.msra.mxu0 %v7723_v48  ;;  %v7735_v47 = vld [vmem:[#allocation13 + $0x320] ss:$16 sps:$4 sm:$0xff]   ;;  %v7743_v46 = vld [vmem:[#allocation13 + $0x304] ss:$16 sps:$4 sm:$0xff]   ;;  %v7648_v41 = vld [vmem:[#allocation13 + $0x88] ss:$16 sps:$4 sm:$0xff]  }
 0x731   : > { %5316 = vmatpush2.bf16.msra.mxu1 %v7636_v53  ;;  %v7926_v45 = vpop.eup %7925  ;;  %7947 = vrcp.f32 %v9504_v10  ;;  %5424 = vmatprep.subr.bf16.mxu0 %v7731_v22  ;;  %v7741_v59 = vld [vmem:[#allocation13 + $0x300] ss:$16 sps:$4 sm:$0xff]   ;;  %v7656_v37 = vld [vmem:[#allocation13 + $0x6c] ss:$16 sps:$4 sm:$0xff]   ;;  %v7654_v22 = vld [vmem:[#allocation13 + $0x68] ss:$16 sps:$4 sm:$0xff]  }
 0x732   : > { %3737 = vadd.xlane.f32.xlu1 %v9256_v26  ;;  %5511 = vmatprep.subr.bf16.mxu1 %v7641_v8  ;;  %v7928_v19 = vpop.eup %7927  ;;  %v3909_v25 = vmul.f32 %v7926_v45, %v9282_v28  ;;  %v7642_v26 = vld [vmem:[#allocation13 + $0xc8] ss:$16 sps:$4 sm:$0xff]   ;;  %7949 = vrcp.f32 %v9510_v9  ;;  %v7650_v9 = vld [vmem:[#allocation13 + $0x8c] ss:$16 sps:$4 sm:$0xff]   ;;  %v10357_v50 = vld [vmem:[#allocation55_spill] sm:$0xff] }
 0x733   : > { %v7930_v16 = vpop.eup %7929  ;;  %v2785_v28 = vmul.f32 %v7928_v19, %v10353_v63  ;;  %7951 = vrcp.f32 %v9496_v17  ;;  %v9577_v45 = vld [vmem:[#allocation13 + $0x2ec] ss:$16 sps:$4 sm:$0xff]  }
 0x734   : > { %5318 = vmatmul.mubr.bf16.vlgmr.msra.gmra.mxu1 %v9548_v12  ;;  %v7932_v49 = vpop.eup %7931  ;;  %v9556_v32 = vpack.c.bf16 %v3909_v25, %v3908_v57  ;;  %v3350_v7 = vmul.f32 %v7930_v16, %v10354_v60  ;;  %5425 = vmatpush2.bf16.msra.mxu0 %v7729_v20  ;;  %7953 = vrcp.f32 %v9502_v52  ;;  %v10359_v57 = vld [vmem:[#allocation53_spill] sm:$0xff]  ;;  %v3171_v20 = vpop.xlane.xlu1 %3170 }
 0x735   : > { %5327 = vmatprep.mubr.bf16.mxu1 %v9553_v40  ;;  %5512 = vmatpush1.bf16.msra.mxu1 %v7639_v38  ;;  %v7934_v11 = vpop.eup %7933  ;;  %v2784_v31 = vmul.f32 %v7932_v49, %v10355_v1  ;;  %7955 = vrcp.f32 %v9516_v35  ;;  %v10358_v38 = vld [vmem:[#allocation70_spill] sm:$0xff]  ;;  %v10360_v35 = vld [vmem:[#allocation68_spill] sm:$0xff]  ;;  %v10362_v1 = vld [vmem:[#allocation75_spill] sm:$0xff] }
 0x736   : > { %5513 = vmatprep.subr.bf16.mxu1 %v7644_v33  ;;  %v7936_v53 = vpop.eup %7935  ;;  %v3349_v10 = vmul.f32 %v7934_v11, %v10356_v13  ;;  %5426 = vmatprep.subr.bf16.mxu0 %v7737_v55  ;;  %7957 = vrcp.f32 %v9530_v0  ;;  %v7660_v11 = vld [vmem:[#allocation13 + $0x48] ss:$16 sps:$4 sm:$0xff]   ;;  %v10364_v13 = vld [vmem:[#allocation73_spill] sm:$0xff] }
 0x737   : > { %v7938_v23 = vpop.eup %7937  ;;  %v9567_v8 = vpack.c.bf16 %v2785_v28, %v2784_v31  ;;  %7959 = vrcp.f32 %v9508_v30  ;;  %v2786_v25 = vmul.f32 %v7936_v53, %v10359_v57  ;;  %v3169_v28 = vpop.xlane.xlu0 %3168  ;;  %v10363_v55 = vld [vmem:[#allocation52_spill] sm:$0xff] }
 0x738   : > { %v7940_v27 = vpop.eup %7939  ;;  %v9569_v17 = vpack.c.bf16 %v3350_v7, %v3349_v10  ;;  %5427 = vmatpush2.bf16.msra.mxu0 %v7735_v47  ;;  %v2787_v2 = vmul.f32 %v7938_v23, %v10357_v50  ;;  %7961 = vrcp.f32 %v9522_v14  ;;  %v7668_v7 = vld [vmem:[#allocation13 + $0x2c] ss:$16 sps:$4 sm:$0xff]  }
 0x739   : > { %5514 = vmatpush1.bf16.msra.mxu1 %v7642_v26  ;;  %v7942_v34 = vpop.eup %7941  ;;  %5428 = vmatprep.subr.bf16.mxu0 %v7743_v46  ;;  %v3352_v48 = vmul.f32 %v7940_v27, %v10358_v38  ;;  %7963 = vrcp.f32 %v9536_v58  ;;  %v7674_v58 = vld [vmem:[#allocation13 + $0xc] ss:$16 sps:$4 sm:$0xff]  }
 0x73a   : > { %5515 = vmatprep.subr.bf16.mxu1 %v7647_v18  ;;  %v7944_v52 = vpop.eup %7943  ;;  %v3910_v33 = vmul.f32 %v7942_v34, %v9276_v24  ;;  %v9588_v49 = vpack.c.bf16 %v2787_v2, %v2786_v25  ;;  %v7662_v24 = vld [vmem:[#allocation13 + $0x4c] ss:$16 sps:$4 sm:$0xff]   ;;  %7965 = vrcp.f32 %v3171_v20  ;;  %v10367_v2 = vld [vmem:[#allocation57_spill] sm:$0xff] }
 0x73b   : > { %v3351_v16 = vmul.f32 %v7944_v52, %v10360_v35  ;;  %v10361_v18 = vld [vmem:[#allocation54_spill] sm:$0xff]  ;;  %7967 = vrcp.f32 %v9528_v15  ;;  %v10365_v52 = vld [vmem:[#allocation59_spill] sm:$0xff]  ;;  %v10368_v38 = vld [vmem:[#allocation72_spill] sm:$0xff] }
 0x73c   : > { %5328 = vmatmul.mubr.bf16.gmra.mxu1 %v9567_v8  ;;  %5429 = vmatpush2.bf16.msra.mxu0 %v7741_v59  ;;  %7969 = vrcp.f32 %v3169_v28  ;;  %v7672_v15 = vld [vmem:[#allocation13 + $0x8] ss:$16 sps:$4 sm:$0xff]   ;;  %v7680_v59 = vld [vmem:[#allocation13 + $0x1ec] ss:$16 sps:$4 sm:$0xff]  }
 0x73d   : > { %5337 = vmatprep.mubr.bf16.mxu1 %v9569_v17  ;;  %5516 = vmatpush1.bf16.msra.mxu1 %v7645_v54  ;;  %v7946_v43 = vpop.eup %7945  ;;  %v9590_v26 = vpack.c.bf16 %v3352_v48, %v3351_v16  ;;  %v7666_v54 = vld [vmem:[#allocation13 + $0x28] ss:$16 sps:$4 sm:$0xff]   ;;  %v7686_v57 = vld [vmem:[#allocation13 + $0x1cc] ss:$16 sps:$4 sm:$0xff]  }
 0x73e   : > { %5517 = vmatprep.subr.bf16.mxu1 %v7650_v9  ;;  %v3911_v19 = vmul.f32 %v7946_v43, %v9280_v3  ;;  %5624 = vmatprep.subr.bf16.mxu0 %v9577_v45  ;;  %v7948_v3 = vpop.eup %7947  ;;  %v10366_v43 = vld [vmem:[#allocation74_spill] sm:$0xff]  ;;  %v10371_v28 = vld [vmem:[#allocation56_spill] sm:$0xff] }
 0x73f   : > { %v7950_v30 = vpop.eup %7949  ;;  %v2789_v60 = vmul.f32 %v7948_v3, %v10361_v18 }
 0x740   : > { %v9586_v0 = vpack.c.bf16 %v3911_v19, %v3910_v33  ;;  %v7952_v14 = vpop.eup %7951  ;;  %v3354_v31 = vmul.f32 %v7950_v30, %v10362_v1  ;;  %v7678_v33 = vld [vmem:[#allocation13 + $0x1e8] ss:$16 sps:$4 sm:$0xff]  }
 0x741   : > { %5518 = vmatpush1.bf16.msra.mxu1 %v7648_v41  ;;  %v7954_v63 = vpop.eup %7953  ;;  %v2788_v53 = vmul.f32 %v7952_v14, %v10363_v55  ;;  %v10369_v30 = vld [vmem:[#allocation58_spill] sm:$0xff] }
 0x742   : > { %5519 = vmatprep.subr.bf16.mxu1 %v7656_v37  ;;  %v3353_v10 = vmul.f32 %v7954_v63, %v10364_v13  ;;  %v7956_v23 = vpop.eup %7955  ;;  %v7692_v14 = vld [vmem:[#allocation13 + $0x1ac] ss:$16 sps:$4 sm:$0xff]   ;;  %v7690_v1 = vld [vmem:[#allocation13 + $0x1a8] ss:$16 sps:$4 sm:$0xff]  }
 0x743   : > { %v9600_v47 = vpack.c.bf16 %v2789_v60, %v2788_v53  ;;  %v7958_v27 = vpop.eup %7957  ;;  %v2791_v41 = vmul.f32 %v7956_v23, %v10365_v52  ;;  %v10372_v60 = vld [vmem:[#allocation77_spill] sm:$0xff]  ;;  %v7698_v55 = vld [vmem:[#allocation13 + $0x18c] ss:$16 sps:$4 sm:$0xff]   ;;  %v7696_v13 = vld [vmem:[#allocation13 + $0x188] ss:$16 sps:$4 sm:$0xff]  }
 0x744   : > { %5338 = vmatmul.mubr.bf16.gmra.mxu1 %v9588_v49  ;;  %v9602_v9 = vpack.c.bf16 %v3354_v31, %v3353_v10  ;;  %v7960_v34 = vpop.eup %7959  ;;  %v3356_v50 = vmul.f32 %v7958_v27, %v10366_v43  ;;  %v7704_v10 = vld [vmem:[#allocation13 + $0x16c] ss:$16 sps:$4 sm:$0xff]   ;;  %v7708_v23 = vld [vmem:[#allocation13 + $0x148] ss:$16 sps:$4 sm:$0xff]  }
 0x745   : > { %5347 = vmatprep.mubr.bf16.mxu1 %v9590_v26  ;;  %5520 = vmatpush1.bf16.msra.mxu1 %v7654_v22  ;;  %v7962_v46 = vpop.eup %7961  ;;  %v2790_v37 = vmul.f32 %v7960_v34, %v10367_v2  ;;  %v7716_v27 = vld [vmem:[#allocation13 + $0x12c] ss:$16 sps:$4 sm:$0xff]   ;;  %v7714_v34 = vld [vmem:[#allocation13 + $0x128] ss:$16 sps:$4 sm:$0xff]  }
 0x746   : > { %5521 = vmatprep.subr.bf16.mxu1 %v7662_v24  ;;  %v3355_v48 = vmul.f32 %v7962_v46, %v10368_v38  ;;  %v7964_v25 = vpop.eup %7963  ;;  %v7684_v24 = vld [vmem:[#allocation13 + $0x1c8] ss:$16 sps:$4 sm:$0xff]  }
 0x747   : > { %v9610_v19 = vpack.c.bf16 %v2791_v41, %v2790_v37  ;;  %v7966_v16 = vpop.eup %7965  ;;  %v2793_v20 = vmul.f32 %v7964_v25, %v10369_v30  ;;  %v7720_v46 = vld [vmem:[#allocation13 + $0x108] ss:$16 sps:$4 sm:$0xff]  }
 0x748   : > { %v9612_v35 = vpack.c.bf16 %v3356_v50, %v3355_v48  ;;  %v7968_v22 = vpop.eup %7967 }
 0x749   : > { %5522 = vmatpush1.bf16.msra.mxu1 %v7660_v11  ;;  %v7970_v3 = vpop.eup %7969  ;;  %v10370_v11 = vld [vmem:[#allocation79_spill] sm:$0xff]  ;;  %v2792_v18 = vmul.f32 %v7968_v22, %v10371_v28 }
 0x74a   : > { %5523 = vmatprep.subr.bf16.mxu1 %v7668_v7  ;;  %v3358_v63 = vmul.f32 %v7966_v16, %v10370_v11  ;;  %v3357_v7 = vmul.f32 %v7970_v3, %v10372_v60  ;;  %v10373_v3 = vld [vmem:[#allocation61_spill] sm:$0xff] }
 0x74b   : > { %v9620_v31 = vpack.c.bf16 %v2793_v20, %v2792_v18  ;;  %v10374_v20 = vld [vmem:[#allocation63_spill] sm:$0xff] }
 0x74c   : > { %5348 = vmatmul.mubr.bf16.gmra.mxu1 %v9600_v47  ;;  %v9622_v53 = vpack.c.bf16 %v3358_v63, %v3357_v7  ;;  %v10375_v7 = vld [vmem:[#allocation76_spill] sm:$0xff] }
 0x74d   : > { %5357 = vmatprep.mubr.bf16.mxu1 %v9602_v9  ;;  %5524 = vmatpush1.bf16.msra.mxu1 %v7666_v54  ;;  %v7702_v54 = vld [vmem:[#allocation13 + $0x168] ss:$16 sps:$4 sm:$0xff]  }
 0x74e   : > { %5525 = vmatprep.subr.bf16.mxu1 %v7674_v58  ;;  %v7710_v58 = vld [vmem:[#allocation13 + $0x14c] ss:$16 sps:$4 sm:$0xff]  }
 0x751   : > { %5526 = vmatpush1.bf16.msra.mxu1 %v7672_v15  ;;  %v7722_v15 = vld [vmem:[#allocation13 + $0x10c] ss:$16 sps:$4 sm:$0xff]  }
 0x752   : > { %5527 = vmatprep.subr.bf16.mxu1 %v7680_v59 }
 0x754   : > { %5358 = vmatmul.mubr.bf16.gmra.mxu1 %v9610_v19 }
 0x755   : > { %5367 = vmatprep.mubr.bf16.mxu1 %v9612_v35  ;;  %5528 = vmatpush2.bf16.msra.mxu1 %v7678_v33 }
 0x756   : > { %5529 = vmatprep.subr.bf16.mxu1 %v7686_v57 }
 0x759   : > { %5530 = vmatpush2.bf16.msra.mxu1 %v7684_v24 }
 0x75a   : > { %5531 = vmatprep.subr.bf16.mxu1 %v7692_v14 }
 0x75c   : > { %5368 = vmatmul.mubr.bf16.gmra.mxu1 %v9620_v31 }
 0x75d   : > { %5377 = vmatprep.mubr.bf16.mxu1 %v9622_v53  ;;  %5532 = vmatpush2.bf16.msra.mxu1 %v7690_v1 }
 0x75e   : > { %5533 = vmatprep.subr.bf16.mxu1 %v7698_v55  ;;  %v10376_v55 = vld [vmem:[#allocation78_spill] sm:$0xff] }
 0x761   : > { %5534 = vmatpush2.bf16.msra.mxu1 %v7696_v13 }
 0x762   : > { %5535 = vmatprep.subr.bf16.mxu1 %v7704_v10 }
 0x765   : > { %5536 = vmatpush2.bf16.msra.mxu1 %v7702_v54 }
 0x766   : > { %5537 = vmatprep.subr.bf16.mxu1 %v7710_v58 }
 0x769   : > { %5538 = vmatpush2.bf16.msra.mxu1 %v7708_v23  ;;  %v10377_v23 = vld [vmem:[#allocation60_spill] sm:$0xff] }
 0x76a   : > { %5539 = vmatprep.subr.bf16.mxu1 %v7716_v27 }
 0x76d   : > { %5540 = vmatpush2.bf16.msra.mxu1 %v7714_v34  ;;  %v10378_v34 = vld [vmem:[#allocation62_spill] sm:$0xff] }
 0x76e   : > { %5541 = vmatprep.subr.bf16.mxu1 %v7722_v15 }
 0x771   : > { %5542 = vmatpush2.bf16.msra.mxu1 %v7720_v46 }
 0x772   : > { %7229 = vmatprep.subr.bf16.mxu1 %v9577_v45 }
 0x777   : > { %v4275_v52 = vpop.xlane.xlu0 %4274 }
 0x77b   : > { %v4271_v41 = vpop.xlane.xlu0 %4270  ;;  %v4277_v59 = vpop.xlane.xlu1 %4276 }
 0x77f   : > { %v2606_v43 = vpop.xlane.xlu0 %2605  ;;  %v4273_v50 = vpop.xlane.xlu1 %4272 }
 0x780   : > { %7971 = vrcp.f32 %v2606_v43 }
 0x783   : > { %v9627_v2 = vpop.xlane.xlu0 %3715  ;;  %v2608_v37 = vpop.xlane.xlu1 %2607 }
 0x784   : > { %7973 = vrcp.f32 %v2608_v37  ;;  %v7726_v37 = vld [vmem:[#allocation13 + $0x2e8] ss:$16 sps:$4 sm:$0xff]  }
 0x787   : > { %v3173_v38 = vpop.xlane.xlu0 %3172  ;;  %v3718_v48 = vpop.xlane.xlu1 %3717 }
 0x788   : > { %7975 = vrcp.f32 %v3173_v38 }
 0x78b   : > { %v4279_v33 = vpop.xlane.xlu0 %4278  ;;  %v3175_v57 = vpop.xlane.xlu1 %3174 }
 0x78c   : > { %7977 = vrcp.f32 %v3175_v57  ;;  %v7734_v57 = vld [vmem:[#allocation13 + $0x2cc] ss:$16 sps:$4 sm:$0xff]  }
 0x78d   : > { %v7972_v45 = vpop.eup %7971 }
 0x78e   : > { %v2794_v30 = vmul.f32 %v7972_v45, %v10373_v3 }
 0x78f   : > { %v9629_v25 = vpop.xlane.xlu0 %4282  ;;  %v4281_v16 = vpop.xlane.xlu1 %4280 }
 0x791   : > { %v7974_v22 = vpop.eup %7973 }
 0x792   : > { %v2795_v14 = vmul.f32 %v7974_v22, %v10374_v20  ;;  %v9649_v22 = vld [vmem:[#allocation13 + $0x2c8] ss:$16 sps:$4 sm:$0xff]  }
 0x793   : > { %v4285_v24 = vpop.xlane.xlu1 %4284  ;;  %v2610_v11 = vpop.xlane.xlu0 %2609 }
 0x794   : > { %v9633_v63 = vpack.c.bf16 %v2795_v14, %v2794_v30  ;;  %7979 = vrcp.f32 %v2610_v11  ;;  %v9652_v30 = vld [vmem:[#allocation13 + $0x2a8] ss:$16 sps:$4 sm:$0xff]  }
 0x795   : > { %v7976_v18 = vpop.eup %7975 }
 0x796   : > { %5378 = vmatmul.mubr.bf16.gmra.mxu1 %v9633_v63  ;;  %v3359_v1 = vmul.f32 %v7976_v18, %v10375_v7  ;;  %v9662_v7 = vld [vmem:[#allocation13 + $0x288] ss:$16 sps:$4 sm:$0xff]  }
 0x797   : > { %v2612_v28 = vpop.xlane.xlu1 %2611  ;;  %v3720_v38 = vpop.xlane.xlu0 %3719 }
 0x798   : > { %7981 = vrcp.f32 %v2612_v28 }
 0x799   : > { %v7978_v60 = vpop.eup %7977  ;;  %7983 = vrcp.f32 %v4271_v41 }
 0x79a   : > { %v3360_v13 = vmul.f32 %v7978_v60, %v10376_v55  ;;  %7985 = vrcp.f32 %v4277_v59  ;;  %v7740_v59 = vld [vmem:[#allocation13 + $0x2ac] ss:$16 sps:$4 sm:$0xff]  }
 0x79b   : > { %7987 = vrcp.f32 %v4273_v50  ;;  %v3722_v43 = vpop.xlane.xlu1 %3721 }
 0x79c   : > { %v9638_v10 = vpack.c.bf16 %v3360_v13, %v3359_v1  ;;  %7989 = vrcp.f32 %v4275_v52 }
 0x79d   : > { %7991 = vrcp.f32 %v4281_v16 }
 0x79e   : > { %5387 = vmatprep.mubr.bf16.mxu1 %v9638_v10  ;;  %7993 = vrcp.f32 %v4279_v33 }
 0x79f   : > { %v4289_v41 = vpop.xlane.xlu1 %4288  ;;  %7995 = vrcp.f32 %v3718_v48 }
 0x7a0   : > { %7997 = vrcp.f32 %v9627_v2 }
 0x7a1   : > { %v7980_v54 = vpop.eup %7979  ;;  %7999 = vrcp.f32 %v4285_v24  ;;  %v9675_v24 = vld [vmem:[#allocation13 + $0x268] ss:$16 sps:$4 sm:$0xff]  }
 0x7a2   : > { %v2796_v27 = vmul.f32 %v7980_v54, %v10377_v23  ;;  %8001 = vrcp.f32 %v9629_v25 }
 0x7a3   : > { %v3726_v16 = vpop.xlane.xlu1 %3725  ;;  %8003 = vrcp.f32 %v3722_v43 }
 0x7a4   : > { %8005 = vrcp.f32 %v3720_v38 }
 0x7a5   : > { %v7982_v58 = vpop.eup %7981  ;;  %8007 = vrcp.f32 %v4289_v41 }
 0x7a6   : > { %v2797_v15 = vmul.f32 %v7982_v58, %v10378_v34  ;;  %v7984_v52 = vpop.eup %7983  ;;  %v9678_v58 = vld [vmem:[#allocation13 + $0x24c] ss:$16 sps:$4 sm:$0xff]  }
 0x7a7   : > { %v4293_v54 = vpop.xlane.xlu1 %4292 }
 0x7a8   : > { %v9643_v46 = vpack.c.bf16 %v2797_v15, %v2796_v27 }
 0x7aa   : > { %5388 = vmatmul.mubr.bf16.gmra.mxu1 %v9643_v46 }
 0x7ab   : > { %5543 = vmatprep.mubr.bf16.mxu1 %v9487_v4  ;;  %v4287_v4 = vpop.xlane.xlu0 %4286  ;;  %v3730_v38 = vpop.xlane.xlu1 %3729 }
 0x7ac   : > { %8009 = vrcp.f32 %v4287_v4 }
 0x7ad   : > { %8011 = vrcp.f32 %v3726_v16 }
 0x7af   : > { %v3724_v48 = vpop.xlane.xlu0 %3723 }
 0x7b0   : > { %8013 = vrcp.f32 %v3724_v48 }
 0x7b1   : > { %8015 = vrcp.f32 %v4293_v54 }
 0x7b2   : > { %5544 = vmatmul.mubr.bf16.vlgmr.msra.gmra.mxu1 %v9548_v12  ;;  %v7986_v12 = vpop.eup %7985 }
 0x7b3   : > { %5553 = vmatprep.mubr.bf16.mxu1 %v9553_v40  ;;  %7245 = vmatpush1.bf16.msra.mxu1 %v7726_v37  ;;  %v9654_v40 = vld [vmem:[#allocation13 + $0x28c] ss:$16 sps:$4 sm:$0xff]   ;;  %v7988_v20 = vpop.eup %7987  ;;  %v4291_v27 = vpop.xlane.xlu0 %4290 }
 0x7b4   : > { %v7215_v45 = vpop.f32.mrf.mxu1  ;;  %7230 = vmatprep.subr.bf16.mxu1 %v7734_v57  ;;  %v7990_v33 = vpop.eup %7989  ;;  %8017 = vrcp.f32 %v4291_v27 }
 0x7b5   : > { %v4473_v1 = vmul.f32 %v7990_v33, %v7215_v45  ;;  %v7992_v23 = vpop.eup %7991  ;;  %v9725_v33 = vld [vmem:[#allocation13 + $0x3e8] ss:$16 sps:$4 sm:$0xff]   ;;  %8019 = vrcp.f32 %v3730_v38 }
 0x7b6   : > { %v4408_v3 = vpop.f32.mrf.mxu1  ;;  %v7994_v15 = vpop.eup %7993 }
 0x7b7   : > { %7246 = vmatpush1.bf16.msra.mxu1 %v9649_v22  ;;  %v4471_v11 = vmul.f32 %v7984_v52, %v4408_v3  ;;  %v9696_v52 = vld [vmem:[#allocation13 + $0x228] ss:$16 sps:$4 sm:$0xff]  }
 0x7b8   : > { %v7216_v50 = vpop.f32.mrf.mxu1  ;;  %7231 = vmatprep.subr.bf16.mxu1 %v7740_v59 }
 0x7b9   : > { %v4474_v28 = vmul.f32 %v7986_v12, %v7216_v50  ;;  %v3728_v50 = vpop.xlane.xlu0 %3727 }
 0x7ba   : > { %v4411_v14 = vpop.f32.mrf.mxu1  ;;  %5554 = vmatmul.mubr.bf16.gmra.mxu1 %v9567_v8  ;;  %v9667_v8 = vld [vmem:[#allocation13 + $0x26c] ss:$16 sps:$4 sm:$0xff]   ;;  %8021 = vrcp.f32 %v3728_v50 }
 0x7bb   : > { %v4472_v18 = vmul.f32 %v7988_v20, %v4411_v14  ;;  %5563 = vmatprep.mubr.bf16.mxu1 %v9569_v17  ;;  %7247 = vmatpush1.bf16.msra.mxu1 %v9652_v30  ;;  %v9670_v2 = vpack.c.bf16 %v4474_v28, %v4473_v1 }
 0x7bc   : > { %v9660_v60 = vpop.f32.mrf.mxu1  ;;  %7232 = vmatprep.subr.bf16.mxu1 %v9654_v40 }
 0x7bd   : > { %v9664_v55 = vpack.c.bf16 %v4472_v18, %v4471_v11  ;;  %v4297_v11 = vpop.xlane.xlu1 %4296  ;;  %v4295_v28 = vpop.xlane.xlu0 %4294 }
 0x7be   : > { %v4424_v13 = vpop.f32.mrf.mxu1  ;;  %8023 = vrcp.f32 %v4297_v11 }
 0x7bf   : > { %5430 = vmatprep.mubr.bf16.mxu0 %v9664_v55  ;;  %7248 = vmatpush1.bf16.msra.mxu1 %v9662_v7  ;;  %v4475_v43 = vmul.f32 %v7994_v15, %v4424_v13  ;;  %8025 = vrcp.f32 %v4295_v28 }
 0x7c0   : > { %v7220_v17 = vpop.f32.mrf.mxu1  ;;  %5431 = vmatmul.mubr.bf16.vlgmr.msra.gmra.mxu0 %v9556_v32  ;;  %7233 = vmatprep.subr.bf16.mxu1 %v9667_v8 }
 0x7c1   : > { %5440 = vmatprep.mubr.bf16.mxu0 %v9670_v2  ;;  %5625 = vmatpush1.bf16.msra.mxu0 %v7726_v37  ;;  %v9686_v37 = vld [vmem:[#allocation13 + $0x248] ss:$16 sps:$4 sm:$0xff]   ;;  %v3734_v13 = vpop.xlane.xlu1 %3733 }
 0x7c2   : > { %v4427_v25 = vpop.f32.mrf.mxu1  ;;  %5626 = vmatprep.subr.bf16.mxu0 %v7734_v57  ;;  %5564 = vmatmul.mubr.bf16.gmra.mxu1 %v9588_v49  ;;  %v9690_v57 = vld [vmem:[#allocation13 + $0x22c] ss:$16 sps:$4 sm:$0xff]   ;;  %v7996_v49 = vpop.eup %7995  ;;  %8027 = vrcp.f32 %v3734_v13 }
 0x7c3   : > { %v4476_v34 = vmul.f32 %v7992_v23, %v4427_v25  ;;  %5573 = vmatprep.mubr.bf16.mxu1 %v9590_v26  ;;  %7249 = vmatpush1.bf16.msra.mxu1 %v9675_v24  ;;  %v7998_v41 = vpop.eup %7997  ;;  %v3913_v4 = vmul.f32 %v7996_v49, %v9290_v56  ;;  %v3732_v25 = vpop.xlane.xlu0 %3731 }
 0x7c4   : > { %v9684_v45 = vpop.f32.mrf.mxu1  ;;  %7234 = vmatprep.subr.bf16.mxu1 %v9678_v58  ;;  %v3912_v16 = vmul.f32 %v7998_v41, %v9286_v21  ;;  %8029 = vrcp.f32 %v3732_v25 }
 0x7c5   : > { %5627 = vmatpush1.bf16.msra.mxu0 %v9649_v22  ;;  %v9692_v3 = vpack.c.bf16 %v4476_v34, %v4475_v43  ;;  %v9700_v22 = vld [vmem:[#allocation13 + $0x20c] ss:$16 sps:$4 sm:$0xff]  }
 0x7c6   : > { %5628 = vmatprep.subr.bf16.mxu0 %v7740_v59  ;;  %v4440_v26 = vpop.f32.mrf.mxu1  ;;  %v8000_v59 = vpop.eup %7999  ;;  %v9716_v56 = vpack.c.bf16 %v3913_v4, %v3912_v16  ;;  %v9757_v43 = vld [vmem:[#allocation13 + $0x38c] ss:$16 sps:$4 sm:$0xff]  }
 0x7c7   : > { %7250 = vmatpush1.bf16.msra.mxu1 %v9686_v37  ;;  %v4478_v12 = vmul.f32 %v8000_v59, %v7220_v17  ;;  %v8002_v20 = vpop.eup %8001  ;;  %v4299_v38 = vpop.xlane.xlu0 %4298 }
 0x7c8   : > { %5441 = vmatmul.mubr.bf16.gmra.mxu0 %v9586_v0  ;;  %7235 = vmatprep.subr.bf16.mxu1 %v9690_v57  ;;  %v9706_v14 = vpop.f32.mrf.mxu1 }
 0x7c9   : > { %5450 = vmatprep.mubr.bf16.mxu0 %v9692_v3  ;;  %5629 = vmatpush1.bf16.msra.mxu0 %v9652_v30  ;;  %v9710_v30 = vld [vmem:[#allocation13 + $0x208] ss:$16 sps:$4 sm:$0xff]  }
 0x7ca   : > { %5630 = vmatprep.subr.bf16.mxu0 %v9654_v40  ;;  %5574 = vmatmul.mubr.bf16.gmra.mxu1 %v9600_v47  ;;  %v4477_v40 = vmul.f32 %v8002_v20, %v9660_v60  ;;  %v9719_v47 = vld [vmem:[#allocation13 + $0x3ec] ss:$16 sps:$4 sm:$0xff]   ;;  %v4443_v21 = vpop.f32.mrf.mxu1 }
 0x7cb   : > { %5583 = vmatprep.mubr.bf16.mxu1 %v9602_v9  ;;  %7251 = vmatpush1.bf16.msra.mxu1 %v9696_v52  ;;  %v8004_v9 = vpop.eup %8003 }
 0x7cc   : > { %7236 = vmatprep.subr.bf16.mxu1 %v9700_v22  ;;  %v9721_v18 = vpack.c.bf16 %v4478_v12, %v4477_v40  ;;  %v8006_v60 = vpop.eup %8005  ;;  %v3915_v1 = vmul.f32 %v8004_v9, %v9288_v36  ;;  %v9735_v54 = vpop.f32.mrf.mxu1  ;;  %v7774_v9 = vld [vmem:[#allocation13 + $0x348] ss:$16 sps:$4 sm:$0xff]  }
 0x7cd   : > { %5631 = vmatpush1.bf16.msra.mxu0 %v9662_v7  ;;  %v9729_v7 = vld [vmem:[#allocation13 + $0x3cc] ss:$16 sps:$4 sm:$0xff]   ;;  %v8008_v48 = vpop.eup %8007  ;;  %v3914_v23 = vmul.f32 %v8006_v60, %v9284_v62  ;;  %v9753_v62 = vld [vmem:[#allocation13 + $0x3a8] ss:$16 sps:$4 sm:$0xff]  }
 0x7ce   : > { %5632 = vmatprep.subr.bf16.mxu0 %v9667_v8  ;;  %v4480_v8 = vmul.f32 %v8008_v48, %v4443_v21  ;;  %v8010_v17 = vpop.eup %8009  ;;  %v4456_v34 = vpop.f32.mrf.mxu1 }
 0x7cf   : > { %7252 = vmatpush1.bf16.msra.mxu1 %v9710_v30  ;;  %v9744_v36 = vpack.c.bf16 %v3915_v1, %v3914_v23 }
 0x7d0   : > { %5451 = vmatmul.mubr.bf16.gmra.mxu0 %v9716_v56  ;;  %7237 = vmatprep.subr.bf16.mxu1 %v9719_v47  ;;  %v7228_v50 = vpop.f32.mrf.mxu1 }
 0x7d1   : > { %5460 = vmatprep.mubr.bf16.mxu0 %v9721_v18  ;;  %5633 = vmatpush1.bf16.msra.mxu0 %v9675_v24  ;;  %v9739_v24 = vld [vmem:[#allocation13 + $0x3c8] ss:$16 sps:$4 sm:$0xff]  }
 0x7d2   : > { %5634 = vmatprep.subr.bf16.mxu0 %v9678_v58  ;;  %5584 = vmatmul.mubr.bf16.gmra.mxu1 %v9610_v19  ;;  %v4479_v58 = vmul.f32 %v8010_v17, %v4440_v26  ;;  %v9747_v19 = vld [vmem:[#allocation13 + $0x3ac] ss:$16 sps:$4 sm:$0xff]   ;;  %v4459_v20 = vpop.f32.mrf.mxu1  ;;  %v7780_v17 = vld [vmem:[#allocation13 + $0x308] ss:$16 sps:$4 sm:$0xff]  }
 0x7d3   : > { %5593 = vmatprep.mubr.bf16.mxu1 %v9612_v35  ;;  %7253 = vmatpush2.bf16.msra.mxu1 %v9725_v33  ;;  %v8012_v35 = vpop.eup %8011 }
 0x7d4   : > { %7238 = vmatprep.subr.bf16.mxu1 %v9729_v7  ;;  %v9749_v27 = vpack.c.bf16 %v4480_v8, %v4479_v58  ;;  %v8014_v15 = vpop.eup %8013  ;;  %v3917_v49 = vmul.f32 %v8012_v35, %v9298_v61 }
 0x7d5   : > { %5635 = vmatpush1.bf16.msra.mxu0 %v9686_v37  ;;  %v4301_v37 = vpop.xlane.xlu1 %4300  ;;  %v3916_v59 = vmul.f32 %v8014_v15, %v9294_v39  ;;  %v7771_v39 = vld [vmem:[#allocation13 + $0x368] ss:$16 sps:$4 sm:$0xff]  }
 0x7d6   : > { %5636 = vmatprep.subr.bf16.mxu0 %v9690_v57  ;;  %v8016_v57 = vpop.eup %8015  ;;  %8031 = vrcp.f32 %v4301_v37 }
 0x7d7   : > { %7254 = vmatpush2.bf16.msra.mxu1 %v9739_v24  ;;  %v4482_v26 = vmul.f32 %v8016_v57, %v9706_v14  ;;  %v8018_v41 = vpop.eup %8017  ;;  %v9770_v61 = vpack.c.bf16 %v3917_v49, %v3916_v59  ;;  %8033 = vrcp.f32 %v4299_v38  ;;  %v3736_v14 = vpop.xlane.xlu0 %3735 }
 0x7d8   : > { %5461 = vmatmul.mubr.bf16.gmra.mxu0 %v9744_v36  ;;  %7239 = vmatprep.subr.bf16.mxu1 %v9747_v19  ;;  %v8020_v4 = vpop.eup %8019 }
 0x7d9   : > { %5470 = vmatprep.mubr.bf16.mxu0 %v9749_v27  ;;  %5637 = vmatpush1.bf16.msra.mxu0 %v9696_v52  ;;  %v7768_v52 = vld [vmem:[#allocation13 + $0x388] ss:$16 sps:$4 sm:$0xff]   ;;  %v3919_v11 = vmul.f32 %v8020_v4, %v9296_v42  ;;  %v7779_v42 = vld [vmem:[#allocation13 + $0x32c] ss:$16 sps:$4 sm:$0xff]  }
 0x7da   : > { %5638 = vmatprep.subr.bf16.mxu0 %v9700_v22  ;;  %5594 = vmatmul.mubr.bf16.gmra.mxu1 %v9620_v31  ;;  %v4481_v22 = vmul.f32 %v8018_v41, %v9684_v45  ;;  %v7773_v31 = vld [vmem:[#allocation13 + $0x36c] ss:$16 sps:$4 sm:$0xff]   ;;  %v8022_v45 = vpop.eup %8021 }
 0x7db   : > { %5603 = vmatprep.mubr.bf16.mxu1 %v9622_v53  ;;  %7255 = vmatpush2.bf16.msra.mxu1 %v9753_v62  ;;  %v3738_v53 = vpop.xlane.xlu1 %3737  ;;  %v8024_v16 = vpop.eup %8023  ;;  %v3918_v28 = vmul.f32 %v8022_v45, %v9292_v51  ;;  %v7782_v51 = vld [vmem:[#allocation13 + $0x30c] ss:$16 sps:$4 sm:$0xff]  }
 0x7dc   : > { %7240 = vmatprep.subr.bf16.mxu1 %v9757_v43  ;;  %v9773_v12 = vpack.c.bf16 %v4482_v26, %v4481_v22  ;;  %8035 = vrcp.f32 %v3738_v53  ;;  %v4484_v40 = vmul.f32 %v8024_v16, %v4459_v20  ;;  %v9890_v16 = vld [vmem:[%s10223_s6] sm:$0xf] }
 0x7dd   : > { %5639 = vmatpush1.bf16.msra.mxu0 %v9710_v30  ;;  %v7776_v30 = vld [vmem:[#allocation13 + $0x34c] ss:$16 sps:$4 sm:$0xff]   ;;  %8037 = vrcp.f32 %v3736_v14 }
 0x7de   : > { %5640 = vmatprep.subr.bf16.mxu0 %v9719_v47  ;;  %v8026_v47 = vpop.eup %8025 }
 0x7df   : > { %7256 = vmatpush2.bf16.msra.mxu1 %v7768_v52  ;;  %v4483_v21 = vmul.f32 %v8026_v47, %v4456_v34  ;;  %v8028_v60 = vpop.eup %8027 }
 0x7e0   : > { %5471 = vmatmul.mubr.bf16.gmra.mxu0 %v9770_v61  ;;  %7241 = vmatprep.subr.bf16.mxu1 %v7773_v31  ;;  %v3921_v1 = vmul.f32 %v8028_v60, %v9306_v6 }
 0x7e1   : > { %5480 = vmatprep.mubr.bf16.mxu0 %v9773_v12  ;;  %5641 = vmatpush2.bf16.msra.mxu0 %v9725_v33  ;;  %v9784_v33 = vpack.c.bf16 %v3919_v11, %v3918_v28 }
 0x7e2   : > { %5642 = vmatprep.subr.bf16.mxu0 %v9729_v7  ;;  %5604 = vmatmul.mubr.bf16.gmra.mxu1 %v9633_v63  ;;  %v4493_v7 = vpack.c.bf16 %v4484_v40, %v4483_v21  ;;  %v7777_v63 = vld [vmem:[#allocation13 + $0x328] ss:$16 sps:$4 sm:$0xff]  }
 0x7e3   : > { %5613 = vmatprep.mubr.bf16.mxu1 %v9638_v10  ;;  %7257 = vmatpush2.bf16.msra.mxu1 %v7771_v39  ;;  %v8030_v10 = vpop.eup %8029 }
 0x7e4   : > { %7242 = vmatprep.subr.bf16.mxu1 %v7776_v30  ;;  %v8032_v48 = vpop.eup %8031 }
 0x7e5   : > { %5643 = vmatpush2.bf16.msra.mxu0 %v9739_v24  ;;  %v4486_v13 = vmul.f32 %v8032_v48, %v7228_v50  ;;  %v8034_v8 = vpop.eup %8033  ;;  %v3920_v24 = vmul.f32 %v8030_v10, %v9302_v44 }
 0x7e6   : > { %5644 = vmatprep.subr.bf16.mxu0 %v9747_v19  ;;  %v4485_v23 = vmul.f32 %v8034_v8, %v9735_v54 }
 0x7e7   : > { %7258 = vmatpush2.bf16.msra.mxu1 %v7774_v9  ;;  %v3930_v25 = vpack.c.bf16 %v3921_v1, %v3920_v24 }
 0x7e8   : > { %5481 = vmatmul.mubr.bf16.gmra.mxu0 %v9784_v33  ;;  %7243 = vmatprep.subr.bf16.mxu1 %v7779_v42  ;;  %v4494_v19 = vpack.c.bf16 %v4486_v13, %v4485_v23 }
 0x7e9   : > { %5490 = vmatprep.mubr.bf16.mxu0 %v4493_v7  ;;  %5645 = vmatpush2.bf16.msra.mxu0 %v9753_v62  ;;  %v8036_v58 = vpop.eup %8035 }
 0x7ea   : > { %5646 = vmatprep.subr.bf16.mxu0 %v9757_v43  ;;  %5614 = vmatmul.mubr.bf16.gmra.mxu1 %v9643_v46  ;;  %v8038_v6 = vpop.eup %8037  ;;  %v3923_v46 = vmul.f32 %v8036_v58, %v9304_v5 }
 0x7eb   : > { %7259 = vmatpush2.bf16.msra.mxu1 %v7777_v63  ;;  %5716 = vmatprep.mubr.bf16.mxu1 %v4493_v7  ;;  %v3922_v44 = vmul.f32 %v8038_v6, %v9300_v29 }
 0x7ec   : > { %7244 = vmatprep.subr.bf16.mxu1 %v7782_v51 }
 0x7ed   : > { %5647 = vmatpush2.bf16.msra.mxu0 %v7768_v52  ;;  %v3931_v54 = vpack.c.bf16 %v3923_v46, %v3922_v44 }
 0x7ee   : > { %5648 = vmatprep.subr.bf16.mxu0 %v7773_v31 }
 0x7ef   : > { %7260 = vmatpush2.bf16.msra.mxu1 %v7780_v17 }
 0x7f0   : > { %5491 = vmatmul.mubr.bf16.gmra.mxu0 %v3930_v25 }
 0x7f1   : > { %5500 = vmatprep.mubr.bf16.mxu0 %v4494_v19  ;;  %5649 = vmatpush2.bf16.msra.mxu0 %v7771_v39 }
 0x7f2   : > { %5650 = vmatprep.subr.bf16.mxu0 %v7776_v30  ;;  %5717 = vmatmul.mubr.bf16.vlgmr.msra.gmra.mxu1 %v3930_v25 }
 0x7f3   : > { %5726 = vmatprep.mubr.bf16.mxu1 %v4494_v19 }
 0x7f4   : > { %v9797_v35 = vpop.f32.mrf.mxu1 }
 0x7f5   : > { %5651 = vmatpush2.bf16.msra.mxu0 %v7774_v9 }
 0x7f6   : > { %5652 = vmatprep.subr.bf16.mxu0 %v7779_v42  ;;  %v9801_v5 = vpop.f32.mrf.mxu1 }
 0x7f8   : > { %5501 = vmatmul.mubr.bf16.gmra.mxu0 %v3931_v54  ;;  %v9803_v34 = vpop.f32.mrf.mxu1 }
 0x7f9   : > { %5653 = vmatpush2.bf16.msra.mxu0 %v7777_v63  ;;  %5656 = vmatprep.mubr.bf16.mxu0 %v9664_v55 }
 0x7fa   : > { %5654 = vmatprep.subr.bf16.mxu0 %v7782_v51  ;;  %5727 = vmatmul.mubr.bf16.gmra.mxu1 %v3931_v54  ;;  %v9807_v29 = vpop.f32.mrf.mxu1 }
 0x7fc   : > { %v9809_v55 = vpop.f32.mrf.mxu1 }
 0x7fd   : > { %5655 = vmatpush2.bf16.msra.mxu0 %v7780_v17 }
 0x7fe   : > { %v9813_v62 = vpop.f32.mrf.mxu1 }
 0x800   : > { %5657 = vmatmul.mubr.bf16.vlgmr.msra.gmra.mxu0 %v9556_v32  ;;  %v9815_v32 = vpop.f32.mrf.mxu1 }
 0x801   : > { %5666 = vmatprep.mubr.bf16.mxu0 %v9670_v2 }
 0x802   : > { %v9819_v2 = vpop.f32.mrf.mxu1 }
 0x808   : > { %5667 = vmatmul.mubr.bf16.gmra.mxu0 %v9586_v0  ;;  %v9821_v0 = vpop.f32.mrf.mxu1 }
 0x809   : > { %5676 = vmatprep.mubr.bf16.mxu0 %v9692_v3 }
 0x80a   : > { %v9825_v3 = vpop.f32.mrf.mxu1 }
 0x810   : > { %5677 = vmatmul.mubr.bf16.gmra.mxu0 %v9716_v56  ;;  %v9827_v56 = vpop.f32.mrf.mxu1 }
 0x811   : > { %5686 = vmatprep.mubr.bf16.mxu0 %v9721_v18 }
 0x812   : > { %v9830_v18 = vpop.f32.mrf.mxu1 }
 0x814   : > { %v9832_v15 = vpop.f32.mrf.mxu1 }
 0x818   : > { %5687 = vmatmul.mubr.bf16.gmra.mxu0 %v9744_v36  ;;  %v9834_v36 = vpop.f32.mrf.mxu1 }
 0x819   : > { %5696 = vmatprep.mubr.bf16.mxu0 %v9749_v27 }
 0x81a   : > { %v9836_v27 = vpop.f32.mrf.mxu1 }
 0x81c   : > { %v9838_v37 = vpop.f32.mrf.mxu1 }
 0x81e   : > { %v9840_v43 = vpop.f32.mrf.mxu1 }
 0x820   : > { %5697 = vmatmul.mubr.bf16.gmra.mxu0 %v9770_v61  ;;  %v9842_v57 = vpop.f32.mrf.mxu1 }
 0x821   : > { %5706 = vmatprep.mubr.bf16.mxu0 %v9773_v12  ;;  %v4625_v12 = vlaneseq }
 0x822   : > { %v9844_v49 = vpop.f32.mrf.mxu1 }
 0x823   : > { %v9872_v45 = vshrl.u32 %v4625_v12, 7 }
 0x824   : > { %v9846_v38 = vpop.f32.mrf.mxu1 }
 0x825   : > { %v4627_v11 = vsub.s32 0, %v9872_v45 }
 0x826   : > { %v9848_v26 = vpop.f32.mrf.mxu1 }
 0x828   : > { %5707 = vmatmul.mubr.bf16.gmra.mxu0 %v9784_v33  ;;  %v9850_v41 = vpop.f32.mrf.mxu1 }
 0x82a   : > { %v9852_v50 = vpop.f32.mrf.mxu1 }
 0x82c   : > { %v9854_v52 = vpop.f32.mrf.mxu1 }
 0x856   : > { %v9856_v59 = vpop.f32.mrf.mxu1 }
 0x858   : > { %v9858_v22 = vpop.f32.mrf.mxu1 }
 0x85a   : > { %v9860_v61 = vpop.f32.mrf.mxu1 }
 0x85c   : > { %v9862_v31 = vpop.f32.mrf.mxu1 }
 0x86a   : > { %v9864_v4 = vpop.f32.mrf.mxu1 }
 0x86c   : > { %v9866_v53 = vpop.f32.mrf.mxu1 }
 0x86e   : > { %v9868_v20 = vpop.f32.mrf.mxu1 }
 0x870   : > { %v9870_v39 = vpop.f32.mrf.mxu1 }
 0x872   : > { %v9874_v14 = vpop.f32.mrf.mxu1 }
 0x874   : > { %v9876_v30 = vpop.f32.mrf.mxu1 }
 0x876   : > { %v9893_v40 = vpop.f32.mrf.mxu1 }
 0x877   : > { %8212 = shalt.err (!%p8209_p8)
}
 0x878   : > { %s8213_s4 = scalar_lea.hbm %s9883_s22, 4096  ;;  %s8217_s3 = scalar_lea.hbm %s10225_s8, 8192 }
 0x879   : > { %p8214_p2 = scmp.ne.s32.totalorder %s9883_s22, %s8213_s4  ;;  %p8218_p11 = scmp.lt.s32.totalorder %s9883_s22, %s10225_s8 }
 0x87a   : > { %p8219_p5 = scmp.lt.s32.totalorder %s8217_s3, %s8213_s4 }
 0x87b   : > { %p8215_p3 = pnand %p8214_p2, %p8508_p0 }
 0x87c   : > { %p8220_p4 = por %p8219_p5, %p8218_p11 }
 0x87d   : > { %p8216_p13 = pneg %p8215_p3 }
 0x87f   : > { %p8221_p10 = pnand %p8220_p4, %p8216_p13 }
 0x881   : > { %8224 = shalt.err (!%p8221_p10)
}
 0x882   : > { %s8339_s11 = smov 64   ;;  %s8340_s13 = smov 4   ;;  %v4631_v47 = vsub.s32 1, %v9872_v45  ;;  %v9919_v9 = vpop.f32.mrf.mxu1  ;;  %v9922_v28 = vrot.slane %v9890_v16, %v4627_v11  ;;  %v5432_v63 = vpop.f32.mrf.mxu0 }
 0x883   : > { %7282 = dma.vmem_to_hbm [thread:$0]  (%p8508_p0), %s9885_s24, 4096, %s9883_s22, %s5807_s12, %s8339_s11, %s8339_s11, %s8340_s13  }
 0x884   : > { %v9924_v21 = vpop.f32.mrf.mxu1  ;;  %v9927_v33 = vrot.slane %v9890_v16, %v4631_v47  ;;  %s6046_s18 = sshll.u32 %s8555_s0, 9  ;;  %v5320_v60 = vadd.f32 %v9797_v35, %v9922_v28  ;;  %v5434_v1 = vpop.f32.mrf.mxu0  ;;  %v5324_v13 = vadd.f32 %v9803_v34, %v9922_v28  ;;  %v5330_v6 = vadd.f32 %v9809_v55, %v9922_v28  ;;  %s6651_s25 = sshll.u32 %s8317_s30, 13 }
 0x885   : > { %s9942_s24 = scalar_lea.vmem [#allocation15], %s6046_s18  ;;  %v5334_v12 = vadd.f32 %v9815_v32, %v9922_v28  ;;  %s10165_s26 = scalar_lea.hbm %s10224_s7, %s6651_s25 }
 0x886   : > { %v9929_v42 = vpop.f32.mrf.mxu1  ;;  %v5322_v10 = vadd.f32 %v9801_v5, %v9927_v33  ;;  %v5433_v51 = vadd.f32 %v5432_v63, %v5320_v60  ;;  %v5436_v24 = vpop.f32.mrf.mxu0  ;;  %v5326_v23 = vadd.f32 %v9807_v29, %v9927_v33  ;;  %v5332_v35 = vadd.f32 %v9813_v62, %v9927_v33  ;;  %s5823_s20 = sshll.u32 %s9942_s24, 4  ;;  %s5802_s30 = scalar_lea.sflag [#allocation6], %s8555_s0  ;;  %s10167_s20 = int_to_ptr.vmem [resolvable:$true] %s5823_s20 }
 0x887   : > { %v5437_v25 = vadd.f32 %v5436_v24, %v5324_v13  ;;  %v5336_v60 = vadd.f32 %v9819_v2, %v9927_v33  ;;  %s8225_s12 = scalar_lea.vmem %s10167_s20, 8192  ;;  %s8341_s16 = smov [#allocation15]  }
 0x888   : > { %v9934_v7 = vpop.f32.mrf.mxu1  ;;  %5737 = vst [vmem:[%s9942_s24] sm:$0xff] %v5433_v51  ;;  %v5435_v8 = vadd.f32 %v5434_v1, %v5322_v10  ;;  %v5438_v19 = vpop.f32.mrf.mxu0  ;;  %v5340_v51 = vadd.f32 %v9821_v0, %v9922_v28  ;;  %p8226_p12 = scmp.ne.s32.totalorder %s10167_s20, %s8225_s12  ;;  %s8229_s21 = sshll.u32 %s8341_s16, 4  ;;  %s8230_s21 = int_to_ptr.vmem [resolvable:$false] %s8229_s21 }
 0x889   : > { %5741 = vst [vmem:[%s9942_s24 + $0x20] sm:$0xff] %v5437_v25  ;;  %v5439_v46 = vadd.f32 %v5438_v19, %v5326_v23  ;;  %v5344_v25 = vadd.f32 %v9827_v56, %v9922_v28  ;;  %s8231_s19 = scalar_lea.vmem %s8230_s21, 16384  ;;  %p8232_p9 = scmp.lt.s32.totalorder %s10167_s20, %s8230_s21 }
 0x88a   : > { %v9938_v48 = vpop.f32.mrf.mxu1  ;;  %5738 = vst [vmem:[%s9942_s24 + $0x8] sm:$0xff] %v5435_v8  ;;  %v5442_v54 = vpop.f32.mrf.mxu0  ;;  %v5342_v8 = vadd.f32 %v9825_v3, %v9927_v33  ;;  %p8227_p7 = pnand %p8226_p12, %p8508_p0  ;;  %p8233_p8 = scmp.lt.s32.totalorder %s8231_s19, %s8225_s12 }
 0x88b   : > { %5742 = vst [vmem:[%s9942_s24 + $0x28] sm:$0xff] %v5439_v46  ;;  %v5443_v5 = vadd.f32 %v5442_v54, %v5330_v6  ;;  %v5346_v46 = vadd.f32 %v9830_v18, %v9927_v33 }
 0x88c   : > { %v9945_v17 = vpop.f32.mrf.mxu1  ;;  %v5444_v29 = vpop.f32.mrf.mxu0  ;;  %p8228_p1 = pneg %p8227_p7  ;;  %p8234_p2 = por %p8233_p8, %p8232_p9 }
 0x88d   : > { %5745 = vst [vmem:[%s9942_s24 + $0x40] sm:$0xff] %v5443_v5  ;;  %v5445_v55 = vadd.f32 %v5444_v29, %v5332_v35  ;;  %v5350_v5 = vadd.f32 %v9832_v15, %v9922_v28 }
 0x88e   : > { %v9950_v58 = vpop.f32.mrf.mxu1  ;;  %v5446_v47 = vpop.f32.mrf.mxu0  ;;  %p8235_p3 = pnand %p8234_p2, %p8228_p1 }
 0x88f   : > { %5746 = vst [vmem:[%s9942_s24 + $0x48] sm:$0xff] %v5445_v55  ;;  %v5447_v62 = vadd.f32 %v5446_v47, %v5334_v12  ;;  %v5352_v55 = vadd.f32 %v9834_v36, %v9927_v33 }
 0x890   : > { %v9955_v44 = vpop.f32.mrf.mxu1  ;;  %v5448_v10 = vpop.f32.mrf.mxu0 }
 0x891   : > { %5749 = vst [vmem:[%s9942_s24 + $0x60] sm:$0xff] %v5447_v62  ;;  %v5449_v32 = vadd.f32 %v5448_v10, %v5336_v60  ;;  %v5354_v62 = vadd.f32 %v9836_v27, %v9922_v28 }
 0x892   : > { %v9960_v34 = vpop.f32.mrf.mxu1  ;;  %v5452_v13 = vpop.f32.mrf.mxu0 }
 0x893   : > { %5750 = vst [vmem:[%s9942_s24 + $0x68] sm:$0xff] %v5449_v32  ;;  %v5453_v2 = vadd.f32 %v5452_v13, %v5340_v51  ;;  %v5356_v32 = vadd.f32 %v9838_v37, %v9927_v33 }
 0x894   : > { %v9965_v11 = vpop.f32.mrf.mxu1  ;;  %v5454_v23 = vpop.f32.mrf.mxu0 }
 0x895   : > { %5753 = vst [vmem:[%s9942_s24 + $0x80] sm:$0xff] %v5453_v2  ;;  %v5455_v0 = vadd.f32 %v5454_v23, %v5342_v8  ;;  %v5360_v2 = vadd.f32 %v9840_v43, %v9922_v28 }
 0x896   : > { %v9970_v63 = vpop.f32.mrf.mxu1  ;;  %v5456_v6 = vpop.f32.mrf.mxu0 }
 0x897   : > { %5754 = vst [vmem:[%s9942_s24 + $0x88] sm:$0xff] %v5455_v0  ;;  %v5457_v3 = vadd.f32 %v5456_v6, %v5344_v25  ;;  %v5362_v0 = vadd.f32 %v9842_v57, %v9927_v33 }
 0x898   : > { %v9975_v1 = vpop.f32.mrf.mxu1  ;;  %v5458_v35 = vpop.f32.mrf.mxu0 }
 0x899   : > { %5757 = vst [vmem:[%s9942_s24 + $0xa0] sm:$0xff] %v5457_v3  ;;  %v5459_v56 = vadd.f32 %v5458_v35, %v5346_v46  ;;  %v5364_v3 = vadd.f32 %v9844_v49, %v9922_v28 }
 0x89a   : > { %v9980_v24 = vpop.f32.mrf.mxu1  ;;  %v5462_v12 = vpop.f32.mrf.mxu0 }
 0x89b   : > { %5758 = vst [vmem:[%s9942_s24 + $0xa8] sm:$0xff] %v5459_v56  ;;  %v5463_v18 = vadd.f32 %v5462_v12, %v5350_v5  ;;  %v5366_v56 = vadd.f32 %v9846_v38, %v9927_v33 }
 0x89c   : > { %v9985_v19 = vpop.f32.mrf.mxu1  ;;  %v5464_v60 = vpop.f32.mrf.mxu0 }
 0x89d   : > { %5761 = vst [vmem:[%s9942_s24 + $0xc0] sm:$0xff] %v5463_v18  ;;  %v5465_v15 = vadd.f32 %v5464_v60, %v5352_v55  ;;  %v5370_v18 = vadd.f32 %v9848_v26, %v9922_v28  ;;  %v4635_v26 = vsub.s32 2, %v9872_v45 }
 0x89e   : > { %v9990_v54 = vpop.f32.mrf.mxu1  ;;  %v5466_v51 = vpop.f32.mrf.mxu0 }
 0x89f   : > { %5762 = vst [vmem:[%s9942_s24 + $0xc8] sm:$0xff] %v5465_v15  ;;  %v5467_v36 = vadd.f32 %v5466_v51, %v5354_v62  ;;  %v5372_v15 = vadd.f32 %v9850_v41, %v9927_v33 }
 0x8a0   : > { %v9995_v29 = vpop.f32.mrf.mxu1  ;;  %v5468_v8 = vpop.f32.mrf.mxu0 }
 0x8a1   : > { %5765 = vst [vmem:[%s9942_s24 + $0xe0] sm:$0xff] %v5467_v36  ;;  %v5469_v27 = vadd.f32 %v5468_v8, %v5356_v32  ;;  %v5374_v36 = vadd.f32 %v9852_v50, %v9922_v28  ;;  %v5380_v50 = vadd.f32 %v9856_v59, %v9922_v28 }
 0x8a2   : > { %v10000_v47 = vpop.f32.mrf.mxu1  ;;  %v5472_v25 = vpop.f32.mrf.mxu0 }
 0x8a3   : > { %5766 = vst [vmem:[%s9942_s24 + $0xe8] sm:$0xff] %v5469_v27  ;;  %v5473_v37 = vadd.f32 %v5472_v25, %v5360_v2  ;;  %v5376_v25 = vadd.f32 %v9854_v52, %v9927_v33  ;;  %v5382_v52 = vadd.f32 %v9858_v22, %v9927_v33 }
 0x8a4   : > { %v10005_v10 = vpop.f32.mrf.mxu1  ;;  %v5474_v46 = vpop.f32.mrf.mxu0 }
 0x8a5   : > { %5769 = vst [vmem:[%s9942_s24 + $0x100] sm:$0xff] %v5473_v37  ;;  %v5475_v43 = vadd.f32 %v5474_v46, %v5362_v0  ;;  %v4639_v37 = vsub.s32 3, %v9872_v45 }
 0x8a6   : > { %v10010_v13 = vpop.f32.mrf.mxu1  ;;  %v5476_v5 = vpop.f32.mrf.mxu0 }
 0x8a7   : > { %5770 = vst [vmem:[%s9942_s24 + $0x108] sm:$0xff] %v5475_v43  ;;  %v5477_v57 = vadd.f32 %v5476_v5, %v5364_v3  ;;  %v10046_v5 = vrot.slane %v9890_v16, %v4635_v26  ;;  %v10052_v45 = vrot.slane %v9890_v16, %v4639_v37 }
 0x8a8   : > { %v10015_v23 = vpop.f32.mrf.mxu1  ;;  %v5478_v55 = vpop.f32.mrf.mxu0 }
 0x8a9   : > { %5773 = vst [vmem:[%s9942_s24 + $0x120] sm:$0xff] %v5477_v57  ;;  %v5479_v60 = vadd.f32 %v5478_v55, %v5366_v56 }
 0x8aa   : > { %v10020_v6 = vpop.f32.mrf.mxu1  ;;  %v5482_v62 = vpop.f32.mrf.mxu0 }
 0x8ab   : > { %5774 = vst [vmem:[%s9942_s24 + $0x128] sm:$0xff] %v5479_v60  ;;  %v5483_v51 = vadd.f32 %v5482_v62, %v5370_v18  ;;  %v5384_v60 = vadd.f32 %v9860_v61, %v9922_v28 }
 0x8ac   : > { %v5605_v35 = vpop.f32.mrf.mxu1  ;;  %v5484_v32 = vpop.f32.mrf.mxu0 }
 0x8ad   : > { %5777 = vst [vmem:[%s9942_s24 + $0x140] sm:$0xff] %v5483_v51  ;;  %v5485_v8 = vadd.f32 %v5484_v32, %v5372_v15  ;;  %v5606_v59 = vadd.f32 %v5605_v35, %v10046_v5 }
 0x8ae   : > { %v5607_v12 = vpop.f32.mrf.mxu1  ;;  %v5486_v27 = vpop.f32.mrf.mxu0 }
 0x8af   : > { %5778 = vst [vmem:[%s9942_s24 + $0x148] sm:$0xff] %v5485_v8  ;;  %v5487_v41 = vadd.f32 %v5486_v27, %v5374_v36  ;;  %v5608_v51 = vadd.f32 %v5607_v12, %v10052_v45  ;;  %v5386_v36 = vadd.f32 %v9862_v31, %v9927_v33  ;;  %v5390_v27 = vadd.f32 %v9864_v4, %v9922_v28 }
 0x8b0   : > { %v5609_v49 = vpop.f32.mrf.mxu1  ;;  %v5488_v46 = vpop.f32.mrf.mxu0 }
 0x8b1   : > { %5781 = vst [vmem:[%s9942_s24 + $0x160] sm:$0xff] %v5487_v41  ;;  %v5489_v3 = vadd.f32 %v5488_v46, %v5376_v25  ;;  %v5610_v8 = vadd.f32 %v5609_v49, %v10046_v5  ;;  %v5392_v49 = vadd.f32 %v9866_v53, %v9927_v33 }
 0x8b2   : > { %v5611_v38 = vpop.f32.mrf.mxu1  ;;  %v5492_v56 = vpop.f32.mrf.mxu0 }
 0x8b3   : > { %5782 = vst [vmem:[%s9942_s24 + $0x168] sm:$0xff] %v5489_v3  ;;  %v5493_v57 = vadd.f32 %v5492_v56, %v5380_v50  ;;  %v5612_v41 = vadd.f32 %v5611_v38, %v10052_v45  ;;  %v5394_v38 = vadd.f32 %v9868_v20, %v9922_v28 }
 0x8b4   : > { %v5615_v2 = vpop.f32.mrf.mxu1  ;;  %v5494_v18 = vpop.f32.mrf.mxu0 }
 0x8b5   : > { %5785 = vst [vmem:[%s9942_s24 + $0x180] sm:$0xff] %v5493_v57  ;;  %v5495_v62 = vadd.f32 %v5494_v18, %v5382_v52  ;;  %v5616_v3 = vadd.f32 %v5615_v2, %v10046_v5  ;;  %v5396_v2 = vadd.f32 %v9870_v39, %v9927_v33 }
 0x8b6   : > { %v5617_v0 = vpop.f32.mrf.mxu1  ;;  %v5496_v32 = vpop.f32.mrf.mxu0 }
 0x8b7   : > { %5786 = vst [vmem:[%s9942_s24 + $0x188] sm:$0xff] %v5495_v62  ;;  %v5497_v16 = vadd.f32 %v5496_v32, %v5384_v60 }
 0x8b8   : > { %v5619_v43 = vpop.f32.mrf.mxu1  ;;  %v5498_v26 = vpop.f32.mrf.mxu0 }
 0x8b9   : > { %5789 = vst [vmem:[%s9942_s24 + $0x1a0] sm:$0xff] %v5497_v16  ;;  %v5499_v12 = vadd.f32 %v5498_v26, %v5386_v36  ;;  %v5552_v26 = vadd.f32 %v9919_v9, %v10052_v45  ;;  %v5560_v9 = vadd.f32 %v9934_v7, %v10046_v5  ;;  %v5568_v7 = vadd.f32 %v9950_v58, %v10052_v45 }
 0x8ba   : > { %v5621_v55 = vpop.f32.mrf.mxu1  ;;  %v5502_v37 = vpop.f32.mrf.mxu0  ;;  %v5576_v58 = vadd.f32 %v9965_v11, %v10046_v5  ;;  %v5582_v11 = vadd.f32 %v9980_v24, %v10052_v45  ;;  %v5590_v24 = vadd.f32 %v9995_v29, %v10046_v5  ;;  %v5598_v29 = vadd.f32 %v10010_v13, %v10052_v45 }
 0x8bb   : > { %5790 = vst [vmem:[%s9942_s24 + $0x1a8] sm:$0xff] %v5499_v12  ;;  %v5503_v46 = vadd.f32 %v5502_v37, %v5390_v27  ;;  %v5622_v39 = vadd.f32 %v5621_v55, %v10052_v45  ;;  %v5556_v12 = vadd.f32 %v9924_v21, %v10046_v5  ;;  %v5562_v21 = vadd.f32 %v9938_v48, %v10052_v45 }
 0x8bc   : > { %v5718_v15 = vpop.f32.mrf.mxu1  ;;  %v5504_v56 = vpop.f32.mrf.mxu0  ;;  %v5570_v48 = vadd.f32 %v9955_v44, %v10046_v5  ;;  %v5578_v44 = vadd.f32 %v9970_v63, %v10052_v45  ;;  %v5586_v63 = vadd.f32 %v9985_v19, %v10046_v5  ;;  %v5592_v19 = vadd.f32 %v10000_v47, %v10052_v45 }
 0x8bd   : > { %v5719_v22 = vadd.f32 %v5718_v15, %v5606_v59  ;;  %5793 = vst [vmem:[%s9942_s24 + $0x1c0] sm:$0xff] %v5503_v46  ;;  %v5505_v52 = vadd.f32 %v5504_v56, %v5392_v49  ;;  %v5618_v59 = vadd.f32 %v5617_v0, %v10052_v45  ;;  %v5620_v15 = vadd.f32 %v5619_v43, %v10046_v5 }
 0x8be   : > { %v5720_v35 = vpop.f32.mrf.mxu1  ;;  %v5506_v18 = vpop.f32.mrf.mxu0  ;;  %v5546_v0 = vadd.f32 %v9874_v14, %v10046_v5  ;;  %v5548_v43 = vadd.f32 %v9876_v30, %v10052_v45  ;;  %v5600_v47 = vadd.f32 %v10015_v23, %v10046_v5 }
 0x8bf   : > { %5787 = vst [vmem:[%s9942_s24 + $0x190] sm:$0xff] %v5719_v22  ;;  %v5721_v61 = vadd.f32 %v5720_v35, %v5608_v51  ;;  %5794 = vst [vmem:[%s9942_s24 + $0x1c8] sm:$0xff] %v5505_v52  ;;  %v5507_v60 = vadd.f32 %v5506_v18, %v5394_v38 }
 0x8c0   : > { %v5722_v25 = vpop.f32.mrf.mxu1  ;;  %v5508_v28 = vpop.f32.mrf.mxu0 }
 0x8c1   : > { %5788 = vst [vmem:[%s9942_s24 + $0x198] sm:$0xff] %v5721_v61  ;;  %v5723_v31 = vadd.f32 %v5722_v25, %v5610_v8  ;;  %5797 = vst [vmem:[%s9942_s24 + $0x1e0] sm:$0xff] %v5507_v60  ;;  %v5509_v51 = vadd.f32 %v5508_v28, %v5396_v2  ;;  %v5550_v8 = vadd.f32 %v9893_v40, %v10046_v5 }
 0x8c2   : > { %v5724_v50 = vpop.f32.mrf.mxu1  ;;  %v5658_v32 = vpop.f32.mrf.mxu0  ;;  %v5558_v40 = vadd.f32 %v9929_v42, %v10052_v45  ;;  %v5566_v42 = vadd.f32 %v9945_v17, %v10046_v5  ;;  %v5572_v17 = vadd.f32 %v9960_v34, %v10052_v45  ;;  %v5580_v34 = vadd.f32 %v9975_v1, %v10046_v5 }
 0x8c3   : > { %5791 = vst [vmem:[%s9942_s24 + $0x1b0] sm:$0xff] %v5723_v31  ;;  %v5725_v4 = vadd.f32 %v5724_v50, %v5612_v41  ;;  %5798 = vst [vmem:[%s9942_s24 + $0x1e8] sm:$0xff] %v5509_v51  ;;  %v5659_v36 = vadd.f32 %v5658_v32, %v5546_v0  ;;  %v5588_v1 = vadd.f32 %v9990_v54, %v10052_v45 }
 0x8c4   : > { %v5728_v57 = vpop.f32.mrf.mxu1  ;;  %v5660_v35 = vpop.f32.mrf.mxu0  ;;  %v5596_v54 = vadd.f32 %v10005_v10, %v10046_v5 }
 0x8c5   : > { %5792 = vst [vmem:[%s9942_s24 + $0x1b8] sm:$0xff] %v5725_v4  ;;  %v5729_v53 = vadd.f32 %v5728_v57, %v5616_v3  ;;  %5739 = vst [vmem:[%s9942_s24 + $0x10] sm:$0xff] %v5659_v36  ;;  %v5661_v55 = vadd.f32 %v5660_v35, %v5548_v43 }
 0x8c6   : > { %v5730_v62 = vpop.f32.mrf.mxu1  ;;  %v5662_v61 = vpop.f32.mrf.mxu0 }
 0x8c7   : > { %5795 = vst [vmem:[%s9942_s24 + $0x1d0] sm:$0xff] %v5729_v53  ;;  %v5731_v20 = vadd.f32 %v5730_v62, %v5618_v59  ;;  %5740 = vst [vmem:[%s9942_s24 + $0x18] sm:$0xff] %v5661_v55  ;;  %v5663_v30 = vadd.f32 %v5662_v61, %v5550_v8 }
 0x8c8   : > { %v5732_v22 = vpop.f32.mrf.mxu1  ;;  %v5664_v27 = vpop.f32.mrf.mxu0 }
 0x8c9   : > { %5796 = vst [vmem:[%s9942_s24 + $0x1d8] sm:$0xff] %v5731_v20  ;;  %v5733_v33 = vadd.f32 %v5732_v22, %v5620_v15  ;;  %5743 = vst [vmem:[%s9942_s24 + $0x30] sm:$0xff] %v5663_v30  ;;  %v5665_v25 = vadd.f32 %v5664_v27, %v5552_v26  ;;  %v5602_v30 = vadd.f32 %v10020_v6, %v10052_v45 }
 0x8ca   : > { %v5734_v16 = vpop.f32.mrf.mxu1  ;;  %v5668_v41 = vpop.f32.mrf.mxu0 }
 0x8cb   : > { %5799 = vst [vmem:[%s9942_s24 + $0x1f0] sm:$0xff] %v5733_v33  ;;  %v5735_v14 = vadd.f32 %v5734_v16, %v5622_v39  ;;  %5744 = vst [vmem:[%s9942_s24 + $0x38] sm:$0xff] %v5665_v25  ;;  %v5669_v31 = vadd.f32 %v5668_v41, %v5556_v12 }
 0x8cc   : > { %v5670_v37 = vpop.f32.mrf.mxu0 }
 0x8cd   : > { %5800 = vst [vmem:[%s9942_s24 + $0x1f8] sm:$0xff] %v5735_v14  ;;  %5747 = vst [vmem:[%s9942_s24 + $0x50] sm:$0xff] %v5669_v31  ;;  %v5671_v49 = vadd.f32 %v5670_v37, %v5558_v40 }
 0x8ce   : > { %v5672_v46 = vpop.f32.mrf.mxu0 }
 0x8cf   : > { %5748 = vst [vmem:[%s9942_s24 + $0x58] sm:$0xff] %v5671_v49  ;;  %v5673_v50 = vadd.f32 %v5672_v46, %v5560_v9 }
 0x8d0   : > { %v5674_v3 = vpop.f32.mrf.mxu0 }
 0x8d1   : > { %5751 = vst [vmem:[%s9942_s24 + $0x70] sm:$0xff] %v5673_v50  ;;  %v5675_v4 = vadd.f32 %v5674_v3, %v5562_v21 }
 0x8d2   : > { %v5678_v56 = vpop.f32.mrf.mxu0 }
 0x8d3   : > { %5752 = vst [vmem:[%s9942_s24 + $0x78] sm:$0xff] %v5675_v4  ;;  %v5679_v38 = vadd.f32 %v5678_v56, %v5566_v42 }
 0x8d4   : > { %v5680_v52 = vpop.f32.mrf.mxu0 }
 0x8d5   : > { %5755 = vst [vmem:[%s9942_s24 + $0x90] sm:$0xff] %v5679_v38  ;;  %v5681_v57 = vadd.f32 %v5680_v52, %v5568_v7 }
 0x8d6   : > { %v5682_v59 = vpop.f32.mrf.mxu0 }
 0x8d7   : > { %5756 = vst [vmem:[%s9942_s24 + $0x98] sm:$0xff] %v5681_v57  ;;  %v5683_v53 = vadd.f32 %v5682_v59, %v5570_v48 }
 0x8d8   : > { %v5684_v18 = vpop.f32.mrf.mxu0 }
 0x8d9   : > { %5759 = vst [vmem:[%s9942_s24 + $0xb0] sm:$0xff] %v5683_v53  ;;  %v5685_v2 = vadd.f32 %v5684_v18, %v5572_v17 }
 0x8da   : > { %v5688_v60 = vpop.f32.mrf.mxu0 }
 0x8db   : > { %5760 = vst [vmem:[%s9942_s24 + $0xb8] sm:$0xff] %v5685_v2  ;;  %v5689_v62 = vadd.f32 %v5688_v60, %v5576_v58 }
 0x8dc   : > { %v5690_v15 = vpop.f32.mrf.mxu0 }
 0x8dd   : > { %5763 = vst [vmem:[%s9942_s24 + $0xd0] sm:$0xff] %v5689_v62  ;;  %v5691_v20 = vadd.f32 %v5690_v15, %v5578_v44 }
 0x8de   : > { %v5692_v28 = vpop.f32.mrf.mxu0 }
 0x8df   : > { %5764 = vst [vmem:[%s9942_s24 + $0xd8] sm:$0xff] %v5691_v20  ;;  %v5693_v0 = vadd.f32 %v5692_v28, %v5580_v34 }
 0x8e0   : > { %v5694_v51 = vpop.f32.mrf.mxu0 }
 0x8e1   : > { %5767 = vst [vmem:[%s9942_s24 + $0xf0] sm:$0xff] %v5693_v0  ;;  %v5695_v22 = vadd.f32 %v5694_v51, %v5582_v11 }
 0x8e2   : > { %v5698_v39 = vpop.f32.mrf.mxu0 }
 0x8e3   : > { %5768 = vst [vmem:[%s9942_s24 + $0xf8] sm:$0xff] %v5695_v22  ;;  %v5699_v33 = vadd.f32 %v5698_v39, %v5586_v63 }
 0x8e4   : > { %v5700_v32 = vpop.f32.mrf.mxu0 }
 0x8e5   : > { %5771 = vst [vmem:[%s9942_s24 + $0x110] sm:$0xff] %v5699_v33  ;;  %v5701_v43 = vadd.f32 %v5700_v32, %v5588_v1 }
 0x8e6   : > { %v5702_v36 = vpop.f32.mrf.mxu0 }
 0x8e7   : > { %5772 = vst [vmem:[%s9942_s24 + $0x118] sm:$0xff] %v5701_v43  ;;  %v5703_v16 = vadd.f32 %v5702_v36, %v5590_v24 }
 0x8e8   : > { %v5704_v14 = vpop.f32.mrf.mxu0 }
 0x8e9   : > { %5775 = vst [vmem:[%s9942_s24 + $0x130] sm:$0xff] %v5703_v16  ;;  %v5705_v35 = vadd.f32 %v5704_v14, %v5592_v19 }
 0x8ea   : > { %v5708_v8 = vpop.f32.mrf.mxu0 }
 0x8eb   : > { %5776 = vst [vmem:[%s9942_s24 + $0x138] sm:$0xff] %v5705_v35  ;;  %v5709_v55 = vadd.f32 %v5708_v8, %v5596_v54 }
 0x8ec   : > { %v5710_v61 = vpop.f32.mrf.mxu0 }
 0x8ed   : > { %5779 = vst [vmem:[%s9942_s24 + $0x150] sm:$0xff] %v5709_v55  ;;  %v5711_v26 = vadd.f32 %v5710_v61, %v5598_v29 }
 0x8ee   : > { %v5712_v10 = vpop.f32.mrf.mxu0 }
 0x8ef   : > { %5780 = vst [vmem:[%s9942_s24 + $0x158] sm:$0xff] %v5711_v26  ;;  %v5713_v13 = vadd.f32 %v5712_v10, %v5600_v47 }
 0x8f0   : > { %v5714_v27 = vpop.f32.mrf.mxu0 }
 0x8f1   : > { %5783 = vst [vmem:[%s9942_s24 + $0x170] sm:$0xff] %v5713_v13  ;;  %v5715_v23 = vadd.f32 %v5714_v27, %v5602_v30 }
 0x8f3   : > { %5784 = vst [vmem:[%s9942_s24 + $0x178] sm:$0xff] %v5715_v23 }
 0x8f4   : > { %8238 = shalt.err (!%p8235_p3)
}
 0x8f5   : > { %s8239_s2 = scalar_lea.hbm %s10165_s26, 8192  ;;  %s8243_s29 = scalar_lea.hbm %s10224_s7, 16384 }
 0x8f6   : > { %p8240_p13 = scmp.ne.s32.totalorder %s10165_s26, %s8239_s2  ;;  %p8244_p4 = scmp.lt.s32.totalorder %s10165_s26, %s10224_s7 }
 0x8f7   : > { %p8245_p10 = scmp.lt.s32.totalorder %s8243_s29, %s8239_s2 }
 0x8f8   : > { %p8241_p11 = pnand %p8240_p13, %p8508_p0 }
 0x8f9   : > { %p8246_p12 = por %p8245_p10, %p8244_p4 }
 0x8fa   : > { %p8242_p5 = pneg %p8241_p11 }
 0x8fc   : > { %p8247_p7 = pnand %p8246_p12, %p8242_p5 }
 0x8fe   : > { %8250 = shalt.err (!%p8247_p7)
}
 0x8ff   : > { %s8342_s15 = smov 512   ;;  %s8343_s11 = smov 32  }
 0x900   : > { %7281 = dma.vmem_to_hbm [thread:$0]  (%p8508_p0), %s10167_s20, 8192, %s10165_s26, %s5802_s30, %s8342_s15, %s8342_s15, %s8343_s11  }
 0x901 PF: > { %s5857_s18 = sand.u32 1, %s8305_s27   ;;  %p10380_p1 = scmp.ge.s32.totalorder %s8325_s10, 2 }
 0x902   : > { %s5858_s24 = scalar_lea.sflag [#allocation6], %s5857_s18 }
 0x903   : > { %p7306_p9 = pnand %p10380_p1, %p8434_p6 }
 0x905   : > { %p7307_p8 = pneg %p7306_p9 }
 0x907   : > { %8296 = dma.done.wait (%p7307_p8), %s5858_s24, 8192  }
 0x908   : > { %8298 = vsyncadd (%p7307_p8), %s5858_s24, 4294959104  ;;  %s5867_s25 = scalar_lea.sflag [#allocation17], %s5857_s18 }
 0x909   : > { %8300 = dma.done.wait (%p7307_p8), %s5867_s25, 4096  }
 0x90a   : > { %8302 = vsyncadd (%p7307_p8), %s5867_s25, 4294963200  ;;  %s33_s10 = sadd.s32 1, %s8325_s10   ;;  %s10381_s17 = sld [smem:[#allocation25_spill]] }
 0x90b   : > { %p30_p2 = scmp.ge.s32.totalorder %s33_s10, 4   ;;  %s10382_s29 = sld [smem:[#allocation28_spill]] }
 0x90c   : > { %s10383_s0 = sld [smem:[#allocation27_spill]]  ;;  %s10384_s27 = smov %s8309_s28 }
 0x90d   : > { %s10386_s30 = smov %s8321_s9 }
 0x90e   :  { %32 = sbr.rel (!%p30_p2) target bundleno = 18 (0x12), region = 146 }
 0x910   : > { %s10385_s28 = smov %s10381_s17 }
 0x912   : > { %s10387_s9 = smov %s10383_s0 }
 0x913   :  { %5872 = vsyncpa [#allocation5], 1 }
 0x914   :  { %5874 = vsyncpa [#allocation5 + $0x1], 1 }
 0x915   :  { %5875 = vsyncpa [#allocation8], 1 }
 0x916   :  { %5877 = vsyncpa [#allocation8 + $0x1], 1 }
 0x917   :  { %5878 = vsyncpa [#allocation11], 1 }
 0x918   :  { %5879 = vsyncpa [#allocation14], 1 }
 0x919   :  { %5880 = vsyncpa [#allocation6], 1 }
 0x91a   :  { %5882 = vsyncpa [#allocation6 + $0x1], 1 }
 0x91b   :  { %5883 = vsyncpa [#allocation17], 1 }
 0x91c   :  { %5885 = vsyncpa [#allocation17 + $0x1], 1 }

// kernel: tpu_custom_call.1
= control target key start
LH: loop header
LB: loop body
LE: loop exit
PB: predicated region body
PF: predicated region fallthrough
CT: control target
= control target key end

     0   :  { %s10217_s0 = inlined_call_operand.hbm [shape: f32[2,128,128], index: 0, kind: input, shape index: {}]   ;;  %s10218_s1 = inlined_call_operand.hbm [shape: f32[2,128,128], index: 1, kind: input, shape index: {}]   ;;  %s10219_s2 = inlined_call_operand.hbm [shape: bf16[128,512], index: 2, kind: input, shape index: {}]   ;;  %s10220_s3 = inlined_call_operand.hbm [shape: bf16[128,512], index: 3, kind: input, shape index: {}]   ;;  %s10221_s4 = inlined_call_operand.hbm [shape: bf16[128,512], index: 4, kind: input, shape index: {}]   ;;  %s10222_s5 = inlined_call_operand.hbm [shape: bf16[512,512], index: 5, kind: input, shape index: {}]   ;;  %s10223_s6 = inlined_call_operand.vmem [shape: f32[1,512], index: 6, kind: input, shape index: {}]   ;;  %s10224_s7 = inlined_call_operand.hbm [shape: f32[2,128,512], index: 7, kind: output, shape index: {0}]   ;;  %s10225_s8 = inlined_call_operand.hbm [shape: bf16[8,128,128], index: 8, kind: output, shape index: {1}]  }
   0x1   :  { %10250 = sst [smem:[#allocation80_spill]] %s10217_s0 }
   0x2   :  { %10251 = sst [smem:[#allocation81_spill]] %s10219_s2 }
   0x3   :  { %10252 = sst [smem:[#allocation82_spill]] %s10220_s3 }
   0x4   :  { %10253 = sst [smem:[#allocation83_spill]] %s10221_s4 }
   0x5   :  { %10254 = sst [smem:[#allocation84_spill]] %s10222_s5 }
   0x6   :  { %14 = vsyncpa [#allocation5], 0 }
   0x7   :  { %16 = vsyncpa [#allocation5 + $0x1], 0 }
   0x8   :  { %17 = vsyncpa [#allocation8], 0 }
   0x9   :  { %19 = vsyncpa [#allocation8 + $0x1], 0 }
   0xa   :  { %20 = vsyncpa [#allocation11], 0 }
   0xb   :  { %21 = vsyncpa [#allocation14], 0 }
   0xc   :  { %22 = vsyncpa [#allocation6], 0 }
   0xd   :  { %24 = vsyncpa [#allocation6 + $0x1], 0 }
   0xe   :  { %25 = vsyncpa [#allocation17], 0 }
   0xf   :  { %27 = vsyncpa [#allocation17 + $0x1], 0  ;;  %s8389_s27 = smov 0   ;;  %s8391_s28 = smov 0  }
  0x10   :  { %s8393_s29 = smov 0   ;;  %s8395_s30 = smov 0  }
  0x11   :  { %s8397_s9 = smov 0   ;;  %s8399_s10 = smov 0  }
  0x12 LB: > { %10255 = sst [smem:[#allocation25_spill]] %s8313_s29  ;;  %s8420_s11 = sadd.s32 4294967295, %s8325_s10   ;;  %s8325_s10 = sphi %s8399_s10, %s33_s10   ;;  %s8321_s9 = sphi %s8397_s9, %s10387_s9   ;;  %s8317_s30 = sphi %s8395_s30, %s10386_s30   ;;  %s8313_s29 = sphi %s8393_s29, %s10382_s29   ;;  %s8309_s28 = sphi %s8391_s28, %s10385_s28   ;;  %s8305_s27 = sphi %s8389_s27, %s10384_s27  }
  0x13   : > { %s6026_s12 = sadd.s32 4294967294, %s8325_s10   ;;  %p67_p0 = scmp.ne.s32.totalorder %s8309_s28, %s8305_s27 }
  0x14   : > { %p10226_p1 = scmp.eq.s32.totalorder %s8420_s11, 0  ;;  %p224_p2 = scmp.eq.s32.totalorder %s8420_s11, 1 }
  0x15   : > { %p230_p3 = scmp.eq.s32.totalorder %s6026_s12, 1  ;;  %p6027_p5 = scmp.ge.s32.totalorder %s8325_s10, 1 }
  0x16   : > { %p8429_p4 = por %p10226_p1, %p67_p0  ;;  %p265_p7 = scmp.lt.s32.totalorder %s8325_s10, 3 }
  0x17   : > { %p8434_p6 = por %p230_p3, %p67_p0  ;;  %s8327_s16 = smov [#allocation9]  }
  0x18   : > { %p8439_p8 = pnand %p6027_p5, %p265_p7  ;;  %s277_s17 = sshll.u32 %s8327_s16, 4  ;;  %s278_s17 = int_to_ptr.vmem [resolvable:$true] %s277_s17 }
  0x19   : > { %s10257_s14 = scalar_select %p8434_p6, 1, 0 }
  0x1a   : > { %p7285_p9 = pneg %p8439_p8  ;;  %s8328_s19 = smov [#allocation10]  }
  0x1b   : > { %10258 = sst [smem:[#allocation26_spill]] %s10257_s14  ;;  %s290_s20 = sshll.u32 %s8328_s19, 4  ;;  %s291_s20 = int_to_ptr.vmem [resolvable:$true] %s290_s20 }
  0x1c   : > { %p8448_p11 = pnand %p7285_p9, %p10226_p1  ;;  %s8329_s21 = smov [#allocation12]  }
  0x1d   : > { %s303_s22 = sshll.u32 %s8329_s21, 4  ;;  %s8050_s23 = scalar_lea.vmem %s278_s17, 4096  ;;  %s304_s22 = int_to_ptr.vmem [resolvable:$true] %s303_s22 }
  0x1e   : > { %p8041_p12 = pneg %p8448_p11  ;;  %p8051_p13 = scmp.ne.s32.totalorder %s278_s17, %s8050_s23 }
  0x1f   : > { %p8058_p5 = scmp.lt.s32.totalorder %s278_s17, %s278_s17  ;;  %p8059_p7 = scmp.lt.s32.totalorder %s8050_s23, %s8050_s23 }
  0x20   : > { %p8053_p0 = pnand %p8051_p13, %p8041_p12 }
  0x21   : > { %p8060_p9 = por %p8059_p7, %p8058_p5 }
  0x22   : > { %p8054_p3 = pneg %p8053_p0 }
  0x24   : > { %p8061_p10 = pnand %p8060_p9, %p8054_p3 }
  0x26   : > { %8064 = shalt.err (!%p8061_p10)
}
  0x27   : > { %s8330_s24 = smov 256   ;;  %s8331_s25 = smov 16  }
  0x28   : > { %s10261_s2 = sld [smem:[#allocation81_spill]]  ;;  %s8076_s16 = scalar_lea.vmem %s291_s20, 4096 }
  0x29   : > { %p8077_p13 = scmp.ne.s32.totalorder %s291_s20, %s8076_s16  ;;  %p8084_p3 = scmp.lt.s32.totalorder %s291_s20, %s291_s20 }
  0x2a   : > { %p8085_p10 = scmp.lt.s32.totalorder %s8076_s16, %s8076_s16 }
  0x2b   : > { %p8079_p0 = pnand %p8077_p13, %p8041_p12 }
  0x2c   : > { %p8086_p7 = por %p8085_p10, %p8084_p3 }
  0x2d   : > { %p8080_p5 = pneg %p8079_p0 }
  0x2e   : > { %7288 = dma.hbm_to_vmem [thread:$0]  (!%p8448_p11), %s10261_s2, 4096, %s278_s17, [#allocation8], %s8330_s24, %s8330_s24, %s8331_s25  }
  0x2f   : > { %p8087_p9 = pnand %p8086_p7, %p8080_p5 }
  0x31   : > { %8090 = shalt.err (!%p8087_p9)
}
  0x32   : > { %s10262_s3 = sld [smem:[#allocation82_spill]]  ;;  %s8102_s17 = scalar_lea.vmem %s304_s22, 4096 }
  0x33   : > { %p8103_p1 = scmp.ne.s32.totalorder %s304_s22, %s8102_s17  ;;  %p8110_p3 = scmp.lt.s32.totalorder %s304_s22, %s304_s22 }
  0x34   : > { %p8111_p5 = scmp.lt.s32.totalorder %s8102_s17, %s8102_s17 }
  0x35   : > { %p8105_p13 = pnand %p8103_p1, %p8041_p12 }
  0x36   : > { %p8112_p10 = por %p8111_p5, %p8110_p3 }
  0x37   : > { %p8106_p0 = pneg %p8105_p13 }
  0x38   : > { %7291 = dma.hbm_to_vmem [thread:$0]  (!%p8448_p11), %s10262_s3, 4096, %s291_s20, [#allocation11], %s8330_s24, %s8330_s24, %s8331_s25  }
  0x39   : > { %p8113_p7 = pnand %p8112_p10, %p8106_p0 }
  0x3b   : > { %8116 = shalt.err (!%p8113_p7)
}
  0x3c   : > { %s10263_s4 = sld [smem:[#allocation83_spill]]  ;;  %s8332_s20 = smov [#allocation13]  }
  0x3d   : > { %s316_s12 = sshll.u32 %s8332_s20, 4  ;;  %s317_s12 = int_to_ptr.vmem [resolvable:$true] %s316_s12 }
  0x3e   : > { %s8128_s16 = scalar_lea.vmem %s317_s12, 16384  ;;  %p8136_p0 = scmp.lt.s32.totalorder %s317_s12, %s317_s12 }
  0x3f   : > { %p8129_p1 = scmp.ne.s32.totalorder %s317_s12, %s8128_s16  ;;  %p8137_p3 = scmp.lt.s32.totalorder %s8128_s16, %s8128_s16 }
  0x41   : > { %p8131_p9 = pnand %p8129_p1, %p8041_p12  ;;  %p8138_p5 = por %p8137_p3, %p8136_p0 }
  0x42   : > { %7294 = dma.hbm_to_vmem [thread:$0]  (!%p8448_p11), %s10263_s4, 4096, %s304_s22, [#allocation11], %s8330_s24, %s8330_s24, %s8331_s25  }
  0x43   : > { %p8132_p13 = pneg %p8131_p9 }
  0x45   : > { %p8139_p10 = pnand %p8138_p5, %p8132_p13 }
  0x47   : > { %8142 = shalt.err (!%p8139_p10)
}
  0x48   : > { %s10264_s5 = sld [smem:[#allocation84_spill]]  ;;  %s45_s18 = sadd.s32 1, %s8321_s9 }
  0x49   : > { %s54_s21 = sadd.s32 1, %s8313_s29  ;;  %p47_p12 = scmp.ge.s32.totalorder %s45_s18, 2 }
  0x4a   : > { %p61_p7 = scmp.ne.s32.totalorder %s8313_s29, %s8309_s28  ;;  %p62_p1 = scmp.eq.s32.totalorder %s8325_s10, 0 }
  0x4b   : > { %p7316_p9 = scmp.lt.s32.totalorder %s8325_s10, 2  ;;  %s10389_s18 = smov (%p47_p12, %s45_s18), 0 }
  0x4c   : > { %10265 = sst [smem:[#allocation27_spill]] %s10389_s18  ;;  %p63_p13 = por %p62_p1, %p61_p7 }
  0x4d   : > { %p8508_p0 = por %p224_p2, %p61_p7  ;;  %s49_s23 = ssub.s32 %s8321_s9, %s10389_s18 }
  0x4e   : > { %7297 = dma.hbm_to_vmem [thread:$0]  (!%p8448_p11), %s10264_s5, 16384, %s317_s12, [#allocation14], %s8330_s24, %s8330_s24, %s8331_s25  }
  0x4f   : > { %s333_s26 = sand.u32 1, %s8313_s29   ;;  %p52_p11 = scmp.eq.s32.totalorder %s49_s23, 0 }
  0x50   : > { %s8515_s24 = sshll.u32 %s333_s26, 7  ;;  %s10227_s25 = sshll.u32 %s8321_s9, 11 }
  0x51   : > { %s8519_s20 = scalar_select %p52_p11, %s8313_s29, %s54_s21  }
  0x52   : > { %s10268_s0 = sld [smem:[#allocation80_spill]]  ;;  %s337_s19 = scalar_lea.vmem [#allocation4], %s8515_s24 }
  0x53   : > { %10267 = sst [smem:[#allocation28_spill]] %s8519_s20  ;;  %s346_s2 = sshll.u32 %s337_s19, 4  ;;  %s347_s2 = int_to_ptr.vmem [resolvable:$true] %s346_s2 }
  0x54   : > { %p8529_p2 = pnand %p7316_p9, %p63_p13  ;;  %s334_s23 = scalar_lea.sflag [#allocation5], %s333_s26 }
  0x55   : > { %s8156_s21 = scalar_lea.vmem %s347_s2, 2048  ;;  %s8333_s12 = smov [#allocation4]  }
  0x56   : > { %p8145_p3 = pneg %p8529_p2  ;;  %p8157_p5 = scmp.ne.s32.totalorder %s347_s2, %s8156_s21 }
  0x57   : > { %s8161_s16 = sshll.u32 %s8333_s12, 4  ;;  %s8162_s16 = int_to_ptr.vmem [resolvable:$false] %s8161_s16 }
  0x58   : > { %s345_s22 = scalar_lea.hbm %s10268_s0, %s10227_s25  ;;  %p8159_p10 = pnand %p8157_p5, %p8145_p3 }
  0x59   : > { %s8163_s19 = scalar_lea.vmem %s8162_s16, 4096  ;;  %p8164_p7 = scmp.lt.s32.totalorder %s347_s2, %s8162_s16 }
  0x5a   : > { %p8160_p12 = pneg %p8159_p10  ;;  %p8165_p1 = scmp.lt.s32.totalorder %s8163_s19, %s8156_s21 }
  0x5c   : > { %p8166_p9 = por %p8165_p1, %p8164_p7 }
  0x5e   : > { %p8167_p13 = pnand %p8166_p9, %p8160_p12 }
  0x60   : > { %8170 = shalt.err (!%p8167_p13)
}
  0x61   : > { %s8334_s25 = smov 128   ;;  %s8335_s26 = smov 8  }
  0x62   : > { %7301 = dma.hbm_to_vmem [thread:$0]  (!%p8529_p2), %s345_s22, 2048, %s347_s2, %s334_s23, %s8334_s25, %s8334_s25, %s8335_s26  }
  0x63   : > { %s10270_s0 = sshll.u32 %s8321_s9, 11  ;;  %s360_s18 = scalar_lea.vmem [#allocation7], %s8515_s24 }
  0x64   : > { %s366_s12 = scalar_lea.hbm %s10218_s1, %s10270_s0  ;;  %s367_s16 = sshll.u32 %s360_s18, 4  ;;  %s368_s16 = int_to_ptr.vmem [resolvable:$true] %s367_s16 }
  0x65   : > { %s356_s21 = sand.u32 1, %s8325_s10   ;;  %s8184_s20 = scalar_lea.vmem %s368_s16, 2048 }
  0x66   : > { %s357_s19 = scalar_lea.sflag [#allocation8], %s356_s21  ;;  %p8185_p11 = scmp.ne.s32.totalorder %s368_s16, %s8184_s20 }
  0x67   : > { %s8336_s29 = smov [#allocation7]  }
  0x68   : > { %p8187_p5 = pnand %p8185_p11, %p8145_p3  ;;  %s8189_s14 = sshll.u32 %s8336_s29, 4  ;;  %s8190_s14 = int_to_ptr.vmem [resolvable:$false] %s8189_s14 }
  0x69   : > { %s8191_s2 = scalar_lea.vmem %s8190_s14, 4096  ;;  %p8192_p12 = scmp.lt.s32.totalorder %s368_s16, %s8190_s14 }
  0x6a   : > { %p8188_p10 = pneg %p8187_p5  ;;  %p8193_p7 = scmp.lt.s32.totalorder %s8191_s2, %s8184_s20 }
  0x6c   : > { %p8194_p1 = por %p8193_p7, %p8192_p12 }
  0x6e   : > { %p8195_p9 = pnand %p8194_p1, %p8188_p10 }
  0x70   : > { %8198 = shalt.err (!%p8195_p9)
}
  0x71   : > { %7304 = dma.hbm_to_vmem [thread:$0]  (!%p8529_p2), %s366_s12, 2048, %s368_s16, %s357_s19, %s8334_s25, %s8334_s25, %s8335_s26  }
  0x72   : > { %379 = sbr.rel (%p8439_p8) target bundleno = 2305 (0x901), region = 48 }
  0x77   : > { %s8555_s0 = sand.u32 1, %s8309_s28  }
  0x78   : > { %s6040_s4 = sshll.u32 %s8555_s0, 7  ;;  %s382_s5 = scalar_lea.sflag [#allocation5], %s8555_s0 }
  0x79   : > { %s8559_s29 = scalar_lea.vmem [#allocation4], %s6040_s4 }
  0x7a   : > { %8276 = dma.done.wait (%p8429_p4), %s382_s5, 2048  }
  0x7b   : > { %8278 = vsyncadd (%p8429_p4), %s382_s5, 4294965248  ;;  %s390_s3 = sand.u32 1, %s8420_s11   ;;  %s8566_s15 = scalar_lea.vmem [#allocation7], %s6040_s4 }
  0x7c   : > { %s391_s14 = scalar_lea.sflag [#allocation8], %s390_s3 }
  0x7d   : > { %8280 = dma.done.wait (%p8429_p4), %s391_s14, 2048  }
  0x7e   : > { %8282 = vsyncadd (%p8429_p4), %s391_s14, 4294965248  ;;  %p10271_p8 = scmp.eq.s32.totalorder %s8420_s11, 0 }
  0x80   : > { %8284 = dma.done.wait (%p10271_p8), [#allocation8], 4096   ;;  %p10272_p2 = pmov %p10271_p8 }
  0x82   : > { %8286 = vsyncadd (%p10272_p2), [#allocation8], 4294963200  ;;  %p10273_p3 = pmov %p10272_p2 }
  0x83   : > { %p10274_p13 = pmov %p10272_p2 }
  0x84   : > { %8288 = dma.done.wait (%p10273_p3), [#allocation11], 8192  }
  0x85   : > { %8290 = vsyncadd (%p10274_p13), [#allocation11], 4294959104  ;;  %p10275_p11 = pmov %p10272_p2 }
  0x86   : > { %p10276_p5 = pmov %p10272_p2 }
  0x87   : > { %8292 = dma.done.wait (%p10275_p11), [#allocation14], 16384  }
  0x88   : > { %8294 = vsyncadd (%p10276_p5), [#allocation14], 4294950912  ;;  %v8337_v0 = vmov 0   ;;  %v7383_v1 = vld [vmem:[#allocation10 + $0xe4] ss:$16 sps:$4 sm:$0xff]   ;;  %v463_v18 = vld [vmem:[%s8566_s15 + $0x8] sm:$0xff] }
  0x89   : > { %710 = vmatprep.mubr.bf16.mxu0 %v8337_v0  ;;  %823 = vmatprep.mubr.bf16.mxu1 %v8337_v0  ;;  %v7385_v2 = vld [vmem:[#allocation10 + $0xe0] ss:$16 sps:$4 sm:$0xff]   ;;  %v7386_v3 = vld [vmem:[#allocation10 + $0xc4] ss:$16 sps:$4 sm:$0xff]   ;;  %v465_v24 = vld [vmem:[%s8566_s15 + $0x18] sm:$0xff]  ;;  %s6047_s11 = sshll.u32 %s8555_s0, 8 }
  0x8a   : > { %678 = vmatprep.subr.bf16.mxu0 %v7383_v1  ;;  %v7388_v4 = vld [vmem:[#allocation10 + $0xc0] ss:$16 sps:$4 sm:$0xff]   ;;  %v7389_v5 = vld [vmem:[#allocation10 + $0xa4] ss:$16 sps:$4 sm:$0xff]   ;;  %v467_v31 = vld [vmem:[%s8566_s15 + $0x28] sm:$0xff]  ;;  %s8782_s13 = scalar_lea.vmem [#allocation16], %s6047_s11 }
  0x8b   : > { %679 = vmatpush1.bf16.msra.mxu0 %v7385_v2  ;;  %v7391_v6 = vld [vmem:[#allocation10 + $0xa0] ss:$16 sps:$4 sm:$0xff]   ;;  %v7392_v7 = vld [vmem:[#allocation10 + $0x84] ss:$16 sps:$4 sm:$0xff]   ;;  %v469_v38 = vld [vmem:[%s8566_s15 + $0x38] sm:$0xff]  ;;  %s6653_s18 = sshll.u32 %s8317_s30, 12 }
  0x8c   : > { %680 = vmatprep.subr.bf16.mxu0 %v7386_v3  ;;  %v7394_v8 = vld [vmem:[#allocation10 + $0x80] ss:$16 sps:$4 sm:$0xff]   ;;  %v7395_v9 = vld [vmem:[#allocation10 + $0x64] ss:$16 sps:$4 sm:$0xff]   ;;  %v471_v45 = vld [vmem:[%s8566_s15 + $0x48] sm:$0xff]  ;;  %s5842_s24 = sshll.u32 %s8782_s13, 4  ;;  %s9883_s22 = scalar_lea.hbm %s10225_s8, %s6653_s18  ;;  %s9885_s24 = int_to_ptr.vmem [resolvable:$true] %s5842_s24 }
  0x8d   : > { %v7397_v10 = vld [vmem:[#allocation10 + $0x60] ss:$16 sps:$4 sm:$0xff]   ;;  %v7398_v11 = vld [vmem:[#allocation10 + $0x44] ss:$16 sps:$4 sm:$0xff]   ;;  %v473_v50 = vld [vmem:[%s8566_s15 + $0x58] sm:$0xff]  ;;  %s5807_s12 = scalar_lea.sflag [#allocation17], %s8555_s0 }
  0x8e   : > { %v7400_v12 = vld [vmem:[#allocation10 + $0x40] ss:$16 sps:$4 sm:$0xff]   ;;  %v7401_v13 = vld [vmem:[#allocation10 + $0x24] ss:$16 sps:$4 sm:$0xff]   ;;  %v7455_v52 = vld [vmem:[#allocation10 + $0xec] ss:$16 sps:$4 sm:$0xff]  }
  0x8f   : > { %681 = vmatpush1.bf16.msra.mxu0 %v7388_v4  ;;  %v7403_v14 = vld [vmem:[#allocation10 + $0x20] ss:$16 sps:$4 sm:$0xff]   ;;  %v7404_v15 = vld [vmem:[#allocation10 + $0x4] ss:$16 sps:$4 sm:$0xff]   ;;  %v7457_v53 = vld [vmem:[#allocation10 + $0xe8] ss:$16 sps:$4 sm:$0xff]   ;;  %791 = vmatprep.subr.bf16.mxu1 %v7455_v52 }
  0x90   : > { %682 = vmatprep.subr.bf16.mxu0 %v7389_v5  ;;  %v7406_v16 = vld [vmem:[#allocation10] ss:$16 sps:$4 sm:$0xff]   ;;  %v7409_v19 = vld [vmem:[#allocation12 + $0xe4] ss:$16 sps:$4 sm:$0xff]   ;;  %v475_v55 = vld [vmem:[%s8566_s15 + $0x68] sm:$0xff]  ;;  %792 = vmatpush1.bf16.msra.mxu1 %v7457_v53  ;;  %s8199_s16 = scalar_lea.vmem %s9885_s24, 4096 }
  0x91   : > { %v462_v17 = vld [vmem:[%s8566_s15] sm:$0xff]  ;;  %v464_v23 = vld [vmem:[%s8566_s15 + $0x10] sm:$0xff]  ;;  %v7458_v56 = vld [vmem:[#allocation10 + $0xcc] ss:$16 sps:$4 sm:$0xff]   ;;  %p8200_p4 = scmp.ne.s32.totalorder %s9885_s24, %s8199_s16  ;;  %s8338_s21 = smov [#allocation16]  }
  0x92   : > { %v8588_v20 = vpack.c.bf16 %v463_v18, %v462_v17  ;;  %v7407_v21 = vld [vmem:[#allocation12 + $0xe0] ss:$16 sps:$4 sm:$0xff]   ;;  %v7412_v22 = vld [vmem:[#allocation12 + $0xc4] ss:$16 sps:$4 sm:$0xff]   ;;  %v8594_v27 = vpack.c.bf16 %v465_v24, %v464_v23  ;;  %793 = vmatprep.subr.bf16.mxu1 %v7458_v56  ;;  %v7460_v58 = vld [vmem:[#allocation10 + $0xc8] ss:$16 sps:$4 sm:$0xff]  }
  0x93   : > { %683 = vmatpush1.bf16.msra.mxu0 %v7391_v6  ;;  %v7410_v25 = vld [vmem:[#allocation12 + $0xc0] ss:$16 sps:$4 sm:$0xff]   ;;  %v7415_v26 = vld [vmem:[#allocation12 + $0xa4] ss:$16 sps:$4 sm:$0xff]   ;;  %v7461_v59 = vld [vmem:[#allocation10 + $0xac] ss:$16 sps:$4 sm:$0xff]   ;;  %p8201_p10 = pnand %p8200_p4, %p8508_p0 }
  0x94   : > { %684 = vmatprep.subr.bf16.mxu0 %v7392_v7  ;;  %v7413_v28 = vld [vmem:[#allocation12 + $0xa0] ss:$16 sps:$4 sm:$0xff]   ;;  %v7418_v29 = vld [vmem:[#allocation12 + $0x84] ss:$16 sps:$4 sm:$0xff]   ;;  %794 = vmatpush1.bf16.msra.mxu1 %v7460_v58  ;;  %v7463_v60 = vld [vmem:[#allocation10 + $0xa8] ss:$16 sps:$4 sm:$0xff]  }
  0x95   : > { %v466_v30 = vld [vmem:[%s8566_s15 + $0x20] sm:$0xff]  ;;  %v468_v37 = vld [vmem:[%s8566_s15 + $0x30] sm:$0xff]  ;;  %v477_v62 = vld [vmem:[%s8566_s15 + $0x78] sm:$0xff]  ;;  %795 = vmatprep.subr.bf16.mxu1 %v7461_v59  ;;  %p8202_p12 = pneg %p8201_p10  ;;  %s8203_s19 = sshll.u32 %s8338_s21, 4  ;;  %s8204_s19 = int_to_ptr.vmem [resolvable:$false] %s8203_s19 }
  0x96   : > { %v7416_v32 = vld [vmem:[#allocation12 + $0x80] ss:$16 sps:$4 sm:$0xff]   ;;  %v7421_v33 = vld [vmem:[#allocation12 + $0x64] ss:$16 sps:$4 sm:$0xff]   ;;  %v8600_v35 = vpack.c.bf16 %v467_v31, %v466_v30  ;;  %v8606_v42 = vpack.c.bf16 %v469_v38, %v468_v37  ;;  %v7464_v63 = vld [vmem:[#allocation10 + $0x8c] ss:$16 sps:$4 sm:$0xff]   ;;  %p8206_p7 = scmp.lt.s32.totalorder %s9885_s24, %s8204_s19 }
  0x97   : > { %685 = vmatpush1.bf16.msra.mxu0 %v7394_v8  ;;  %v7419_v34 = vld [vmem:[#allocation12 + $0x60] ss:$16 sps:$4 sm:$0xff]   ;;  %v7424_v36 = vld [vmem:[#allocation12 + $0x44] ss:$16 sps:$4 sm:$0xff]   ;;  %v7466_v2 = vld [vmem:[#allocation10 + $0x88] ss:$16 sps:$4 sm:$0xff]  }
  0x98   : > { %686 = vmatprep.subr.bf16.mxu0 %v7395_v9  ;;  %v7422_v39 = vld [vmem:[#allocation12 + $0x40] ss:$16 sps:$4 sm:$0xff]   ;;  %v7427_v40 = vld [vmem:[#allocation12 + $0x24] ss:$16 sps:$4 sm:$0xff]   ;;  %796 = vmatpush1.bf16.msra.mxu1 %v7463_v60  ;;  %v7467_v3 = vld [vmem:[#allocation10 + $0x6c] ss:$16 sps:$4 sm:$0xff]  }
  0x99   : > { %v7425_v41 = vld [vmem:[#allocation12 + $0x20] ss:$16 sps:$4 sm:$0xff]   ;;  %v7430_v43 = vld [vmem:[#allocation12 + $0x4] ss:$16 sps:$4 sm:$0xff]   ;;  %797 = vmatprep.subr.bf16.mxu1 %v7464_v63  ;;  %v7469_v4 = vld [vmem:[#allocation10 + $0x68] ss:$16 sps:$4 sm:$0xff]  }
  0x9a   : > { %v470_v44 = vld [vmem:[%s8566_s15 + $0x40] sm:$0xff]  ;;  %v472_v49 = vld [vmem:[%s8566_s15 + $0x50] sm:$0xff]  ;;  %v7470_v7 = vld [vmem:[#allocation10 + $0x4c] ss:$16 sps:$4 sm:$0xff]   ;;  %s8205_s2 = scalar_lea.vmem %s8204_s19, 8192 }
  0x9b   : > { %687 = vmatpush1.bf16.msra.mxu0 %v7397_v10  ;;  %v7428_v46 = vld [vmem:[#allocation12] ss:$16 sps:$4 sm:$0xff]   ;;  %v7433_v47 = vld [vmem:[#allocation9 + $0xe4] ss:$16 sps:$4 sm:$0xff]   ;;  %v8612_v48 = vpack.c.bf16 %v471_v45, %v470_v44  ;;  %v8618_v51 = vpack.c.bf16 %v473_v50, %v472_v49  ;;  %v7472_v8 = vld [vmem:[#allocation10 + $0x48] ss:$16 sps:$4 sm:$0xff]   ;;  %p8207_p1 = scmp.lt.s32.totalorder %s8205_s2, %s8199_s16 }
  0x9c   : > { %688 = vmatprep.subr.bf16.mxu0 %v7398_v11  ;;  %v474_v54 = vld [vmem:[%s8566_s15 + $0x60] sm:$0xff]  ;;  %v476_v61 = vld [vmem:[%s8566_s15 + $0x70] sm:$0xff]  ;;  %798 = vmatpush1.bf16.msra.mxu1 %v7466_v2  ;;  %v7473_v11 = vld [vmem:[#allocation10 + $0x2c] ss:$16 sps:$4 sm:$0xff]  }
  0x9d   : > { %v8624_v57 = vpack.c.bf16 %v475_v55, %v474_v54  ;;  %v8630_v1 = vpack.c.bf16 %v477_v62, %v476_v61  ;;  %799 = vmatprep.subr.bf16.mxu1 %v7467_v3  ;;  %v7431_v5 = vld [vmem:[#allocation9 + $0xe0] ss:$16 sps:$4 sm:$0xff]   ;;  %v7436_v6 = vld [vmem:[#allocation9 + $0xc4] ss:$16 sps:$4 sm:$0xff]   ;;  %v7484_v30 = vld [vmem:[#allocation12 + $0xcc] ss:$16 sps:$4 sm:$0xff]   ;;  %p8208_p9 = por %p8207_p1, %p8206_p7 }
  0x9e   : > { %v7434_v9 = vld [vmem:[#allocation9 + $0xc0] ss:$16 sps:$4 sm:$0xff]   ;;  %v7439_v10 = vld [vmem:[#allocation9 + $0xa4] ss:$16 sps:$4 sm:$0xff]   ;;  %v7482_v31 = vld [vmem:[#allocation12 + $0xc8] ss:$16 sps:$4 sm:$0xff]  }
  0x9f   : > { %689 = vmatpush1.bf16.msra.mxu0 %v7400_v12  ;;  %v7475_v12 = vld [vmem:[#allocation10 + $0x28] ss:$16 sps:$4 sm:$0xff]   ;;  %v7440_v17 = vld [vmem:[#allocation9 + $0x80] ss:$16 sps:$4 sm:$0xff]   ;;  %v7445_v18 = vld [vmem:[#allocation9 + $0x64] ss:$16 sps:$4 sm:$0xff]   ;;  %p8209_p8 = pnand %p8208_p9, %p8202_p12 }
  0xa0   : > { %690 = vmatprep.subr.bf16.mxu0 %v7401_v13  ;;  %800 = vmatpush1.bf16.msra.mxu1 %v7469_v4  ;;  %v7437_v13 = vld [vmem:[#allocation9 + $0xa0] ss:$16 sps:$4 sm:$0xff]   ;;  %v7451_v23 = vld [vmem:[#allocation9 + $0x24] ss:$16 sps:$4 sm:$0xff]   ;;  %v1771_v38 = vld [vmem:[%s8559_s29 + $0x8] sm:$0xff] }
  0xa1   : > { %801 = vmatprep.subr.bf16.mxu1 %v7470_v7  ;;  %v7449_v24 = vld [vmem:[#allocation9 + $0x20] ss:$16 sps:$4 sm:$0xff]   ;;  %v7494_v44 = vld [vmem:[#allocation12 + $0x48] ss:$16 sps:$4 sm:$0xff]   ;;  %v7502_v52 = vld [vmem:[#allocation12 + $0xc] ss:$16 sps:$4 sm:$0xff]  }
  0xa2   : > { %v1770_v37 = vld [vmem:[%s8559_s29] sm:$0xff]  ;;  %v1772_v45 = vld [vmem:[%s8559_s29 + $0x10] sm:$0xff]  ;;  %v7497_v49 = vld [vmem:[#allocation12 + $0x28] ss:$16 sps:$4 sm:$0xff]  }
  0xa3   : > { %691 = vmatpush1.bf16.msra.mxu0 %v7403_v14  ;;  %v7442_v14 = vld [vmem:[#allocation9 + $0x84] ss:$16 sps:$4 sm:$0xff]   ;;  %v7500_v53 = vld [vmem:[#allocation12 + $0x8] ss:$16 sps:$4 sm:$0xff]   ;;  %v7510_v3 = vld [vmem:[#allocation9 + $0xec] ss:$16 sps:$4 sm:$0xff]  }
  0xa4   : > { %692 = vmatprep.subr.bf16.mxu0 %v7404_v15  ;;  %802 = vmatpush1.bf16.msra.mxu1 %v7472_v8  ;;  %v7476_v15 = vld [vmem:[#allocation10 + $0xc] ss:$16 sps:$4 sm:$0xff]   ;;  %v1774_v54 = vld [vmem:[%s8559_s29 + $0x20] sm:$0xff]  ;;  %v1776_v58 = vld [vmem:[%s8559_s29 + $0x30] sm:$0xff] }
  0xa5   : > { %803 = vmatprep.subr.bf16.mxu1 %v7473_v11  ;;  %v1775_v55 = vld [vmem:[%s8559_s29 + $0x28] sm:$0xff]  ;;  %v1777_v59 = vld [vmem:[%s8559_s29 + $0x38] sm:$0xff] }
  0xa6   : > { %v8681_v56 = vpack.c.bf16 %v1775_v55, %v1774_v54  ;;  %v8689_v60 = vpack.c.bf16 %v1777_v59, %v1776_v58  ;;  %v1779_v61 = vld [vmem:[%s8559_s29 + $0x48] sm:$0xff]  ;;  %v1781_v63 = vld [vmem:[%s8559_s29 + $0x58] sm:$0xff] }
  0xa7   : > { %693 = vmatpush1.bf16.msra.mxu0 %v7406_v16  ;;  %v7478_v16 = vld [vmem:[#allocation10 + $0x8] ss:$16 sps:$4 sm:$0xff]   ;;  %v7517_v8 = vld [vmem:[#allocation9 + $0xac] ss:$16 sps:$4 sm:$0xff]  }
  0xa8   : > { %1320 = vmatprep.subr.bf16.mxu0 %v7409_v19  ;;  %804 = vmatpush1.bf16.msra.mxu1 %v7475_v12  ;;  %v7443_v19 = vld [vmem:[#allocation9 + $0x60] ss:$16 sps:$4 sm:$0xff]   ;;  %v1783_v4 = vld [vmem:[%s8559_s29 + $0x68] sm:$0xff] }
  0xa9   : > { %805 = vmatprep.subr.bf16.mxu1 %v7476_v15  ;;  %v7512_v7 = vld [vmem:[#allocation9 + $0xc8] ss:$16 sps:$4 sm:$0xff]   ;;  %v7521_v12 = vld [vmem:[#allocation9 + $0x8c] ss:$16 sps:$4 sm:$0xff]  }
  0xaa   : > { %711 = vmatmul.mubr.bf16.vlgmr.msra.gmra.mxu0 %v8588_v20  ;;  %v7515_v11 = vld [vmem:[#allocation9 + $0xa8] ss:$16 sps:$4 sm:$0xff]  }
  0xab   : > { %1321 = vmatpush1.bf16.msra.mxu0 %v7407_v21  ;;  %720 = vmatprep.mubr.bf16.mxu0 %v8337_v0  ;;  %v7448_v21 = vld [vmem:[#allocation9 + $0x44] ss:$16 sps:$4 sm:$0xff]   ;;  %v7522_v15 = vld [vmem:[#allocation9 + $0x68] ss:$16 sps:$4 sm:$0xff]  }
  0xac   : > { %1322 = vmatprep.subr.bf16.mxu0 %v7412_v22  ;;  %806 = vmatpush1.bf16.msra.mxu1 %v7478_v16  ;;  %v7446_v22 = vld [vmem:[#allocation9 + $0x40] ss:$16 sps:$4 sm:$0xff]   ;;  %v7528_v16 = vld [vmem:[#allocation9 + $0x4c] ss:$16 sps:$4 sm:$0xff]  }
  0xaf   : > { %1323 = vmatpush1.bf16.msra.mxu0 %v7410_v25  ;;  %824 = vmatmul.mubr.bf16.vlgmr.msra.gmra.mxu1 %v8588_v20  ;;  %v7454_v25 = vld [vmem:[#allocation9 + $0x4] ss:$16 sps:$4 sm:$0xff]  }
  0xb0   : > { %1324 = vmatprep.subr.bf16.mxu0 %v7415_v26  ;;  %833 = vmatprep.mubr.bf16.mxu1 %v8337_v0  ;;  %v7452_v26 = vld [vmem:[#allocation9] ss:$16 sps:$4 sm:$0xff]  }
  0xb2   : > { %721 = vmatmul.mubr.bf16.gmra.mxu0 %v8594_v27 }
  0xb3   : > { %730 = vmatprep.mubr.bf16.mxu0 %v8337_v0  ;;  %1325 = vmatpush1.bf16.msra.mxu0 %v7413_v28  ;;  %v7481_v28 = vld [vmem:[#allocation12 + $0xec] ss:$16 sps:$4 sm:$0xff]  }
  0xb4   : > { %1326 = vmatprep.subr.bf16.mxu0 %v7418_v29  ;;  %v7479_v29 = vld [vmem:[#allocation12 + $0xe8] ss:$16 sps:$4 sm:$0xff]   ;;  %1433 = vmatprep.subr.bf16.mxu1 %v7481_v28 }
  0xb5   : > { %1434 = vmatpush1.bf16.msra.mxu1 %v7479_v29 }
  0xb6   : > { %1435 = vmatprep.subr.bf16.mxu1 %v7484_v30 }
  0xb7   : > { %1327 = vmatpush1.bf16.msra.mxu0 %v7416_v32  ;;  %834 = vmatmul.mubr.bf16.gmra.mxu1 %v8594_v27  ;;  %v7487_v32 = vld [vmem:[#allocation12 + $0xac] ss:$16 sps:$4 sm:$0xff]  }
  0xb8   : > { %1328 = vmatprep.subr.bf16.mxu0 %v7421_v33  ;;  %843 = vmatprep.mubr.bf16.mxu1 %v8337_v0  ;;  %v7485_v33 = vld [vmem:[#allocation12 + $0xa8] ss:$16 sps:$4 sm:$0xff]  }
  0xb9   : > { %1436 = vmatpush1.bf16.msra.mxu1 %v7482_v31 }
  0xba   : > { %731 = vmatmul.mubr.bf16.gmra.mxu0 %v8600_v35  ;;  %1437 = vmatprep.subr.bf16.mxu1 %v7487_v32 }
  0xbb   : > { %740 = vmatprep.mubr.bf16.mxu0 %v8337_v0  ;;  %1329 = vmatpush1.bf16.msra.mxu0 %v7419_v34  ;;  %v7490_v34 = vld [vmem:[#allocation12 + $0x8c] ss:$16 sps:$4 sm:$0xff]  }
  0xbc   : > { %1330 = vmatprep.subr.bf16.mxu0 %v7424_v36  ;;  %v7488_v36 = vld [vmem:[#allocation12 + $0x88] ss:$16 sps:$4 sm:$0xff]  }
  0xbd   : > { %1438 = vmatpush1.bf16.msra.mxu1 %v7485_v33 }
  0xbe   : > { %1439 = vmatprep.subr.bf16.mxu1 %v7490_v34 }
  0xbf   : > { %1331 = vmatpush1.bf16.msra.mxu0 %v7422_v39  ;;  %844 = vmatmul.mubr.bf16.gmra.mxu1 %v8600_v35  ;;  %v7493_v39 = vld [vmem:[#allocation12 + $0x6c] ss:$16 sps:$4 sm:$0xff]  }
  0xc0   : > { %1332 = vmatprep.subr.bf16.mxu0 %v7427_v40  ;;  %853 = vmatprep.mubr.bf16.mxu1 %v8337_v0  ;;  %v7491_v40 = vld [vmem:[#allocation12 + $0x68] ss:$16 sps:$4 sm:$0xff]  }
  0xc1   : > { %1440 = vmatpush1.bf16.msra.mxu1 %v7488_v36 }
  0xc2   : > { %741 = vmatmul.mubr.bf16.gmra.mxu0 %v8606_v42  ;;  %1441 = vmatprep.subr.bf16.mxu1 %v7493_v39 }
  0xc3   : > { %750 = vmatprep.mubr.bf16.mxu0 %v8337_v0  ;;  %1333 = vmatpush1.bf16.msra.mxu0 %v7425_v41  ;;  %v8665_v41 = vpack.c.bf16 %v1771_v38, %v1770_v37 }
  0xc4   : > { %1334 = vmatprep.subr.bf16.mxu0 %v7430_v43  ;;  %v7496_v43 = vld [vmem:[#allocation12 + $0x4c] ss:$16 sps:$4 sm:$0xff]  }
  0xc5   : > { %1442 = vmatpush1.bf16.msra.mxu1 %v7491_v40 }
  0xc6   : > { %1443 = vmatprep.subr.bf16.mxu1 %v7496_v43 }
  0xc7   : > { %1335 = vmatpush1.bf16.msra.mxu0 %v7428_v46  ;;  %854 = vmatmul.mubr.bf16.gmra.mxu1 %v8606_v42  ;;  %v1773_v46 = vld [vmem:[%s8559_s29 + $0x18] sm:$0xff] }
  0xc8   : > { %1986 = vmatprep.subr.bf16.mxu0 %v7433_v47  ;;  %863 = vmatprep.mubr.bf16.mxu1 %v8337_v0  ;;  %v7499_v47 = vld [vmem:[#allocation12 + $0x2c] ss:$16 sps:$4 sm:$0xff]   ;;  %v8673_v50 = vpack.c.bf16 %v1773_v46, %v1772_v45 }
  0xc9   : > { %1444 = vmatpush1.bf16.msra.mxu1 %v7494_v44 }
  0xca   : > { %751 = vmatmul.mubr.bf16.gmra.mxu0 %v8612_v48  ;;  %1445 = vmatprep.subr.bf16.mxu1 %v7499_v47 }
  0xcb   : > { %760 = vmatprep.mubr.bf16.mxu0 %v8337_v0 }
  0xcd   : > { %1446 = vmatpush1.bf16.msra.mxu1 %v7497_v49 }
  0xce   : > { %1447 = vmatprep.subr.bf16.mxu1 %v7502_v52 }
  0xcf   : > { %864 = vmatmul.mubr.bf16.gmra.mxu1 %v8612_v48 }
  0xd0   : > { %873 = vmatprep.mubr.bf16.mxu1 %v8337_v0 }
  0xd1   : > { %1448 = vmatpush1.bf16.msra.mxu1 %v7500_v53 }
  0xd2   : > { %761 = vmatmul.mubr.bf16.gmra.mxu0 %v8618_v51  ;;  %2099 = vmatprep.subr.bf16.mxu1 %v7510_v3 }
  0xd3   : > { %770 = vmatprep.mubr.bf16.mxu0 %v8337_v0 }
  0xd7   : > { %874 = vmatmul.mubr.bf16.gmra.mxu1 %v8618_v51 }
  0xd8   : > { %883 = vmatprep.mubr.bf16.mxu1 %v8337_v0 }
  0xda   : > { %771 = vmatmul.mubr.bf16.gmra.mxu0 %v8624_v57 }
  0xdb   : > { %780 = vmatprep.mubr.bf16.mxu0 %v8337_v0 }
  0xdf   : > { %884 = vmatmul.mubr.bf16.gmra.mxu1 %v8624_v57 }
  0xe0   : > { %893 = vmatprep.mubr.bf16.mxu1 %v8337_v0 }
  0xe2   : > { %781 = vmatmul.mubr.bf16.gmra.mxu0 %v8630_v1 }
  0xe3   : > { %1352 = vmatprep.mubr.bf16.mxu0 %v8337_v0 }
  0xe7   : > { %894 = vmatmul.mubr.bf16.gmra.mxu1 %v8630_v1 }
  0xe8   : > { %1465 = vmatprep.mubr.bf16.mxu1 %v8337_v0 }
  0xea   : > { %1353 = vmatmul.mubr.bf16.vlgmr.msra.gmra.mxu0 %v8588_v20 }
  0xeb   : > { %1987 = vmatpush1.bf16.msra.mxu0 %v7431_v5  ;;  %1362 = vmatprep.mubr.bf16.mxu0 %v8337_v0  ;;  %v7508_v5 = vld [vmem:[#allocation9 + $0xe8] ss:$16 sps:$4 sm:$0xff]  }
  0xec   : > { %1988 = vmatprep.subr.bf16.mxu0 %v7436_v6 }
  0xef   : > { %1989 = vmatpush1.bf16.msra.mxu0 %v7434_v9  ;;  %1466 = vmatmul.mubr.bf16.vlgmr.msra.gmra.mxu1 %v8588_v20  ;;  %v1778_v20 = vld [vmem:[%s8559_s29 + $0x40] sm:$0xff]  ;;  %v1784_v9 = vld [vmem:[%s8559_s29 + $0x70] sm:$0xff] }
  0xf0   : > { %1990 = vmatprep.subr.bf16.mxu0 %v7439_v10  ;;  %1475 = vmatprep.mubr.bf16.mxu1 %v8337_v0  ;;  %v8697_v62 = vpack.c.bf16 %v1779_v61, %v1778_v20  ;;  %v1785_v10 = vld [vmem:[%s8559_s29 + $0x78] sm:$0xff] }
  0xf1   : > { %2100 = vmatpush1.bf16.msra.mxu1 %v7508_v5 }
  0xf2   : > { %1363 = vmatmul.mubr.bf16.gmra.mxu0 %v8594_v27 }
  0xf3   : > { %1372 = vmatprep.mubr.bf16.mxu0 %v8337_v0  ;;  %1991 = vmatpush1.bf16.msra.mxu0 %v7437_v13  ;;  %v7519_v13 = vld [vmem:[#allocation9 + $0x88] ss:$16 sps:$4 sm:$0xff]  }
  0xf4   : > { %1992 = vmatprep.subr.bf16.mxu0 %v7442_v14  ;;  %v7524_v14 = vld [vmem:[#allocation9 + $0x6c] ss:$16 sps:$4 sm:$0xff]  }
  0xf7   : > { %1993 = vmatpush1.bf16.msra.mxu0 %v7440_v17  ;;  %1476 = vmatmul.mubr.bf16.gmra.mxu1 %v8594_v27  ;;  %v1780_v27 = vld [vmem:[%s8559_s29 + $0x50] sm:$0xff] }
  0xf8   : > { %1994 = vmatprep.subr.bf16.mxu0 %v7445_v18  ;;  %1485 = vmatprep.mubr.bf16.mxu1 %v8337_v0  ;;  %v8705_v2 = vpack.c.bf16 %v1781_v63, %v1780_v27  ;;  %v7531_v18 = vld [vmem:[#allocation9 + $0x2c] ss:$16 sps:$4 sm:$0xff]  }
  0xfa   : > { %1373 = vmatmul.mubr.bf16.gmra.mxu0 %v8600_v35 }
  0xfb   : > { %1382 = vmatprep.mubr.bf16.mxu0 %v8337_v0  ;;  %1995 = vmatpush1.bf16.msra.mxu0 %v7443_v19  ;;  %v7529_v19 = vld [vmem:[#allocation9 + $0x28] ss:$16 sps:$4 sm:$0xff]  }
  0xfc   : > { %1996 = vmatprep.subr.bf16.mxu0 %v7448_v21 }
  0xff   : > { %1997 = vmatpush1.bf16.msra.mxu0 %v7446_v22  ;;  %1486 = vmatmul.mubr.bf16.gmra.mxu1 %v8600_v35  ;;  %v1782_v35 = vld [vmem:[%s8559_s29 + $0x60] sm:$0xff] }
 0x100   : > { %1998 = vmatprep.subr.bf16.mxu0 %v7451_v23  ;;  %1495 = vmatprep.mubr.bf16.mxu1 %v8337_v0  ;;  %v8713_v6 = vpack.c.bf16 %v1783_v4, %v1782_v35 }
 0x102   : > { %1383 = vmatmul.mubr.bf16.gmra.mxu0 %v8606_v42 }
 0x103   : > { %1392 = vmatprep.mubr.bf16.mxu0 %v8337_v0  ;;  %1999 = vmatpush1.bf16.msra.mxu0 %v7449_v24 }
 0x104   : > { %2000 = vmatprep.subr.bf16.mxu0 %v7454_v25  ;;  %v7533_v25 = vld [vmem:[#allocation9 + $0x8] ss:$16 sps:$4 sm:$0xff]  }
 0x107   : > { %2001 = vmatpush1.bf16.msra.mxu0 %v7452_v26  ;;  %1496 = vmatmul.mubr.bf16.gmra.mxu1 %v8606_v42  ;;  %v7514_v42 = vld [vmem:[#allocation9 + $0xcc] ss:$16 sps:$4 sm:$0xff]  }
 0x108   : > { %1505 = vmatprep.mubr.bf16.mxu1 %v8337_v0  ;;  %2101 = vmatprep.subr.bf16.mxu1 %v7514_v42 }
 0x109   : > { %2102 = vmatpush1.bf16.msra.mxu1 %v7512_v7 }
 0x10a   : > { %1393 = vmatmul.mubr.bf16.gmra.mxu0 %v8612_v48  ;;  %2103 = vmatprep.subr.bf16.mxu1 %v7517_v8 }
 0x10b   : > { %1402 = vmatprep.mubr.bf16.mxu0 %v8337_v0 }
 0x10d   : > { %2104 = vmatpush1.bf16.msra.mxu1 %v7515_v11 }
 0x10e   : > { %2105 = vmatprep.subr.bf16.mxu1 %v7521_v12 }
 0x10f   : > { %1506 = vmatmul.mubr.bf16.gmra.mxu1 %v8612_v48  ;;  %v8721_v48 = vpack.c.bf16 %v1785_v10, %v1784_v9 }
 0x110   : > { %1515 = vmatprep.mubr.bf16.mxu1 %v8337_v0 }
 0x111   : > { %2106 = vmatpush1.bf16.msra.mxu1 %v7519_v13 }
 0x112   : > { %1403 = vmatmul.mubr.bf16.gmra.mxu0 %v8618_v51  ;;  %2107 = vmatprep.subr.bf16.mxu1 %v7524_v14 }
 0x113   : > { %1412 = vmatprep.mubr.bf16.mxu0 %v8337_v0 }
 0x115   : > { %2108 = vmatpush1.bf16.msra.mxu1 %v7522_v15 }
 0x116   : > { %2109 = vmatprep.subr.bf16.mxu1 %v7528_v16 }
 0x117   : > { %1516 = vmatmul.mubr.bf16.gmra.mxu1 %v8618_v51  ;;  %v7526_v51 = vld [vmem:[#allocation9 + $0x48] ss:$16 sps:$4 sm:$0xff]  }
 0x118   : > { %1525 = vmatprep.mubr.bf16.mxu1 %v8337_v0 }
 0x119   : > { %2110 = vmatpush1.bf16.msra.mxu1 %v7526_v51 }
 0x11a   : > { %1413 = vmatmul.mubr.bf16.gmra.mxu0 %v8624_v57  ;;  %2111 = vmatprep.subr.bf16.mxu1 %v7531_v18 }
 0x11b   : > { %1422 = vmatprep.mubr.bf16.mxu0 %v8337_v0 }
 0x11d   : > { %2112 = vmatpush1.bf16.msra.mxu1 %v7529_v19 }
 0x11f   : > { %1526 = vmatmul.mubr.bf16.gmra.mxu1 %v8624_v57  ;;  %v7535_v57 = vld [vmem:[#allocation9 + $0xc] ss:$16 sps:$4 sm:$0xff]  }
 0x120   : > { %1535 = vmatprep.mubr.bf16.mxu1 %v8337_v0  ;;  %2113 = vmatprep.subr.bf16.mxu1 %v7535_v57 }
 0x121   : > { %2114 = vmatpush1.bf16.msra.mxu1 %v7533_v25 }
 0x122   : > { %1423 = vmatmul.mubr.bf16.gmra.mxu0 %v8630_v1 }
 0x123   : > { %2018 = vmatprep.mubr.bf16.mxu0 %v8337_v0 }
 0x127   : > { %1536 = vmatmul.mubr.bf16.gmra.mxu1 %v8630_v1 }
 0x128   : > { %2131 = vmatprep.mubr.bf16.mxu1 %v8337_v0 }
 0x12a   : > { %2019 = vmatmul.mubr.bf16.vlgmr.msra.gmra.mxu0 %v8665_v41 }
 0x12b   : > { %2028 = vmatprep.mubr.bf16.mxu0 %v8337_v0 }
 0x12f   : > { %2132 = vmatmul.mubr.bf16.vlgmr.msra.gmra.mxu1 %v8665_v41 }
 0x130   : > { %2141 = vmatprep.mubr.bf16.mxu1 %v8337_v0 }
 0x132   : > { %2029 = vmatmul.mubr.bf16.gmra.mxu0 %v8673_v50 }
 0x133   : > { %2038 = vmatprep.mubr.bf16.mxu0 %v8337_v0 }
 0x137   : > { %2142 = vmatmul.mubr.bf16.gmra.mxu1 %v8673_v50 }
 0x138   : > { %2151 = vmatprep.mubr.bf16.mxu1 %v8337_v0 }
 0x13a   : > { %2039 = vmatmul.mubr.bf16.gmra.mxu0 %v8681_v56 }
 0x13b   : > { %2048 = vmatprep.mubr.bf16.mxu0 %v8337_v0 }
 0x13f   : > { %2152 = vmatmul.mubr.bf16.gmra.mxu1 %v8681_v56 }
 0x140   : > { %2161 = vmatprep.mubr.bf16.mxu1 %v8337_v0 }
 0x142   : > { %2049 = vmatmul.mubr.bf16.gmra.mxu0 %v8689_v60 }
 0x143   : > { %2058 = vmatprep.mubr.bf16.mxu0 %v8337_v0 }
 0x147   : > { %2162 = vmatmul.mubr.bf16.gmra.mxu1 %v8689_v60 }
 0x148   : > { %2171 = vmatprep.mubr.bf16.mxu1 %v8337_v0 }
 0x14a   : > { %2059 = vmatmul.mubr.bf16.gmra.mxu0 %v8697_v62 }
 0x14b   : > { %2068 = vmatprep.mubr.bf16.mxu0 %v8337_v0 }
 0x14f   : > { %2172 = vmatmul.mubr.bf16.gmra.mxu1 %v8697_v62 }
 0x150   : > { %2181 = vmatprep.mubr.bf16.mxu1 %v8337_v0 }
 0x152   : > { %2069 = vmatmul.mubr.bf16.gmra.mxu0 %v8705_v2 }
 0x153   : > { %2078 = vmatprep.mubr.bf16.mxu0 %v8337_v0 }
 0x157   : > { %2182 = vmatmul.mubr.bf16.gmra.mxu1 %v8705_v2 }
 0x158   : > { %2191 = vmatprep.mubr.bf16.mxu1 %v8337_v0 }
 0x15a   : > { %2079 = vmatmul.mubr.bf16.gmra.mxu0 %v8713_v6 }
 0x15b   : > { %2088 = vmatprep.mubr.bf16.mxu0 %v8337_v0 }
 0x15f   : > { %2192 = vmatmul.mubr.bf16.gmra.mxu1 %v8713_v6 }
 0x160   : > { %2201 = vmatprep.mubr.bf16.mxu1 %v8337_v0 }
 0x162   : > { %2089 = vmatmul.mubr.bf16.gmra.mxu0 %v8721_v48 }
 0x167   : > { %2202 = vmatmul.mubr.bf16.gmra.mxu1 %v8721_v48 }
 0x16a   : > { %v712_v17 = vpop.f32.mrf.mxu0 }
 0x16c   : > { %v714_v21 = vpop.f32.mrf.mxu0 }
 0x16d   : > { %v6523_v22 = vpack.c.bf16 %v714_v21, %v712_v17 }
 0x16e   : > { %v716_v23 = vpop.f32.mrf.mxu0 }
 0x16f   : > { %1096 = vst [vmem:[#allocation2] sm:$0xff] %v6523_v22 }
 0x170   : > { %v718_v24 = vpop.f32.mrf.mxu0 }
 0x171   : > { %v6525_v26 = vpack.c.bf16 %v718_v24, %v716_v23 }
 0x172   : > { %v722_v28 = vpop.f32.mrf.mxu0 }
 0x173   : > { %1098 = vst [vmem:[#allocation2 + $0x10] sm:$0xff] %v6525_v26 }
 0x174   : > { %v724_v29 = vpop.f32.mrf.mxu0 }
 0x175   : > { %v6527_v30 = vpack.c.bf16 %v724_v29, %v722_v28 }
 0x176   : > { %v726_v31 = vpop.f32.mrf.mxu0 }
 0x177   : > { %1100 = vst [vmem:[#allocation2 + $0x20] sm:$0xff] %v6527_v30 }
 0x178   : > { %v728_v1 = vpop.f32.mrf.mxu0 }
 0x179   : > { %v6529_v32 = vpack.c.bf16 %v728_v1, %v726_v31 }
 0x17a   : > { %v732_v33 = vpop.f32.mrf.mxu0 }
 0x17b   : > { %1102 = vst [vmem:[#allocation2 + $0x30] sm:$0xff] %v6529_v32 }
 0x17c   : > { %v734_v34 = vpop.f32.mrf.mxu0 }
 0x17d   : > { %v6531_v36 = vpack.c.bf16 %v734_v34, %v732_v33 }
 0x17e   : > { %v736_v37 = vpop.f32.mrf.mxu0 }
 0x17f   : > { %1104 = vst [vmem:[#allocation2 + $0x40] sm:$0xff] %v6531_v36 }
 0x180   : > { %v738_v38 = vpop.f32.mrf.mxu0 }
 0x181   : > { %v6533_v39 = vpack.c.bf16 %v738_v38, %v736_v37 }
 0x182   : > { %v742_v40 = vpop.f32.mrf.mxu0 }
 0x183   : > { %1106 = vst [vmem:[#allocation2 + $0x50] sm:$0xff] %v6533_v39 }
 0x184   : > { %v744_v41 = vpop.f32.mrf.mxu0 }
 0x185   : > { %v6535_v43 = vpack.c.bf16 %v744_v41, %v742_v40 }
 0x186   : > { %v746_v44 = vpop.f32.mrf.mxu0 }
 0x187   : > { %1108 = vst [vmem:[#allocation2 + $0x60] sm:$0xff] %v6535_v43 }
 0x188   : > { %v748_v45 = vpop.f32.mrf.mxu0 }
 0x189   : > { %v6537_v46 = vpack.c.bf16 %v748_v45, %v746_v44 }
 0x18a   : > { %v752_v47 = vpop.f32.mrf.mxu0  ;;  %v7511_v44 = vld [vmem:[#allocation2 + $0x40] ss:$16 sps:$4 sm:$0xff]  }
 0x18b   : > { %1110 = vst [vmem:[#allocation2 + $0x70] sm:$0xff] %v6537_v46 }
 0x18c   : > { %v754_v49 = vpop.f32.mrf.mxu0 }
 0x18d   : > { %v6539_v50 = vpack.c.bf16 %v754_v49, %v752_v47 }
 0x18e   : > { %v756_v52 = vpop.f32.mrf.mxu0 }
 0x18f   : > { %1112 = vst [vmem:[#allocation2 + $0x80] sm:$0xff] %v6539_v50 }
 0x190   : > { %v758_v53 = vpop.f32.mrf.mxu0 }
 0x191   : > { %v6541_v54 = vpack.c.bf16 %v758_v53, %v756_v52  ;;  %v7518_v53 = vld [vmem:[#allocation2 + $0x20] ss:$16 sps:$4 sm:$0xff]  }
 0x192   : > { %v762_v55 = vpop.f32.mrf.mxu0  ;;  %v7507_v36 = vld [vmem:[#allocation2 + $0x60] ss:$16 sps:$4 sm:$0xff]  }
 0x193   : > { %1114 = vst [vmem:[#allocation2 + $0x90] sm:$0xff] %v6541_v54 }
 0x194   : > { %v764_v56 = vpop.f32.mrf.mxu0 }
 0x195   : > { %v6543_v58 = vpack.c.bf16 %v764_v56, %v762_v55 }
 0x196   : > { %v766_v59 = vpop.f32.mrf.mxu0 }
 0x197   : > { %1116 = vst [vmem:[#allocation2 + $0xa0] sm:$0xff] %v6543_v58 }
 0x198   : > { %v768_v20 = vpop.f32.mrf.mxu0 }
 0x199   : > { %v6545_v61 = vpack.c.bf16 %v768_v20, %v766_v59 }
 0x19a   : > { %v772_v27 = vpop.f32.mrf.mxu0  ;;  %v7506_v29 = vld [vmem:[#allocation2 + $0x80] ss:$16 sps:$4 sm:$0xff]  }
 0x19b   : > { %1118 = vst [vmem:[#allocation2 + $0xb0] sm:$0xff] %v6545_v61  ;;  %v7525_v61 = vld [vmem:[#allocation2] ss:$16 sps:$4 sm:$0xff]  }
 0x19c   : > { %v774_v60 = vpop.f32.mrf.mxu0 }
 0x19d   : > { %v6547_v63 = vpack.c.bf16 %v774_v60, %v772_v27 }
 0x19e   : > { %v776_v3 = vpop.f32.mrf.mxu0 }
 0x19f   : > { %1120 = vst [vmem:[#allocation2 + $0xc0] sm:$0xff] %v6547_v63 }
 0x1a0   : > { %v778_v35 = vpop.f32.mrf.mxu0 }
 0x1a1   : > { %v6549_v4 = vpack.c.bf16 %v778_v35, %v776_v3 }
 0x1a2   : > { %v782_v5 = vpop.f32.mrf.mxu0  ;;  %v7505_v22 = vld [vmem:[#allocation2 + $0xa0] ss:$16 sps:$4 sm:$0xff]  }
 0x1a3   : > { %1122 = vst [vmem:[#allocation2 + $0xd0] sm:$0xff] %v6549_v4 }
 0x1a4   : > { %v784_v62 = vpop.f32.mrf.mxu0 }
 0x1a5   : > { %v6551_v42 = vpack.c.bf16 %v784_v62, %v782_v5 }
 0x1a6   : > { %v786_v7 = vpop.f32.mrf.mxu0 }
 0x1a7   : > { %1124 = vst [vmem:[#allocation2 + $0xe0] sm:$0xff] %v6551_v42 }
 0x1a8   : > { %v788_v8 = vpop.f32.mrf.mxu0 }
 0x1a9   : > { %v6553_v9 = vpack.c.bf16 %v788_v8, %v786_v7 }
 0x1aa   : > { %v1354_v10 = vpop.f32.mrf.mxu0  ;;  %v7504_v51 = vld [vmem:[#allocation2 + $0xc0] ss:$16 sps:$4 sm:$0xff]  }
 0x1ab   : > { %1126 = vst [vmem:[#allocation2 + $0xf0] sm:$0xff] %v6553_v9 }
 0x1ac   : > { %v1356_v2 = vpop.f32.mrf.mxu0 }
 0x1ad   : > { %v6555_v11 = vpack.c.bf16 %v1356_v2, %v1354_v10 }
 0x1ae   : > { %v1358_v12 = vpop.f32.mrf.mxu0 }
 0x1af   : > { %1738 = vst [vmem:[#allocation3] sm:$0xff] %v6555_v11 }
 0x1b0   : > { %v1360_v13 = vpop.f32.mrf.mxu0 }
 0x1b1   : > { %v6557_v14 = vpack.c.bf16 %v1360_v13, %v1358_v12 }
 0x1b2   : > { %v1364_v15 = vpop.f32.mrf.mxu0  ;;  %v7503_v16 = vld [vmem:[#allocation2 + $0xe0] ss:$16 sps:$4 sm:$0xff]   ;;  %v7532_v5 = vld [vmem:[#allocation2 + $0xe4] ss:$16 sps:$4 sm:$0xff]  }
 0x1b3   : > { %1740 = vst [vmem:[#allocation3 + $0x10] sm:$0xff] %v6557_v14  ;;  %6973 = vmatprep.subr.bf16.mxu0 %v7503_v16 }
 0x1b4   : > { %v1366_v6 = vpop.f32.mrf.mxu0  ;;  %6974 = vmatpush3.bf16.xpose.msra.mxu0 %v7503_v16 }
 0x1b5   : > { %v6559_v0 = vpack.c.bf16 %v1366_v6, %v1364_v15  ;;  %6975 = vmatprep.subr.bf16.mxu0 %v7504_v51  ;;  %v7538_v15 = vld [vmem:[#allocation2 + $0xc4] ss:$16 sps:$4 sm:$0xff]  }
 0x1b6   : > { %v1368_v17 = vpop.f32.mrf.mxu0 }
 0x1b7   : > { %1742 = vst [vmem:[#allocation3 + $0x20] sm:$0xff] %v6559_v0 }
 0x1b8   : > { %v1370_v18 = vpop.f32.mrf.mxu0 }
 0x1b9   : > { %v6561_v19 = vpack.c.bf16 %v1370_v18, %v1368_v17 }
 0x1ba   : > { %v1374_v21 = vpop.f32.mrf.mxu0 }
 0x1bb   : > { %1744 = vst [vmem:[#allocation3 + $0x30] sm:$0xff] %v6561_v19 }
 0x1bc   : > { %v1376_v48 = vpop.f32.mrf.mxu0  ;;  %6976 = vmatpush3.bf16.xpose.msra.mxu0 %v7504_v51 }
 0x1bd   : > { %v6563_v23 = vpack.c.bf16 %v1376_v48, %v1374_v21  ;;  %6977 = vmatprep.subr.bf16.mxu0 %v7505_v22  ;;  %v7541_v21 = vld [vmem:[#allocation2 + $0xa4] ss:$16 sps:$4 sm:$0xff]  }
 0x1be   : > { %v1378_v57 = vpop.f32.mrf.mxu0 }
 0x1bf   : > { %1746 = vst [vmem:[#allocation3 + $0x40] sm:$0xff] %v6563_v23 }
 0x1c0   : > { %v1380_v24 = vpop.f32.mrf.mxu0 }
 0x1c1   : > { %v6565_v25 = vpack.c.bf16 %v1380_v24, %v1378_v57 }
 0x1c2   : > { %v1384_v26 = vpop.f32.mrf.mxu0 }
 0x1c3   : > { %1748 = vst [vmem:[#allocation3 + $0x50] sm:$0xff] %v6565_v25 }
 0x1c4   : > { %v1386_v28 = vpop.f32.mrf.mxu0  ;;  %6978 = vmatpush3.bf16.xpose.msra.mxu0 %v7505_v22 }
 0x1c5   : > { %v6567_v30 = vpack.c.bf16 %v1386_v28, %v1384_v26  ;;  %6979 = vmatprep.subr.bf16.mxu0 %v7506_v29  ;;  %v7545_v26 = vld [vmem:[#allocation3 + $0x20] ss:$16 sps:$4 sm:$0xff]   ;;  %v7544_v28 = vld [vmem:[#allocation2 + $0x84] ss:$16 sps:$4 sm:$0xff]  }
 0x1c6   : > { %v1388_v31 = vpop.f32.mrf.mxu0 }
 0x1c7   : > { %1750 = vst [vmem:[#allocation3 + $0x60] sm:$0xff] %v6567_v30 }
 0x1c8   : > { %v1390_v1 = vpop.f32.mrf.mxu0 }
 0x1c9   : > { %v6569_v32 = vpack.c.bf16 %v1390_v1, %v1388_v31  ;;  %v7546_v31 = vld [vmem:[#allocation3] ss:$16 sps:$4 sm:$0xff]  }
 0x1ca   : > { %v1394_v33 = vpop.f32.mrf.mxu0  ;;  %v7543_v23 = vld [vmem:[#allocation3 + $0x40] ss:$16 sps:$4 sm:$0xff]  }
 0x1cb   : > { %1752 = vst [vmem:[#allocation3 + $0x70] sm:$0xff] %v6569_v32 }
 0x1cc   : > { %v1396_v34 = vpop.f32.mrf.mxu0  ;;  %6980 = vmatpush3.bf16.xpose.msra.mxu0 %v7506_v29 }
 0x1cd   : > { %v6571_v37 = vpack.c.bf16 %v1396_v34, %v1394_v33  ;;  %6981 = vmatprep.subr.bf16.mxu0 %v7507_v36 }
 0x1ce   : > { %v1398_v38 = vpop.f32.mrf.mxu0 }
 0x1cf   : > { %1754 = vst [vmem:[#allocation3 + $0x80] sm:$0xff] %v6571_v37 }
 0x1d0   : > { %v1400_v39 = vpop.f32.mrf.mxu0 }
 0x1d1   : > { %v6573_v40 = vpack.c.bf16 %v1400_v39, %v1398_v38 }
 0x1d2   : > { %v1404_v41 = vpop.f32.mrf.mxu0  ;;  %v7542_v19 = vld [vmem:[#allocation3 + $0x60] ss:$16 sps:$4 sm:$0xff]  }
 0x1d3   : > { %1756 = vst [vmem:[#allocation3 + $0x90] sm:$0xff] %v6573_v40 }
 0x1d4   : > { %v1406_v43 = vpop.f32.mrf.mxu0  ;;  %6982 = vmatpush3.bf16.xpose.msra.mxu0 %v7507_v36  ;;  %v7547_v36 = vld [vmem:[#allocation2 + $0x64] ss:$16 sps:$4 sm:$0xff]  }
 0x1d5   : > { %v6575_v45 = vpack.c.bf16 %v1406_v43, %v1404_v41  ;;  %6983 = vmatprep.subr.bf16.mxu0 %v7511_v44  ;;  %v7549_v43 = vld [vmem:[#allocation2 + $0x44] ss:$16 sps:$4 sm:$0xff]  }
 0x1d6   : > { %v1408_v46 = vpop.f32.mrf.mxu0 }
 0x1d7   : > { %1758 = vst [vmem:[#allocation3 + $0xa0] sm:$0xff] %v6575_v45 }
 0x1d8   : > { %v1410_v47 = vpop.f32.mrf.mxu0 }
 0x1d9   : > { %v6577_v49 = vpack.c.bf16 %v1410_v47, %v1408_v46 }
 0x1da   : > { %v1414_v50 = vpop.f32.mrf.mxu0  ;;  %v7540_v51 = vld [vmem:[#allocation3 + $0x80] ss:$16 sps:$4 sm:$0xff]  }
 0x1db   : > { %1760 = vst [vmem:[#allocation3 + $0xb0] sm:$0xff] %v6577_v49 }
 0x1dc   : > { %v1416_v52 = vpop.f32.mrf.mxu0  ;;  %6984 = vmatpush3.bf16.xpose.msra.mxu0 %v7511_v44 }
 0x1dd   : > { %v6579_v54 = vpack.c.bf16 %v1416_v52, %v1414_v50  ;;  %6985 = vmatprep.subr.bf16.mxu0 %v7518_v53  ;;  %v7550_v50 = vld [vmem:[#allocation2 + $0x24] ss:$16 sps:$4 sm:$0xff]  }
 0x1de   : > { %v1418_v55 = vpop.f32.mrf.mxu0 }
 0x1df   : > { %1762 = vst [vmem:[#allocation3 + $0xc0] sm:$0xff] %v6579_v54 }
 0x1e0   : > { %v1420_v56 = vpop.f32.mrf.mxu0 }
 0x1e1   : > { %v6581_v58 = vpack.c.bf16 %v1420_v56, %v1418_v55 }
 0x1e2   : > { %v1424_v59 = vpop.f32.mrf.mxu0  ;;  %v7539_v14 = vld [vmem:[#allocation3 + $0xa0] ss:$16 sps:$4 sm:$0xff]  }
 0x1e3   : > { %1764 = vst [vmem:[#allocation3 + $0xd0] sm:$0xff] %v6581_v58  ;;  %v7551_v58 = vld [vmem:[#allocation2 + $0x4] ss:$16 sps:$4 sm:$0xff]  }
 0x1e4   : > { %v1426_v20 = vpop.f32.mrf.mxu0  ;;  %6986 = vmatpush3.bf16.xpose.msra.mxu0 %v7518_v53 }
 0x1e5   : > { %v6583_v27 = vpack.c.bf16 %v1426_v20, %v1424_v59  ;;  %6987 = vmatprep.subr.bf16.mxu0 %v7525_v61 }
 0x1e6   : > { %v1428_v60 = vpop.f32.mrf.mxu0 }
 0x1e7   : > { %1766 = vst [vmem:[#allocation3 + $0xe0] sm:$0xff] %v6583_v27 }
 0x1e8   : > { %v1430_v63 = vpop.f32.mrf.mxu0 }
 0x1e9   : > { %v6585_v3 = vpack.c.bf16 %v1430_v63, %v1428_v60 }
 0x1ea   : > { %v2020_v35 = vpop.f32.mrf.mxu0  ;;  %v7537_v2 = vld [vmem:[#allocation3 + $0xc0] ss:$16 sps:$4 sm:$0xff]  }
 0x1eb   : > { %1768 = vst [vmem:[#allocation3 + $0xf0] sm:$0xff] %v6585_v3 }
 0x1ec   : > { %v8744_v4 = vpop.f32.mrf.mxu0  ;;  %6988 = vmatpush3.bf16.xpose.msra.mxu0 %v7525_v61 }
 0x1ed   : > { %7037 = vmatprep.subr.bf16.mxu0 %v7532_v5 }
 0x1ee   : > { %v2024_v62 = vpop.f32.mrf.mxu0 }
 0x1ef   : > { %v2212_v42 = vpack.c.bf16 %v2024_v62, %v2020_v35 }
 0x1f0   : > { %v8746_v7 = vpop.f32.mrf.mxu0 }
 0x1f1   : > { %6989 = vmatprep.mubr.bf16.mxu0 %v2212_v42  ;;  %v2213_v56 = vpack.c.bf16 %v8746_v7, %v8744_v4  ;;  %v825_v4 = vpop.f32.mrf.mxu1 }
 0x1f2   : > { %v2030_v8 = vpop.f32.mrf.mxu0  ;;  %v7536_v9 = vld [vmem:[#allocation3 + $0xe0] ss:$16 sps:$4 sm:$0xff]   ;;  %v8758_v34 = vld [vmem:[#allocation3 + $0xe4] ss:$16 sps:$4 sm:$0xff]  }
 0x1f3   : > { %7005 = vmatprep.subr.bf16.mxu1 %v7536_v9 }
 0x1f4   : > { %v8748_v10 = vpop.f32.mrf.mxu0  ;;  %7006 = vmatpush3.bf16.msra.mxu1 %v7536_v9 }
 0x1f5   : > { %7007 = vmatprep.subr.bf16.mxu1 %v7537_v2 }
 0x1f6   : > { %v2034_v11 = vpop.f32.mrf.mxu0 }
 0x1f7   : > { %v2216_v12 = vpack.c.bf16 %v2034_v11, %v2030_v8 }
 0x1f8   : > { %v8750_v13 = vpop.f32.mrf.mxu0  ;;  %7008 = vmatpush3.bf16.msra.mxu1 %v7537_v2 }
 0x1f9   : > { %6990 = vmatmul.mubr.bf16.vlgmr.msra.gmra.mxu0 %v2216_v12  ;;  %7009 = vmatprep.subr.bf16.mxu1 %v7539_v14  ;;  %v2217_v59 = vpack.c.bf16 %v8750_v13, %v8748_v10 }
 0x1fa   : > { %7038 = vmatpush3.bf16.xpose.msra.mxu0 %v7532_v5  ;;  %v2040_v16 = vpop.f32.mrf.mxu0  ;;  %v827_v5 = vpop.f32.mrf.mxu1 }
 0x1fb   : > { %7039 = vmatprep.subr.bf16.mxu0 %v7538_v15  ;;  %v6524_v62 = vpack.c.bf16 %v827_v5, %v825_v4 }
 0x1fc   : > { %v8752_v6 = vpop.f32.mrf.mxu0  ;;  %7010 = vmatpush3.bf16.msra.mxu1 %v7539_v14  ;;  %v829_v42 = vpop.f32.mrf.mxu1 }
 0x1fd   : > { %7011 = vmatprep.subr.bf16.mxu1 %v7540_v51  ;;  %1097 = vst [vmem:[#allocation2 + $0x8] sm:$0xff] %v6524_v62 }
 0x1fe   : > { %v2044_v0 = vpop.f32.mrf.mxu0  ;;  %v831_v7 = vpop.f32.mrf.mxu1 }
 0x1ff   : > { %v2220_v17 = vpack.c.bf16 %v2044_v0, %v2040_v16  ;;  %v6526_v8 = vpack.c.bf16 %v831_v7, %v829_v42 }
 0x200   : > { %v8754_v18 = vpop.f32.mrf.mxu0  ;;  %7012 = vmatpush3.bf16.msra.mxu1 %v7540_v51  ;;  %v835_v9 = vpop.f32.mrf.mxu1 }
 0x201   : > { %6993 = vmatprep.mubr.bf16.mxu0 %v2220_v17  ;;  %7013 = vmatprep.subr.bf16.mxu1 %v7542_v19  ;;  %v2221_v20 = vpack.c.bf16 %v8754_v18, %v8752_v6  ;;  %1099 = vst [vmem:[#allocation2 + $0x18] sm:$0xff] %v6526_v8 }
 0x202   : > { %7040 = vmatpush3.bf16.xpose.msra.mxu0 %v7538_v15  ;;  %v2050_v48 = vpop.f32.mrf.mxu0  ;;  %v837_v10 = vpop.f32.mrf.mxu1 }
 0x203   : > { %7041 = vmatprep.subr.bf16.mxu0 %v7541_v21  ;;  %v6528_v2 = vpack.c.bf16 %v837_v10, %v835_v9 }
 0x204   : > { %v8756_v22 = vpop.f32.mrf.mxu0  ;;  %7014 = vmatpush3.bf16.msra.mxu1 %v7542_v19  ;;  %v839_v11 = vpop.f32.mrf.mxu1 }
 0x205   : > { %7015 = vmatprep.subr.bf16.mxu1 %v7543_v23  ;;  %1101 = vst [vmem:[#allocation2 + $0x28] sm:$0xff] %v6528_v2 }
 0x206   : > { %v2054_v57 = vpop.f32.mrf.mxu0  ;;  %v841_v12 = vpop.f32.mrf.mxu1 }
 0x207   : > { %v2224_v24 = vpack.c.bf16 %v2054_v57, %v2050_v48  ;;  %v6530_v13 = vpack.c.bf16 %v841_v12, %v839_v11 }
 0x208   : > { %v2056_v25 = vpop.f32.mrf.mxu0  ;;  %7016 = vmatpush3.bf16.msra.mxu1 %v7543_v23  ;;  %v845_v14 = vpop.f32.mrf.mxu1 }
 0x209   : > { %6994 = vmatmul.mubr.bf16.gmra.mxu0 %v2224_v24  ;;  %7017 = vmatprep.subr.bf16.mxu1 %v7545_v26  ;;  %v2225_v61 = vpack.c.bf16 %v2056_v25, %v8756_v22  ;;  %1103 = vst [vmem:[#allocation2 + $0x38] sm:$0xff] %v6530_v13 }
 0x20a   : > { %7042 = vmatpush3.bf16.xpose.msra.mxu0 %v7541_v21  ;;  %v2060_v29 = vpop.f32.mrf.mxu0  ;;  %v847_v15 = vpop.f32.mrf.mxu1 }
 0x20b   : > { %7043 = vmatprep.subr.bf16.mxu0 %v7544_v28  ;;  %v6532_v16 = vpack.c.bf16 %v847_v15, %v845_v14 }
 0x20c   : > { %v2062_v30 = vpop.f32.mrf.mxu0  ;;  %7018 = vmatpush3.bf16.msra.mxu1 %v7545_v26  ;;  %v849_v6 = vpop.f32.mrf.mxu1 }
 0x20d   : > { %7019 = vmatprep.subr.bf16.mxu1 %v7546_v31  ;;  %1105 = vst [vmem:[#allocation2 + $0x48] sm:$0xff] %v6532_v16 }
 0x20e   : > { %v2064_v1 = vpop.f32.mrf.mxu0  ;;  %v851_v51 = vpop.f32.mrf.mxu1 }
 0x20f   : > { %v2228_v32 = vpack.c.bf16 %v2064_v1, %v2060_v29  ;;  %v6534_v0 = vpack.c.bf16 %v851_v51, %v849_v6 }
 0x210   : > { %v2066_v33 = vpop.f32.mrf.mxu0  ;;  %7020 = vmatpush3.bf16.msra.mxu1 %v7546_v31  ;;  %v855_v17 = vpop.f32.mrf.mxu1 }
 0x211   : > { %6997 = vmatprep.mubr.bf16.mxu0 %v2228_v32  ;;  %7069 = vmatprep.subr.bf16.mxu1 %v8758_v34  ;;  %v2229_v27 = vpack.c.bf16 %v2066_v33, %v2062_v30  ;;  %1107 = vst [vmem:[#allocation2 + $0x58] sm:$0xff] %v6534_v0 }
 0x212   : > { %7044 = vmatpush3.bf16.xpose.msra.mxu0 %v7544_v28  ;;  %v2070_v37 = vpop.f32.mrf.mxu0  ;;  %v857_v18 = vpop.f32.mrf.mxu1 }
 0x213   : > { %7045 = vmatprep.subr.bf16.mxu0 %v7547_v36  ;;  %v6536_v19 = vpack.c.bf16 %v857_v18, %v855_v17 }
 0x214   : > { %v2072_v38 = vpop.f32.mrf.mxu0  ;;  %v859_v21 = vpop.f32.mrf.mxu1 }
 0x215   : > { %1109 = vst [vmem:[#allocation2 + $0x68] sm:$0xff] %v6536_v19 }
 0x216   : > { %v2074_v39 = vpop.f32.mrf.mxu0  ;;  %v861_v48 = vpop.f32.mrf.mxu1 }
 0x217   : > { %v2232_v40 = vpack.c.bf16 %v2074_v39, %v2070_v37  ;;  %v6538_v22 = vpack.c.bf16 %v861_v48, %v859_v21 }
 0x218   : > { %v2076_v41 = vpop.f32.mrf.mxu0  ;;  %v865_v23 = vpop.f32.mrf.mxu1 }
 0x219   : > { %6998 = vmatmul.mubr.bf16.gmra.mxu0 %v2232_v40  ;;  %v2233_v60 = vpack.c.bf16 %v2076_v41, %v2072_v38  ;;  %1111 = vst [vmem:[#allocation2 + $0x78] sm:$0xff] %v6538_v22 }
 0x21a   : > { %7046 = vmatpush3.bf16.xpose.msra.mxu0 %v7547_v36  ;;  %v2080_v44 = vpop.f32.mrf.mxu0  ;;  %v867_v57 = vpop.f32.mrf.mxu1 }
 0x21b   : > { %7047 = vmatprep.subr.bf16.mxu0 %v7549_v43  ;;  %v6540_v24 = vpack.c.bf16 %v867_v57, %v865_v23 }
 0x21c   : > { %v2082_v45 = vpop.f32.mrf.mxu0  ;;  %v869_v25 = vpop.f32.mrf.mxu1 }
 0x21d   : > { %1113 = vst [vmem:[#allocation2 + $0x88] sm:$0xff] %v6540_v24 }
 0x21e   : > { %v2084_v46 = vpop.f32.mrf.mxu0  ;;  %v871_v26 = vpop.f32.mrf.mxu1 }
 0x21f   : > { %v2236_v47 = vpack.c.bf16 %v2084_v46, %v2080_v44  ;;  %v6542_v28 = vpack.c.bf16 %v871_v26, %v869_v25 }
 0x220   : > { %v2086_v49 = vpop.f32.mrf.mxu0  ;;  %v875_v29 = vpop.f32.mrf.mxu1 }
 0x221   : > { %7001 = vmatprep.mubr.bf16.mxu0 %v2236_v47  ;;  %v2237_v63 = vpack.c.bf16 %v2086_v49, %v2082_v45  ;;  %1115 = vst [vmem:[#allocation2 + $0x98] sm:$0xff] %v6542_v28 }
 0x222   : > { %7048 = vmatpush3.bf16.xpose.msra.mxu0 %v7549_v43  ;;  %v2090_v52 = vpop.f32.mrf.mxu0  ;;  %v877_v30 = vpop.f32.mrf.mxu1 }
 0x223   : > { %7049 = vmatprep.subr.bf16.mxu0 %v7550_v50  ;;  %v6544_v31 = vpack.c.bf16 %v877_v30, %v875_v29 }
 0x224   : > { %v2092_v53 = vpop.f32.mrf.mxu0  ;;  %v879_v1 = vpop.f32.mrf.mxu1 }
 0x225   : > { %1117 = vst [vmem:[#allocation2 + $0xa8] sm:$0xff] %v6544_v31 }
 0x226   : > { %v2094_v54 = vpop.f32.mrf.mxu0  ;;  %v881_v32 = vpop.f32.mrf.mxu1 }
 0x227   : > { %v2240_v55 = vpack.c.bf16 %v2094_v54, %v2090_v52  ;;  %v6546_v33 = vpack.c.bf16 %v881_v32, %v879_v1 }
 0x228   : > { %v2096_v3 = vpop.f32.mrf.mxu0  ;;  %v885_v36 = vpop.f32.mrf.mxu1 }
 0x229   : > { %7002 = vmatmul.mubr.bf16.gmra.mxu0 %v2240_v55  ;;  %v2241_v35 = vpack.c.bf16 %v2096_v3, %v2092_v53  ;;  %1119 = vst [vmem:[#allocation2 + $0xb8] sm:$0xff] %v6546_v33 }
 0x22a   : > { %7050 = vmatpush3.bf16.xpose.msra.mxu0 %v7550_v50  ;;  %7053 = vmatprep.mubr.bf16.mxu0 %v2213_v56  ;;  %v887_v37 = vpop.f32.mrf.mxu1 }
 0x22b   : > { %7051 = vmatprep.subr.bf16.mxu0 %v7551_v58  ;;  %v6548_v38 = vpack.c.bf16 %v887_v37, %v885_v36 }
 0x22c   : > { %v889_v39 = vpop.f32.mrf.mxu1 }
 0x22d   : > { %1121 = vst [vmem:[#allocation2 + $0xc8] sm:$0xff] %v6548_v38 }
 0x22e   : > { %v891_v40 = vpop.f32.mrf.mxu1 }
 0x22f   : > { %v6550_v41 = vpack.c.bf16 %v891_v40, %v889_v39 }
 0x230   : > { %v895_v43 = vpop.f32.mrf.mxu1 }
 0x231   : > { %1123 = vst [vmem:[#allocation2 + $0xd8] sm:$0xff] %v6550_v41 }
 0x232   : > { %7052 = vmatpush3.bf16.xpose.msra.mxu0 %v7551_v58  ;;  %v897_v44 = vpop.f32.mrf.mxu1 }
 0x233   : > { %v6552_v45 = vpack.c.bf16 %v897_v44, %v895_v43 }
 0x234   : > { %v899_v46 = vpop.f32.mrf.mxu1 }
 0x235   : > { %1125 = vst [vmem:[#allocation2 + $0xe8] sm:$0xff] %v6552_v45 }
 0x236   : > { %v901_v47 = vpop.f32.mrf.mxu1 }
 0x237   : > { %v6554_v49 = vpack.c.bf16 %v901_v47, %v899_v46 }
 0x238   : > { %v1467_v50 = vpop.f32.mrf.mxu1 }
 0x239   : > { %7054 = vmatmul.mubr.bf16.vlgmr.msra.gmra.mxu0 %v2217_v59  ;;  %1127 = vst [vmem:[#allocation2 + $0xf8] sm:$0xff] %v6554_v49 }
 0x23a   : > { %7057 = vmatprep.mubr.bf16.mxu0 %v2221_v20  ;;  %v1469_v52 = vpop.f32.mrf.mxu1 }
 0x23b   : > { %v6556_v53 = vpack.c.bf16 %v1469_v52, %v1467_v50 }
 0x23c   : > { %v1471_v54 = vpop.f32.mrf.mxu1 }
 0x23d   : > { %1739 = vst [vmem:[#allocation3 + $0x8] sm:$0xff] %v6556_v53 }
 0x23e   : > { %v1473_v55 = vpop.f32.mrf.mxu1 }
 0x23f   : > { %v6558_v56 = vpack.c.bf16 %v1473_v55, %v1471_v54 }
 0x240   : > { %v1477_v58 = vpop.f32.mrf.mxu1 }
 0x241   : > { %7058 = vmatmul.mubr.bf16.gmra.mxu0 %v2225_v61  ;;  %1741 = vst [vmem:[#allocation3 + $0x18] sm:$0xff] %v6558_v56 }
 0x242   : > { %7061 = vmatprep.mubr.bf16.mxu0 %v2229_v27  ;;  %v1479_v59 = vpop.f32.mrf.mxu1 }
 0x243   : > { %v6560_v61 = vpack.c.bf16 %v1479_v59, %v1477_v58 }
 0x244   : > { %v1481_v27 = vpop.f32.mrf.mxu1 }
 0x245   : > { %1743 = vst [vmem:[#allocation3 + $0x28] sm:$0xff] %v6560_v61 }
 0x249   : > { %7062 = vmatmul.mubr.bf16.gmra.mxu0 %v2233_v60 }
 0x24a   : > { %7065 = vmatprep.mubr.bf16.mxu0 %v2237_v63  ;;  %v1483_v63 = vpop.f32.mrf.mxu1 }
 0x24c   : > { %v1487_v5 = vpop.f32.mrf.mxu1 }
 0x24e   : > { %v1489_v7 = vpop.f32.mrf.mxu1 }
 0x24f   : > { %v6564_v8 = vpack.c.bf16 %v1489_v7, %v1487_v5 }
 0x250   : > { %v1491_v9 = vpop.f32.mrf.mxu1 }
 0x251   : > { %7066 = vmatmul.mubr.bf16.gmra.mxu0 %v2241_v35  ;;  %v6562_v35 = vpack.c.bf16 %v1483_v63, %v1481_v27  ;;  %1747 = vst [vmem:[#allocation3 + $0x48] sm:$0xff] %v6564_v8 }
 0x252   : > { %v1493_v10 = vpop.f32.mrf.mxu1 }
 0x253   : > { %1745 = vst [vmem:[#allocation3 + $0x38] sm:$0xff] %v6562_v35  ;;  %v6566_v11 = vpack.c.bf16 %v1493_v10, %v1491_v9 }
 0x254   : > { %v1497_v2 = vpop.f32.mrf.mxu1 }
 0x255   : > { %1749 = vst [vmem:[#allocation3 + $0x58] sm:$0xff] %v6566_v11 }
 0x256   : > { %v1499_v12 = vpop.f32.mrf.mxu1 }
 0x257   : > { %v6568_v16 = vpack.c.bf16 %v1499_v12, %v1497_v2 }
 0x258   : > { %v1501_v14 = vpop.f32.mrf.mxu1 }
 0x259   : > { %1751 = vst [vmem:[#allocation3 + $0x68] sm:$0xff] %v6568_v16 }
 0x25a   : > { %v1503_v6 = vpop.f32.mrf.mxu1 }
 0x25b   : > { %v6570_v17 = vpack.c.bf16 %v1503_v6, %v1501_v14 }
 0x25c   : > { %v1507_v18 = vpop.f32.mrf.mxu1 }
 0x25d   : > { %1753 = vst [vmem:[#allocation3 + $0x78] sm:$0xff] %v6570_v17 }
 0x25e   : > { %v1509_v48 = vpop.f32.mrf.mxu1 }
 0x25f   : > { %v6572_v22 = vpack.c.bf16 %v1509_v48, %v1507_v18 }
 0x260   : > { %v1511_v23 = vpop.f32.mrf.mxu1 }
 0x261   : > { %1755 = vst [vmem:[#allocation3 + $0x88] sm:$0xff] %v6572_v22 }
 0x262   : > { %v1513_v57 = vpop.f32.mrf.mxu1 }
 0x263   : > { %v6574_v24 = vpack.c.bf16 %v1513_v57, %v1511_v23  ;;  %v7565_v57 = vld [vmem:[#allocation3 + $0x28] ss:$16 sps:$4 sm:$0xff]  }
 0x264   : > { %v1517_v25 = vpop.f32.mrf.mxu1  ;;  %v7563_v6 = vld [vmem:[#allocation3 + $0x68] ss:$16 sps:$4 sm:$0xff]  }
 0x265   : > { %1757 = vst [vmem:[#allocation3 + $0x98] sm:$0xff] %v6574_v24 }
 0x266   : > { %v1519_v26 = vpop.f32.mrf.mxu1 }
 0x267   : > { %v6576_v29 = vpack.c.bf16 %v1519_v26, %v1517_v25 }
 0x268   : > { %v1521_v30 = vpop.f32.mrf.mxu1 }
 0x269   : > { %1759 = vst [vmem:[#allocation3 + $0xa8] sm:$0xff] %v6576_v29  ;;  %v7566_v29 = vld [vmem:[#allocation3 + $0x8] ss:$16 sps:$4 sm:$0xff]  }
 0x26a   : > { %v1523_v1 = vpop.f32.mrf.mxu1 }
 0x26b   : > { %v6578_v38 = vpack.c.bf16 %v1523_v1, %v1521_v30  ;;  %v8904_v1 = vld [vmem:[#allocation2 + $0xec] ss:$16 sps:$4 sm:$0xff]  }
 0x26c   : > { %v1527_v36 = vpop.f32.mrf.mxu1  ;;  %v7562_v2 = vld [vmem:[#allocation3 + $0x88] ss:$16 sps:$4 sm:$0xff]  }
 0x26d   : > { %1761 = vst [vmem:[#allocation3 + $0xb8] sm:$0xff] %v6578_v38 }
 0x26e   : > { %v1529_v40 = vpop.f32.mrf.mxu1 }
 0x26f   : > { %v6580_v41 = vpack.c.bf16 %v1529_v40, %v1527_v36 }
 0x270   : > { %v1531_v43 = vpop.f32.mrf.mxu1 }
 0x271   : > { %1763 = vst [vmem:[#allocation3 + $0xc8] sm:$0xff] %v6580_v41 }
 0x272   : > { %v1533_v44 = vpop.f32.mrf.mxu1 }
 0x273   : > { %v6582_v45 = vpack.c.bf16 %v1533_v44, %v1531_v43 }
 0x274   : > { %v1537_v46 = vpop.f32.mrf.mxu1  ;;  %v7561_v7 = vld [vmem:[#allocation3 + $0xa8] ss:$16 sps:$4 sm:$0xff]  }
 0x275   : > { %1765 = vst [vmem:[#allocation3 + $0xd8] sm:$0xff] %v6582_v45 }
 0x276   : > { %v1539_v47 = vpop.f32.mrf.mxu1 }
 0x277   : > { %v6584_v50 = vpack.c.bf16 %v1539_v47, %v1537_v46 }
 0x278   : > { %v1541_v52 = vpop.f32.mrf.mxu1 }
 0x279   : > { %1767 = vst [vmem:[#allocation3 + $0xe8] sm:$0xff] %v6584_v50 }
 0x27a   : > { %v1543_v54 = vpop.f32.mrf.mxu1 }
 0x27b   : > { %v6586_v56 = vpack.c.bf16 %v1543_v54, %v1541_v52 }
 0x27c   : > { %v7560_v35 = vld [vmem:[#allocation3 + $0xc8] ss:$16 sps:$4 sm:$0xff]  }
 0x27d   : > { %1769 = vst [vmem:[#allocation3 + $0xf8] sm:$0xff] %v6586_v56 }
 0x284   : > { %v7559_v27 = vld [vmem:[#allocation3 + $0xe8] ss:$16 sps:$4 sm:$0xff]  }
 0x285   : > { %7133 = vmatprep.subr.bf16.mxu0 %v7559_v27 }
 0x286   : > { %7134 = vmatpush3.bf16.msra.mxu0 %v7559_v27 }
 0x287   : > { %7135 = vmatprep.subr.bf16.mxu0 %v7560_v35 }
 0x28a   : > { %7136 = vmatpush3.bf16.msra.mxu0 %v7560_v35 }
 0x28b   : > { %7137 = vmatprep.subr.bf16.mxu0 %v7561_v7 }
 0x28e   : > { %7138 = vmatpush3.bf16.msra.mxu0 %v7561_v7 }
 0x28f   : > { %7139 = vmatprep.subr.bf16.mxu0 %v7562_v2 }
 0x292   : > { %7140 = vmatpush3.bf16.msra.mxu0 %v7562_v2 }
 0x293   : > { %7141 = vmatprep.subr.bf16.mxu0 %v7563_v6 }
 0x296   : > { %7142 = vmatpush3.bf16.msra.mxu0 %v7563_v6 }
 0x2b9   : > { %v8768_v20 = vpop.f32.mrf.mxu0 }
 0x2ba   : > { %2505 = vmax.xlane.f32.xlu1 %v8768_v20 }
 0x2bb   : > { %v8772_v60 = vpop.f32.mrf.mxu0 }
 0x2bc   : > { %2501 = vmax.xlane.f32.xlu0 %v8772_v60 }
 0x2bd   : > { %v8775_v3 = vpop.f32.mrf.mxu0 }
 0x2be   : > { %v6662_v4 = vpack.c.bf16 %v8775_v3, %v8768_v20  ;;  %2507 = vmax.xlane.f32.xlu1 %v8775_v3 }
 0x2bf   : > { %v8780_v62 = vpop.f32.mrf.mxu0 }
 0x2c0   : > { %6814 = vst [vmem:[%s8782_s13 + $0x8] sm:$0xff] %v6662_v4   ;;  %v6657_v42 = vpack.c.bf16 %v8780_v62, %v8772_v60  ;;  %2503 = vmax.xlane.f32.xlu0 %v8780_v62 }
 0x2c2   : > { %6658 = vst [vmem:[%s8782_s13] sm:$0xff] %v6657_v42  }
 0x2c9   : > { %v8789_v13 = vpop.f32.mrf.mxu0 }
 0x2cb   : > { %v8791_v15 = vpop.f32.mrf.mxu0 }
 0x2cc   : > { %2509 = vmax.xlane.f32.xlu0 %v8791_v15 }
 0x2cd   : > { %v8794_v51 = vpop.f32.mrf.mxu0 }
 0x2ce   : > { %v6672_v0 = vpack.c.bf16 %v8794_v51, %v8789_v13 }
 0x2cf   : > { %v8798_v19 = vpop.f32.mrf.mxu0 }
 0x2d0   : > { %6816 = vst [vmem:[%s8782_s13 + $0x18] sm:$0xff] %v6672_v0   ;;  %v6667_v21 = vpack.c.bf16 %v8798_v19, %v8791_v15  ;;  %2513 = vmax.xlane.f32.xlu0 %v8789_v13  ;;  %2511 = vmax.xlane.f32.xlu1 %v8798_v19 }
 0x2d2   : > { %6815 = vst [vmem:[%s8782_s13 + $0x10] sm:$0xff] %v6667_v21   ;;  %v7564_v21 = vld [vmem:[#allocation3 + $0x48] ss:$16 sps:$4 sm:$0xff]  }
 0x2d3   : > { %7143 = vmatprep.subr.bf16.mxu0 %v7564_v21 }
 0x2d4   : > { %2515 = vmax.xlane.f32.xlu1 %v8794_v51  ;;  %7144 = vmatpush3.bf16.msra.mxu0 %v7564_v21 }
 0x2d5   : > { %7145 = vmatprep.subr.bf16.mxu0 %v7565_v57 }
 0x2d8   : > { %7146 = vmatpush3.bf16.msra.mxu0 %v7565_v57 }
 0x2d9   : > { %v8807_v28 = vpop.f32.mrf.mxu0  ;;  %7147 = vmatprep.subr.bf16.mxu0 %v7566_v29 }
 0x2db   : > { %v8809_v31 = vpop.f32.mrf.mxu0 }
 0x2dc   : > { %2517 = vmax.xlane.f32.xlu0 %v8809_v31  ;;  %7148 = vmatpush3.bf16.msra.mxu0 %v7566_v29  ;;  %v7554_v29 = vld [vmem:[#allocation3 + $0x84] ss:$16 sps:$4 sm:$0xff]  }
 0x2dd   : > { %v8812_v32 = vpop.f32.mrf.mxu0  ;;  %7165 = vmatprep.subr.bf16.mxu0 %v8904_v1 }
 0x2de   : > { %v6682_v33 = vpack.c.bf16 %v8812_v32, %v8807_v28 }
 0x2df   : > { %v8816_v37 = vpop.f32.mrf.mxu0 }
 0x2e0   : > { %6818 = vst [vmem:[%s8782_s13 + $0x28] sm:$0xff] %v6682_v33   ;;  %v6677_v39 = vpack.c.bf16 %v8816_v37, %v8809_v31  ;;  %2521 = vmax.xlane.f32.xlu0 %v8807_v28  ;;  %2519 = vmax.xlane.f32.xlu1 %v8816_v37 }
 0x2e2   : > { %6817 = vst [vmem:[%s8782_s13 + $0x20] sm:$0xff] %v6677_v39  }
 0x2e4   : > { %2523 = vmax.xlane.f32.xlu1 %v8812_v32 }
 0x2e9   : > { %v8825_v49 = vpop.f32.mrf.mxu0 }
 0x2eb   : > { %v8827_v53 = vpop.f32.mrf.mxu0 }
 0x2ec   : > { %2525 = vmax.xlane.f32.xlu0 %v8827_v53 }
 0x2ed   : > { %v8830_v55 = vpop.f32.mrf.mxu0 }
 0x2ee   : > { %v6692_v58 = vpack.c.bf16 %v8830_v55, %v8825_v49 }
 0x2ef   : > { %v8834_v59 = vpop.f32.mrf.mxu0 }
 0x2f0   : > { %6820 = vst [vmem:[%s8782_s13 + $0x38] sm:$0xff] %v6692_v58   ;;  %v6687_v61 = vpack.c.bf16 %v8834_v59, %v8827_v53  ;;  %2529 = vmax.xlane.f32.xlu0 %v8825_v49  ;;  %2527 = vmax.xlane.f32.xlu1 %v8834_v59 }
 0x2f2   : > { %6819 = vst [vmem:[%s8782_s13 + $0x30] sm:$0xff] %v6687_v61  }
 0x2f4   : > { %2531 = vmax.xlane.f32.xlu1 %v8830_v55 }
 0x2f9   : > { %v8843_v63 = vpop.f32.mrf.mxu0 }
 0x2fb   : > { %v8845_v4 = vpop.f32.mrf.mxu0 }
 0x2fc   : > { %3064 = vmax.xlane.f32.xlu0 %v8845_v4 }
 0x2fd   : > { %v8848_v5 = vpop.f32.mrf.mxu0 }
 0x2fe   : > { %v6702_v42 = vpack.c.bf16 %v8848_v5, %v8843_v63 }
 0x2ff   : > { %v8852_v8 = vpop.f32.mrf.mxu0 }
 0x300   : > { %6822 = vst [vmem:[%s8782_s13 + $0x48] sm:$0xff] %v6702_v42   ;;  %v6697_v9 = vpack.c.bf16 %v8852_v8, %v8845_v4  ;;  %3068 = vmax.xlane.f32.xlu0 %v8843_v63  ;;  %3066 = vmax.xlane.f32.xlu1 %v8852_v8 }
 0x301   : > { %v8859_v10 = vpop.f32.mrf.mxu0 }
 0x302   : > { %6821 = vst [vmem:[%s8782_s13 + $0x40] sm:$0xff] %v6697_v9  }
 0x303   : > { %v8862_v11 = vpop.f32.mrf.mxu0 }
 0x304   : > { %3070 = vmax.xlane.f32.xlu1 %v8848_v5  ;;  %3072 = vmax.xlane.f32.xlu0 %v8862_v11 }
 0x305   : > { %v8866_v12 = vpop.f32.mrf.mxu0 }
 0x306   : > { %v6712_v14 = vpack.c.bf16 %v8866_v12, %v8859_v10 }
 0x307   : > { %v8870_v16 = vpop.f32.mrf.mxu0 }
 0x308   : > { %6824 = vst [vmem:[%s8782_s13 + $0x58] sm:$0xff] %v6712_v14   ;;  %v6707_v0 = vpack.c.bf16 %v8870_v16, %v8862_v11  ;;  %3076 = vmax.xlane.f32.xlu0 %v8859_v10  ;;  %3074 = vmax.xlane.f32.xlu1 %v8870_v16 }
 0x309   : > { %v8877_v17 = vpop.f32.mrf.mxu0 }
 0x30a   : > { %6823 = vst [vmem:[%s8782_s13 + $0x50] sm:$0xff] %v6707_v0  }
 0x30b   : > { %v8880_v18 = vpop.f32.mrf.mxu0 }
 0x30c   : > { %3078 = vmax.xlane.f32.xlu1 %v8866_v12  ;;  %3080 = vmax.xlane.f32.xlu0 %v8880_v18 }
 0x30d   : > { %v8884_v48 = vpop.f32.mrf.mxu0 }
 0x30e   : > { %v6722_v22 = vpack.c.bf16 %v8884_v48, %v8877_v17 }
 0x30f   : > { %v8888_v23 = vpop.f32.mrf.mxu0 }
 0x310   : > { %6826 = vst [vmem:[%s8782_s13 + $0x68] sm:$0xff] %v6722_v22   ;;  %v6717_v24 = vpack.c.bf16 %v8888_v23, %v8880_v18  ;;  %3084 = vmax.xlane.f32.xlu0 %v8877_v17  ;;  %3082 = vmax.xlane.f32.xlu1 %v8888_v23  ;;  %v7553_v22 = vld [vmem:[#allocation3 + $0xa4] ss:$16 sps:$4 sm:$0xff]  }
 0x311   : > { %v8895_v25 = vpop.f32.mrf.mxu0 }
 0x312   : > { %6825 = vst [vmem:[%s8782_s13 + $0x60] sm:$0xff] %v6717_v24  }
 0x313   : > { %v8898_v26 = vpop.f32.mrf.mxu0 }
 0x314   : > { %3086 = vmax.xlane.f32.xlu1 %v8884_v48  ;;  %3088 = vmax.xlane.f32.xlu0 %v8898_v26 }
 0x315   : > { %v8902_v30 = vpop.f32.mrf.mxu0 }
 0x316   : > { %v6732_v33 = vpack.c.bf16 %v8902_v30, %v8895_v25 }
 0x317   : > { %v8908_v36 = vpop.f32.mrf.mxu0 }
 0x318   : > { %6828 = vst [vmem:[%s8782_s13 + $0x78] sm:$0xff] %v6732_v33   ;;  %v6727_v38 = vpack.c.bf16 %v8908_v36, %v8898_v26  ;;  %3092 = vmax.xlane.f32.xlu0 %v8895_v25  ;;  %3090 = vmax.xlane.f32.xlu1 %v8908_v36 }
 0x31a   : > { %6827 = vst [vmem:[%s8782_s13 + $0x70] sm:$0xff] %v6727_v38  }
 0x31c   : > { %3094 = vmax.xlane.f32.xlu1 %v8902_v30 }
 0x343   : > { %v2506_v39 = vpop.xlane.xlu1 %2505 }
 0x344   : > { %v2535_v43 = vsub.f32 %v8768_v20, %v2506_v39 }
 0x345   : > { %v2502_v40 = vpop.xlane.xlu0 %2501 }
 0x346   : > { %v2533_v41 = vsub.f32 %v8772_v60, %v2502_v40  ;;  %v2553_v54 = vmul.f32 1.442695, %v2535_v43 }
 0x347   : > { %v2508_v44 = vpop.xlane.xlu1 %2507 }
 0x348   : > { %v2549_v45 = vmul.f32 1.442695, %v2533_v41  ;;  %v2536_v46 = vsub.f32 %v8775_v3, %v2508_v44  ;;  %v7555_v41 = vld [vmem:[#allocation3 + $0x64] ss:$16 sps:$4 sm:$0xff]  }
 0x349   : > { %v2504_v47 = vpop.xlane.xlu0 %2503 }
 0x34a   : > { %v2555_v50 = vmul.f32 1.442695, %v2536_v46  ;;  %v2534_v52 = vsub.f32 %v8780_v62, %v2504_v47  ;;  %7783 = vpow2.f32 %v2549_v45 }
 0x34c   : > { %v2551_v56 = vmul.f32 1.442695, %v2534_v52  ;;  %7785 = vpow2.f32 %v2555_v50 }
 0x34e   : > { %7787 = vpow2.f32 %v2551_v56  ;;  %v7557_v56 = vld [vmem:[#allocation3 + $0x24] ss:$16 sps:$4 sm:$0xff]  }
 0x34f   : > { %7789 = vpow2.f32 %v2553_v54 }
 0x355   : > { %v2510_v58 = vpop.xlane.xlu0 %2509 }
 0x356   : > { %v2537_v61 = vsub.f32 %v8791_v15, %v2510_v58 }
 0x357   : > { %v8923_v60 = vpop.eup %7783 }
 0x358   : > { %v2557_v3 = vmul.f32 1.442695, %v2537_v61  ;;  %v7558_v61 = vld [vmem:[#allocation3 + $0x4] ss:$16 sps:$4 sm:$0xff]  }
 0x359   : > { %v2514_v20 = vpop.xlane.xlu0 %2513  ;;  %v2512_v27 = vpop.xlane.xlu1 %2511 }
 0x35a   : > { %v8925_v35 = vpop.eup %7785  ;;  %v2539_v42 = vsub.f32 %v8789_v13, %v2514_v20  ;;  %v2538_v62 = vsub.f32 %v8798_v19, %v2512_v27  ;;  %7791 = vpow2.f32 %v2557_v3  ;;  %v7552_v13 = vld [vmem:[#allocation3 + $0xc4] ss:$16 sps:$4 sm:$0xff]   ;;  %v8956_v3 = vld [vmem:[#allocation2 + $0xe8] ss:$16 sps:$4 sm:$0xff]  }
 0x35b   : > { %v8929_v7 = vpop.eup %7787 }
 0x35c   : > { %v8931_v9 = vpop.eup %7789  ;;  %v2559_v2 = vmul.f32 1.442695, %v2538_v62  ;;  %v2629_v14 = vpack.c.bf16 %v8929_v7, %v8923_v60  ;;  %v2561_v15 = vmul.f32 1.442695, %v2539_v42 }
 0x35d   : > { %v2516_v6 = vpop.xlane.xlu1 %2515  ;;  %v2630_v0 = vpack.c.bf16 %v8925_v35, %v8931_v9 }
 0x35e   : > { %v2540_v21 = vsub.f32 %v8794_v51, %v2516_v6  ;;  %7021 = vmatprep.mubr.bf16.mxu1 %v2629_v14  ;;  %7793 = vpow2.f32 %v2559_v2 }
 0x35f   : > { %7022 = vmatmul.mubr.bf16.vlgmr.msra.gmra.mxu1 %v2630_v0  ;;  %7795 = vpow2.f32 %v2561_v15  ;;  %v8962_v15 = vpop.f32.mrf.mxu1 }
 0x360   : > { %v2563_v19 = vmul.f32 1.442695, %v2540_v21  ;;  %7070 = vmatpush3.bf16.msra.mxu1 %v8758_v34 }
 0x361   : > { %7071 = vmatprep.subr.bf16.mxu1 %v7552_v13 }
 0x362   : > { %7797 = vpow2.f32 %v2563_v19 }
 0x364   : > { %7072 = vmatpush3.bf16.msra.mxu1 %v7552_v13 }
 0x365   : > { %7073 = vmatprep.subr.bf16.mxu1 %v7553_v22  ;;  %v2518_v57 = vpop.xlane.xlu0 %2517 }
 0x366   : > { %v2541_v24 = vsub.f32 %v8809_v31, %v2518_v57 }
 0x367   : > { %v8942_v34 = vpop.eup %7791 }
 0x368   : > { %7074 = vmatpush3.bf16.msra.mxu1 %v7553_v22  ;;  %v2565_v38 = vmul.f32 1.442695, %v2541_v24  ;;  %v8974_v22 = vpop.f32.mrf.mxu1 }
 0x369   : > { %7075 = vmatprep.subr.bf16.mxu1 %v7554_v29  ;;  %v2522_v51 = vpop.xlane.xlu0 %2521  ;;  %v2520_v33 = vpop.xlane.xlu1 %2519 }
 0x36a   : > { %v2543_v39 = vsub.f32 %v8807_v28, %v2522_v51  ;;  %v2542_v40 = vsub.f32 %v8816_v37, %v2520_v33  ;;  %7799 = vpow2.f32 %v2565_v38  ;;  %v7556_v37 = vld [vmem:[#allocation3 + $0x44] ss:$16 sps:$4 sm:$0xff]  }
 0x36b   : > { %v8944_v43 = vpop.eup %7793 }
 0x36c   : > { %v2567_v44 = vmul.f32 1.442695, %v2542_v40  ;;  %7076 = vmatpush3.bf16.msra.mxu1 %v7554_v29  ;;  %v2569_v45 = vmul.f32 1.442695, %v2543_v39  ;;  %v2631_v46 = vpack.c.bf16 %v8944_v43, %v8942_v34  ;;  %v8948_v47 = vpop.eup %7795  ;;  %v8978_v29 = vpop.f32.mrf.mxu1 }
 0x36d   : > { %7077 = vmatprep.subr.bf16.mxu1 %v7555_v41  ;;  %v2524_v31 = vpop.xlane.xlu1 %2523  ;;  %10277 = vst [vmem:[#allocation29_spill] sm:$0xff] %v8948_v47 }
 0x36e   : > { %v2544_v28 = vsub.f32 %v8812_v32, %v2524_v31  ;;  %7801 = vpow2.f32 %v2567_v44  ;;  %7025 = vmatprep.mubr.bf16.mxu1 %v2631_v46  ;;  %v8981_v38 = vpop.f32.mrf.mxu1 }
 0x36f   : > { %v8951_v50 = vpop.eup %7797  ;;  %7803 = vpow2.f32 %v2569_v45 }
 0x370   : > { %10278 = vst [vmem:[#allocation30_spill] sm:$0xff] %v8951_v50  ;;  %v2571_v52 = vmul.f32 1.442695, %v2544_v28  ;;  %7078 = vmatpush3.bf16.msra.mxu1 %v7555_v41  ;;  %v2632_v54 = vpack.c.bf16 %v8951_v50, %v8948_v47  ;;  %v8987_v31 = vpop.f32.mrf.mxu1 }
 0x371   : > { %7079 = vmatprep.subr.bf16.mxu1 %v7556_v37 }
 0x372   : > { %7805 = vpow2.f32 %v2571_v52  ;;  %7026 = vmatmul.mubr.bf16.gmra.mxu1 %v2632_v54 }
 0x374   : > { %7080 = vmatpush3.bf16.msra.mxu1 %v7556_v37 }
 0x375   : > { %7081 = vmatprep.subr.bf16.mxu1 %v7557_v56  ;;  %v2526_v58 = vpop.xlane.xlu0 %2525 }
 0x376   : > { %v2545_v32 = vsub.f32 %v8827_v53, %v2526_v58 }
 0x377   : > { %v8960_v14 = vpop.eup %7799 }
 0x378   : > { %7082 = vmatpush3.bf16.msra.mxu1 %v7557_v56  ;;  %v2573_v42 = vmul.f32 1.442695, %v2545_v32  ;;  %10279 = vst [vmem:[#allocation31_spill] sm:$0xff] %v8960_v14  ;;  %v8999_v32 = vpop.f32.mrf.mxu1 }
 0x379   : > { %7083 = vmatprep.subr.bf16.mxu1 %v7558_v61  ;;  %v2530_v20 = vpop.xlane.xlu0 %2529  ;;  %v2528_v27 = vpop.xlane.xlu1 %2527 }
 0x37a   : > { %v2547_v62 = vsub.f32 %v8825_v49, %v2530_v20  ;;  %v2546_v2 = vsub.f32 %v8834_v59, %v2528_v27  ;;  %7807 = vpow2.f32 %v2573_v42 }
 0x37b   : > { %v8964_v6 = vpop.eup %7801 }
 0x37c   : > { %10280 = vst [vmem:[#allocation32_spill] sm:$0xff] %v8964_v6  ;;  %v2575_v0 = vmul.f32 1.442695, %v2546_v2  ;;  %7084 = vmatpush3.bf16.msra.mxu1 %v7558_v61  ;;  %v2577_v53 = vmul.f32 1.442695, %v2547_v62  ;;  %v2633_v13 = vpack.c.bf16 %v8964_v6, %v8960_v14  ;;  %v8969_v19 = vpop.eup %7803 }
 0x37d   : > { %v2532_v21 = vpop.xlane.xlu1 %2531  ;;  %7101 = vmatprep.subr.bf16.mxu1 %v8956_v3  ;;  %10281 = vst [vmem:[#allocation33_spill] sm:$0xff] %v8969_v19 }
 0x37e   : > { %v2548_v49 = vsub.f32 %v8830_v55, %v2532_v21  ;;  %7809 = vpow2.f32 %v2575_v0  ;;  %7029 = vmatprep.mubr.bf16.mxu1 %v2633_v13 }
 0x37f   : > { %v8972_v59 = vpop.eup %7805  ;;  %7811 = vpow2.f32 %v2577_v53 }
 0x380   : > { %10282 = vst [vmem:[#allocation34_spill] sm:$0xff] %v8972_v59  ;;  %v2579_v57 = vmul.f32 1.442695, %v2548_v49  ;;  %v2634_v24 = vpack.c.bf16 %v8972_v59, %v8969_v19 }
 0x382   : > { %7813 = vpow2.f32 %v2579_v57  ;;  %7030 = vmatmul.mubr.bf16.gmra.mxu1 %v2634_v24 }
 0x385   : > { %v3065_v51 = vpop.xlane.xlu0 %3064 }
 0x386   : > { %v3096_v33 = vsub.f32 %v8845_v4, %v3065_v51 }
 0x387   : > { %v8985_v45 = vpop.eup %7807 }
 0x388   : > { %v3112_v40 = vmul.f32 1.442695, %v3096_v33  ;;  %10283 = vst [vmem:[#allocation35_spill] sm:$0xff] %v8985_v45 }
 0x389   : > { %v3069_v55 = vpop.xlane.xlu0 %3068  ;;  %v3067_v39 = vpop.xlane.xlu1 %3066 }
 0x38a   : > { %v3098_v41 = vsub.f32 %v8843_v63, %v3069_v55  ;;  %v3097_v44 = vsub.f32 %v8852_v8, %v3067_v39  ;;  %7815 = vpow2.f32 %v3112_v40 }
 0x38b   : > { %v8989_v46 = vpop.eup %7809 }
 0x38c   : > { %10284 = vst [vmem:[#allocation36_spill] sm:$0xff] %v8989_v46  ;;  %v3114_v28 = vmul.f32 1.442695, %v3097_v44  ;;  %v3116_v37 = vmul.f32 1.442695, %v3098_v41  ;;  %v2635_v4 = vpack.c.bf16 %v8989_v46, %v8985_v45  ;;  %v8993_v56 = vpop.eup %7811 }
 0x38d   : > { %v3071_v52 = vpop.xlane.xlu1 %3070  ;;  %v3073_v54 = vpop.xlane.xlu0 %3072  ;;  %10285 = vst [vmem:[#allocation37_spill] sm:$0xff] %v8993_v56 }
 0x38e   : > { %v3099_v63 = vsub.f32 %v8848_v5, %v3071_v52  ;;  %v3100_v8 = vsub.f32 %v8862_v11, %v3073_v54  ;;  %7817 = vpow2.f32 %v3114_v28  ;;  %7033 = vmatprep.mubr.bf16.mxu1 %v2635_v4  ;;  %v9005_v11 = vpop.f32.mrf.mxu1 }
 0x38f   : > { %v8997_v58 = vpop.eup %7813  ;;  %7819 = vpow2.f32 %v3116_v37 }
 0x390   : > { %10286 = vst [vmem:[#allocation38_spill] sm:$0xff] %v8997_v58  ;;  %v3118_v61 = vmul.f32 1.442695, %v3099_v63  ;;  %v2636_v20 = vpack.c.bf16 %v8997_v58, %v8993_v56  ;;  %v3120_v62 = vmul.f32 1.442695, %v3100_v8  ;;  %v9009_v24 = vpop.f32.mrf.mxu1 }
 0x391   : > { %v3077_v27 = vpop.xlane.xlu0 %3076  ;;  %v3075_v42 = vpop.xlane.xlu1 %3074  ;;  %v7578_v58 = vld [vmem:[#allocation3 + $0xac] ss:$16 sps:$4 sm:$0xff]  }
 0x392   : > { %7821 = vpow2.f32 %v3118_v61  ;;  %v3102_v2 = vsub.f32 %v8859_v10, %v3077_v27  ;;  %v3101_v5 = vsub.f32 %v8870_v16, %v3075_v42  ;;  %7034 = vmatmul.mubr.bf16.gmra.mxu1 %v2636_v20  ;;  %v9015_v41 = vpop.f32.mrf.mxu1 }
 0x393   : > { %7823 = vpow2.f32 %v3120_v62 }
 0x394   : > { %v3122_v0 = vmul.f32 1.442695, %v3101_v5  ;;  %v3124_v53 = vmul.f32 1.442695, %v3102_v2  ;;  %v9027_v63 = vpop.f32.mrf.mxu1 }
 0x395   : > { %v3079_v21 = vpop.xlane.xlu1 %3078  ;;  %v3081_v13 = vpop.xlane.xlu0 %3080 }
 0x396   : > { %v3103_v49 = vsub.f32 %v8866_v12, %v3079_v21  ;;  %v3104_v57 = vsub.f32 %v8880_v18, %v3081_v13  ;;  %7825 = vpow2.f32 %v3122_v0  ;;  %v9036_v5 = vpop.f32.mrf.mxu1 }
 0x397   : > { %7827 = vpow2.f32 %v3124_v53  ;;  %v9013_v40 = vpop.eup %7815 }
 0x398   : > { %v3126_v51 = vmul.f32 1.442695, %v3103_v49  ;;  %v3128_v16 = vmul.f32 1.442695, %v3104_v57 }
 0x399   : > { %v3085_v10 = vpop.xlane.xlu0 %3084  ;;  %v3083_v33 = vpop.xlane.xlu1 %3082 }
 0x39a   : > { %7829 = vpow2.f32 %v3126_v51  ;;  %v3106_v55 = vsub.f32 %v8877_v17, %v3085_v10  ;;  %v3105_v39 = vsub.f32 %v8888_v23, %v3083_v33  ;;  %v7570_v33 = vld [vmem:[#allocation2 + $0xa8] ss:$16 sps:$4 sm:$0xff]  }
 0x39b   : > { %v9017_v12 = vpop.eup %7817  ;;  %7831 = vpow2.f32 %v3128_v16 }
 0x39c   : > { %v3130_v18 = vmul.f32 1.442695, %v3105_v39  ;;  %v3132_v44 = vmul.f32 1.442695, %v3106_v55  ;;  %v3192_v52 = vpack.c.bf16 %v9017_v12, %v9013_v40  ;;  %v9021_v54 = vpop.eup %7819 }
 0x39d   : > { %v3087_v28 = vpop.xlane.xlu1 %3086  ;;  %v3089_v37 = vpop.xlane.xlu0 %3088 }
 0x39e   : > { %v3107_v17 = vsub.f32 %v8884_v48, %v3087_v28  ;;  %v3108_v23 = vsub.f32 %v8898_v26, %v3089_v37  ;;  %7833 = vpow2.f32 %v3130_v18  ;;  %7085 = vmatprep.mubr.bf16.mxu1 %v3192_v52  ;;  %v7569_v26 = vld [vmem:[#allocation2 + $0xc8] ss:$16 sps:$4 sm:$0xff]  }
 0x39f   : > { %v9025_v4 = vpop.eup %7821  ;;  %7835 = vpow2.f32 %v3132_v44  ;;  %v7571_v52 = vld [vmem:[#allocation2 + $0x88] ss:$16 sps:$4 sm:$0xff]  }
 0x3a0   : > { %v3193_v8 = vpack.c.bf16 %v9025_v4, %v9021_v54  ;;  %v3134_v61 = vmul.f32 1.442695, %v3107_v17  ;;  %v3136_v42 = vmul.f32 1.442695, %v3108_v23  ;;  %v9033_v2 = vpop.eup %7823 }
 0x3a1   : > { %v3093_v20 = vpop.xlane.xlu0 %3092  ;;  %v3091_v27 = vpop.xlane.xlu1 %3090 }
 0x3a2   : > { %7837 = vpow2.f32 %v3134_v61  ;;  %v3110_v62 = vsub.f32 %v8895_v25, %v3093_v20  ;;  %v3109_v48 = vsub.f32 %v8908_v36, %v3091_v27  ;;  %7086 = vmatmul.mubr.bf16.vlgmr.msra.gmra.mxu1 %v3193_v8 }
 0x3a3   : > { %7102 = vmatpush3.bf16.xpose.msra.mxu1 %v8956_v3  ;;  %v9038_v0 = vpop.eup %7825  ;;  %7839 = vpow2.f32 %v3136_v42  ;;  %v9047_v3 = vpop.f32.mrf.mxu1  ;;  %v2214_v42 = vpack.c.bf16 %v8978_v29, %v8962_v15  ;;  %v7574_v15 = vld [vmem:[#allocation2 + $0x28] ss:$16 sps:$4 sm:$0xff]  }
 0x3a4   : > { %v3138_v53 = vmul.f32 1.442695, %v3109_v48  ;;  %7103 = vmatprep.subr.bf16.mxu1 %v7569_v26  ;;  %v3140_v21 = vmul.f32 1.442695, %v3110_v62  ;;  %v3194_v49 = vpack.c.bf16 %v9038_v0, %v9033_v2  ;;  %v9042_v25 = vpop.eup %7827 }
 0x3a5   : > { %v3095_v13 = vpop.xlane.xlu1 %3094  ;;  %v9053_v55 = vpop.f32.mrf.mxu1 }
 0x3a6   : > { %v3111_v36 = vsub.f32 %v8902_v30, %v3095_v13  ;;  %7841 = vpow2.f32 %v3138_v53  ;;  %7089 = vmatprep.mubr.bf16.mxu1 %v3194_v49  ;;  %v7573_v13 = vld [vmem:[#allocation2 + $0x48] ss:$16 sps:$4 sm:$0xff]  }
 0x3a7   : > { %v9045_v57 = vpop.eup %7829  ;;  %7843 = vpow2.f32 %v3140_v21  ;;  %v9063_v28 = vpop.f32.mrf.mxu1 }
 0x3a8   : > { %10287 = vst [vmem:[#allocation39_spill] sm:$0xff] %v9045_v57  ;;  %v3142_v51 = vmul.f32 1.442695, %v3111_v36  ;;  %v3195_v10 = vpack.c.bf16 %v9045_v57, %v9042_v25  ;;  %v9051_v16 = vpop.eup %7831 }
 0x3a9   : > { %10288 = vst [vmem:[#allocation40_spill] sm:$0xff] %v9051_v16  ;;  %v2167_v23 = vpop.f32.mrf.mxu1 }
 0x3aa   : > { %7845 = vpow2.f32 %v3142_v51  ;;  %7090 = vmatmul.mubr.bf16.gmra.mxu1 %v3195_v10  ;;  %v7575_v10 = vld [vmem:[#allocation2 + $0x8] ss:$16 sps:$4 sm:$0xff]  }
 0x3ab   : > { %7104 = vmatpush3.bf16.xpose.msra.mxu1 %v7569_v26  ;;  %v9055_v30 = vpop.eup %7833  ;;  %v9079_v62 = vpop.f32.mrf.mxu1  ;;  %v7572_v26 = vld [vmem:[#allocation2 + $0x68] ss:$16 sps:$4 sm:$0xff]  }
 0x3ac   : > { %10289 = vst [vmem:[#allocation41_spill] sm:$0xff] %v9055_v30  ;;  %7105 = vmatprep.subr.bf16.mxu1 %v7570_v33  ;;  %v3196_v39 = vpack.c.bf16 %v9055_v30, %v9051_v16  ;;  %v9059_v18 = vpop.eup %7835 }
 0x3ad   : > { %10290 = vst [vmem:[#allocation42_spill] sm:$0xff] %v9059_v18  ;;  %v2173_v53 = vpop.f32.mrf.mxu1 }
 0x3ae   : > { %7093 = vmatprep.mubr.bf16.mxu1 %v3196_v39 }
 0x3af   : > { %v9061_v44 = vpop.eup %7837  ;;  %v9083_v21 = vpop.f32.mrf.mxu1 }
 0x3b0   : > { %10291 = vst [vmem:[#allocation43_spill] sm:$0xff] %v9061_v44  ;;  %v3197_v37 = vpack.c.bf16 %v9061_v44, %v9059_v18  ;;  %v9067_v17 = vpop.eup %7839 }
 0x3b1   : > { %10292 = vst [vmem:[#allocation44_spill] sm:$0xff] %v9067_v17  ;;  %v2177_v49 = vpop.f32.mrf.mxu1 }
 0x3b2   : > { %7094 = vmatmul.mubr.bf16.gmra.mxu1 %v3197_v37  ;;  %v7576_v37 = vld [vmem:[#allocation3 + $0xec] ss:$16 sps:$4 sm:$0xff]  }
 0x3b3   : > { %7106 = vmatpush3.bf16.xpose.msra.mxu1 %v7570_v33  ;;  %v9069_v8 = vpop.eup %7841  ;;  %v9085_v36 = vpop.f32.mrf.mxu1 }
 0x3b4   : > { %10293 = vst [vmem:[#allocation45_spill] sm:$0xff] %v9069_v8  ;;  %7107 = vmatprep.subr.bf16.mxu1 %v7571_v52  ;;  %v3198_v61 = vpack.c.bf16 %v9069_v8, %v9067_v17  ;;  %v9073_v20 = vpop.eup %7843 }
 0x3b5   : > { %10294 = vst [vmem:[#allocation46_spill] sm:$0xff] %v9073_v20  ;;  %v2183_v29 = vpop.f32.mrf.mxu1 }
 0x3b6   : > { %7097 = vmatprep.mubr.bf16.mxu1 %v3198_v61  ;;  %v2222_v61 = vpack.c.bf16 %v9036_v5, %v9015_v41  ;;  %v7579_v41 = vld [vmem:[#allocation3 + $0x8c] ss:$16 sps:$4 sm:$0xff]  }
 0x3b7   : > { %v9075_v27 = vpop.eup %7845  ;;  %v9087_v51 = vpop.f32.mrf.mxu1 }
 0x3b8   : > { %10295 = vst [vmem:[#allocation47_spill] sm:$0xff] %v9075_v27  ;;  %v3199_v48 = vpack.c.bf16 %v9075_v27, %v9073_v20 }
 0x3b9   : > { %v2187_v33 = vpop.f32.mrf.mxu1 }
 0x3ba   : > { %7098 = vmatmul.mubr.bf16.gmra.mxu1 %v3199_v48  ;;  %v2218_v48 = vpack.c.bf16 %v9005_v11, %v8987_v31  ;;  %v2234_v31 = vpack.c.bf16 %v2187_v33, %v2183_v29  ;;  %v7580_v11 = vld [vmem:[#allocation3 + $0x6c] ss:$16 sps:$4 sm:$0xff]  }
 0x3bb   : > { %7108 = vmatpush3.bf16.xpose.msra.mxu1 %v7571_v52  ;;  %7117 = vmatprep.mubr.bf16.mxu1 %v2214_v42  ;;  %v9089_v39 = vpop.f32.mrf.mxu1 }
 0x3bc   : > { %7109 = vmatprep.subr.bf16.mxu1 %v7572_v26 }
 0x3bd   : > { %v2193_v52 = vpop.f32.mrf.mxu1 }
 0x3bf   : > { %v9093_v42 = vpop.f32.mrf.mxu1 }
 0x3c3   : > { %7110 = vmatpush3.bf16.xpose.msra.mxu1 %v7572_v26  ;;  %v7577_v26 = vld [vmem:[#allocation3 + $0xcc] ss:$16 sps:$4 sm:$0xff]  }
 0x3c4   : > { %7111 = vmatprep.subr.bf16.mxu1 %v7573_v13 }
 0x3cb   : > { %7112 = vmatpush3.bf16.xpose.msra.mxu1 %v7573_v13  ;;  %v2197_v13 = vpop.f32.mrf.mxu1 }
 0x3cc   : > { %7113 = vmatprep.subr.bf16.mxu1 %v7574_v15 }
 0x3cd   : > { %v9098_v56 = vpop.f32.mrf.mxu1 }
 0x3cf   : > { %v2203_v5 = vpop.f32.mrf.mxu1 }
 0x3d3   : > { %7114 = vmatpush3.bf16.xpose.msra.mxu1 %v7574_v15  ;;  %v2226_v15 = vpack.c.bf16 %v2167_v23, %v9053_v55  ;;  %v7581_v55 = vld [vmem:[#allocation3 + $0x4c] ss:$16 sps:$4 sm:$0xff]  }
 0x3d4   : > { %7115 = vmatprep.subr.bf16.mxu1 %v7575_v10 }
 0x3db   : > { %7116 = vmatpush3.bf16.xpose.msra.mxu1 %v7575_v10  ;;  %v2230_v10 = vpack.c.bf16 %v2177_v49, %v2173_v53  ;;  %v7582_v49 = vld [vmem:[#allocation3 + $0x2c] ss:$16 sps:$4 sm:$0xff]  }
 0x3dc   : > { %7197 = vmatprep.subr.bf16.mxu1 %v7576_v37 }
 0x3e2   : > { %7118 = vmatmul.mubr.bf16.vlgmr.msra.gmra.mxu1 %v2218_v48 }
 0x3e3   : > { %7198 = vmatpush3.bf16.msra.mxu1 %v7576_v37  ;;  %7121 = vmatprep.mubr.bf16.mxu1 %v2222_v61  ;;  %v2238_v37 = vpack.c.bf16 %v2197_v13, %v2193_v52  ;;  %v9100_v61 = vpop.f32.mrf.mxu1 }
 0x3e4   : > { %7199 = vmatprep.subr.bf16.mxu1 %v7577_v26 }
 0x3e5   : > { %v2207_v23 = vpop.f32.mrf.mxu1 }
 0x3e6   : > { %v2242_v53 = vpack.c.bf16 %v2207_v23, %v2203_v5 }
 0x3e7   : > { %7200 = vmatpush3.bf16.msra.mxu1 %v7577_v26  ;;  %v9102_v29 = vpop.f32.mrf.mxu1 }
 0x3e8   : > { %7201 = vmatprep.subr.bf16.mxu1 %v7578_v58 }
 0x3ea   : > { %7122 = vmatmul.mubr.bf16.gmra.mxu1 %v2226_v15 }
 0x3eb   : > { %7202 = vmatpush3.bf16.msra.mxu1 %v7578_v58  ;;  %7125 = vmatprep.mubr.bf16.mxu1 %v2230_v10  ;;  %v7583_v58 = vld [vmem:[#allocation3 + $0xc] ss:$16 sps:$4 sm:$0xff]  }
 0x3ec   : > { %7203 = vmatprep.subr.bf16.mxu1 %v7579_v41 }
 0x3ef   : > { %7204 = vmatpush3.bf16.msra.mxu1 %v7579_v41 }
 0x3f0   : > { %7205 = vmatprep.subr.bf16.mxu1 %v7580_v11 }
 0x3f2   : > { %7126 = vmatmul.mubr.bf16.gmra.mxu1 %v2234_v31 }
 0x3f3   : > { %7206 = vmatpush3.bf16.msra.mxu1 %v7580_v11  ;;  %7129 = vmatprep.mubr.bf16.mxu1 %v2238_v37 }
 0x3f4   : > { %7207 = vmatprep.subr.bf16.mxu1 %v7581_v55 }
 0x3f7   : > { %7208 = vmatpush3.bf16.msra.mxu1 %v7581_v55 }
 0x3f8   : > { %7209 = vmatprep.subr.bf16.mxu1 %v7582_v49 }
 0x3fa   : > { %7130 = vmatmul.mubr.bf16.gmra.mxu1 %v2242_v53 }
 0x3fb   : > { %7210 = vmatpush3.bf16.msra.mxu1 %v7582_v49 }
 0x3fc   : > { %7211 = vmatprep.subr.bf16.mxu1 %v7583_v58 }
 0x3ff   : > { %7212 = vmatpush3.bf16.msra.mxu1 %v7583_v58 }
 0x41f   : > { %v9104_v33 = vpop.f32.mrf.mxu1 }
 0x420   : > { %10296 = vst [vmem:[#allocation48_spill] sm:$0xff] %v9104_v33 }
 0x421   : > { %v9106_v52 = vpop.f32.mrf.mxu1 }
 0x422   : > { %10297 = vst [vmem:[#allocation49_spill] sm:$0xff] %v9106_v52 }
 0x423   : > { %v9108_v48 = vpop.f32.mrf.mxu1 }
 0x424   : > { %10298 = vst [vmem:[#allocation50_spill] sm:$0xff] %v9108_v48 }
 0x425   : > { %v9110_v26 = vpop.f32.mrf.mxu1 }
 0x426   : > { %10299 = vst [vmem:[#allocation51_spill] sm:$0xff] %v9110_v26 }
 0x432   : > { %v9112_v13 = vpop.f32.mrf.mxu1 }
 0x433   : > { %10300 = vst [vmem:[#allocation52_spill] sm:$0xff] %v9112_v13 }
 0x434   : > { %v9114_v15 = vpop.f32.mrf.mxu1 }
 0x435   : > { %10301 = vst [vmem:[#allocation53_spill] sm:$0xff] %v9114_v15 }
 0x436   : > { %v9116_v10 = vpop.f32.mrf.mxu1 }
 0x437   : > { %10302 = vst [vmem:[#allocation54_spill] sm:$0xff] %v9116_v10 }
 0x438   : > { %v9118_v41 = vpop.f32.mrf.mxu1 }
 0x439   : > { %10303 = vst [vmem:[#allocation55_spill] sm:$0xff] %v9118_v41 }
 0x442   : > { %v9120_v5 = vpop.f32.mrf.mxu1 }
 0x443   : > { %10304 = vst [vmem:[#allocation56_spill] sm:$0xff] %v9120_v5 }
 0x444   : > { %v9122_v31 = vpop.f32.mrf.mxu1 }
 0x445   : > { %10305 = vst [vmem:[#allocation57_spill] sm:$0xff] %v9122_v31 }
 0x446   : > { %v9124_v11 = vpop.f32.mrf.mxu1 }
 0x447   : > { %10306 = vst [vmem:[#allocation58_spill] sm:$0xff] %v9124_v11 }
 0x448   : > { %v9126_v37 = vpop.f32.mrf.mxu1 }
 0x449   : > { %10307 = vst [vmem:[#allocation59_spill] sm:$0xff] %v9126_v37 }
 0x452   : > { %v9128_v55 = vpop.f32.mrf.mxu1 }
 0x453   : > { %10308 = vst [vmem:[#allocation60_spill] sm:$0xff] %v9128_v55 }
 0x454   : > { %v9130_v23 = vpop.f32.mrf.mxu1 }
 0x455   : > { %10309 = vst [vmem:[#allocation61_spill] sm:$0xff] %v9130_v23 }
 0x456   : > { %v9132_v53 = vpop.f32.mrf.mxu1 }
 0x457   : > { %10310 = vst [vmem:[#allocation62_spill] sm:$0xff] %v9132_v53 }
 0x458   : > { %v9134_v49 = vpop.f32.mrf.mxu1 }
 0x459   : > { %10311 = vst [vmem:[#allocation63_spill] sm:$0xff] %v9134_v49 }
 0x462   : > { %v9136_v58 = vpop.f32.mrf.mxu1 }
 0x463   : > { %10312 = vst [vmem:[#allocation64_spill] sm:$0xff] %v9136_v58 }
 0x464   : > { %v9138_v13 = vpop.f32.mrf.mxu1 }
 0x465   : > { %10313 = vst [vmem:[#allocation65_spill] sm:$0xff] %v9138_v13 }
 0x466   : > { %v9140_v10 = vpop.f32.mrf.mxu1 }
 0x467   : > { %10314 = vst [vmem:[#allocation66_spill] sm:$0xff] %v9140_v10 }
 0x468   : > { %v9142_v5 = vpop.f32.mrf.mxu1 }
 0x469   : > { %10315 = vst [vmem:[#allocation67_spill] sm:$0xff] %v9142_v5 }
 0x46a   : > { %v9144_v31 = vpop.f32.mrf.mxu1 }
 0x46b   : > { %10316 = vst [vmem:[#allocation68_spill] sm:$0xff] %v9144_v31 }
 0x46c   : > { %v9146_v11 = vpop.f32.mrf.mxu1 }
 0x46d   : > { %10317 = vst [vmem:[#allocation69_spill] sm:$0xff] %v9146_v11 }
 0x46e   : > { %v9148_v37 = vpop.f32.mrf.mxu1 }
 0x46f   : > { %10318 = vst [vmem:[#allocation70_spill] sm:$0xff] %v9148_v37 }
 0x470   : > { %v9150_v55 = vpop.f32.mrf.mxu1 }
 0x471   : > { %10319 = vst [vmem:[#allocation71_spill] sm:$0xff] %v9150_v55 }
 0x472   : > { %v9152_v53 = vpop.f32.mrf.mxu1 }
 0x473   : > { %10320 = vst [vmem:[#allocation72_spill] sm:$0xff] %v9152_v53 }
 0x474   : > { %v9154_v49 = vpop.f32.mrf.mxu1 }
 0x475   : > { %10321 = vst [vmem:[#allocation73_spill] sm:$0xff] %v9154_v49 }
 0x476   : > { %v9156_v23 = vpop.f32.mrf.mxu1 }
 0x477   : > { %10322 = vst [vmem:[#allocation74_spill] sm:$0xff] %v9156_v23 }
 0x478   : > { %v9158_v15 = vpop.f32.mrf.mxu1 }
 0x479   : > { %10323 = vst [vmem:[#allocation75_spill] sm:$0xff] %v9158_v15 }
 0x47a   : > { %v9160_v41 = vpop.f32.mrf.mxu1 }
 0x47b   : > { %10324 = vst [vmem:[#allocation76_spill] sm:$0xff] %v9160_v41 }
 0x47c   : > { %v9162_v33 = vpop.f32.mrf.mxu1 }
 0x47d   : > { %10325 = vst [vmem:[#allocation77_spill] sm:$0xff] %v9162_v33 }
 0x47e   : > { %v9164_v31 = vpop.f32.mrf.mxu1 }
 0x47f   : > { %10326 = vst [vmem:[#allocation78_spill] sm:$0xff] %v9164_v31 }
 0x480   : > { %v9166_v11 = vpop.f32.mrf.mxu1 }
 0x481   : > { %10327 = vst [vmem:[#allocation79_spill] sm:$0xff] %v9166_v11 }
 0x4a2   : > { %v7119_v37 = vpop.f32.mrf.mxu1 }
 0x4a4   : > { %v3483_v48 = vpop.f32.mrf.mxu1 }
 0x4a5   : > { %3627 = vmax.xlane.f32.xlu0 %v3483_v48 }
 0x4a6   : > { %v7120_v53 = vpop.f32.mrf.mxu1 }
 0x4a7   : > { %v6742_v55 = vpack.c.bf16 %v7120_v53, %v7119_v37 }
 0x4a8   : > { %v3486_v49 = vpop.f32.mrf.mxu1 }
 0x4a9   : > { %6830 = vst [vmem:[%s8782_s13 + $0x88] sm:$0xff] %v6742_v55   ;;  %v6737_v23 = vpack.c.bf16 %v3486_v49, %v3483_v48  ;;  %3631 = vmax.xlane.f32.xlu0 %v7119_v37  ;;  %3629 = vmax.xlane.f32.xlu1 %v3486_v49 }
 0x4aa   : > { %v7123_v15 = vpop.f32.mrf.mxu1 }
 0x4ab   : > { %6829 = vst [vmem:[%s8782_s13 + $0x80] sm:$0xff] %v6737_v23  }
 0x4ac   : > { %v3499_v41 = vpop.f32.mrf.mxu1 }
 0x4ad   : > { %3633 = vmax.xlane.f32.xlu1 %v7120_v53  ;;  %3635 = vmax.xlane.f32.xlu0 %v3499_v41 }
 0x4ae   : > { %v9170_v31 = vpop.f32.mrf.mxu1 }
 0x4af   : > { %v6752_v33 = vpack.c.bf16 %v9170_v31, %v7123_v15 }
 0x4b0   : > { %v3502_v11 = vpop.f32.mrf.mxu1 }
 0x4b1   : > { %6832 = vst [vmem:[%s8782_s13 + $0x98] sm:$0xff] %v6752_v33   ;;  %v6747_v58 = vpack.c.bf16 %v3502_v11, %v3499_v41  ;;  %3639 = vmax.xlane.f32.xlu0 %v7123_v15  ;;  %3637 = vmax.xlane.f32.xlu1 %v3502_v11 }
 0x4b2   : > { %v9174_v55 = vpop.f32.mrf.mxu1 }
 0x4b3   : > { %6831 = vst [vmem:[%s8782_s13 + $0x90] sm:$0xff] %v6747_v58  }
 0x4b4   : > { %v3515_v52 = vpop.f32.mrf.mxu1 }
 0x4b5   : > { %3641 = vmax.xlane.f32.xlu1 %v9170_v31  ;;  %3643 = vmax.xlane.f32.xlu0 %v3515_v52 }
 0x4b6   : > { %v9178_v23 = vpop.f32.mrf.mxu1 }
 0x4b7   : > { %v6762_v10 = vpack.c.bf16 %v9178_v23, %v9174_v55 }
 0x4b8   : > { %v3518_v26 = vpop.f32.mrf.mxu1 }
 0x4b9   : > { %6834 = vst [vmem:[%s8782_s13 + $0xa8] sm:$0xff] %v6762_v10   ;;  %v6757_v33 = vpack.c.bf16 %v3518_v26, %v3515_v52  ;;  %3647 = vmax.xlane.f32.xlu0 %v9174_v55  ;;  %3645 = vmax.xlane.f32.xlu1 %v3518_v26 }
 0x4ba   : > { %v9184_v5 = vpop.f32.mrf.mxu1 }
 0x4bb   : > { %6833 = vst [vmem:[%s8782_s13 + $0xa0] sm:$0xff] %v6757_v33  }
 0x4bc   : > { %v9187_v58 = vpop.f32.mrf.mxu1 }
 0x4bd   : > { %3649 = vmax.xlane.f32.xlu1 %v9178_v23  ;;  %3651 = vmax.xlane.f32.xlu0 %v9187_v58 }
 0x4be   : > { %v9191_v13 = vpop.f32.mrf.mxu1 }
 0x4bf   : > { %v6772_v27 = vpack.c.bf16 %v9191_v13, %v9184_v5 }
 0x4c0   : > { %v9195_v10 = vpop.f32.mrf.mxu1 }
 0x4c1   : > { %6836 = vst [vmem:[%s8782_s13 + $0xb8] sm:$0xff] %v6772_v27   ;;  %v6767_v20 = vpack.c.bf16 %v9195_v10, %v9187_v58  ;;  %3655 = vmax.xlane.f32.xlu0 %v9184_v5  ;;  %3653 = vmax.xlane.f32.xlu1 %v9195_v10 }
 0x4c3   : > { %6835 = vst [vmem:[%s8782_s13 + $0xb0] sm:$0xff] %v6767_v20  }
 0x4c5   : > { %3657 = vmax.xlane.f32.xlu1 %v9191_v13 }
 0x52e   : > { %v3628_v33 = vpop.xlane.xlu0 %3627 }
 0x52f   : > { %v3659_v46 = vsub.f32 %v3483_v48, %v3628_v33 }
 0x531   : > { %v3675_v17 = vmul.f32 1.442695, %v3659_v46 }
 0x532   : > { %v3632_v45 = vpop.xlane.xlu0 %3631  ;;  %v3630_v8 = vpop.xlane.xlu1 %3629 }
 0x533   : > { %v3661_v59 = vsub.f32 %v7119_v37, %v3632_v45  ;;  %v3660_v44 = vsub.f32 %v3486_v49, %v3630_v8  ;;  %7847 = vpow2.f32 %v3675_v17 }
 0x535   : > { %v3677_v19 = vmul.f32 1.442695, %v3660_v44  ;;  %v3679_v18 = vmul.f32 1.442695, %v3661_v59 }
 0x536   : > { %v3634_v27 = vpop.xlane.xlu1 %3633  ;;  %v3636_v6 = vpop.xlane.xlu0 %3635 }
 0x537   : > { %v3662_v30 = vsub.f32 %v7120_v53, %v3634_v27  ;;  %v3663_v14 = vsub.f32 %v3499_v41, %v3636_v6  ;;  %7849 = vpow2.f32 %v3677_v19 }
 0x538   : > { %7851 = vpow2.f32 %v3679_v18 }
 0x539   : > { %v3681_v50 = vmul.f32 1.442695, %v3662_v30  ;;  %v3683_v57 = vmul.f32 1.442695, %v3663_v14 }
 0x53a   : > { %v3640_v20 = vpop.xlane.xlu0 %3639  ;;  %v3638_v16 = vpop.xlane.xlu1 %3637 }
 0x53b   : > { %7853 = vpow2.f32 %v3681_v50  ;;  %v3665_v48 = vsub.f32 %v7123_v15, %v3640_v20  ;;  %v3664_v33 = vsub.f32 %v3502_v11, %v3638_v16 }
 0x53c   : > { %7855 = vpow2.f32 %v3683_v57 }
 0x53d   : > { %v3685_v47 = vmul.f32 1.442695, %v3664_v33  ;;  %v3687_v46 = vmul.f32 1.442695, %v3665_v48 }
 0x53e   : > { %v3642_v45 = vpop.xlane.xlu1 %3641  ;;  %v3644_v8 = vpop.xlane.xlu0 %3643 }
 0x53f   : > { %v3666_v59 = vsub.f32 %v9170_v31, %v3642_v45  ;;  %v3667_v44 = vsub.f32 %v3515_v52, %v3644_v8  ;;  %7857 = vpow2.f32 %v3685_v47 }
 0x540   : > { %7859 = vpow2.f32 %v3687_v46  ;;  %v9206_v18 = vpop.eup %7847 }
 0x541   : > { %v3689_v17 = vmul.f32 1.442695, %v3666_v59  ;;  %v3691_v30 = vmul.f32 1.442695, %v3667_v44 }
 0x542   : > { %v3648_v6 = vpop.xlane.xlu0 %3647  ;;  %v3646_v19 = vpop.xlane.xlu1 %3645 }
 0x543   : > { %7861 = vpow2.f32 %v3689_v17  ;;  %v3669_v50 = vsub.f32 %v9174_v55, %v3648_v6  ;;  %v3668_v14 = vsub.f32 %v3518_v26, %v3646_v19  ;;  %v7585_v19 = vld [vmem:[#allocation2 + $0xac] ss:$16 sps:$4 sm:$0xff]  }
 0x544   : > { %v9208_v16 = vpop.eup %7849  ;;  %7863 = vpow2.f32 %v3691_v30 }
 0x545   : > { %v3693_v15 = vmul.f32 1.442695, %v3668_v14  ;;  %v3695_v41 = vmul.f32 1.442695, %v3669_v50  ;;  %v3755_v47 = vpack.c.bf16 %v9208_v16, %v9206_v18  ;;  %v9212_v52 = vpop.eup %7851 }
 0x546   : > { %v3650_v57 = vpop.xlane.xlu1 %3649  ;;  %v3652_v11 = vpop.xlane.xlu0 %3651 }
 0x547   : > { %v3670_v31 = vsub.f32 %v9178_v23, %v3650_v57  ;;  %v3671_v37 = vsub.f32 %v9187_v58, %v3652_v11  ;;  %7865 = vpow2.f32 %v3693_v15  ;;  %7149 = vmatprep.mubr.bf16.mxu0 %v3755_v47  ;;  %v7584_v23 = vld [vmem:[#allocation2 + $0xcc] ss:$16 sps:$4 sm:$0xff]  }
 0x548   : > { %v9216_v53 = vpop.eup %7853  ;;  %7867 = vpow2.f32 %v3695_v41  ;;  %v7586_v57 = vld [vmem:[#allocation2 + $0x8c] ss:$16 sps:$4 sm:$0xff]  }
 0x549   : > { %v3756_v26 = vpack.c.bf16 %v9216_v53, %v9212_v52  ;;  %v3697_v49 = vmul.f32 1.442695, %v3670_v31  ;;  %v3699_v20 = vmul.f32 1.442695, %v3671_v37  ;;  %v9222_v58 = vpop.eup %7855 }
 0x54a   : > { %v3656_v55 = vpop.xlane.xlu0 %3655  ;;  %v3654_v27 = vpop.xlane.xlu1 %3653 }
 0x54b   : > { %7869 = vpow2.f32 %v3697_v49  ;;  %v3673_v48 = vsub.f32 %v9184_v5, %v3656_v55  ;;  %v3672_v33 = vsub.f32 %v9195_v10, %v3654_v27  ;;  %7150 = vmatmul.mubr.bf16.vlgmr.msra.gmra.mxu0 %v3756_v26  ;;  %v2215_v55 = vpack.c.bf16 %v8981_v38, %v8974_v22  ;;  %v7587_v27 = vld [vmem:[#allocation2 + $0x6c] ss:$16 sps:$4 sm:$0xff]  }
 0x54c   : > { %7166 = vmatpush3.bf16.xpose.msra.mxu0 %v8904_v1  ;;  %v9225_v46 = vpop.eup %7857  ;;  %7871 = vpow2.f32 %v3699_v20  ;;  %v7588_v20 = vld [vmem:[#allocation2 + $0x4c] ss:$16 sps:$4 sm:$0xff]   ;;  %v2223_v22 = vpack.c.bf16 %v9047_v3, %v9027_v63  ;;  %v2227_v38 = vpack.c.bf16 %v9079_v62, %v9063_v28 }
 0x54d   : > { %v3701_v45 = vmul.f32 1.442695, %v3672_v33  ;;  %7167 = vmatprep.subr.bf16.mxu0 %v7584_v23  ;;  %v3703_v8 = vmul.f32 1.442695, %v3673_v48  ;;  %v3757_v44 = vpack.c.bf16 %v9225_v46, %v9222_v58  ;;  %v9229_v17 = vpop.eup %7859  ;;  %v7589_v48 = vld [vmem:[#allocation2 + $0x2c] ss:$16 sps:$4 sm:$0xff]  }
 0x54e   : > { %v3658_v59 = vpop.xlane.xlu1 %3657  ;;  %v7590_v33 = vld [vmem:[#allocation2 + $0xc] ss:$16 sps:$4 sm:$0xff]  }
 0x54f   : > { %v3674_v5 = vsub.f32 %v9191_v13, %v3658_v59  ;;  %7873 = vpow2.f32 %v3701_v45  ;;  %7153 = vmatprep.mubr.bf16.mxu0 %v3757_v44  ;;  %v2231_v45 = vpack.c.bf16 %v9085_v36, %v9083_v21  ;;  %v2239_v59 = vpack.c.bf16 %v9098_v56, %v9093_v42 }
 0x550   : > { %v9232_v10 = vpop.eup %7861  ;;  %7875 = vpow2.f32 %v3703_v8  ;;  %v2235_v8 = vpack.c.bf16 %v9089_v39, %v9087_v51 }
 0x551   : > { %v3705_v6 = vmul.f32 1.442695, %v3674_v5  ;;  %v3758_v1 = vpack.c.bf16 %v9232_v10, %v9229_v17  ;;  %v9236_v30 = vpop.eup %7863 }
 0x553   : > { %7877 = vpow2.f32 %v3705_v6  ;;  %7154 = vmatmul.mubr.bf16.gmra.mxu0 %v3758_v1 }
 0x554   : > { %7168 = vmatpush3.bf16.xpose.msra.mxu0 %v7584_v23  ;;  %v9238_v50 = vpop.eup %7865  ;;  %v2219_v23 = vpack.c.bf16 %v9009_v24, %v8999_v32  ;;  %v2243_v32 = vpack.c.bf16 %v9102_v29, %v9100_v61 }
 0x555   : > { %7169 = vmatprep.subr.bf16.mxu0 %v7585_v19  ;;  %v3759_v13 = vpack.c.bf16 %v9238_v50, %v9236_v30  ;;  %v9242_v14 = vpop.eup %7867 }
 0x557   : > { %7157 = vmatprep.mubr.bf16.mxu0 %v3759_v13 }
 0x558   : > { %v9244_v15 = vpop.eup %7869 }
 0x559   : > { %v3760_v41 = vpack.c.bf16 %v9244_v15, %v9242_v14  ;;  %v9248_v11 = vpop.eup %7871 }
 0x55b   : > { %7158 = vmatmul.mubr.bf16.gmra.mxu0 %v3760_v41 }
 0x55c   : > { %7170 = vmatpush3.bf16.xpose.msra.mxu0 %v7585_v19  ;;  %v9250_v47 = vpop.eup %7873 }
 0x55d   : > { %7171 = vmatprep.subr.bf16.mxu0 %v7586_v57  ;;  %v3761_v31 = vpack.c.bf16 %v9250_v47, %v9248_v11  ;;  %v9254_v37 = vpop.eup %7875 }
 0x55f   : > { %7161 = vmatprep.mubr.bf16.mxu0 %v3761_v31 }
 0x560   : > { %v9256_v26 = vpop.eup %7877 }
 0x561   : > { %v3762_v49 = vpack.c.bf16 %v9256_v26, %v9254_v37 }
 0x563   : > { %7162 = vmatmul.mubr.bf16.gmra.mxu0 %v3762_v49 }
 0x564   : > { %7172 = vmatpush3.bf16.xpose.msra.mxu0 %v7586_v57  ;;  %7181 = vmatprep.mubr.bf16.mxu0 %v2215_v55 }
 0x565   : > { %7173 = vmatprep.subr.bf16.mxu0 %v7587_v27 }
 0x56c   : > { %7174 = vmatpush3.bf16.xpose.msra.mxu0 %v7587_v27 }
 0x56d   : > { %7175 = vmatprep.subr.bf16.mxu0 %v7588_v20 }
 0x574   : > { %7176 = vmatpush3.bf16.xpose.msra.mxu0 %v7588_v20 }
 0x575   : > { %7177 = vmatprep.subr.bf16.mxu0 %v7589_v48 }
 0x57c   : > { %7178 = vmatpush3.bf16.xpose.msra.mxu0 %v7589_v48 }
 0x57d   : > { %7179 = vmatprep.subr.bf16.mxu0 %v7590_v33 }
 0x584   : > { %7180 = vmatpush3.bf16.xpose.msra.mxu0 %v7590_v33 }
 0x58b   : > { %7182 = vmatmul.mubr.bf16.vlgmr.msra.gmra.mxu0 %v2219_v23 }
 0x58c   : > { %7185 = vmatprep.mubr.bf16.mxu0 %v2223_v22 }
 0x593   : > { %7186 = vmatmul.mubr.bf16.gmra.mxu0 %v2227_v38 }
 0x594   : > { %7189 = vmatprep.mubr.bf16.mxu0 %v2231_v45 }
 0x59b   : > { %7190 = vmatmul.mubr.bf16.gmra.mxu0 %v2235_v8 }
 0x59c   : > { %7193 = vmatprep.mubr.bf16.mxu0 %v2239_v59 }
 0x5a3   : > { %7194 = vmatmul.mubr.bf16.gmra.mxu0 %v2243_v32 }
 0x60b   : > { %v9276_v24 = vpop.f32.mrf.mxu0 }
 0x60d   : > { %v9278_v63 = vpop.f32.mrf.mxu0 }
 0x60f   : > { %v9280_v3 = vpop.f32.mrf.mxu0 }
 0x611   : > { %v9282_v28 = vpop.f32.mrf.mxu0 }
 0x613   : > { %v9284_v62 = vpop.f32.mrf.mxu0 }
 0x615   : > { %v9286_v21 = vpop.f32.mrf.mxu0 }
 0x617   : > { %v9288_v36 = vpop.f32.mrf.mxu0 }
 0x619   : > { %v9290_v56 = vpop.f32.mrf.mxu0 }
 0x61b   : > { %v9292_v51 = vpop.f32.mrf.mxu0 }
 0x61d   : > { %v9294_v39 = vpop.f32.mrf.mxu0 }
 0x61f   : > { %v9296_v42 = vpop.f32.mrf.mxu0 }
 0x621   : > { %v9298_v61 = vpop.f32.mrf.mxu0 }
 0x623   : > { %v9300_v29 = vpop.f32.mrf.mxu0 }
 0x625   : > { %v9302_v44 = vpop.f32.mrf.mxu0 }
 0x627   : > { %v9304_v5 = vpop.f32.mrf.mxu0 }
 0x629   : > { %v9306_v6 = vpop.f32.mrf.mxu0 }
 0x64b   : > { %v9308_v1 = vpop.f32.mrf.mxu0 }
 0x64d   : > { %v9310_v19 = vpop.f32.mrf.mxu0 }
 0x64e   : > { %4190 = vmax.xlane.f32.xlu0 %v9310_v19 }
 0x64f   : > { %v9313_v13 = vpop.f32.mrf.mxu0 }
 0x650   : > { %v6782_v41 = vpack.c.bf16 %v9313_v13, %v9308_v1 }
 0x651   : > { %v9317_v57 = vpop.f32.mrf.mxu0 }
 0x652   : > { %6838 = vst [vmem:[%s8782_s13 + $0xc8] sm:$0xff] %v6782_v41   ;;  %v6777_v31 = vpack.c.bf16 %v9317_v57, %v9310_v19  ;;  %4194 = vmax.xlane.f32.xlu0 %v9308_v1  ;;  %4192 = vmax.xlane.f32.xlu1 %v9317_v57 }
 0x653   : > { %v9324_v49 = vpop.f32.mrf.mxu0 }
 0x654   : > { %6837 = vst [vmem:[%s8782_s13 + $0xc0] sm:$0xff] %v6777_v31  }
 0x655   : > { %v9327_v55 = vpop.f32.mrf.mxu0 }
 0x656   : > { %4196 = vmax.xlane.f32.xlu1 %v9313_v13  ;;  %4198 = vmax.xlane.f32.xlu0 %v9327_v55 }
 0x657   : > { %v9331_v27 = vpop.f32.mrf.mxu0 }
 0x658   : > { %v6792_v20 = vpack.c.bf16 %v9331_v27, %v9324_v49 }
 0x659   : > { %v9335_v48 = vpop.f32.mrf.mxu0 }
 0x65a   : > { %6840 = vst [vmem:[%s8782_s13 + $0xd8] sm:$0xff] %v6792_v20   ;;  %v6787_v33 = vpack.c.bf16 %v9335_v48, %v9327_v55  ;;  %4202 = vmax.xlane.f32.xlu0 %v9324_v49  ;;  %4200 = vmax.xlane.f32.xlu1 %v9335_v48 }
 0x65b   : > { %v9342_v23 = vpop.f32.mrf.mxu0 }
 0x65c   : > { %6839 = vst [vmem:[%s8782_s13 + $0xd0] sm:$0xff] %v6787_v33  }
 0x65d   : > { %v9345_v22 = vpop.f32.mrf.mxu0 }
 0x65e   : > { %4204 = vmax.xlane.f32.xlu1 %v9331_v27  ;;  %4206 = vmax.xlane.f32.xlu0 %v9345_v22 }
 0x65f   : > { %v9349_v38 = vpop.f32.mrf.mxu0 }
 0x660   : > { %v6802_v45 = vpack.c.bf16 %v9349_v38, %v9342_v23 }
 0x661   : > { %v9353_v8 = vpop.f32.mrf.mxu0 }
 0x662   : > { %6842 = vst [vmem:[%s8782_s13 + $0xe8] sm:$0xff] %v6802_v45   ;;  %v6797_v59 = vpack.c.bf16 %v9353_v8, %v9345_v22  ;;  %4210 = vmax.xlane.f32.xlu0 %v9342_v23  ;;  %4208 = vmax.xlane.f32.xlu1 %v9353_v8 }
 0x663   : > { %v9360_v32 = vpop.f32.mrf.mxu0 }
 0x664   : > { %6841 = vst [vmem:[%s8782_s13 + $0xe0] sm:$0xff] %v6797_v59   ;;  %v7593_v59 = vld [vmem:[#allocation13 + $0xe4] ss:$16 sps:$4 sm:$0xff]  }
 0x665   : > { %v9363_v41 = vpop.f32.mrf.mxu0  ;;  %5285 = vmatprep.subr.bf16.mxu1 %v7593_v59 }
 0x666   : > { %4212 = vmax.xlane.f32.xlu1 %v9349_v38  ;;  %4214 = vmax.xlane.f32.xlu0 %v9363_v41 }
 0x667   : > { %v9367_v31 = vpop.f32.mrf.mxu0 }
 0x668   : > { %v6812_v20 = vpack.c.bf16 %v9367_v31, %v9360_v32 }
 0x669   : > { %v9371_v33 = vpop.f32.mrf.mxu0 }
 0x66a   : > { %6844 = vst [vmem:[%s8782_s13 + $0xf8] sm:$0xff] %v6812_v20   ;;  %v6807_v45 = vpack.c.bf16 %v9371_v33, %v9363_v41  ;;  %4218 = vmax.xlane.f32.xlu0 %v9360_v32  ;;  %4216 = vmax.xlane.f32.xlu1 %v9371_v33 }
 0x66c   : > { %6843 = vst [vmem:[%s8782_s13 + $0xf0] sm:$0xff] %v6807_v45  }
 0x66e   : > { %3144 = vadd.xlane.f32.xlu0 %v9013_v40  ;;  %4220 = vmax.xlane.f32.xlu1 %v9367_v31  ;;  %v10329_v40 = vld [vmem:[#allocation39_spill] sm:$0xff] }
 0x672   : > { %2581 = vadd.xlane.f32.xlu0 %v8923_v60  ;;  %3146 = vadd.xlane.f32.xlu1 %v9017_v12  ;;  %v10328_v60 = vld [vmem:[#allocation29_spill] sm:$0xff]  ;;  %v10332_v12 = vld [vmem:[#allocation31_spill] sm:$0xff] }
 0x676   : > { %3148 = vadd.xlane.f32.xlu0 %v9021_v54  ;;  %2583 = vadd.xlane.f32.xlu1 %v8929_v7  ;;  %v10330_v7 = vld [vmem:[#allocation40_spill] sm:$0xff]  ;;  %v10333_v54 = vld [vmem:[#allocation41_spill] sm:$0xff] }
 0x67a   : > { %2585 = vadd.xlane.f32.xlu0 %v8931_v9  ;;  %3150 = vadd.xlane.f32.xlu1 %v9025_v4  ;;  %v10331_v9 = vld [vmem:[#allocation30_spill] sm:$0xff]  ;;  %v10337_v4 = vld [vmem:[#allocation43_spill] sm:$0xff] }
 0x67e   : > { %3152 = vadd.xlane.f32.xlu0 %v9033_v2  ;;  %2587 = vadd.xlane.f32.xlu1 %v8925_v35  ;;  %v10334_v35 = vld [vmem:[#allocation32_spill] sm:$0xff]  ;;  %v10338_v2 = vld [vmem:[#allocation34_spill] sm:$0xff] }
 0x682   : > { %2589 = vadd.xlane.f32.xlu0 %v8942_v34  ;;  %3154 = vadd.xlane.f32.xlu1 %v9038_v0  ;;  %v10335_v34 = vld [vmem:[#allocation42_spill] sm:$0xff]  ;;  %v10339_v0 = vld [vmem:[#allocation44_spill] sm:$0xff] }
 0x686   : > { %3156 = vadd.xlane.f32.xlu0 %v9042_v25  ;;  %2591 = vadd.xlane.f32.xlu1 %v8944_v43  ;;  %v10336_v43 = vld [vmem:[#allocation33_spill] sm:$0xff] }
 0x687   : > { %v10340_v25 = vld [vmem:[#allocation45_spill] sm:$0xff] }
 0x68a   : > { %2593 = vadd.xlane.f32.xlu0 %v10328_v60  ;;  %3158 = vadd.xlane.f32.xlu1 %v10329_v40 }
 0x68e   : > { %3160 = vadd.xlane.f32.xlu0 %v10330_v7  ;;  %2595 = vadd.xlane.f32.xlu1 %v10331_v9 }
 0x692   : > { %2597 = vadd.xlane.f32.xlu0 %v10332_v12  ;;  %3162 = vadd.xlane.f32.xlu1 %v10333_v54 }
 0x696   : > { %3707 = vadd.xlane.f32.xlu0 %v9206_v18  ;;  %2599 = vadd.xlane.f32.xlu1 %v10334_v35 }
 0x69a   : > { %3164 = vadd.xlane.f32.xlu0 %v10335_v34  ;;  %3709 = vadd.xlane.f32.xlu1 %v9208_v16 }
 0x69e   : > { %2601 = vadd.xlane.f32.xlu0 %v10336_v43  ;;  %3166 = vadd.xlane.f32.xlu1 %v10337_v4 }
 0x6a2   : > { %3711 = vadd.xlane.f32.xlu0 %v9212_v52  ;;  %2603 = vadd.xlane.f32.xlu1 %v10338_v2 }
 0x6a6   : > { %3168 = vadd.xlane.f32.xlu0 %v10339_v0  ;;  %3713 = vadd.xlane.f32.xlu1 %v9216_v53 }
 0x6aa   : > { %3170 = vadd.xlane.f32.xlu1 %v10340_v25 }
 0x6d7   : > { %v4191_v18 = vpop.xlane.xlu0 %4190 }
 0x6d8   : > { %v4222_v20 = vsub.f32 %v9310_v19, %v4191_v18 }
 0x6da   : > { %v4238_v45 = vmul.f32 1.442695, %v4222_v20 }
 0x6db   : > { %v4195_v59 = vpop.xlane.xlu0 %4194  ;;  %v4193_v16 = vpop.xlane.xlu1 %4192 }
 0x6dc   : > { %v4224_v60 = vsub.f32 %v9308_v1, %v4195_v59  ;;  %v4223_v40 = vsub.f32 %v9317_v57, %v4193_v16  ;;  %7879 = vpow2.f32 %v4238_v45 }
 0x6de   : > { %v4242_v7 = vmul.f32 1.442695, %v4224_v60  ;;  %v4240_v52 = vmul.f32 1.442695, %v4223_v40 }
 0x6df   : > { %v4197_v9 = vpop.xlane.xlu1 %4196  ;;  %v4199_v12 = vpop.xlane.xlu0 %4198 }
 0x6e0   : > { %7881 = vpow2.f32 %v4242_v7  ;;  %v4225_v53 = vsub.f32 %v9313_v13, %v4197_v9  ;;  %v4226_v54 = vsub.f32 %v9327_v55, %v4199_v12 }
 0x6e1   : > { %7883 = vpow2.f32 %v4240_v52 }
 0x6e2   : > { %v4244_v35 = vmul.f32 1.442695, %v4225_v53  ;;  %v4246_v43 = vmul.f32 1.442695, %v4226_v54 }
 0x6e3   : > { %v4203_v19 = vpop.xlane.xlu0 %4202  ;;  %v4201_v34 = vpop.xlane.xlu1 %4200 }
 0x6e4   : > { %7885 = vpow2.f32 %v4244_v35  ;;  %v4228_v1 = vsub.f32 %v9324_v49, %v4203_v19  ;;  %v4227_v57 = vsub.f32 %v9335_v48, %v4201_v34  ;;  %v7591_v35 = vld [vmem:[#allocation13 + $0xe0] ss:$16 sps:$4 sm:$0xff]  }
 0x6e5   : > { %7887 = vpow2.f32 %v4246_v43  ;;  %v7596_v43 = vld [vmem:[#allocation13 + $0xc4] ss:$16 sps:$4 sm:$0xff]  }
 0x6e6   : > { %v4248_v4 = vmul.f32 1.442695, %v4227_v57  ;;  %v4250_v2 = vmul.f32 1.442695, %v4228_v1 }
 0x6e7   : > { %v4205_v0 = vpop.xlane.xlu1 %4204  ;;  %v4207_v25 = vpop.xlane.xlu0 %4206 }
 0x6e8   : > { %v4229_v18 = vsub.f32 %v9331_v27, %v4205_v0  ;;  %v4230_v13 = vsub.f32 %v9345_v22, %v4207_v25  ;;  %7889 = vpow2.f32 %v4248_v4  ;;  %v7594_v4 = vld [vmem:[#allocation13 + $0xc0] ss:$16 sps:$4 sm:$0xff]  }
 0x6e9   : > { %7891 = vpow2.f32 %v4250_v2  ;;  %v7880_v59 = vpop.eup %7879 }
 0x6ea   : > { %v4252_v55 = vmul.f32 1.442695, %v4229_v18  ;;  %v4254_v16 = vmul.f32 1.442695, %v4230_v13  ;;  %v10341_v18 = vld [vmem:[#allocation35_spill] sm:$0xff] }
 0x6eb   : > { %v4211_v20 = vpop.xlane.xlu0 %4210  ;;  %v4209_v45 = vpop.xlane.xlu1 %4208 }
 0x6ec   : > { %7893 = vpow2.f32 %v4252_v55  ;;  %v4232_v49 = vsub.f32 %v9342_v23, %v4211_v20  ;;  %v4231_v48 = vsub.f32 %v9353_v8, %v4209_v45  ;;  %v7599_v45 = vld [vmem:[#allocation13 + $0xa4] ss:$16 sps:$4 sm:$0xff]  }
 0x6ed   : > { %v7882_v60 = vpop.eup %7881  ;;  %7895 = vpow2.f32 %v4254_v16  ;;  %v7597_v16 = vld [vmem:[#allocation13 + $0xa0] ss:$16 sps:$4 sm:$0xff]  }
 0x6ee   : > { %v7884_v40 = vpop.eup %7883  ;;  %v4256_v7 = vmul.f32 1.442695, %v4231_v48  ;;  %4274 = vadd.xlane.f32.xlu0 %v7882_v60  ;;  %v4258_v52 = vmul.f32 1.442695, %v4232_v49  ;;  %v10342_v48 = vld [vmem:[#allocation36_spill] sm:$0xff] }
 0x6ef   : > { %v4213_v27 = vpop.xlane.xlu1 %4212  ;;  %v4215_v9 = vpop.xlane.xlu0 %4214  ;;  %v4318_v22 = vpack.c.bf16 %v7884_v40, %v7880_v59 }
 0x6f0   : > { %v4233_v12 = vsub.f32 %v9349_v38, %v4213_v27  ;;  %v4234_v53 = vsub.f32 %v9363_v41, %v4215_v9  ;;  %7897 = vpow2.f32 %v4256_v7  ;;  %v7600_v27 = vld [vmem:[#allocation13 + $0x80] ss:$16 sps:$4 sm:$0xff]  }
 0x6f1   : > { %v7886_v54 = vpop.eup %7885  ;;  %7213 = vmatprep.mubr.bf16.mxu1 %v4318_v22  ;;  %7899 = vpow2.f32 %v4258_v52 }
 0x6f2   : > { %v4319_v23 = vpack.c.bf16 %v7886_v54, %v7882_v60  ;;  %v4260_v19 = vmul.f32 1.442695, %v4233_v12  ;;  %4270 = vadd.xlane.f32.xlu0 %v7880_v59  ;;  %4276 = vadd.xlane.f32.xlu1 %v7886_v54  ;;  %v4262_v1 = vmul.f32 1.442695, %v4234_v53  ;;  %v7888_v41 = vpop.eup %7887  ;;  %v7605_v54 = vld [vmem:[#allocation13 + $0x64] ss:$16 sps:$4 sm:$0xff]  }
 0x6f3   : > { %v4219_v8 = vpop.xlane.xlu0 %4218  ;;  %v4217_v34 = vpop.xlane.xlu1 %4216 }
 0x6f4   : > { %7901 = vpow2.f32 %v4260_v19  ;;  %v4236_v57 = vsub.f32 %v9360_v32, %v4219_v8  ;;  %v4235_v38 = vsub.f32 %v9371_v33, %v4217_v34  ;;  %7214 = vmatmul.mubr.bf16.vlgmr.msra.gmra.mxu1 %v4319_v23  ;;  %v7653_v23 = vld [vmem:[#allocation13 + $0x2e4] ss:$16 sps:$4 sm:$0xff]   ;;  %v7603_v8 = vld [vmem:[#allocation13 + $0x60] ss:$16 sps:$4 sm:$0xff]  }
 0x6f5   : > { %5286 = vmatpush1.bf16.msra.mxu1 %v7591_v35  ;;  %v9425_v2 = vpop.eup %7889  ;;  %7903 = vpow2.f32 %v4262_v1  ;;  %v7651_v34 = vld [vmem:[#allocation13 + $0x2e0] ss:$16 sps:$4 sm:$0xff]   ;;  %5398 = vmatprep.subr.bf16.mxu0 %v7653_v23 }
 0x6f6   : > { %v4266_v0 = vmul.f32 1.442695, %v4236_v57  ;;  %v4264_v25 = vmul.f32 1.442695, %v4235_v38  ;;  %2605 = vadd.xlane.f32.xlu0 %v10341_v18  ;;  %4272 = vadd.xlane.f32.xlu1 %v7884_v40  ;;  %v4320_v20 = vpack.c.bf16 %v9425_v2, %v7888_v41  ;;  %v7892_v32 = vpop.eup %7891  ;;  %v7608_v38 = vld [vmem:[#allocation13 + $0x44] ss:$16 sps:$4 sm:$0xff]  }
 0x6f7   : > { %5287 = vmatprep.subr.bf16.mxu1 %v7596_v43  ;;  %v3145_v13 = vpop.xlane.xlu0 %3144  ;;  %v4221_v55 = vpop.xlane.xlu1 %4220  ;;  %5399 = vmatpush1.bf16.msra.mxu0 %v7651_v34 }
 0x6f8   : > { %v4237_v33 = vsub.f32 %v9367_v31, %v4221_v55  ;;  %7905 = vpow2.f32 %v4264_v25  ;;  %7217 = vmatprep.mubr.bf16.mxu1 %v4320_v20  ;;  %v7602_v31 = vld [vmem:[#allocation13 + $0x84] ss:$16 sps:$4 sm:$0xff]   ;;  %v7606_v25 = vld [vmem:[#allocation13 + $0x40] ss:$16 sps:$4 sm:$0xff]  }
 0x6f9   : > { %v9430_v59 = vpop.eup %7893  ;;  %5288 = vmatpush1.bf16.msra.mxu1 %v7594_v4  ;;  %7907 = vpow2.f32 %v4266_v0  ;;  %v7659_v4 = vld [vmem:[#allocation13 + $0x2c4] ss:$16 sps:$4 sm:$0xff]  }
 0x6fa   : > { %v4268_v49 = vmul.f32 1.442695, %v4237_v33  ;;  %3715 = vadd.xlane.f32.xlu0 %v9222_v58  ;;  %2607 = vadd.xlane.f32.xlu1 %v10342_v48  ;;  %v4321_v60 = vpack.c.bf16 %v9430_v59, %v7892_v32  ;;  %7909 = vrcp.f32 %v3145_v13  ;;  %v9437_v52 = vpop.eup %7895  ;;  %v10343_v58 = vld [vmem:[#allocation46_spill] sm:$0xff]  ;;  %v7611_v33 = vld [vmem:[#allocation13 + $0x24] ss:$16 sps:$4 sm:$0xff]  }
 0x6fb   : > { %5289 = vmatprep.subr.bf16.mxu1 %v7599_v45  ;;  %v9435_v40 = vpop.xlane.xlu0 %2581  ;;  %v3147_v7 = vpop.xlane.xlu1 %3146  ;;  %5400 = vmatprep.subr.bf16.mxu0 %v7659_v4 }
 0x6fc   : > { %7911 = vpow2.f32 %v4268_v49  ;;  %7218 = vmatmul.mubr.bf16.gmra.mxu1 %v4321_v60  ;;  %v7665_v49 = vld [vmem:[#allocation13 + $0x2a4] ss:$16 sps:$4 sm:$0xff]  }
 0x6fd   : > { %5290 = vmatpush1.bf16.msra.mxu1 %v7597_v16  ;;  %v9439_v9 = vpop.eup %7897  ;;  %7913 = vrcp.f32 %v3147_v7  ;;  %v10345_v60 = vld [vmem:[#allocation37_spill] sm:$0xff] }
 0x6fe   : > { %3172 = vadd.xlane.f32.xlu0 %v10343_v58  ;;  %3717 = vadd.xlane.f32.xlu1 %v9225_v46  ;;  %v4322_v53 = vpack.c.bf16 %v9439_v9, %v9437_v52  ;;  %v9449_v35 = vpop.eup %7899  ;;  %v10344_v46 = vld [vmem:[#allocation47_spill] sm:$0xff] }
 0x6ff   : > { %5291 = vmatprep.subr.bf16.mxu1 %v7602_v31  ;;  %v9443_v22 = vpop.xlane.xlu0 %3148  ;;  %v9445_v12 = vpop.xlane.xlu1 %2583 }
 0x700   : > { %7221 = vmatprep.mubr.bf16.mxu1 %v4322_v53  ;;  %v7614_v53 = vld [vmem:[#allocation13 + $0x4] ss:$16 sps:$4 sm:$0xff]   ;;  %7915 = vrcp.f32 %v9445_v12  ;;  %v7627_v12 = vld [vmem:[#allocation13 + $0x160] ss:$16 sps:$4 sm:$0xff]  }
 0x701   : > { %v9451_v19 = vpop.eup %7901  ;;  %5292 = vmatpush1.bf16.msra.mxu1 %v7600_v27 }
 0x702   : > { %4278 = vadd.xlane.f32.xlu0 %v7888_v41  ;;  %3174 = vadd.xlane.f32.xlu1 %v10344_v46  ;;  %v4323_v43 = vpack.c.bf16 %v9451_v19, %v9449_v35  ;;  %v9460_v0 = vpop.eup %7903  ;;  %v7657_v41 = vld [vmem:[#allocation13 + $0x2c0] ss:$16 sps:$4 sm:$0xff]   ;;  %v7671_v46 = vld [vmem:[#allocation13 + $0x284] ss:$16 sps:$4 sm:$0xff]  }
 0x703   : > { %5293 = vmatprep.subr.bf16.mxu1 %v7605_v54  ;;  %v9456_v1 = vpop.xlane.xlu0 %2585  ;;  %v9458_v57 = vpop.xlane.xlu1 %3150  ;;  %5401 = vmatpush1.bf16.msra.mxu0 %v7657_v41  ;;  %v10346_v54 = vld [vmem:[#allocation65_spill] sm:$0xff] }
 0x704   : > { %7222 = vmatmul.mubr.bf16.gmra.mxu1 %v4323_v43  ;;  %5402 = vmatprep.subr.bf16.mxu0 %v7665_v49  ;;  %v7669_v43 = vld [vmem:[#allocation13 + $0x280] ss:$16 sps:$4 sm:$0xff]   ;;  %7917 = vrcp.f32 %v9458_v57  ;;  %v7632_v57 = vld [vmem:[#allocation13 + $0x144] ss:$16 sps:$4 sm:$0xff]  }
 0x705   : > { %5294 = vmatpush1.bf16.msra.mxu1 %v7603_v8  ;;  %v9462_v18 = vpop.eup %7905  ;;  %v10347_v8 = vld [vmem:[#allocation67_spill] sm:$0xff]  ;;  %7919 = vrcp.f32 %v9435_v40 }
 0x706   : > { %4282 = vadd.xlane.f32.xlu0 %v7892_v32  ;;  %4280 = vadd.xlane.f32.xlu1 %v9425_v2  ;;  %v9465_v13 = vpop.eup %7907  ;;  %v4324_v45 = vpack.c.bf16 %v9462_v18, %v9460_v0  ;;  %v7609_v2 = vld [vmem:[#allocation13 + $0x20] ss:$16 sps:$4 sm:$0xff]   ;;  %7921 = vrcp.f32 %v9443_v22  ;;  %v7707_v40 = vld [vmem:[#allocation13 + $0x3c4] ss:$16 sps:$4 sm:$0xff]  }
 0x707   : > { %5295 = vmatprep.subr.bf16.mxu1 %v7608_v38  ;;  %v9467_v55 = vpop.xlane.xlu0 %3152  ;;  %v9469_v20 = vpop.xlane.xlu1 %2587  ;;  %v7663_v32 = vld [vmem:[#allocation13 + $0x2a0] ss:$16 sps:$4 sm:$0xff]   ;;  %v10348_v38 = vld [vmem:[#allocation38_spill] sm:$0xff] }
 0x708   : > { %v7910_v16 = vpop.eup %7909  ;;  %7225 = vmatprep.mubr.bf16.mxu1 %v4324_v45  ;;  %5403 = vmatpush1.bf16.msra.mxu0 %v7663_v32  ;;  %v7617_v45 = vld [vmem:[#allocation13 + $0x1e4] ss:$16 sps:$4 sm:$0xff]   ;;  %v7675_v49 = vld [vmem:[#allocation13 + $0x260] ss:$16 sps:$4 sm:$0xff]  }
 0x709   : > { %v9473_v48 = vpop.eup %7911  ;;  %5296 = vmatpush1.bf16.msra.mxu1 %v7606_v25  ;;  %v3345_v23 = vmul.f32 %v7910_v16, %v10346_v54  ;;  %5404 = vmatprep.subr.bf16.mxu0 %v7671_v46  ;;  %v7615_v16 = vld [vmem:[#allocation13 + $0x1e0] ss:$16 sps:$4 sm:$0xff]   ;;  %v7620_v32 = vld [vmem:[#allocation13 + $0x1c4] ss:$16 sps:$4 sm:$0xff]  }
 0x70a   : > { %2609 = vadd.xlane.f32.xlu0 %v10345_v60  ;;  %4284 = vadd.xlane.f32.xlu1 %v9430_v59  ;;  %v4325_v7 = vpack.c.bf16 %v9473_v48, %v9465_v13  ;;  %v7914_v31 = vpop.eup %7913  ;;  %v7612_v59 = vld [vmem:[#allocation13] ss:$16 sps:$4 sm:$0xff]   ;;  %v7683_v60 = vld [vmem:[#allocation13 + $0x244] ss:$16 sps:$4 sm:$0xff]  }
 0x70b   : > { %5297 = vmatprep.subr.bf16.mxu1 %v7611_v33  ;;  %v9479_v27 = vpop.xlane.xlu0 %2589  ;;  %v9481_v58 = vpop.xlane.xlu1 %3154  ;;  %v3346_v34 = vmul.f32 %v7914_v31, %v10347_v8  ;;  %v7677_v33 = vld [vmem:[#allocation13 + $0x264] ss:$16 sps:$4 sm:$0xff]   ;;  %v7681_v31 = vld [vmem:[#allocation13 + $0x240] ss:$16 sps:$4 sm:$0xff]  }
 0x70c   : > { %7226 = vmatmul.mubr.bf16.gmra.mxu1 %v4325_v7  ;;  %5405 = vmatpush1.bf16.msra.mxu0 %v7669_v43  ;;  %v7618_v7 = vld [vmem:[#allocation13 + $0x1c0] ss:$16 sps:$4 sm:$0xff]   ;;  %v7689_v54 = vld [vmem:[#allocation13 + $0x224] ss:$16 sps:$4 sm:$0xff]  }
 0x70d   : > { %5298 = vmatpush1.bf16.msra.mxu1 %v7609_v2  ;;  %v9487_v4 = vpack.c.bf16 %v3346_v34, %v3345_v23  ;;  %5406 = vmatprep.subr.bf16.mxu0 %v7677_v33  ;;  %v7621_v23 = vld [vmem:[#allocation13 + $0x1a0] ss:$16 sps:$4 sm:$0xff]   ;;  %v7626_v34 = vld [vmem:[#allocation13 + $0x184] ss:$16 sps:$4 sm:$0xff]  }
 0x70e   : > { %3719 = vadd.xlane.f32.xlu0 %v9229_v17  ;;  %2611 = vadd.xlane.f32.xlu1 %v10348_v38  ;;  %v7687_v8 = vld [vmem:[#allocation13 + $0x220] ss:$16 sps:$4 sm:$0xff]   ;;  %v7695_v46 = vld [vmem:[#allocation13 + $0x204] ss:$16 sps:$4 sm:$0xff]  }
 0x70f   : > { %5299 = vmatprep.subr.bf16.mxu1 %v7614_v53  ;;  %v9489_v25 = vpop.xlane.xlu0 %3156  ;;  %v9491_v41 = vpop.xlane.xlu1 %2591  ;;  %5317 = vmatprep.mubr.bf16.mxu1 %v9487_v4  ;;  %v7623_v53 = vld [vmem:[#allocation13 + $0x1a4] ss:$16 sps:$4 sm:$0xff]   ;;  %v7693_v43 = vld [vmem:[#allocation13 + $0x200] ss:$16 sps:$4 sm:$0xff]  }
 0x710   : > { %5407 = vmatpush1.bf16.msra.mxu0 %v7675_v49  ;;  %v7629_v38 = vld [vmem:[#allocation13 + $0x164] ss:$16 sps:$4 sm:$0xff]   ;;  %v7699_v33 = vld [vmem:[#allocation13 + $0x3e0] ss:$16 sps:$4 sm:$0xff]  }
 0x711   : > { %5300 = vmatpush1.bf16.msra.mxu1 %v7612_v59  ;;  %5408 = vmatprep.subr.bf16.mxu0 %v7683_v60  ;;  %v7624_v59 = vld [vmem:[#allocation13 + $0x180] ss:$16 sps:$4 sm:$0xff]   ;;  %v7635_v49 = vld [vmem:[#allocation13 + $0x124] ss:$16 sps:$4 sm:$0xff]  }
 0x712   : > { %4286 = vadd.xlane.f32.xlu0 %v9437_v52  ;;  %3721 = vadd.xlane.f32.xlu1 %v9232_v10  ;;  %v7705_v22 = vld [vmem:[#allocation13 + $0x3c0] ss:$16 sps:$4 sm:$0xff]   ;;  %v7638_v60 = vld [vmem:[#allocation13 + $0x104] ss:$16 sps:$4 sm:$0xff]  }
 0x713   : > { %5301 = vmatprep.subr.bf16.mxu1 %v7617_v45  ;;  %v9496_v17 = vpop.xlane.xlu0 %2593  ;;  %v9498_v2 = vpop.xlane.xlu1 %3158  ;;  %v7701_v45 = vld [vmem:[#allocation13 + $0x3e4] ss:$16 sps:$4 sm:$0xff]  }
 0x714   : > { %5409 = vmatpush1.bf16.msra.mxu0 %v7681_v31  ;;  %v7719_v31 = vld [vmem:[#allocation13 + $0x384] ss:$16 sps:$4 sm:$0xff]  }
 0x715   : > { %5302 = vmatpush2.bf16.msra.mxu1 %v7615_v16  ;;  %5410 = vmatprep.subr.bf16.mxu0 %v7689_v54  ;;  %v7630_v16 = vld [vmem:[#allocation13 + $0x140] ss:$16 sps:$4 sm:$0xff]  }
 0x716   : > { %3723 = vadd.xlane.f32.xlu0 %v9236_v30  ;;  %4288 = vadd.xlane.f32.xlu1 %v9439_v9 }
 0x717   : > { %5303 = vmatprep.subr.bf16.mxu1 %v7620_v32  ;;  %v9502_v52 = vpop.xlane.xlu0 %3160  ;;  %v9504_v10 = vpop.xlane.xlu1 %2595  ;;  %v7713_v32 = vld [vmem:[#allocation13 + $0x3a4] ss:$16 sps:$4 sm:$0xff]  }
 0x718   : > { %5411 = vmatpush1.bf16.msra.mxu0 %v7687_v8  ;;  %v7641_v8 = vld [vmem:[#allocation13 + $0xec] ss:$16 sps:$4 sm:$0xff]  }
 0x719   : > { %5304 = vmatpush2.bf16.msra.mxu1 %v7618_v7  ;;  %5412 = vmatprep.subr.bf16.mxu0 %v7695_v46 }
 0x71a   : > { %4290 = vadd.xlane.f32.xlu0 %v9449_v35  ;;  %3725 = vadd.xlane.f32.xlu1 %v9238_v50 }
 0x71b   : > { %5305 = vmatprep.subr.bf16.mxu1 %v7623_v53  ;;  %v9508_v30 = vpop.xlane.xlu0 %2597  ;;  %v9510_v9 = vpop.xlane.xlu1 %3162  ;;  %v7636_v53 = vld [vmem:[#allocation13 + $0x100] ss:$16 sps:$4 sm:$0xff]  }
 0x71c   : > { %5413 = vmatpush1.bf16.msra.mxu0 %v7693_v43 }
 0x71d   : > { %5306 = vmatpush2.bf16.msra.mxu1 %v7621_v23  ;;  %5414 = vmatprep.subr.bf16.mxu0 %v7701_v45 }
 0x71e   : > { %3727 = vadd.xlane.f32.xlu0 %v9242_v14  ;;  %4292 = vadd.xlane.f32.xlu1 %v9451_v19 }
 0x71f   : > { %5307 = vmatprep.subr.bf16.mxu1 %v7626_v34  ;;  %v3708_v50 = vpop.xlane.xlu0 %3707  ;;  %v9516_v35 = vpop.xlane.xlu1 %2599  ;;  %v10350_v34 = vld [vmem:[#allocation66_spill] sm:$0xff] }
 0x720   : > { %7923 = vrcp.f32 %v3708_v50  ;;  %5415 = vmatpush2.bf16.msra.mxu0 %v7699_v33  ;;  %v7725_v50 = vld [vmem:[#allocation13 + $0x364] ss:$16 sps:$4 sm:$0xff]   ;;  %v7644_v33 = vld [vmem:[#allocation13 + $0xcc] ss:$16 sps:$4 sm:$0xff]  }
 0x721   : > { %5308 = vmatpush2.bf16.msra.mxu1 %v7624_v59  ;;  %5416 = vmatprep.subr.bf16.mxu0 %v7707_v40  ;;  %v10351_v59 = vld [vmem:[#allocation49_spill] sm:$0xff] }
 0x722   : > { %4294 = vadd.xlane.f32.xlu0 %v9460_v0  ;;  %3729 = vadd.xlane.f32.xlu1 %v9244_v15 }
 0x723   : > { %5309 = vmatprep.subr.bf16.mxu1 %v7629_v38  ;;  %v9522_v14 = vpop.xlane.xlu0 %3164  ;;  %v3710_v19 = vpop.xlane.xlu1 %3709  ;;  %v7639_v38 = vld [vmem:[#allocation13 + $0xe8] ss:$16 sps:$4 sm:$0xff]  }
 0x724   : > { %7925 = vrcp.f32 %v3710_v19  ;;  %5417 = vmatpush2.bf16.msra.mxu0 %v7705_v22  ;;  %v7731_v22 = vld [vmem:[#allocation13 + $0x344] ss:$16 sps:$4 sm:$0xff]  }
 0x725   : > { %5310 = vmatpush2.bf16.msra.mxu1 %v7627_v12  ;;  %7927 = vrcp.f32 %v9469_v20  ;;  %v7633_v20 = vld [vmem:[#allocation13 + $0x120] ss:$16 sps:$4 sm:$0xff]   ;;  %5418 = vmatprep.subr.bf16.mxu0 %v7713_v32 }
 0x726   : > { %3731 = vadd.xlane.f32.xlu0 %v9248_v11  ;;  %4296 = vadd.xlane.f32.xlu1 %v9462_v18  ;;  %7929 = vrcp.f32 %v9481_v58  ;;  %v7711_v11 = vld [vmem:[#allocation13 + $0x3a0] ss:$16 sps:$4 sm:$0xff]   ;;  %v7916_v18 = vpop.eup %7915 }
 0x727   : > { %5311 = vmatprep.subr.bf16.mxu1 %v7632_v57  ;;  %v9528_v15 = vpop.xlane.xlu0 %2601  ;;  %v9530_v0 = vpop.xlane.xlu1 %3166  ;;  %7931 = vrcp.f32 %v9456_v1 }
 0x728   : > { %7933 = vrcp.f32 %v9467_v55  ;;  %v7918_v7 = vpop.eup %7917  ;;  %5419 = vmatpush2.bf16.msra.mxu0 %v7711_v11 }
 0x729   : > { %5312 = vmatpush2.bf16.msra.mxu1 %v7630_v16  ;;  %7935 = vrcp.f32 %v9479_v27  ;;  %v7920_v55 = vpop.eup %7919  ;;  %v3348_v46 = vmul.f32 %v7918_v7, %v10350_v34  ;;  %5420 = vmatprep.subr.bf16.mxu0 %v7719_v31 }
 0x72a   : > { %4298 = vadd.xlane.f32.xlu0 %v9465_v13  ;;  %3733 = vadd.xlane.f32.xlu1 %v9250_v47  ;;  %7937 = vrcp.f32 %v9491_v41  ;;  %v7717_v13 = vld [vmem:[#allocation13 + $0x380] ss:$16 sps:$4 sm:$0xff]   ;;  %v7922_v54 = vpop.eup %7921  ;;  %v2782_v43 = vmul.f32 %v7920_v55, %v10351_v59  ;;  %v7737_v55 = vld [vmem:[#allocation13 + $0x324] ss:$16 sps:$4 sm:$0xff]  }
 0x72b   : > { %5313 = vmatprep.subr.bf16.mxu1 %v7635_v49  ;;  %v9536_v58 = vpop.xlane.xlu1 %2603  ;;  %v3712_v1 = vpop.xlane.xlu0 %3711  ;;  %v10349_v47 = vld [vmem:[#allocation51_spill] sm:$0xff]  ;;  %7939 = vrcp.f32 %v9498_v2  ;;  %v10352_v2 = vld [vmem:[#allocation64_spill] sm:$0xff] }
 0x72c   : > { %v2783_v23 = vmul.f32 %v7916_v18, %v10349_v47  ;;  %7941 = vrcp.f32 %v3712_v1  ;;  %5421 = vmatpush2.bf16.msra.mxu0 %v7717_v13  ;;  %v7647_v18 = vld [vmem:[#allocation13 + $0xac] ss:$16 sps:$4 sm:$0xff]   ;;  %v10356_v13 = vld [vmem:[#allocation69_spill] sm:$0xff] }
 0x72d   : > { %5314 = vmatpush2.bf16.msra.mxu1 %v7633_v20  ;;  %v7924_v41 = vpop.eup %7923  ;;  %7943 = vrcp.f32 %v9489_v25  ;;  %5422 = vmatprep.subr.bf16.mxu0 %v7725_v50  ;;  %v7729_v20 = vld [vmem:[#allocation13 + $0x340] ss:$16 sps:$4 sm:$0xff]   ;;  %v10355_v1 = vld [vmem:[#allocation48_spill] sm:$0xff] }
 0x72e   : > { %3735 = vadd.xlane.f32.xlu0 %v9254_v37  ;;  %4300 = vadd.xlane.f32.xlu1 %v9473_v48  ;;  %v3347_v37 = vmul.f32 %v7922_v54, %v10352_v2  ;;  %v7723_v48 = vld [vmem:[#allocation13 + $0x360] ss:$16 sps:$4 sm:$0xff]   ;;  %v9548_v12 = vpack.c.bf16 %v2783_v23, %v2782_v43  ;;  %v3908_v57 = vmul.f32 %v7924_v41, %v9278_v63  ;;  %v10353_v63 = vld [vmem:[#allocation50_spill] sm:$0xff] }
 0x72f   : > { %5315 = vmatprep.subr.bf16.mxu1 %v7638_v60  ;;  %v3714_v27 = vpop.xlane.xlu1 %3713  ;;  %v10354_v60 = vld [vmem:[#allocation71_spill] sm:$0xff]  ;;  %v7645_v54 = vld [vmem:[#allocation13 + $0xa8] ss:$16 sps:$4 sm:$0xff]  }
 0x730   : > { %7945 = vrcp.f32 %v3714_v27  ;;  %v9553_v40 = vpack.c.bf16 %v3348_v46, %v3347_v37  ;;  %5423 = vmatpush2.bf16.msra.mxu0 %v7723_v48  ;;  %v7735_v47 = vld [vmem:[#allocation13 + $0x320] ss:$16 sps:$4 sm:$0xff]   ;;  %v7743_v46 = vld [vmem:[#allocation13 + $0x304] ss:$16 sps:$4 sm:$0xff]   ;;  %v7648_v41 = vld [vmem:[#allocation13 + $0x88] ss:$16 sps:$4 sm:$0xff]  }
 0x731   : > { %5316 = vmatpush2.bf16.msra.mxu1 %v7636_v53  ;;  %v7926_v45 = vpop.eup %7925  ;;  %7947 = vrcp.f32 %v9504_v10  ;;  %5424 = vmatprep.subr.bf16.mxu0 %v7731_v22  ;;  %v7741_v59 = vld [vmem:[#allocation13 + $0x300] ss:$16 sps:$4 sm:$0xff]   ;;  %v7656_v37 = vld [vmem:[#allocation13 + $0x6c] ss:$16 sps:$4 sm:$0xff]   ;;  %v7654_v22 = vld [vmem:[#allocation13 + $0x68] ss:$16 sps:$4 sm:$0xff]  }
 0x732   : > { %3737 = vadd.xlane.f32.xlu1 %v9256_v26  ;;  %5511 = vmatprep.subr.bf16.mxu1 %v7641_v8  ;;  %v7928_v19 = vpop.eup %7927  ;;  %v3909_v25 = vmul.f32 %v7926_v45, %v9282_v28  ;;  %v7642_v26 = vld [vmem:[#allocation13 + $0xc8] ss:$16 sps:$4 sm:$0xff]   ;;  %7949 = vrcp.f32 %v9510_v9  ;;  %v7650_v9 = vld [vmem:[#allocation13 + $0x8c] ss:$16 sps:$4 sm:$0xff]   ;;  %v10357_v50 = vld [vmem:[#allocation55_spill] sm:$0xff] }
 0x733   : > { %v7930_v16 = vpop.eup %7929  ;;  %v2785_v28 = vmul.f32 %v7928_v19, %v10353_v63  ;;  %7951 = vrcp.f32 %v9496_v17  ;;  %v9577_v45 = vld [vmem:[#allocation13 + $0x2ec] ss:$16 sps:$4 sm:$0xff]  }
 0x734   : > { %5318 = vmatmul.mubr.bf16.vlgmr.msra.gmra.mxu1 %v9548_v12  ;;  %v7932_v49 = vpop.eup %7931  ;;  %v9556_v32 = vpack.c.bf16 %v3909_v25, %v3908_v57  ;;  %v3350_v7 = vmul.f32 %v7930_v16, %v10354_v60  ;;  %5425 = vmatpush2.bf16.msra.mxu0 %v7729_v20  ;;  %7953 = vrcp.f32 %v9502_v52  ;;  %v10359_v57 = vld [vmem:[#allocation53_spill] sm:$0xff]  ;;  %v3171_v20 = vpop.xlane.xlu1 %3170 }
 0x735   : > { %5327 = vmatprep.mubr.bf16.mxu1 %v9553_v40  ;;  %5512 = vmatpush1.bf16.msra.mxu1 %v7639_v38  ;;  %v7934_v11 = vpop.eup %7933  ;;  %v2784_v31 = vmul.f32 %v7932_v49, %v10355_v1  ;;  %7955 = vrcp.f32 %v9516_v35  ;;  %v10358_v38 = vld [vmem:[#allocation70_spill] sm:$0xff]  ;;  %v10360_v35 = vld [vmem:[#allocation68_spill] sm:$0xff]  ;;  %v10362_v1 = vld [vmem:[#allocation75_spill] sm:$0xff] }
 0x736   : > { %5513 = vmatprep.subr.bf16.mxu1 %v7644_v33  ;;  %v7936_v53 = vpop.eup %7935  ;;  %v3349_v10 = vmul.f32 %v7934_v11, %v10356_v13  ;;  %5426 = vmatprep.subr.bf16.mxu0 %v7737_v55  ;;  %7957 = vrcp.f32 %v9530_v0  ;;  %v7660_v11 = vld [vmem:[#allocation13 + $0x48] ss:$16 sps:$4 sm:$0xff]   ;;  %v10364_v13 = vld [vmem:[#allocation73_spill] sm:$0xff] }
 0x737   : > { %v7938_v23 = vpop.eup %7937  ;;  %v9567_v8 = vpack.c.bf16 %v2785_v28, %v2784_v31  ;;  %7959 = vrcp.f32 %v9508_v30  ;;  %v2786_v25 = vmul.f32 %v7936_v53, %v10359_v57  ;;  %v3169_v28 = vpop.xlane.xlu0 %3168  ;;  %v10363_v55 = vld [vmem:[#allocation52_spill] sm:$0xff] }
 0x738   : > { %v7940_v27 = vpop.eup %7939  ;;  %v9569_v17 = vpack.c.bf16 %v3350_v7, %v3349_v10  ;;  %5427 = vmatpush2.bf16.msra.mxu0 %v7735_v47  ;;  %v2787_v2 = vmul.f32 %v7938_v23, %v10357_v50  ;;  %7961 = vrcp.f32 %v9522_v14  ;;  %v7668_v7 = vld [vmem:[#allocation13 + $0x2c] ss:$16 sps:$4 sm:$0xff]  }
 0x739   : > { %5514 = vmatpush1.bf16.msra.mxu1 %v7642_v26  ;;  %v7942_v34 = vpop.eup %7941  ;;  %5428 = vmatprep.subr.bf16.mxu0 %v7743_v46  ;;  %v3352_v48 = vmul.f32 %v7940_v27, %v10358_v38  ;;  %7963 = vrcp.f32 %v9536_v58  ;;  %v7674_v58 = vld [vmem:[#allocation13 + $0xc] ss:$16 sps:$4 sm:$0xff]  }
 0x73a   : > { %5515 = vmatprep.subr.bf16.mxu1 %v7647_v18  ;;  %v7944_v52 = vpop.eup %7943  ;;  %v3910_v33 = vmul.f32 %v7942_v34, %v9276_v24  ;;  %v9588_v49 = vpack.c.bf16 %v2787_v2, %v2786_v25  ;;  %v7662_v24 = vld [vmem:[#allocation13 + $0x4c] ss:$16 sps:$4 sm:$0xff]   ;;  %7965 = vrcp.f32 %v3171_v20  ;;  %v10367_v2 = vld [vmem:[#allocation57_spill] sm:$0xff] }
 0x73b   : > { %v3351_v16 = vmul.f32 %v7944_v52, %v10360_v35  ;;  %v10361_v18 = vld [vmem:[#allocation54_spill] sm:$0xff]  ;;  %7967 = vrcp.f32 %v9528_v15  ;;  %v10365_v52 = vld [vmem:[#allocation59_spill] sm:$0xff]  ;;  %v10368_v38 = vld [vmem:[#allocation72_spill] sm:$0xff] }
 0x73c   : > { %5328 = vmatmul.mubr.bf16.gmra.mxu1 %v9567_v8  ;;  %5429 = vmatpush2.bf16.msra.mxu0 %v7741_v59  ;;  %7969 = vrcp.f32 %v3169_v28  ;;  %v7672_v15 = vld [vmem:[#allocation13 + $0x8] ss:$16 sps:$4 sm:$0xff]   ;;  %v7680_v59 = vld [vmem:[#allocation13 + $0x1ec] ss:$16 sps:$4 sm:$0xff]  }
 0x73d   : > { %5337 = vmatprep.mubr.bf16.mxu1 %v9569_v17  ;;  %5516 = vmatpush1.bf16.msra.mxu1 %v7645_v54  ;;  %v7946_v43 = vpop.eup %7945  ;;  %v9590_v26 = vpack.c.bf16 %v3352_v48, %v3351_v16  ;;  %v7666_v54 = vld [vmem:[#allocation13 + $0x28] ss:$16 sps:$4 sm:$0xff]   ;;  %v7686_v57 = vld [vmem:[#allocation13 + $0x1cc] ss:$16 sps:$4 sm:$0xff]  }
 0x73e   : > { %5517 = vmatprep.subr.bf16.mxu1 %v7650_v9  ;;  %v3911_v19 = vmul.f32 %v7946_v43, %v9280_v3  ;;  %5624 = vmatprep.subr.bf16.mxu0 %v9577_v45  ;;  %v7948_v3 = vpop.eup %7947  ;;  %v10366_v43 = vld [vmem:[#allocation74_spill] sm:$0xff]  ;;  %v10371_v28 = vld [vmem:[#allocation56_spill] sm:$0xff] }
 0x73f   : > { %v7950_v30 = vpop.eup %7949  ;;  %v2789_v60 = vmul.f32 %v7948_v3, %v10361_v18 }
 0x740   : > { %v9586_v0 = vpack.c.bf16 %v3911_v19, %v3910_v33  ;;  %v7952_v14 = vpop.eup %7951  ;;  %v3354_v31 = vmul.f32 %v7950_v30, %v10362_v1  ;;  %v7678_v33 = vld [vmem:[#allocation13 + $0x1e8] ss:$16 sps:$4 sm:$0xff]  }
 0x741   : > { %5518 = vmatpush1.bf16.msra.mxu1 %v7648_v41  ;;  %v7954_v63 = vpop.eup %7953  ;;  %v2788_v53 = vmul.f32 %v7952_v14, %v10363_v55  ;;  %v10369_v30 = vld [vmem:[#allocation58_spill] sm:$0xff] }
 0x742   : > { %5519 = vmatprep.subr.bf16.mxu1 %v7656_v37  ;;  %v3353_v10 = vmul.f32 %v7954_v63, %v10364_v13  ;;  %v7956_v23 = vpop.eup %7955  ;;  %v7692_v14 = vld [vmem:[#allocation13 + $0x1ac] ss:$16 sps:$4 sm:$0xff]   ;;  %v7690_v1 = vld [vmem:[#allocation13 + $0x1a8] ss:$16 sps:$4 sm:$0xff]  }
 0x743   : > { %v9600_v47 = vpack.c.bf16 %v2789_v60, %v2788_v53  ;;  %v7958_v27 = vpop.eup %7957  ;;  %v2791_v41 = vmul.f32 %v7956_v23, %v10365_v52  ;;  %v10372_v60 = vld [vmem:[#allocation77_spill] sm:$0xff]  ;;  %v7698_v55 = vld [vmem:[#allocation13 + $0x18c] ss:$16 sps:$4 sm:$0xff]   ;;  %v7696_v13 = vld [vmem:[#allocation13 + $0x188] ss:$16 sps:$4 sm:$0xff]  }
 0x744   : > { %5338 = vmatmul.mubr.bf16.gmra.mxu1 %v9588_v49  ;;  %v9602_v9 = vpack.c.bf16 %v3354_v31, %v3353_v10  ;;  %v7960_v34 = vpop.eup %7959  ;;  %v3356_v50 = vmul.f32 %v7958_v27, %v10366_v43  ;;  %v7704_v10 = vld [vmem:[#allocation13 + $0x16c] ss:$16 sps:$4 sm:$0xff]   ;;  %v7708_v23 = vld [vmem:[#allocation13 + $0x148] ss:$16 sps:$4 sm:$0xff]  }
 0x745   : > { %5347 = vmatprep.mubr.bf16.mxu1 %v9590_v26  ;;  %5520 = vmatpush1.bf16.msra.mxu1 %v7654_v22  ;;  %v7962_v46 = vpop.eup %7961  ;;  %v2790_v37 = vmul.f32 %v7960_v34, %v10367_v2  ;;  %v7716_v27 = vld [vmem:[#allocation13 + $0x12c] ss:$16 sps:$4 sm:$0xff]   ;;  %v7714_v34 = vld [vmem:[#allocation13 + $0x128] ss:$16 sps:$4 sm:$0xff]  }
 0x746   : > { %5521 = vmatprep.subr.bf16.mxu1 %v7662_v24  ;;  %v3355_v48 = vmul.f32 %v7962_v46, %v10368_v38  ;;  %v7964_v25 = vpop.eup %7963  ;;  %v7684_v24 = vld [vmem:[#allocation13 + $0x1c8] ss:$16 sps:$4 sm:$0xff]  }
 0x747   : > { %v9610_v19 = vpack.c.bf16 %v2791_v41, %v2790_v37  ;;  %v7966_v16 = vpop.eup %7965  ;;  %v2793_v20 = vmul.f32 %v7964_v25, %v10369_v30  ;;  %v7720_v46 = vld [vmem:[#allocation13 + $0x108] ss:$16 sps:$4 sm:$0xff]  }
 0x748   : > { %v9612_v35 = vpack.c.bf16 %v3356_v50, %v3355_v48  ;;  %v7968_v22 = vpop.eup %7967 }
 0x749   : > { %5522 = vmatpush1.bf16.msra.mxu1 %v7660_v11  ;;  %v7970_v3 = vpop.eup %7969  ;;  %v10370_v11 = vld [vmem:[#allocation79_spill] sm:$0xff]  ;;  %v2792_v18 = vmul.f32 %v7968_v22, %v10371_v28 }
 0x74a   : > { %5523 = vmatprep.subr.bf16.mxu1 %v7668_v7  ;;  %v3358_v63 = vmul.f32 %v7966_v16, %v10370_v11  ;;  %v3357_v7 = vmul.f32 %v7970_v3, %v10372_v60  ;;  %v10373_v3 = vld [vmem:[#allocation61_spill] sm:$0xff] }
 0x74b   : > { %v9620_v31 = vpack.c.bf16 %v2793_v20, %v2792_v18  ;;  %v10374_v20 = vld [vmem:[#allocation63_spill] sm:$0xff] }
 0x74c   : > { %5348 = vmatmul.mubr.bf16.gmra.mxu1 %v9600_v47  ;;  %v9622_v53 = vpack.c.bf16 %v3358_v63, %v3357_v7  ;;  %v10375_v7 = vld [vmem:[#allocation76_spill] sm:$0xff] }
 0x74d   : > { %5357 = vmatprep.mubr.bf16.mxu1 %v9602_v9  ;;  %5524 = vmatpush1.bf16.msra.mxu1 %v7666_v54  ;;  %v7702_v54 = vld [vmem:[#allocation13 + $0x168] ss:$16 sps:$4 sm:$0xff]  }
 0x74e   : > { %5525 = vmatprep.subr.bf16.mxu1 %v7674_v58  ;;  %v7710_v58 = vld [vmem:[#allocation13 + $0x14c] ss:$16 sps:$4 sm:$0xff]  }
 0x751   : > { %5526 = vmatpush1.bf16.msra.mxu1 %v7672_v15  ;;  %v7722_v15 = vld [vmem:[#allocation13 + $0x10c] ss:$16 sps:$4 sm:$0xff]  }
 0x752   : > { %5527 = vmatprep.subr.bf16.mxu1 %v7680_v59 }
 0x754   : > { %5358 = vmatmul.mubr.bf16.gmra.mxu1 %v9610_v19 }
 0x755   : > { %5367 = vmatprep.mubr.bf16.mxu1 %v9612_v35  ;;  %5528 = vmatpush2.bf16.msra.mxu1 %v7678_v33 }
 0x756   : > { %5529 = vmatprep.subr.bf16.mxu1 %v7686_v57 }
 0x759   : > { %5530 = vmatpush2.bf16.msra.mxu1 %v7684_v24 }
 0x75a   : > { %5531 = vmatprep.subr.bf16.mxu1 %v7692_v14 }
 0x75c   : > { %5368 = vmatmul.mubr.bf16.gmra.mxu1 %v9620_v31 }
 0x75d   : > { %5377 = vmatprep.mubr.bf16.mxu1 %v9622_v53  ;;  %5532 = vmatpush2.bf16.msra.mxu1 %v7690_v1 }
 0x75e   : > { %5533 = vmatprep.subr.bf16.mxu1 %v7698_v55  ;;  %v10376_v55 = vld [vmem:[#allocation78_spill] sm:$0xff] }
 0x761   : > { %5534 = vmatpush2.bf16.msra.mxu1 %v7696_v13 }
 0x762   : > { %5535 = vmatprep.subr.bf16.mxu1 %v7704_v10 }
 0x765   : > { %5536 = vmatpush2.bf16.msra.mxu1 %v7702_v54 }
 0x766   : > { %5537 = vmatprep.subr.bf16.mxu1 %v7710_v58 }
 0x769   : > { %5538 = vmatpush2.bf16.msra.mxu1 %v7708_v23  ;;  %v10377_v23 = vld [vmem:[#allocation60_spill] sm:$0xff] }
 0x76a   : > { %5539 = vmatprep.subr.bf16.mxu1 %v7716_v27 }
 0x76d   : > { %5540 = vmatpush2.bf16.msra.mxu1 %v7714_v34  ;;  %v10378_v34 = vld [vmem:[#allocation62_spill] sm:$0xff] }
 0x76e   : > { %5541 = vmatprep.subr.bf16.mxu1 %v7722_v15 }
 0x771   : > { %5542 = vmatpush2.bf16.msra.mxu1 %v7720_v46 }
 0x772   : > { %7229 = vmatprep.subr.bf16.mxu1 %v9577_v45 }
 0x777   : > { %v4275_v52 = vpop.xlane.xlu0 %4274 }
 0x77b   : > { %v4271_v41 = vpop.xlane.xlu0 %4270  ;;  %v4277_v59 = vpop.xlane.xlu1 %4276 }
 0x77f   : > { %v2606_v43 = vpop.xlane.xlu0 %2605  ;;  %v4273_v50 = vpop.xlane.xlu1 %4272 }
 0x780   : > { %7971 = vrcp.f32 %v2606_v43 }
 0x783   : > { %v9627_v2 = vpop.xlane.xlu0 %3715  ;;  %v2608_v37 = vpop.xlane.xlu1 %2607 }
 0x784   : > { %7973 = vrcp.f32 %v2608_v37  ;;  %v7726_v37 = vld [vmem:[#allocation13 + $0x2e8] ss:$16 sps:$4 sm:$0xff]  }
 0x787   : > { %v3173_v38 = vpop.xlane.xlu0 %3172  ;;  %v3718_v48 = vpop.xlane.xlu1 %3717 }
 0x788   : > { %7975 = vrcp.f32 %v3173_v38 }
 0x78b   : > { %v4279_v33 = vpop.xlane.xlu0 %4278  ;;  %v3175_v57 = vpop.xlane.xlu1 %3174 }
 0x78c   : > { %7977 = vrcp.f32 %v3175_v57  ;;  %v7734_v57 = vld [vmem:[#allocation13 + $0x2cc] ss:$16 sps:$4 sm:$0xff]  }
 0x78d   : > { %v7972_v45 = vpop.eup %7971 }
 0x78e   : > { %v2794_v30 = vmul.f32 %v7972_v45, %v10373_v3 }
 0x78f   : > { %v9629_v25 = vpop.xlane.xlu0 %4282  ;;  %v4281_v16 = vpop.xlane.xlu1 %4280 }
 0x791   : > { %v7974_v22 = vpop.eup %7973 }
 0x792   : > { %v2795_v14 = vmul.f32 %v7974_v22, %v10374_v20  ;;  %v9649_v22 = vld [vmem:[#allocation13 + $0x2c8] ss:$16 sps:$4 sm:$0xff]  }
 0x793   : > { %v4285_v24 = vpop.xlane.xlu1 %4284  ;;  %v2610_v11 = vpop.xlane.xlu0 %2609 }
 0x794   : > { %v9633_v63 = vpack.c.bf16 %v2795_v14, %v2794_v30  ;;  %7979 = vrcp.f32 %v2610_v11  ;;  %v9652_v30 = vld [vmem:[#allocation13 + $0x2a8] ss:$16 sps:$4 sm:$0xff]  }
 0x795   : > { %v7976_v18 = vpop.eup %7975 }
 0x796   : > { %5378 = vmatmul.mubr.bf16.gmra.mxu1 %v9633_v63  ;;  %v3359_v1 = vmul.f32 %v7976_v18, %v10375_v7  ;;  %v9662_v7 = vld [vmem:[#allocation13 + $0x288] ss:$16 sps:$4 sm:$0xff]  }
 0x797   : > { %v2612_v28 = vpop.xlane.xlu1 %2611  ;;  %v3720_v38 = vpop.xlane.xlu0 %3719 }
 0x798   : > { %7981 = vrcp.f32 %v2612_v28 }
 0x799   : > { %v7978_v60 = vpop.eup %7977  ;;  %7983 = vrcp.f32 %v4271_v41 }
 0x79a   : > { %v3360_v13 = vmul.f32 %v7978_v60, %v10376_v55  ;;  %7985 = vrcp.f32 %v4277_v59  ;;  %v7740_v59 = vld [vmem:[#allocation13 + $0x2ac] ss:$16 sps:$4 sm:$0xff]  }
 0x79b   : > { %7987 = vrcp.f32 %v4273_v50  ;;  %v3722_v43 = vpop.xlane.xlu1 %3721 }
 0x79c   : > { %v9638_v10 = vpack.c.bf16 %v3360_v13, %v3359_v1  ;;  %7989 = vrcp.f32 %v4275_v52 }
 0x79d   : > { %7991 = vrcp.f32 %v4281_v16 }
 0x79e   : > { %5387 = vmatprep.mubr.bf16.mxu1 %v9638_v10  ;;  %7993 = vrcp.f32 %v4279_v33 }
 0x79f   : > { %v4289_v41 = vpop.xlane.xlu1 %4288  ;;  %7995 = vrcp.f32 %v3718_v48 }
 0x7a0   : > { %7997 = vrcp.f32 %v9627_v2 }
 0x7a1   : > { %v7980_v54 = vpop.eup %7979  ;;  %7999 = vrcp.f32 %v4285_v24  ;;  %v9675_v24 = vld [vmem:[#allocation13 + $0x268] ss:$16 sps:$4 sm:$0xff]  }
 0x7a2   : > { %v2796_v27 = vmul.f32 %v7980_v54, %v10377_v23  ;;  %8001 = vrcp.f32 %v9629_v25 }
 0x7a3   : > { %v3726_v16 = vpop.xlane.xlu1 %3725  ;;  %8003 = vrcp.f32 %v3722_v43 }
 0x7a4   : > { %8005 = vrcp.f32 %v3720_v38 }
 0x7a5   : > { %v7982_v58 = vpop.eup %7981  ;;  %8007 = vrcp.f32 %v4289_v41 }
 0x7a6   : > { %v2797_v15 = vmul.f32 %v7982_v58, %v10378_v34  ;;  %v7984_v52 = vpop.eup %7983  ;;  %v9678_v58 = vld [vmem:[#allocation13 + $0x24c] ss:$16 sps:$4 sm:$0xff]  }
 0x7a7   : > { %v4293_v54 = vpop.xlane.xlu1 %4292 }
 0x7a8   : > { %v9643_v46 = vpack.c.bf16 %v2797_v15, %v2796_v27 }
 0x7aa   : > { %5388 = vmatmul.mubr.bf16.gmra.mxu1 %v9643_v46 }
 0x7ab   : > { %5543 = vmatprep.mubr.bf16.mxu1 %v9487_v4  ;;  %v4287_v4 = vpop.xlane.xlu0 %4286  ;;  %v3730_v38 = vpop.xlane.xlu1 %3729 }
 0x7ac   : > { %8009 = vrcp.f32 %v4287_v4 }
 0x7ad   : > { %8011 = vrcp.f32 %v3726_v16 }
 0x7af   : > { %v3724_v48 = vpop.xlane.xlu0 %3723 }
 0x7b0   : > { %8013 = vrcp.f32 %v3724_v48 }
 0x7b1   : > { %8015 = vrcp.f32 %v4293_v54 }
 0x7b2   : > { %5544 = vmatmul.mubr.bf16.vlgmr.msra.gmra.mxu1 %v9548_v12  ;;  %v7986_v12 = vpop.eup %7985 }
 0x7b3   : > { %5553 = vmatprep.mubr.bf16.mxu1 %v9553_v40  ;;  %7245 = vmatpush1.bf16.msra.mxu1 %v7726_v37  ;;  %v9654_v40 = vld [vmem:[#allocation13 + $0x28c] ss:$16 sps:$4 sm:$0xff]   ;;  %v7988_v20 = vpop.eup %7987  ;;  %v4291_v27 = vpop.xlane.xlu0 %4290 }
 0x7b4   : > { %v7215_v45 = vpop.f32.mrf.mxu1  ;;  %7230 = vmatprep.subr.bf16.mxu1 %v7734_v57  ;;  %v7990_v33 = vpop.eup %7989  ;;  %8017 = vrcp.f32 %v4291_v27 }
 0x7b5   : > { %v4473_v1 = vmul.f32 %v7990_v33, %v7215_v45  ;;  %v7992_v23 = vpop.eup %7991  ;;  %v9725_v33 = vld [vmem:[#allocation13 + $0x3e8] ss:$16 sps:$4 sm:$0xff]   ;;  %8019 = vrcp.f32 %v3730_v38 }
 0x7b6   : > { %v4408_v3 = vpop.f32.mrf.mxu1  ;;  %v7994_v15 = vpop.eup %7993 }
 0x7b7   : > { %7246 = vmatpush1.bf16.msra.mxu1 %v9649_v22  ;;  %v4471_v11 = vmul.f32 %v7984_v52, %v4408_v3  ;;  %v9696_v52 = vld [vmem:[#allocation13 + $0x228] ss:$16 sps:$4 sm:$0xff]  }
 0x7b8   : > { %v7216_v50 = vpop.f32.mrf.mxu1  ;;  %7231 = vmatprep.subr.bf16.mxu1 %v7740_v59 }
 0x7b9   : > { %v4474_v28 = vmul.f32 %v7986_v12, %v7216_v50  ;;  %v3728_v50 = vpop.xlane.xlu0 %3727 }
 0x7ba   : > { %v4411_v14 = vpop.f32.mrf.mxu1  ;;  %5554 = vmatmul.mubr.bf16.gmra.mxu1 %v9567_v8  ;;  %v9667_v8 = vld [vmem:[#allocation13 + $0x26c] ss:$16 sps:$4 sm:$0xff]   ;;  %8021 = vrcp.f32 %v3728_v50 }
 0x7bb   : > { %v4472_v18 = vmul.f32 %v7988_v20, %v4411_v14  ;;  %5563 = vmatprep.mubr.bf16.mxu1 %v9569_v17  ;;  %7247 = vmatpush1.bf16.msra.mxu1 %v9652_v30  ;;  %v9670_v2 = vpack.c.bf16 %v4474_v28, %v4473_v1 }
 0x7bc   : > { %v9660_v60 = vpop.f32.mrf.mxu1  ;;  %7232 = vmatprep.subr.bf16.mxu1 %v9654_v40 }
 0x7bd   : > { %v9664_v55 = vpack.c.bf16 %v4472_v18, %v4471_v11  ;;  %v4297_v11 = vpop.xlane.xlu1 %4296  ;;  %v4295_v28 = vpop.xlane.xlu0 %4294 }
 0x7be   : > { %v4424_v13 = vpop.f32.mrf.mxu1  ;;  %8023 = vrcp.f32 %v4297_v11 }
 0x7bf   : > { %5430 = vmatprep.mubr.bf16.mxu0 %v9664_v55  ;;  %7248 = vmatpush1.bf16.msra.mxu1 %v9662_v7  ;;  %v4475_v43 = vmul.f32 %v7994_v15, %v4424_v13  ;;  %8025 = vrcp.f32 %v4295_v28 }
 0x7c0   : > { %v7220_v17 = vpop.f32.mrf.mxu1  ;;  %5431 = vmatmul.mubr.bf16.vlgmr.msra.gmra.mxu0 %v9556_v32  ;;  %7233 = vmatprep.subr.bf16.mxu1 %v9667_v8 }
 0x7c1   : > { %5440 = vmatprep.mubr.bf16.mxu0 %v9670_v2  ;;  %5625 = vmatpush1.bf16.msra.mxu0 %v7726_v37  ;;  %v9686_v37 = vld [vmem:[#allocation13 + $0x248] ss:$16 sps:$4 sm:$0xff]   ;;  %v3734_v13 = vpop.xlane.xlu1 %3733 }
 0x7c2   : > { %v4427_v25 = vpop.f32.mrf.mxu1  ;;  %5626 = vmatprep.subr.bf16.mxu0 %v7734_v57  ;;  %5564 = vmatmul.mubr.bf16.gmra.mxu1 %v9588_v49  ;;  %v9690_v57 = vld [vmem:[#allocation13 + $0x22c] ss:$16 sps:$4 sm:$0xff]   ;;  %v7996_v49 = vpop.eup %7995  ;;  %8027 = vrcp.f32 %v3734_v13 }
 0x7c3   : > { %v4476_v34 = vmul.f32 %v7992_v23, %v4427_v25  ;;  %5573 = vmatprep.mubr.bf16.mxu1 %v9590_v26  ;;  %7249 = vmatpush1.bf16.msra.mxu1 %v9675_v24  ;;  %v7998_v41 = vpop.eup %7997  ;;  %v3913_v4 = vmul.f32 %v7996_v49, %v9290_v56  ;;  %v3732_v25 = vpop.xlane.xlu0 %3731 }
 0x7c4   : > { %v9684_v45 = vpop.f32.mrf.mxu1  ;;  %7234 = vmatprep.subr.bf16.mxu1 %v9678_v58  ;;  %v3912_v16 = vmul.f32 %v7998_v41, %v9286_v21  ;;  %8029 = vrcp.f32 %v3732_v25 }
 0x7c5   : > { %5627 = vmatpush1.bf16.msra.mxu0 %v9649_v22  ;;  %v9692_v3 = vpack.c.bf16 %v4476_v34, %v4475_v43  ;;  %v9700_v22 = vld [vmem:[#allocation13 + $0x20c] ss:$16 sps:$4 sm:$0xff]  }
 0x7c6   : > { %5628 = vmatprep.subr.bf16.mxu0 %v7740_v59  ;;  %v4440_v26 = vpop.f32.mrf.mxu1  ;;  %v8000_v59 = vpop.eup %7999  ;;  %v9716_v56 = vpack.c.bf16 %v3913_v4, %v3912_v16  ;;  %v9757_v43 = vld [vmem:[#allocation13 + $0x38c] ss:$16 sps:$4 sm:$0xff]  }
 0x7c7   : > { %7250 = vmatpush1.bf16.msra.mxu1 %v9686_v37  ;;  %v4478_v12 = vmul.f32 %v8000_v59, %v7220_v17  ;;  %v8002_v20 = vpop.eup %8001  ;;  %v4299_v38 = vpop.xlane.xlu0 %4298 }
 0x7c8   : > { %5441 = vmatmul.mubr.bf16.gmra.mxu0 %v9586_v0  ;;  %7235 = vmatprep.subr.bf16.mxu1 %v9690_v57  ;;  %v9706_v14 = vpop.f32.mrf.mxu1 }
 0x7c9   : > { %5450 = vmatprep.mubr.bf16.mxu0 %v9692_v3  ;;  %5629 = vmatpush1.bf16.msra.mxu0 %v9652_v30  ;;  %v9710_v30 = vld [vmem:[#allocation13 + $0x208] ss:$16 sps:$4 sm:$0xff]  }
 0x7ca   : > { %5630 = vmatprep.subr.bf16.mxu0 %v9654_v40  ;;  %5574 = vmatmul.mubr.bf16.gmra.mxu1 %v9600_v47  ;;  %v4477_v40 = vmul.f32 %v8002_v20, %v9660_v60  ;;  %v9719_v47 = vld [vmem:[#allocation13 + $0x3ec] ss:$16 sps:$4 sm:$0xff]   ;;  %v4443_v21 = vpop.f32.mrf.mxu1 }
 0x7cb   : > { %5583 = vmatprep.mubr.bf16.mxu1 %v9602_v9  ;;  %7251 = vmatpush1.bf16.msra.mxu1 %v9696_v52  ;;  %v8004_v9 = vpop.eup %8003 }
 0x7cc   : > { %7236 = vmatprep.subr.bf16.mxu1 %v9700_v22  ;;  %v9721_v18 = vpack.c.bf16 %v4478_v12, %v4477_v40  ;;  %v8006_v60 = vpop.eup %8005  ;;  %v3915_v1 = vmul.f32 %v8004_v9, %v9288_v36  ;;  %v9735_v54 = vpop.f32.mrf.mxu1  ;;  %v7774_v9 = vld [vmem:[#allocation13 + $0x348] ss:$16 sps:$4 sm:$0xff]  }
 0x7cd   : > { %5631 = vmatpush1.bf16.msra.mxu0 %v9662_v7  ;;  %v9729_v7 = vld [vmem:[#allocation13 + $0x3cc] ss:$16 sps:$4 sm:$0xff]   ;;  %v8008_v48 = vpop.eup %8007  ;;  %v3914_v23 = vmul.f32 %v8006_v60, %v9284_v62  ;;  %v9753_v62 = vld [vmem:[#allocation13 + $0x3a8] ss:$16 sps:$4 sm:$0xff]  }
 0x7ce   : > { %5632 = vmatprep.subr.bf16.mxu0 %v9667_v8  ;;  %v4480_v8 = vmul.f32 %v8008_v48, %v4443_v21  ;;  %v8010_v17 = vpop.eup %8009  ;;  %v4456_v34 = vpop.f32.mrf.mxu1 }
 0x7cf   : > { %7252 = vmatpush1.bf16.msra.mxu1 %v9710_v30  ;;  %v9744_v36 = vpack.c.bf16 %v3915_v1, %v3914_v23 }
 0x7d0   : > { %5451 = vmatmul.mubr.bf16.gmra.mxu0 %v9716_v56  ;;  %7237 = vmatprep.subr.bf16.mxu1 %v9719_v47  ;;  %v7228_v50 = vpop.f32.mrf.mxu1 }
 0x7d1   : > { %5460 = vmatprep.mubr.bf16.mxu0 %v9721_v18  ;;  %5633 = vmatpush1.bf16.msra.mxu0 %v9675_v24  ;;  %v9739_v24 = vld [vmem:[#allocation13 + $0x3c8] ss:$16 sps:$4 sm:$0xff]  }
 0x7d2   : > { %5634 = vmatprep.subr.bf16.mxu0 %v9678_v58  ;;  %5584 = vmatmul.mubr.bf16.gmra.mxu1 %v9610_v19  ;;  %v4479_v58 = vmul.f32 %v8010_v17, %v4440_v26  ;;  %v9747_v19 = vld [vmem:[#allocation13 + $0x3ac] ss:$16 sps:$4 sm:$0xff]   ;;  %v4459_v20 = vpop.f32.mrf.mxu1  ;;  %v7780_v17 = vld [vmem:[#allocation13 + $0x308] ss:$16 sps:$4 sm:$0xff]  }
 0x7d3   : > { %5593 = vmatprep.mubr.bf16.mxu1 %v9612_v35  ;;  %7253 = vmatpush2.bf16.msra.mxu1 %v9725_v33  ;;  %v8012_v35 = vpop.eup %8011 }
 0x7d4   : > { %7238 = vmatprep.subr.bf16.mxu1 %v9729_v7  ;;  %v9749_v27 = vpack.c.bf16 %v4480_v8, %v4479_v58  ;;  %v8014_v15 = vpop.eup %8013  ;;  %v3917_v49 = vmul.f32 %v8012_v35, %v9298_v61 }
 0x7d5   : > { %5635 = vmatpush1.bf16.msra.mxu0 %v9686_v37  ;;  %v4301_v37 = vpop.xlane.xlu1 %4300  ;;  %v3916_v59 = vmul.f32 %v8014_v15, %v9294_v39  ;;  %v7771_v39 = vld [vmem:[#allocation13 + $0x368] ss:$16 sps:$4 sm:$0xff]  }
 0x7d6   : > { %5636 = vmatprep.subr.bf16.mxu0 %v9690_v57  ;;  %v8016_v57 = vpop.eup %8015  ;;  %8031 = vrcp.f32 %v4301_v37 }
 0x7d7   : > { %7254 = vmatpush2.bf16.msra.mxu1 %v9739_v24  ;;  %v4482_v26 = vmul.f32 %v8016_v57, %v9706_v14  ;;  %v8018_v41 = vpop.eup %8017  ;;  %v9770_v61 = vpack.c.bf16 %v3917_v49, %v3916_v59  ;;  %8033 = vrcp.f32 %v4299_v38  ;;  %v3736_v14 = vpop.xlane.xlu0 %3735 }
 0x7d8   : > { %5461 = vmatmul.mubr.bf16.gmra.mxu0 %v9744_v36  ;;  %7239 = vmatprep.subr.bf16.mxu1 %v9747_v19  ;;  %v8020_v4 = vpop.eup %8019 }
 0x7d9   : > { %5470 = vmatprep.mubr.bf16.mxu0 %v9749_v27  ;;  %5637 = vmatpush1.bf16.msra.mxu0 %v9696_v52  ;;  %v7768_v52 = vld [vmem:[#allocation13 + $0x388] ss:$16 sps:$4 sm:$0xff]   ;;  %v3919_v11 = vmul.f32 %v8020_v4, %v9296_v42  ;;  %v7779_v42 = vld [vmem:[#allocation13 + $0x32c] ss:$16 sps:$4 sm:$0xff]  }
 0x7da   : > { %5638 = vmatprep.subr.bf16.mxu0 %v9700_v22  ;;  %5594 = vmatmul.mubr.bf16.gmra.mxu1 %v9620_v31  ;;  %v4481_v22 = vmul.f32 %v8018_v41, %v9684_v45  ;;  %v7773_v31 = vld [vmem:[#allocation13 + $0x36c] ss:$16 sps:$4 sm:$0xff]   ;;  %v8022_v45 = vpop.eup %8021 }
 0x7db   : > { %5603 = vmatprep.mubr.bf16.mxu1 %v9622_v53  ;;  %7255 = vmatpush2.bf16.msra.mxu1 %v9753_v62  ;;  %v3738_v53 = vpop.xlane.xlu1 %3737  ;;  %v8024_v16 = vpop.eup %8023  ;;  %v3918_v28 = vmul.f32 %v8022_v45, %v9292_v51  ;;  %v7782_v51 = vld [vmem:[#allocation13 + $0x30c] ss:$16 sps:$4 sm:$0xff]  }
 0x7dc   : > { %7240 = vmatprep.subr.bf16.mxu1 %v9757_v43  ;;  %v9773_v12 = vpack.c.bf16 %v4482_v26, %v4481_v22  ;;  %8035 = vrcp.f32 %v3738_v53  ;;  %v4484_v40 = vmul.f32 %v8024_v16, %v4459_v20  ;;  %v9890_v16 = vld [vmem:[%s10223_s6] sm:$0xf] }
 0x7dd   : > { %5639 = vmatpush1.bf16.msra.mxu0 %v9710_v30  ;;  %v7776_v30 = vld [vmem:[#allocation13 + $0x34c] ss:$16 sps:$4 sm:$0xff]   ;;  %8037 = vrcp.f32 %v3736_v14 }
 0x7de   : > { %5640 = vmatprep.subr.bf16.mxu0 %v9719_v47  ;;  %v8026_v47 = vpop.eup %8025 }
 0x7df   : > { %7256 = vmatpush2.bf16.msra.mxu1 %v7768_v52  ;;  %v4483_v21 = vmul.f32 %v8026_v47, %v4456_v34  ;;  %v8028_v60 = vpop.eup %8027 }
 0x7e0   : > { %5471 = vmatmul.mubr.bf16.gmra.mxu0 %v9770_v61  ;;  %7241 = vmatprep.subr.bf16.mxu1 %v7773_v31  ;;  %v3921_v1 = vmul.f32 %v8028_v60, %v9306_v6 }
 0x7e1   : > { %5480 = vmatprep.mubr.bf16.mxu0 %v9773_v12  ;;  %5641 = vmatpush2.bf16.msra.mxu0 %v9725_v33  ;;  %v9784_v33 = vpack.c.bf16 %v3919_v11, %v3918_v28 }
 0x7e2   : > { %5642 = vmatprep.subr.bf16.mxu0 %v9729_v7  ;;  %5604 = vmatmul.mubr.bf16.gmra.mxu1 %v9633_v63  ;;  %v4493_v7 = vpack.c.bf16 %v4484_v40, %v4483_v21  ;;  %v7777_v63 = vld [vmem:[#allocation13 + $0x328] ss:$16 sps:$4 sm:$0xff]  }
 0x7e3   : > { %5613 = vmatprep.mubr.bf16.mxu1 %v9638_v10  ;;  %7257 = vmatpush2.bf16.msra.mxu1 %v7771_v39  ;;  %v8030_v10 = vpop.eup %8029 }
 0x7e4   : > { %7242 = vmatprep.subr.bf16.mxu1 %v7776_v30  ;;  %v8032_v48 = vpop.eup %8031 }
 0x7e5   : > { %5643 = vmatpush2.bf16.msra.mxu0 %v9739_v24  ;;  %v4486_v13 = vmul.f32 %v8032_v48, %v7228_v50  ;;  %v8034_v8 = vpop.eup %8033  ;;  %v3920_v24 = vmul.f32 %v8030_v10, %v9302_v44 }
 0x7e6   : > { %5644 = vmatprep.subr.bf16.mxu0 %v9747_v19  ;;  %v4485_v23 = vmul.f32 %v8034_v8, %v9735_v54 }
 0x7e7   : > { %7258 = vmatpush2.bf16.msra.mxu1 %v7774_v9  ;;  %v3930_v25 = vpack.c.bf16 %v3921_v1, %v3920_v24 }
 0x7e8   : > { %5481 = vmatmul.mubr.bf16.gmra.mxu0 %v9784_v33  ;;  %7243 = vmatprep.subr.bf16.mxu1 %v7779_v42  ;;  %v4494_v19 = vpack.c.bf16 %v4486_v13, %v4485_v23 }
 0x7e9   : > { %5490 = vmatprep.mubr.bf16.mxu0 %v4493_v7  ;;  %5645 = vmatpush2.bf16.msra.mxu0 %v9753_v62  ;;  %v8036_v58 = vpop.eup %8035 }
 0x7ea   : > { %5646 = vmatprep.subr.bf16.mxu0 %v9757_v43  ;;  %5614 = vmatmul.mubr.bf16.gmra.mxu1 %v9643_v46  ;;  %v8038_v6 = vpop.eup %8037  ;;  %v3923_v46 = vmul.f32 %v8036_v58, %v9304_v5 }
 0x7eb   : > { %7259 = vmatpush2.bf16.msra.mxu1 %v7777_v63  ;;  %5716 = vmatprep.mubr.bf16.mxu1 %v4493_v7  ;;  %v3922_v44 = vmul.f32 %v8038_v6, %v9300_v29 }
 0x7ec   : > { %7244 = vmatprep.subr.bf16.mxu1 %v7782_v51 }
 0x7ed   : > { %5647 = vmatpush2.bf16.msra.mxu0 %v7768_v52  ;;  %v3931_v54 = vpack.c.bf16 %v3923_v46, %v3922_v44 }
 0x7ee   : > { %5648 = vmatprep.subr.bf16.mxu0 %v7773_v31 }
 0x7ef   : > { %7260 = vmatpush2.bf16.msra.mxu1 %v7780_v17 }
 0x7f0   : > { %5491 = vmatmul.mubr.bf16.gmra.mxu0 %v3930_v25 }
 0x7f1   : > { %5500 = vmatprep.mubr.bf16.mxu0 %v4494_v19  ;;  %5649 = vmatpush2.bf16.msra.mxu0 %v7771_v39 }
 0x7f2   : > { %5650 = vmatprep.subr.bf16.mxu0 %v7776_v30  ;;  %5717 = vmatmul.mubr.bf16.vlgmr.msra.gmra.mxu1 %v3930_v25 }
 0x7f3   : > { %5726 = vmatprep.mubr.bf16.mxu1 %v4494_v19 }
 0x7f4   : > { %v9797_v35 = vpop.f32.mrf.mxu1 }
 0x7f5   : > { %5651 = vmatpush2.bf16.msra.mxu0 %v7774_v9 }
 0x7f6   : > { %5652 = vmatprep.subr.bf16.mxu0 %v7779_v42  ;;  %v9801_v5 = vpop.f32.mrf.mxu1 }
 0x7f8   : > { %5501 = vmatmul.mubr.bf16.gmra.mxu0 %v3931_v54  ;;  %v9803_v34 = vpop.f32.mrf.mxu1 }
 0x7f9   : > { %5653 = vmatpush2.bf16.msra.mxu0 %v7777_v63  ;;  %5656 = vmatprep.mubr.bf16.mxu0 %v9664_v55 }
 0x7fa   : > { %5654 = vmatprep.subr.bf16.mxu0 %v7782_v51  ;;  %5727 = vmatmul.mubr.bf16.gmra.mxu1 %v3931_v54  ;;  %v9807_v29 = vpop.f32.mrf.mxu1 }
 0x7fc   : > { %v9809_v55 = vpop.f32.mrf.mxu1 }
 0x7fd   : > { %5655 = vmatpush2.bf16.msra.mxu0 %v7780_v17 }
 0x7fe   : > { %v9813_v62 = vpop.f32.mrf.mxu1 }
 0x800   : > { %5657 = vmatmul.mubr.bf16.vlgmr.msra.gmra.mxu0 %v9556_v32  ;;  %v9815_v32 = vpop.f32.mrf.mxu1 }
 0x801   : > { %5666 = vmatprep.mubr.bf16.mxu0 %v9670_v2 }
 0x802   : > { %v9819_v2 = vpop.f32.mrf.mxu1 }
 0x808   : > { %5667 = vmatmul.mubr.bf16.gmra.mxu0 %v9586_v0  ;;  %v9821_v0 = vpop.f32.mrf.mxu1 }
 0x809   : > { %5676 = vmatprep.mubr.bf16.mxu0 %v9692_v3 }
 0x80a   : > { %v9825_v3 = vpop.f32.mrf.mxu1 }
 0x810   : > { %5677 = vmatmul.mubr.bf16.gmra.mxu0 %v9716_v56  ;;  %v9827_v56 = vpop.f32.mrf.mxu1 }
 0x811   : > { %5686 = vmatprep.mubr.bf16.mxu0 %v9721_v18 }
 0x812   : > { %v9830_v18 = vpop.f32.mrf.mxu1 }
 0x814   : > { %v9832_v15 = vpop.f32.mrf.mxu1 }
 0x818   : > { %5687 = vmatmul.mubr.bf16.gmra.mxu0 %v9744_v36  ;;  %v9834_v36 = vpop.f32.mrf.mxu1 }
 0x819   : > { %5696 = vmatprep.mubr.bf16.mxu0 %v9749_v27 }
 0x81a   : > { %v9836_v27 = vpop.f32.mrf.mxu1 }
 0x81c   : > { %v9838_v37 = vpop.f32.mrf.mxu1 }
 0x81e   : > { %v9840_v43 = vpop.f32.mrf.mxu1 }
 0x820   : > { %5697 = vmatmul.mubr.bf16.gmra.mxu0 %v9770_v61  ;;  %v9842_v57 = vpop.f32.mrf.mxu1 }
 0x821   : > { %5706 = vmatprep.mubr.bf16.mxu0 %v9773_v12  ;;  %v4625_v12 = vlaneseq }
 0x822   : > { %v9844_v49 = vpop.f32.mrf.mxu1 }
 0x823   : > { %v9872_v45 = vshrl.u32 %v4625_v12, 7 }
 0x824   : > { %v9846_v38 = vpop.f32.mrf.mxu1 }
 0x825   : > { %v4627_v11 = vsub.s32 0, %v9872_v45 }
 0x826   : > { %v9848_v26 = vpop.f32.mrf.mxu1 }
 0x828   : > { %5707 = vmatmul.mubr.bf16.gmra.mxu0 %v9784_v33  ;;  %v9850_v41 = vpop.f32.mrf.mxu1 }
 0x82a   : > { %v9852_v50 = vpop.f32.mrf.mxu1 }
 0x82c   : > { %v9854_v52 = vpop.f32.mrf.mxu1 }
 0x856   : > { %v9856_v59 = vpop.f32.mrf.mxu1 }
 0x858   : > { %v9858_v22 = vpop.f32.mrf.mxu1 }
 0x85a   : > { %v9860_v61 = vpop.f32.mrf.mxu1 }
 0x85c   : > { %v9862_v31 = vpop.f32.mrf.mxu1 }
 0x86a   : > { %v9864_v4 = vpop.f32.mrf.mxu1 }
 0x86c   : > { %v9866_v53 = vpop.f32.mrf.mxu1 }
 0x86e   : > { %v9868_v20 = vpop.f32.mrf.mxu1 }
 0x870   : > { %v9870_v39 = vpop.f32.mrf.mxu1 }
 0x872   : > { %v9874_v14 = vpop.f32.mrf.mxu1 }
 0x874   : > { %v9876_v30 = vpop.f32.mrf.mxu1 }
 0x876   : > { %v9893_v40 = vpop.f32.mrf.mxu1 }
 0x877   : > { %8212 = shalt.err (!%p8209_p8)
}
 0x878   : > { %s8213_s4 = scalar_lea.hbm %s9883_s22, 4096  ;;  %s8217_s3 = scalar_lea.hbm %s10225_s8, 8192 }
 0x879   : > { %p8214_p2 = scmp.ne.s32.totalorder %s9883_s22, %s8213_s4  ;;  %p8218_p11 = scmp.lt.s32.totalorder %s9883_s22, %s10225_s8 }
 0x87a   : > { %p8219_p5 = scmp.lt.s32.totalorder %s8217_s3, %s8213_s4 }
 0x87b   : > { %p8215_p3 = pnand %p8214_p2, %p8508_p0 }
 0x87c   : > { %p8220_p4 = por %p8219_p5, %p8218_p11 }
 0x87d   : > { %p8216_p13 = pneg %p8215_p3 }
 0x87f   : > { %p8221_p10 = pnand %p8220_p4, %p8216_p13 }
 0x881   : > { %8224 = shalt.err (!%p8221_p10)
}
 0x882   : > { %s8339_s11 = smov 64   ;;  %s8340_s13 = smov 4   ;;  %v4631_v47 = vsub.s32 1, %v9872_v45  ;;  %v9919_v9 = vpop.f32.mrf.mxu1  ;;  %v9922_v28 = vrot.slane %v9890_v16, %v4627_v11  ;;  %v5432_v63 = vpop.f32.mrf.mxu0 }
 0x883   : > { %7282 = dma.vmem_to_hbm [thread:$0]  (%p8508_p0), %s9885_s24, 4096, %s9883_s22, %s5807_s12, %s8339_s11, %s8339_s11, %s8340_s13  }
 0x884   : > { %v9924_v21 = vpop.f32.mrf.mxu1  ;;  %v9927_v33 = vrot.slane %v9890_v16, %v4631_v47  ;;  %s6046_s18 = sshll.u32 %s8555_s0, 9  ;;  %v5320_v60 = vadd.f32 %v9797_v35, %v9922_v28  ;;  %v5434_v1 = vpop.f32.mrf.mxu0  ;;  %v5324_v13 = vadd.f32 %v9803_v34, %v9922_v28  ;;  %v5330_v6 = vadd.f32 %v9809_v55, %v9922_v28  ;;  %s6651_s25 = sshll.u32 %s8317_s30, 13 }
 0x885   : > { %s9942_s24 = scalar_lea.vmem [#allocation15], %s6046_s18  ;;  %v5334_v12 = vadd.f32 %v9815_v32, %v9922_v28  ;;  %s10165_s26 = scalar_lea.hbm %s10224_s7, %s6651_s25 }
 0x886   : > { %v9929_v42 = vpop.f32.mrf.mxu1  ;;  %v5322_v10 = vadd.f32 %v9801_v5, %v9927_v33  ;;  %v5433_v51 = vadd.f32 %v5432_v63, %v5320_v60  ;;  %v5436_v24 = vpop.f32.mrf.mxu0  ;;  %v5326_v23 = vadd.f32 %v9807_v29, %v9927_v33  ;;  %v5332_v35 = vadd.f32 %v9813_v62, %v9927_v33  ;;  %s5823_s20 = sshll.u32 %s9942_s24, 4  ;;  %s5802_s30 = scalar_lea.sflag [#allocation6], %s8555_s0  ;;  %s10167_s20 = int_to_ptr.vmem [resolvable:$true] %s5823_s20 }
 0x887   : > { %v5437_v25 = vadd.f32 %v5436_v24, %v5324_v13  ;;  %v5336_v60 = vadd.f32 %v9819_v2, %v9927_v33  ;;  %s8225_s12 = scalar_lea.vmem %s10167_s20, 8192  ;;  %s8341_s16 = smov [#allocation15]  }
 0x888   : > { %v9934_v7 = vpop.f32.mrf.mxu1  ;;  %5737 = vst [vmem:[%s9942_s24] sm:$0xff] %v5433_v51  ;;  %v5435_v8 = vadd.f32 %v5434_v1, %v5322_v10  ;;  %v5438_v19 = vpop.f32.mrf.mxu0  ;;  %v5340_v51 = vadd.f32 %v9821_v0, %v9922_v28  ;;  %p8226_p12 = scmp.ne.s32.totalorder %s10167_s20, %s8225_s12  ;;  %s8229_s21 = sshll.u32 %s8341_s16, 4  ;;  %s8230_s21 = int_to_ptr.vmem [resolvable:$false] %s8229_s21 }
 0x889   : > { %5741 = vst [vmem:[%s9942_s24 + $0x20] sm:$0xff] %v5437_v25  ;;  %v5439_v46 = vadd.f32 %v5438_v19, %v5326_v23  ;;  %v5344_v25 = vadd.f32 %v9827_v56, %v9922_v28  ;;  %s8231_s19 = scalar_lea.vmem %s8230_s21, 16384  ;;  %p8232_p9 = scmp.lt.s32.totalorder %s10167_s20, %s8230_s21 }
 0x88a   : > { %v9938_v48 = vpop.f32.mrf.mxu1  ;;  %5738 = vst [vmem:[%s9942_s24 + $0x8] sm:$0xff] %v5435_v8  ;;  %v5442_v54 = vpop.f32.mrf.mxu0  ;;  %v5342_v8 = vadd.f32 %v9825_v3, %v9927_v33  ;;  %p8227_p7 = pnand %p8226_p12, %p8508_p0  ;;  %p8233_p8 = scmp.lt.s32.totalorder %s8231_s19, %s8225_s12 }
 0x88b   : > { %5742 = vst [vmem:[%s9942_s24 + $0x28] sm:$0xff] %v5439_v46  ;;  %v5443_v5 = vadd.f32 %v5442_v54, %v5330_v6  ;;  %v5346_v46 = vadd.f32 %v9830_v18, %v9927_v33 }
 0x88c   : > { %v9945_v17 = vpop.f32.mrf.mxu1  ;;  %v5444_v29 = vpop.f32.mrf.mxu0  ;;  %p8228_p1 = pneg %p8227_p7  ;;  %p8234_p2 = por %p8233_p8, %p8232_p9 }
 0x88d   : > { %5745 = vst [vmem:[%s9942_s24 + $0x40] sm:$0xff] %v5443_v5  ;;  %v5445_v55 = vadd.f32 %v5444_v29, %v5332_v35  ;;  %v5350_v5 = vadd.f32 %v9832_v15, %v9922_v28 }
 0x88e   : > { %v9950_v58 = vpop.f32.mrf.mxu1  ;;  %v5446_v47 = vpop.f32.mrf.mxu0  ;;  %p8235_p3 = pnand %p8234_p2, %p8228_p1 }
 0x88f   : > { %5746 = vst [vmem:[%s9942_s24 + $0x48] sm:$0xff] %v5445_v55  ;;  %v5447_v62 = vadd.f32 %v5446_v47, %v5334_v12  ;;  %v5352_v55 = vadd.f32 %v9834_v36, %v9927_v33 }
 0x890   : > { %v9955_v44 = vpop.f32.mrf.mxu1  ;;  %v5448_v10 = vpop.f32.mrf.mxu0 }
 0x891   : > { %5749 = vst [vmem:[%s9942_s24 + $0x60] sm:$0xff] %v5447_v62  ;;  %v5449_v32 = vadd.f32 %v5448_v10, %v5336_v60  ;;  %v5354_v62 = vadd.f32 %v9836_v27, %v9922_v28 }
 0x892   : > { %v9960_v34 = vpop.f32.mrf.mxu1  ;;  %v5452_v13 = vpop.f32.mrf.mxu0 }
 0x893   : > { %5750 = vst [vmem:[%s9942_s24 + $0x68] sm:$0xff] %v5449_v32  ;;  %v5453_v2 = vadd.f32 %v5452_v13, %v5340_v51  ;;  %v5356_v32 = vadd.f32 %v9838_v37, %v9927_v33 }
 0x894   : > { %v9965_v11 = vpop.f32.mrf.mxu1  ;;  %v5454_v23 = vpop.f32.mrf.mxu0 }
 0x895   : > { %5753 = vst [vmem:[%s9942_s24 + $0x80] sm:$0xff] %v5453_v2  ;;  %v5455_v0 = vadd.f32 %v5454_v23, %v5342_v8  ;;  %v5360_v2 = vadd.f32 %v9840_v43, %v9922_v28 }
 0x896   : > { %v9970_v63 = vpop.f32.mrf.mxu1  ;;  %v5456_v6 = vpop.f32.mrf.mxu0 }
 0x897   : > { %5754 = vst [vmem:[%s9942_s24 + $0x88] sm:$0xff] %v5455_v0  ;;  %v5457_v3 = vadd.f32 %v5456_v6, %v5344_v25  ;;  %v5362_v0 = vadd.f32 %v9842_v57, %v9927_v33 }
 0x898   : > { %v9975_v1 = vpop.f32.mrf.mxu1  ;;  %v5458_v35 = vpop.f32.mrf.mxu0 }
 0x899   : > { %5757 = vst [vmem:[%s9942_s24 + $0xa0] sm:$0xff] %v5457_v3  ;;  %v5459_v56 = vadd.f32 %v5458_v35, %v5346_v46  ;;  %v5364_v3 = vadd.f32 %v9844_v49, %v9922_v28 }
 0x89a   : > { %v9980_v24 = vpop.f32.mrf.mxu1  ;;  %v5462_v12 = vpop.f32.mrf.mxu0 }
 0x89b   : > { %5758 = vst [vmem:[%s9942_s24 + $0xa8] sm:$0xff] %v5459_v56  ;;  %v5463_v18 = vadd.f32 %v5462_v12, %v5350_v5  ;;  %v5366_v56 = vadd.f32 %v9846_v38, %v9927_v33 }
 0x89c   : > { %v9985_v19 = vpop.f32.mrf.mxu1  ;;  %v5464_v60 = vpop.f32.mrf.mxu0 }
 0x89d   : > { %5761 = vst [vmem:[%s9942_s24 + $0xc0] sm:$0xff] %v5463_v18  ;;  %v5465_v15 = vadd.f32 %v5464_v60, %v5352_v55  ;;  %v5370_v18 = vadd.f32 %v9848_v26, %v9922_v28  ;;  %v4635_v26 = vsub.s32 2, %v9872_v45 }
 0x89e   : > { %v9990_v54 = vpop.f32.mrf.mxu1  ;;  %v5466_v51 = vpop.f32.mrf.mxu0 }
 0x89f   : > { %5762 = vst [vmem:[%s9942_s24 + $0xc8] sm:$0xff] %v5465_v15  ;;  %v5467_v36 = vadd.f32 %v5466_v51, %v5354_v62  ;;  %v5372_v15 = vadd.f32 %v9850_v41, %v9927_v33 }
 0x8a0   : > { %v9995_v29 = vpop.f32.mrf.mxu1  ;;  %v5468_v8 = vpop.f32.mrf.mxu0 }
 0x8a1   : > { %5765 = vst [vmem:[%s9942_s24 + $0xe0] sm:$0xff] %v5467_v36  ;;  %v5469_v27 = vadd.f32 %v5468_v8, %v5356_v32  ;;  %v5374_v36 = vadd.f32 %v9852_v50, %v9922_v28  ;;  %v5380_v50 = vadd.f32 %v9856_v59, %v9922_v28 }
 0x8a2   : > { %v10000_v47 = vpop.f32.mrf.mxu1  ;;  %v5472_v25 = vpop.f32.mrf.mxu0 }
 0x8a3   : > { %5766 = vst [vmem:[%s9942_s24 + $0xe8] sm:$0xff] %v5469_v27  ;;  %v5473_v37 = vadd.f32 %v5472_v25, %v5360_v2  ;;  %v5376_v25 = vadd.f32 %v9854_v52, %v9927_v33  ;;  %v5382_v52 = vadd.f32 %v9858_v22, %v9927_v33 }
 0x8a4   : > { %v10005_v10 = vpop.f32.mrf.mxu1  ;;  %v5474_v46 = vpop.f32.mrf.mxu0 }
 0x8a5   : > { %5769 = vst [vmem:[%s9942_s24 + $0x100] sm:$0xff] %v5473_v37  ;;  %v5475_v43 = vadd.f32 %v5474_v46, %v5362_v0  ;;  %v4639_v37 = vsub.s32 3, %v9872_v45 }
 0x8a6   : > { %v10010_v13 = vpop.f32.mrf.mxu1  ;;  %v5476_v5 = vpop.f32.mrf.mxu0 }
 0x8a7   : > { %5770 = vst [vmem:[%s9942_s24 + $0x108] sm:$0xff] %v5475_v43  ;;  %v5477_v57 = vadd.f32 %v5476_v5, %v5364_v3  ;;  %v10046_v5 = vrot.slane %v9890_v16, %v4635_v26  ;;  %v10052_v45 = vrot.slane %v9890_v16, %v4639_v37 }
 0x8a8   : > { %v10015_v23 = vpop.f32.mrf.mxu1  ;;  %v5478_v55 = vpop.f32.mrf.mxu0 }
 0x8a9   : > { %5773 = vst [vmem:[%s9942_s24 + $0x120] sm:$0xff] %v5477_v57  ;;  %v5479_v60 = vadd.f32 %v5478_v55, %v5366_v56 }
 0x8aa   : > { %v10020_v6 = vpop.f32.mrf.mxu1  ;;  %v5482_v62 = vpop.f32.mrf.mxu0 }
 0x8ab   : > { %5774 = vst [vmem:[%s9942_s24 + $0x128] sm:$0xff] %v5479_v60  ;;  %v5483_v51 = vadd.f32 %v5482_v62, %v5370_v18  ;;  %v5384_v60 = vadd.f32 %v9860_v61, %v9922_v28 }
 0x8ac   : > { %v5605_v35 = vpop.f32.mrf.mxu1  ;;  %v5484_v32 = vpop.f32.mrf.mxu0 }
 0x8ad   : > { %5777 = vst [vmem:[%s9942_s24 + $0x140] sm:$0xff] %v5483_v51  ;;  %v5485_v8 = vadd.f32 %v5484_v32, %v5372_v15  ;;  %v5606_v59 = vadd.f32 %v5605_v35, %v10046_v5 }
 0x8ae   : > { %v5607_v12 = vpop.f32.mrf.mxu1  ;;  %v5486_v27 = vpop.f32.mrf.mxu0 }
 0x8af   : > { %5778 = vst [vmem:[%s9942_s24 + $0x148] sm:$0xff] %v5485_v8  ;;  %v5487_v41 = vadd.f32 %v5486_v27, %v5374_v36  ;;  %v5608_v51 = vadd.f32 %v5607_v12, %v10052_v45  ;;  %v5386_v36 = vadd.f32 %v9862_v31, %v9927_v33  ;;  %v5390_v27 = vadd.f32 %v9864_v4, %v9922_v28 }
 0x8b0   : > { %v5609_v49 = vpop.f32.mrf.mxu1  ;;  %v5488_v46 = vpop.f32.mrf.mxu0 }
 0x8b1   : > { %5781 = vst [vmem:[%s9942_s24 + $0x160] sm:$0xff] %v5487_v41  ;;  %v5489_v3 = vadd.f32 %v5488_v46, %v5376_v25  ;;  %v5610_v8 = vadd.f32 %v5609_v49, %v10046_v5  ;;  %v5392_v49 = vadd.f32 %v9866_v53, %v9927_v33 }
 0x8b2   : > { %v5611_v38 = vpop.f32.mrf.mxu1  ;;  %v5492_v56 = vpop.f32.mrf.mxu0 }
 0x8b3   : > { %5782 = vst [vmem:[%s9942_s24 + $0x168] sm:$0xff] %v5489_v3  ;;  %v5493_v57 = vadd.f32 %v5492_v56, %v5380_v50  ;;  %v5612_v41 = vadd.f32 %v5611_v38, %v10052_v45  ;;  %v5394_v38 = vadd.f32 %v9868_v20, %v9922_v28 }
 0x8b4   : > { %v5615_v2 = vpop.f32.mrf.mxu1  ;;  %v5494_v18 = vpop.f32.mrf.mxu0 }
 0x8b5   : > { %5785 = vst [vmem:[%s9942_s24 + $0x180] sm:$0xff] %v5493_v57  ;;  %v5495_v62 = vadd.f32 %v5494_v18, %v5382_v52  ;;  %v5616_v3 = vadd.f32 %v5615_v2, %v10046_v5  ;;  %v5396_v2 = vadd.f32 %v9870_v39, %v9927_v33 }
 0x8b6   : > { %v5617_v0 = vpop.f32.mrf.mxu1  ;;  %v5496_v32 = vpop.f32.mrf.mxu0 }
 0x8b7   : > { %5786 = vst [vmem:[%s9942_s24 + $0x188] sm:$0xff] %v5495_v62  ;;  %v5497_v16 = vadd.f32 %v5496_v32, %v5384_v60 }
 0x8b8   : > { %v5619_v43 = vpop.f32.mrf.mxu1  ;;  %v5498_v26 = vpop.f32.mrf.mxu0 }
 0x8b9   : > { %5789 = vst [vmem:[%s9942_s24 + $0x1a0] sm:$0xff] %v5497_v16  ;;  %v5499_v12 = vadd.f32 %v5498_v26, %v5386_v36  ;;  %v5552_v26 = vadd.f32 %v9919_v9, %v10052_v45  ;;  %v5560_v9 = vadd.f32 %v9934_v7, %v10046_v5  ;;  %v5568_v7 = vadd.f32 %v9950_v58, %v10052_v45 }
 0x8ba   : > { %v5621_v55 = vpop.f32.mrf.mxu1  ;;  %v5502_v37 = vpop.f32.mrf.mxu0  ;;  %v5576_v58 = vadd.f32 %v9965_v11, %v10046_v5  ;;  %v5582_v11 = vadd.f32 %v9980_v24, %v10052_v45  ;;  %v5590_v24 = vadd.f32 %v9995_v29, %v10046_v5  ;;  %v5598_v29 = vadd.f32 %v10010_v13, %v10052_v45 }
 0x8bb   : > { %5790 = vst [vmem:[%s9942_s24 + $0x1a8] sm:$0xff] %v5499_v12  ;;  %v5503_v46 = vadd.f32 %v5502_v37, %v5390_v27  ;;  %v5622_v39 = vadd.f32 %v5621_v55, %v10052_v45  ;;  %v5556_v12 = vadd.f32 %v9924_v21, %v10046_v5  ;;  %v5562_v21 = vadd.f32 %v9938_v48, %v10052_v45 }
 0x8bc   : > { %v5718_v15 = vpop.f32.mrf.mxu1  ;;  %v5504_v56 = vpop.f32.mrf.mxu0  ;;  %v5570_v48 = vadd.f32 %v9955_v44, %v10046_v5  ;;  %v5578_v44 = vadd.f32 %v9970_v63, %v10052_v45  ;;  %v5586_v63 = vadd.f32 %v9985_v19, %v10046_v5  ;;  %v5592_v19 = vadd.f32 %v10000_v47, %v10052_v45 }
 0x8bd   : > { %v5719_v22 = vadd.f32 %v5718_v15, %v5606_v59  ;;  %5793 = vst [vmem:[%s9942_s24 + $0x1c0] sm:$0xff] %v5503_v46  ;;  %v5505_v52 = vadd.f32 %v5504_v56, %v5392_v49  ;;  %v5618_v59 = vadd.f32 %v5617_v0, %v10052_v45  ;;  %v5620_v15 = vadd.f32 %v5619_v43, %v10046_v5 }
 0x8be   : > { %v5720_v35 = vpop.f32.mrf.mxu1  ;;  %v5506_v18 = vpop.f32.mrf.mxu0  ;;  %v5546_v0 = vadd.f32 %v9874_v14, %v10046_v5  ;;  %v5548_v43 = vadd.f32 %v9876_v30, %v10052_v45  ;;  %v5600_v47 = vadd.f32 %v10015_v23, %v10046_v5 }
 0x8bf   : > { %5787 = vst [vmem:[%s9942_s24 + $0x190] sm:$0xff] %v5719_v22  ;;  %v5721_v61 = vadd.f32 %v5720_v35, %v5608_v51  ;;  %5794 = vst [vmem:[%s9942_s24 + $0x1c8] sm:$0xff] %v5505_v52  ;;  %v5507_v60 = vadd.f32 %v5506_v18, %v5394_v38 }
 0x8c0   : > { %v5722_v25 = vpop.f32.mrf.mxu1  ;;  %v5508_v28 = vpop.f32.mrf.mxu0 }
 0x8c1   : > { %5788 = vst [vmem:[%s9942_s24 + $0x198] sm:$0xff] %v5721_v61  ;;  %v5723_v31 = vadd.f32 %v5722_v25, %v5610_v8  ;;  %5797 = vst [vmem:[%s9942_s24 + $0x1e0] sm:$0xff] %v5507_v60  ;;  %v5509_v51 = vadd.f32 %v5508_v28, %v5396_v2  ;;  %v5550_v8 = vadd.f32 %v9893_v40, %v10046_v5 }
 0x8c2   : > { %v5724_v50 = vpop.f32.mrf.mxu1  ;;  %v5658_v32 = vpop.f32.mrf.mxu0  ;;  %v5558_v40 = vadd.f32 %v9929_v42, %v10052_v45  ;;  %v5566_v42 = vadd.f32 %v9945_v17, %v10046_v5  ;;  %v5572_v17 = vadd.f32 %v9960_v34, %v10052_v45  ;;  %v5580_v34 = vadd.f32 %v9975_v1, %v10046_v5 }
 0x8c3   : > { %5791 = vst [vmem:[%s9942_s24 + $0x1b0] sm:$0xff] %v5723_v31  ;;  %v5725_v4 = vadd.f32 %v5724_v50, %v5612_v41  ;;  %5798 = vst [vmem:[%s9942_s24 + $0x1e8] sm:$0xff] %v5509_v51  ;;  %v5659_v36 = vadd.f32 %v5658_v32, %v5546_v0  ;;  %v5588_v1 = vadd.f32 %v9990_v54, %v10052_v45 }
 0x8c4   : > { %v5728_v57 = vpop.f32.mrf.mxu1  ;;  %v5660_v35 = vpop.f32.mrf.mxu0  ;;  %v5596_v54 = vadd.f32 %v10005_v10, %v10046_v5 }
 0x8c5   : > { %5792 = vst [vmem:[%s9942_s24 + $0x1b8] sm:$0xff] %v5725_v4  ;;  %v5729_v53 = vadd.f32 %v5728_v57, %v5616_v3  ;;  %5739 = vst [vmem:[%s9942_s24 + $0x10] sm:$0xff] %v5659_v36  ;;  %v5661_v55 = vadd.f32 %v5660_v35, %v5548_v43 }
 0x8c6   : > { %v5730_v62 = vpop.f32.mrf.mxu1  ;;  %v5662_v61 = vpop.f32.mrf.mxu0 }
 0x8c7   : > { %5795 = vst [vmem:[%s9942_s24 + $0x1d0] sm:$0xff] %v5729_v53  ;;  %v5731_v20 = vadd.f32 %v5730_v62, %v5618_v59  ;;  %5740 = vst [vmem:[%s9942_s24 + $0x18] sm:$0xff] %v5661_v55  ;;  %v5663_v30 = vadd.f32 %v5662_v61, %v5550_v8 }
 0x8c8   : > { %v5732_v22 = vpop.f32.mrf.mxu1  ;;  %v5664_v27 = vpop.f32.mrf.mxu0 }
 0x8c9   : > { %5796 = vst [vmem:[%s9942_s24 + $0x1d8] sm:$0xff] %v5731_v20  ;;  %v5733_v33 = vadd.f32 %v5732_v22, %v5620_v15  ;;  %5743 = vst [vmem:[%s9942_s24 + $0x30] sm:$0xff] %v5663_v30  ;;  %v5665_v25 = vadd.f32 %v5664_v27, %v5552_v26  ;;  %v5602_v30 = vadd.f32 %v10020_v6, %v10052_v45 }
 0x8ca   : > { %v5734_v16 = vpop.f32.mrf.mxu1  ;;  %v5668_v41 = vpop.f32.mrf.mxu0 }
 0x8cb   : > { %5799 = vst [vmem:[%s9942_s24 + $0x1f0] sm:$0xff] %v5733_v33  ;;  %v5735_v14 = vadd.f32 %v5734_v16, %v5622_v39  ;;  %5744 = vst [vmem:[%s9942_s24 + $0x38] sm:$0xff] %v5665_v25  ;;  %v5669_v31 = vadd.f32 %v5668_v41, %v5556_v12 }
 0x8cc   : > { %v5670_v37 = vpop.f32.mrf.mxu0 }
 0x8cd   : > { %5800 = vst [vmem:[%s9942_s24 + $0x1f8] sm:$0xff] %v5735_v14  ;;  %5747 = vst [vmem:[%s9942_s24 + $0x50] sm:$0xff] %v5669_v31  ;;  %v5671_v49 = vadd.f32 %v5670_v37, %v5558_v40 }
 0x8ce   : > { %v5672_v46 = vpop.f32.mrf.mxu0 }
 0x8cf   : > { %5748 = vst [vmem:[%s9942_s24 + $0x58] sm:$0xff] %v5671_v49  ;;  %v5673_v50 = vadd.f32 %v5672_v46, %v5560_v9 }
 0x8d0   : > { %v5674_v3 = vpop.f32.mrf.mxu0 }
 0x8d1   : > { %5751 = vst [vmem:[%s9942_s24 + $0x70] sm:$0xff] %v5673_v50  ;;  %v5675_v4 = vadd.f32 %v5674_v3, %v5562_v21 }
 0x8d2   : > { %v5678_v56 = vpop.f32.mrf.mxu0 }
 0x8d3   : > { %5752 = vst [vmem:[%s9942_s24 + $0x78] sm:$0xff] %v5675_v4  ;;  %v5679_v38 = vadd.f32 %v5678_v56, %v5566_v42 }
 0x8d4   : > { %v5680_v52 = vpop.f32.mrf.mxu0 }
 0x8d5   : > { %5755 = vst [vmem:[%s9942_s24 + $0x90] sm:$0xff] %v5679_v38  ;;  %v5681_v57 = vadd.f32 %v5680_v52, %v5568_v7 }
 0x8d6   : > { %v5682_v59 = vpop.f32.mrf.mxu0 }
 0x8d7   : > { %5756 = vst [vmem:[%s9942_s24 + $0x98] sm:$0xff] %v5681_v57  ;;  %v5683_v53 = vadd.f32 %v5682_v59, %v5570_v48 }
 0x8d8   : > { %v5684_v18 = vpop.f32.mrf.mxu0 }
 0x8d9   : > { %5759 = vst [vmem:[%s9942_s24 + $0xb0] sm:$0xff] %v5683_v53  ;;  %v5685_v2 = vadd.f32 %v5684_v18, %v5572_v17 }
 0x8da   : > { %v5688_v60 = vpop.f32.mrf.mxu0 }
 0x8db   : > { %5760 = vst [vmem:[%s9942_s24 + $0xb8] sm:$0xff] %v5685_v2  ;;  %v5689_v62 = vadd.f32 %v5688_v60, %v5576_v58 }
 0x8dc   : > { %v5690_v15 = vpop.f32.mrf.mxu0 }
 0x8dd   : > { %5763 = vst [vmem:[%s9942_s24 + $0xd0] sm:$0xff] %v5689_v62  ;;  %v5691_v20 = vadd.f32 %v5690_v15, %v5578_v44 }
 0x8de   : > { %v5692_v28 = vpop.f32.mrf.mxu0 }
 0x8df   : > { %5764 = vst [vmem:[%s9942_s24 + $0xd8] sm:$0xff] %v5691_v20  ;;  %v5693_v0 = vadd.f32 %v5692_v28, %v5580_v34 }
 0x8e0   : > { %v5694_v51 = vpop.f32.mrf.mxu0 }
 0x8e1   : > { %5767 = vst [vmem:[%s9942_s24 + $0xf0] sm:$0xff] %v5693_v0  ;;  %v5695_v22 = vadd.f32 %v5694_v51, %v5582_v11 }
 0x8e2   : > { %v5698_v39 = vpop.f32.mrf.mxu0 }
 0x8e3   : > { %5768 = vst [vmem:[%s9942_s24 + $0xf8] sm:$0xff] %v5695_v22  ;;  %v5699_v33 = vadd.f32 %v5698_v39, %v5586_v63 }
 0x8e4   : > { %v5700_v32 = vpop.f32.mrf.mxu0 }
 0x8e5   : > { %5771 = vst [vmem:[%s9942_s24 + $0x110] sm:$0xff] %v5699_v33  ;;  %v5701_v43 = vadd.f32 %v5700_v32, %v5588_v1 }
 0x8e6   : > { %v5702_v36 = vpop.f32.mrf.mxu0 }
 0x8e7   : > { %5772 = vst [vmem:[%s9942_s24 + $0x118] sm:$0xff] %v5701_v43  ;;  %v5703_v16 = vadd.f32 %v5702_v36, %v5590_v24 }
 0x8e8   : > { %v5704_v14 = vpop.f32.mrf.mxu0 }
 0x8e9   : > { %5775 = vst [vmem:[%s9942_s24 + $0x130] sm:$0xff] %v5703_v16  ;;  %v5705_v35 = vadd.f32 %v5704_v14, %v5592_v19 }
 0x8ea   : > { %v5708_v8 = vpop.f32.mrf.mxu0 }
 0x8eb   : > { %5776 = vst [vmem:[%s9942_s24 + $0x138] sm:$0xff] %v5705_v35  ;;  %v5709_v55 = vadd.f32 %v5708_v8, %v5596_v54 }
 0x8ec   : > { %v5710_v61 = vpop.f32.mrf.mxu0 }
 0x8ed   : > { %5779 = vst [vmem:[%s9942_s24 + $0x150] sm:$0xff] %v5709_v55  ;;  %v5711_v26 = vadd.f32 %v5710_v61, %v5598_v29 }
 0x8ee   : > { %v5712_v10 = vpop.f32.mrf.mxu0 }
 0x8ef   : > { %5780 = vst [vmem:[%s9942_s24 + $0x158] sm:$0xff] %v5711_v26  ;;  %v5713_v13 = vadd.f32 %v5712_v10, %v5600_v47 }
 0x8f0   : > { %v5714_v27 = vpop.f32.mrf.mxu0 }
 0x8f1   : > { %5783 = vst [vmem:[%s9942_s24 + $0x170] sm:$0xff] %v5713_v13  ;;  %v5715_v23 = vadd.f32 %v5714_v27, %v5602_v30 }
 0x8f3   : > { %5784 = vst [vmem:[%s9942_s24 + $0x178] sm:$0xff] %v5715_v23 }
 0x8f4   : > { %8238 = shalt.err (!%p8235_p3)
}
 0x8f5   : > { %s8239_s2 = scalar_lea.hbm %s10165_s26, 8192  ;;  %s8243_s29 = scalar_lea.hbm %s10224_s7, 16384 }
 0x8f6   : > { %p8240_p13 = scmp.ne.s32.totalorder %s10165_s26, %s8239_s2  ;;  %p8244_p4 = scmp.lt.s32.totalorder %s10165_s26, %s10224_s7 }
 0x8f7   : > { %p8245_p10 = scmp.lt.s32.totalorder %s8243_s29, %s8239_s2 }
 0x8f8   : > { %p8241_p11 = pnand %p8240_p13, %p8508_p0 }
 0x8f9   : > { %p8246_p12 = por %p8245_p10, %p8244_p4 }
 0x8fa   : > { %p8242_p5 = pneg %p8241_p11 }
 0x8fc   : > { %p8247_p7 = pnand %p8246_p12, %p8242_p5 }
 0x8fe   : > { %8250 = shalt.err (!%p8247_p7)
}
 0x8ff   : > { %s8342_s15 = smov 512   ;;  %s8343_s11 = smov 32  }
 0x900   : > { %7281 = dma.vmem_to_hbm [thread:$0]  (%p8508_p0), %s10167_s20, 8192, %s10165_s26, %s5802_s30, %s8342_s15, %s8342_s15, %s8343_s11  }
 0x901 PF: > { %s5857_s18 = sand.u32 1, %s8305_s27   ;;  %p10380_p1 = scmp.ge.s32.totalorder %s8325_s10, 2 }
 0x902   : > { %s5858_s24 = scalar_lea.sflag [#allocation6], %s5857_s18 }
 0x903   : > { %p7306_p9 = pnand %p10380_p1, %p8434_p6 }
 0x905   : > { %p7307_p8 = pneg %p7306_p9 }
 0x907   : > { %8296 = dma.done.wait (%p7307_p8), %s5858_s24, 8192  }
 0x908   : > { %8298 = vsyncadd (%p7307_p8), %s5858_s24, 4294959104  ;;  %s5867_s25 = scalar_lea.sflag [#allocation17], %s5857_s18 }
 0x909   : > { %8300 = dma.done.wait (%p7307_p8), %s5867_s25, 4096  }
 0x90a   : > { %8302 = vsyncadd (%p7307_p8), %s5867_s25, 4294963200  ;;  %s33_s10 = sadd.s32 1, %s8325_s10   ;;  %s10381_s17 = sld [smem:[#allocation25_spill]] }
 0x90b   : > { %p30_p2 = scmp.ge.s32.totalorder %s33_s10, 4   ;;  %s10382_s29 = sld [smem:[#allocation28_spill]] }
 0x90c   : > { %s10383_s0 = sld [smem:[#allocation27_spill]]  ;;  %s10384_s27 = smov %s8309_s28 }
 0x90d   : > { %s10386_s30 = smov %s8321_s9 }
 0x90e   :  { %32 = sbr.rel (!%p30_p2) target bundleno = 18 (0x12), region = 146 }
 0x910   : > { %s10385_s28 = smov %s10381_s17 }
 0x912   : > { %s10387_s9 = smov %s10383_s0 }
 0x913   :  { %5872 = vsyncpa [#allocation5], 1 }
 0x914   :  { %5874 = vsyncpa [#allocation5 + $0x1], 1 }
 0x915   :  { %5875 = vsyncpa [#allocation8], 1 }
 0x916   :  { %5877 = vsyncpa [#allocation8 + $0x1], 1 }
 0x917   :  { %5878 = vsyncpa [#allocation11], 1 }
 0x918   :  { %5879 = vsyncpa [#allocation14], 1 }
 0x919   :  { %5880 = vsyncpa [#allocation6], 1 }
 0x91a   :  { %5882 = vsyncpa [#allocation6 + $0x1], 1 }
 0x91b   :  { %5883 = vsyncpa [#allocation17], 1 }
 0x91c   :  { %5885 = vsyncpa [#allocation17 + $0x1], 1 }

</bundles_post_ra>
